<compile_context>
chip_gen: v5e
topology: v5e:2x2
jax: 0.10.0
libtpu: 0.0.40
codegen_flags: <defaults>
</compile_context>

<pallas_src>
import jax
import jax.numpy as jnp
import numpy as np
from jax.experimental import pallas as pl
from jax.experimental.pallas import tpu as pltpu

NUM_HEADS = 8
NUM_CONVS = 3
BN_EPS = 1e-5
F32 = jnp.float32


# ------------------------------ fused kernel --------------------------------

def _net_kernel(
    # graph data
    x0_ref, ea_ref, gsrc_ref, gdst_ref, osrc_ref, obatch_ref, pe_ref, peT_ref,
    # x_embed
    xw1_ref, xb1_ref, xw2_ref, xb2_ref,
    # query MLPs (per head; first layer split 32/32/4 -> no msg concat needed)
    qw1a_ref, qw1b_ref, qw1c_ref, qb1_ref, qw2_ref, qb2_ref, qw3_ref, qb3_ref,
    # value MLPs (per head)
    vw1_ref, vb1_ref, vw2_ref, vb2_ref,
    # node-update MLP (+ BatchNorm affine), first layer split into x / h parts
    uw1x_ref, uw1h_ref, ub1_ref, ug1_ref, ube1_ref,
    uw2_ref, ub2_ref, ug2_ref, ube2_ref,
    # readout
    rw1_ref, rb1_ref, rw2_ref, rb2_ref,
    # output
    out_ref,
    # scratch (persists across the conv grid axis)
    x_state, w_state, logit_state,
):
    conv = pl.program_id(0)

    # ---- step 0: x_embed + loop-invariant value heads folded into W[h] -----
    @pl.when(conv == 0)
    def _init():
        t = jnp.dot(x0_ref[...], xw1_ref[...], preferred_element_type=F32) + xb1_ref[...]
        t = jnp.maximum(t, 0.0)
        x_state[...] = jnp.dot(t, xw2_ref[...], preferred_element_type=F32) + xb2_ref[...]

        pe = pe_ref[...]                                              # (P, 1280)

        @pl.loop(0, NUM_HEADS)
        def _value_head(head):
            v1 = jnp.dot(pe, vw1_ref[head].astype(F32),
                         preferred_element_type=F32) + vb1_ref[head]
            v1 = jnp.maximum(v1, 0.0)
            vs_h = jnp.dot(v1, vw2_ref[head].astype(F32),
                           preferred_element_type=F32) + vb2_ref[head]   # (P, 4)
            # fold the h-part of the node-update first layer into the values:
            w_state[head] = jnp.dot(vs_h, uw1h_ref[head],
                                    preferred_element_type=F32)          # (P, 32)

    # ---------------------------- one conv step -----------------------------
    x = x_state[...]                                                     # (N, 32)
    xs = jnp.dot(gsrc_ref[...], x, preferred_element_type=F32)           # (E, 32)  x[src]
    xd = jnp.dot(gdst_ref[...], x, preferred_element_type=F32)           # (E, 32)  x[dst]
    ea = ea_ref[...]                                                     # (E, 4)
    peT = peT_ref[...]                                                   # (1280, P)

    # per-head 3-layer query MLP fused with the attention-logit matmul
    @pl.loop(0, NUM_HEADS)
    def _query_head(head):
        h1 = (jnp.dot(xs, qw1a_ref[head].astype(F32), preferred_element_type=F32)
              + jnp.dot(xd, qw1b_ref[head].astype(F32), preferred_element_type=F32)
              + jnp.dot(ea, qw1c_ref[head].astype(F32), preferred_element_type=F32)
              + qb1_ref[head])
        h1 = jnp.maximum(h1, 0.0)
        h2 = jnp.dot(h1, qw2_ref[head].astype(F32),
                     preferred_element_type=F32) + qb2_ref[head]
        h2 = jnp.maximum(h2, 0.0)
        q = jnp.dot(h2, qw3_ref[head].astype(F32),
                    preferred_element_type=F32) + qb3_ref[head]          # (E, 1280)
        logit_state[head] = jnp.dot(q, peT, preferred_element_type=F32)  # (E, P)

    logits = logit_state[...]                                            # (H, E, P)
    m = jnp.max(logits, axis=0, keepdims=True)
    el = jnp.exp(logits - m)
    attn = el / jnp.sum(el, axis=0, keepdims=True)                       # softmax over heads

    # sum_h attn[h] @ (vs[h] @ uw1_h[h])  ==  (attn-weighted msgs) @ uw1[32:]
    mh = jnp.einsum('hep,hpo->heo', attn, w_state[...],
                    preferred_element_type=F32)                          # (H, E, 32)
    t_edge = jnp.sum(mh, axis=0)                                         # (E, 32)
    h_node = jnp.dot(osrc_ref[...], t_edge, preferred_element_type=F32)  # (N, 32) scatter-add

    # node-update MLP with training-mode BatchNorm (batch statistics)
    # TODO(synk): BatchNorm1d running-stat tracking / eval mode is not reproduced.
    t = jnp.dot(x, uw1x_ref[...], preferred_element_type=F32) + h_node + ub1_ref[...]
    mu = jnp.mean(t, axis=0, keepdims=True)
    var = jnp.mean((t - mu) ** 2, axis=0, keepdims=True)
    t = (t - mu) / jnp.sqrt(var + BN_EPS) * ug1_ref[...] + ube1_ref[...]
    t = jnp.maximum(t, 0.0)
    t = jnp.dot(t, uw2_ref[...], preferred_element_type=F32) + ub2_ref[...]
    mu = jnp.mean(t, axis=0, keepdims=True)
    var = jnp.mean((t - mu) ** 2, axis=0, keepdims=True)
    t = (t - mu) / jnp.sqrt(var + BN_EPS) * ug2_ref[...] + ube2_ref[...]
    x_state[...] = jnp.maximum(t, 0.0)

    # ---- last step: graph pooling + readout, fused as well ------------------
    @pl.when(conv == pl.num_programs(0) - 1)
    def _final():
        pooled = jnp.dot(obatch_ref[...], x_state[...], preferred_element_type=F32)
        r = jnp.dot(pooled, rw1_ref[...], preferred_element_type=F32) + rb1_ref[...]
        r = jnp.maximum(r, 0.0)
        out_ref[...] = jnp.dot(r, rw2_ref[...], preferred_element_type=F32) + rb2_ref[...]


# ---------------------------- parameter init ---------------------------------

def _linear_params(key, d_in, d_out):
    kw, kb = jax.random.split(key)
    bound = 1.0 / np.sqrt(d_in)
    w = jax.random.uniform(kw, (d_in, d_out), F32, -bound, bound)
    b = jax.random.uniform(kb, (1, d_out), F32, -bound, bound)
    return w, b


def init_params(key):
    keys = iter(jax.random.split(key, 64))
    params = {}
    params["x_embed"] = (*_linear_params(next(keys), 49, 32),
                         *_linear_params(next(keys), 32, 32))

    q1w, q1b, q2w, q2b, q3w, q3b = [], [], [], [], [], []
    for _ in range(NUM_HEADS):
        w1, b1 = _linear_params(next(keys), 68, 320)
        w2, b2 = _linear_params(next(keys), 320, 640)
        w3, b3 = _linear_params(next(keys), 640, 1280)
        q1w.append(w1); q1b.append(b1)
        q2w.append(w2); q2b.append(b2)
        q3w.append(w3); q3b.append(b3)
    qw1 = jnp.stack(q1w)                                   # (H, 68, 320)
    params["queries"] = dict(
        # first layer split by input block (x_src / x_dst / edge_attr)
        w1a=qw1[:, :32, :].astype(jnp.bfloat16),
        w1b=qw1[:, 32:64, :].astype(jnp.bfloat16),
        w1c=qw1[:, 64:, :].astype(jnp.bfloat16),
        b1=jnp.stack(q1b),
        w2=jnp.stack(q2w).astype(jnp.bfloat16), b2=jnp.stack(q2b),
        w3=jnp.stack(q3w).astype(jnp.bfloat16), b3=jnp.stack(q3b),
    )

    v1w, v1b, v2w, v2b = [], [], [], []
    for _ in range(NUM_HEADS):
        w1, b1 = _linear_params(next(keys), 1280, 64)
        w2, b2 = _linear_params(next(keys), 64, 4)
        v1w.append(w1); v1b.append(b1); v2w.append(w2); v2b.append(b2)
    params["values"] = dict(
        w1=jnp.stack(v1w).astype(jnp.bfloat16), b1=jnp.stack(v1b),
        w2=jnp.stack(v2w).astype(jnp.bfloat16), b2=jnp.stack(v2b),
    )

    uw1, ub1 = _linear_params(next(keys), 64, 32)
    uw2, ub2 = _linear_params(next(keys), 32, 32)
    params["mlp_upd"] = dict(
        w1x=uw1[:32, :],                                   # acts on x
        w1h=uw1[32:, :].reshape(NUM_HEADS, 4, 32),         # acts on aggregated msgs (head-major)
        b1=ub1, g1=jnp.ones((1, 32), F32), be1=jnp.zeros((1, 32), F32),
        w2=uw2, b2=ub2, g2=jnp.ones((1, 32), F32), be2=jnp.zeros((1, 32), F32),
    )
    params["readout"] = (*_linear_params(next(keys), 32, 16),
                         *_linear_params(next(keys), 16, 3))
    return params


# -------------------------------- forward ------------------------------------

def _full_spec(shape):
    zeros = (0,) * len(shape)
    return pl.BlockSpec(shape, lambda i: zeros)


def forward(params, x, edge_index, edge_attr, protein_embed, batch, num_graphs):
    n = x.shape[0]
    e = edge_index.shape[1]
    p = protein_embed.shape[0]
    g = int(num_graphs)
    src, dst = edge_index[0], edge_index[1]

    # gather / scatter / pool expressed as one-hot matmuls (exact in f32).
    # TODO(synk): switch to a scalar-prefetch index-driven scatter if N/E grow
    # beyond a few thousand (one-hot is O(N*E)).
    gsrc = (src[:, None] == jnp.arange(n)[None, :]).astype(F32)        # (E, N)
    gdst = (dst[:, None] == jnp.arange(n)[None, :]).astype(F32)        # (E, N)
    osrc = (jnp.arange(n)[:, None] == src[None, :]).astype(F32)        # (N, E)
    obatch = (jnp.arange(g)[:, None] == batch[None, :]).astype(F32)    # (G, N)
    peT = protein_embed.T                                              # (1280, P)

    q = params["queries"]; v = params["values"]; u = params["mlp_upd"]
    xw1, xb1, xw2, xb2 = params["x_embed"]
    rw1, rb1, rw2, rb2 = params["readout"]

    inputs = (
        x, edge_attr, gsrc, gdst, osrc, obatch, protein_embed, peT,
        xw1, xb1, xw2, xb2,
        q["w1a"], q["w1b"], q["w1c"], q["b1"], q["w2"], q["b2"], q["w3"], q["b3"],
        v["w1"], v["b1"], v["w2"], v["b2"],
        u["w1x"], u["w1h"], u["b1"], u["g1"], u["be1"],
        u["w2"], u["b2"], u["g2"], u["be2"],
        rw1, rb1, rw2, rb2,
    )

    grid_spec = pltpu.PrefetchScalarGridSpec(
        num_scalar_prefetch=0,
        grid=(NUM_CONVS,),
        in_specs=[_full_spec(a.shape) for a in inputs],
        out_specs=pl.BlockSpec((g, 3), lambda i: (0, 0)),
        scratch_shapes=[
            pltpu.VMEM((n, 32), F32),               # node state x
            pltpu.VMEM((NUM_HEADS, p, 32), F32),    # W[h] = value_head(h) @ uw1_h[h]
            pltpu.VMEM((NUM_HEADS, e, p), F32),     # attention logits
        ],
    )

    return pl.pallas_call(
        _net_kernel,
        out_shape=jax.ShapeDtypeStruct((g, 3), F32),
        grid_spec=grid_spec,
        compiler_params=pltpu.CompilerParams(
            # conv steps carry state in scratch -> must be sequential
            dimension_semantics=("arbitrary",),
            # ~40 MB working set (bf16 weights, double-buffered) < 64 MiB v7x VMEM
            vmem_limit_bytes=56 * 1024 * 1024,
        ),
    )(*inputs)


# --------------------------- pure-JAX reference -------------------------------

def reference_forward(params, x, edge_index, edge_attr, protein_embed, batch, num_graphs):
    xw1, xb1, xw2, xb2 = params["x_embed"]
    q = params["queries"]; v = params["values"]; u = params["mlp_upd"]
    rw1, rb1, rw2, rb2 = params["readout"]
    qw1a, qw1b, qw1c = q["w1a"].astype(F32), q["w1b"].astype(F32), q["w1c"].astype(F32)
    qw2, qw3 = q["w2"].astype(F32), q["w3"].astype(F32)
    qb1, qb2, qb3 = q["b1"], q["b2"], q["b3"]
    vw1, vb1 = v["w1"].astype(F32), v["b1"]
    vw2, vb2 = v["w2"].astype(F32), v["b2"]
    uw1 = jnp.concatenate([u["w1x"], u["w1h"].reshape(NUM_HEADS * 4, 32)], axis=0)
    src, dst = edge_index[0], edge_index[1]
    n, e = x.shape[0], edge_index.shape[1]

    x = jnp.maximum(x @ xw1 + xb1, 0.0) @ xw2 + xb2
    vs = []
    for h in range(NUM_HEADS):
        t = jnp.maximum(protein_embed @ vw1[h] + vb1[h], 0.0)
        vs.append(t @ vw2[h] + vb2[h])
    vs = jnp.stack(vs, axis=0)                                     # (H, P, 4)

    for _ in range(NUM_CONVS):
        xs, xd = x[src], x[dst]
        qs = []
        for h in range(NUM_HEADS):
            t = jnp.maximum(xs @ qw1a[h] + xd @ qw1b[h] + edge_attr @ qw1c[h] + qb1[h], 0.0)
            t = jnp.maximum(t @ qw2[h] + qb2[h], 0.0)
            qs.append(t @ qw3[h] + qb3[h])
        qs = jnp.stack(qs, axis=1)                                 # (E, H, 1280)
        attn = qs @ protein_embed.T                                # (E, H, P)
        attn = jax.nn.softmax(attn, axis=1)[..., None]
        m = (vs[None] * attn).sum(axis=-2).reshape(e, -1)          # (E, 32)
        hagg = jax.ops.segment_sum(m, src, num_segments=n)         # (N, 32)
        t = jnp.concatenate([x, hagg], axis=1) @ uw1 + u["b1"]
        mu = t.mean(0, keepdims=True); var = ((t - mu) ** 2).mean(0, keepdims=True)
        t = jnp.maximum((t - mu) / jnp.sqrt(var + BN_EPS) * u["g1"] + u["be1"], 0.0)
        t = t @ u["w2"] + u["b2"]
        mu = t.mean(0, keepdims=True); var = ((t - mu) ** 2).mean(0, keepdims=True)
        x = jnp.maximum((t - mu) / jnp.sqrt(var + BN_EPS) * u["g2"] + u["be2"], 0.0)

    pooled = jax.ops.segment_sum(x, batch, num_segments=num_graphs)
    return jnp.maximum(pooled @ rw1 + rb1, 0.0) @ rw2 + rb2


# ----------------------------------- main -------------------------------------

if __name__ == "__main__":
    key = jax.random.PRNGKey(0)
    kp, kx, ke, ka, kpr = jax.random.split(key, 5)
    N, E, P, G = 16, 32, 8, 2

    params = init_params(kp)
    x = jax.random.normal(kx, (N, 49), F32)
    edge_index = jax.random.randint(ke, (2, E), 0, N, dtype=jnp.int32)
    edge_attr = jax.random.normal(ka, (E, 4), F32)
    protein_embed = jax.random.normal(kpr, (P, 1280), F32)
    batch = jnp.repeat(jnp.arange(G, dtype=jnp.int32), N // G)

    pred = forward(params, x, edge_index, edge_attr, protein_embed, batch, G)
    pred = jax.block_until_ready(pred)
    assert pred.shape == (G, 3)

    ref = reference_forward(params, x, edge_index, edge_attr, protein_embed, batch, G)
    np.testing.assert_allclose(np.asarray(pred), np.asarray(ref), rtol=2e-3, atol=2e-3)

    print("KERNEL_OK")
</pallas_src>

<mosaic_0001>
module attributes {stable_mosaic.version = 11 : i64} {
  func.func @_net_kernel(%arg0: i32, %arg1: memref<16x49xf32, #tpu.memory_space<vmem>>, %arg2: memref<32x4xf32, #tpu.memory_space<vmem>>, %arg3: memref<32x16xf32, #tpu.memory_space<vmem>>, %arg4: memref<32x16xf32, #tpu.memory_space<vmem>>, %arg5: memref<16x32xf32, #tpu.memory_space<vmem>>, %arg6: memref<2x16xf32, #tpu.memory_space<vmem>>, %arg7: memref<8x1280xf32, #tpu.memory_space<vmem>>, %arg8: memref<1280x8xf32, #tpu.memory_space<vmem>>, %arg9: memref<49x32xf32, #tpu.memory_space<vmem>>, %arg10: memref<1x32xf32, #tpu.memory_space<vmem>>, %arg11: memref<32x32xf32, #tpu.memory_space<vmem>>, %arg12: memref<1x32xf32, #tpu.memory_space<vmem>>, %arg13: memref<8x32x320xbf16, #tpu.memory_space<vmem>>, %arg14: memref<8x32x320xbf16, #tpu.memory_space<vmem>>, %arg15: memref<8x4x320xbf16, #tpu.memory_space<vmem>>, %arg16: memref<8x1x320xf32, #tpu.memory_space<vmem>>, %arg17: memref<8x320x640xbf16, #tpu.memory_space<vmem>>, %arg18: memref<8x1x640xf32, #tpu.memory_space<vmem>>, %arg19: memref<8x640x1280xbf16, #tpu.memory_space<vmem>>, %arg20: memref<8x1x1280xf32, #tpu.memory_space<vmem>>, %arg21: memref<8x1280x64xbf16, #tpu.memory_space<vmem>>, %arg22: memref<8x1x64xf32, #tpu.memory_space<vmem>>, %arg23: memref<8x64x4xbf16, #tpu.memory_space<vmem>>, %arg24: memref<8x1x4xf32, #tpu.memory_space<vmem>>, %arg25: memref<32x32xf32, #tpu.memory_space<vmem>>, %arg26: memref<8x4x32xf32, #tpu.memory_space<vmem>>, %arg27: memref<1x32xf32, #tpu.memory_space<vmem>>, %arg28: memref<1x32xf32, #tpu.memory_space<vmem>>, %arg29: memref<1x32xf32, #tpu.memory_space<vmem>>, %arg30: memref<32x32xf32, #tpu.memory_space<vmem>>, %arg31: memref<1x32xf32, #tpu.memory_space<vmem>>, %arg32: memref<1x32xf32, #tpu.memory_space<vmem>>, %arg33: memref<1x32xf32, #tpu.memory_space<vmem>>, %arg34: memref<32x16xf32, #tpu.memory_space<vmem>>, %arg35: memref<1x16xf32, #tpu.memory_space<vmem>>, %arg36: memref<16x3xf32, #tpu.memory_space<vmem>>, %arg37: memref<1x3xf32, #tpu.memory_space<vmem>>, %arg38: memref<2x3xf32, #tpu.memory_space<vmem>>, %arg39: memref<16x32xf32, #tpu.memory_space<vmem>>, %arg40: memref<8x8x32xf32, #tpu.memory_space<vmem>>, %arg41: memref<8x32x8xf32, #tpu.memory_space<vmem>>) attributes {dimension_semantics = [#tpu.dimension_semantics<arbitrary>], iteration_bounds = array<i64: 3>, scalar_prefetch = 0 : i64, scratch_operands = 3 : i64, tpu.core_type = #tpu.core_type<tc>, window_params = [{pipeline_mode = #tpu.pipeline_mode<synchronous>, transform_indices = @transform_0, window_bounds = array<i64: 16, 49>}, {pipeline_mode = #tpu.pipeline_mode<synchronous>, transform_indices = @transform_1, window_bounds = array<i64: 32, 4>}, {pipeline_mode = #tpu.pipeline_mode<synchronous>, transform_indices = @transform_2, window_bounds = array<i64: 32, 16>}, {pipeline_mode = #tpu.pipeline_mode<synchronous>, transform_indices = @transform_3, window_bounds = array<i64: 32, 16>}, {pipeline_mode = #tpu.pipeline_mode<synchronous>, transform_indices = @transform_4, window_bounds = array<i64: 16, 32>}, {pipeline_mode = #tpu.pipeline_mode<synchronous>, transform_indices = @transform_5, window_bounds = array<i64: 2, 16>}, {pipeline_mode = #tpu.pipeline_mode<synchronous>, transform_indices = @transform_6, window_bounds = array<i64: 8, 1280>}, {pipeline_mode = #tpu.pipeline_mode<synchronous>, transform_indices = @transform_7, window_bounds = array<i64: 1280, 8>}, {pipeline_mode = #tpu.pipeline_mode<synchronous>, transform_indices = @transform_8, window_bounds = array<i64: 49, 32>}, {pipeline_mode = #tpu.pipeline_mode<synchronous>, transform_indices = @transform_9, window_bounds = array<i64: 1, 32>}, {pipeline_mode = #tpu.pipeline_mode<synchronous>, transform_indices = @transform_10, window_bounds = array<i64: 32, 32>}, {pipeline_mode = #tpu.pipeline_mode<synchronous>, transform_indices = @transform_11, window_bounds = array<i64: 1, 32>}, {pipeline_mode = #tpu.pipeline_mode<synchronous>, transform_indices = @transform_12, window_bounds = array<i64: 8, 32, 320>}, {pipeline_mode = #tpu.pipeline_mode<synchronous>, transform_indices = @transform_13, window_bounds = array<i64: 8, 32, 320>}, {pipeline_mode = #tpu.pipeline_mode<synchronous>, transform_indices = @transform_14, window_bounds = array<i64: 8, 4, 320>}, {pipeline_mode = #tpu.pipeline_mode<synchronous>, transform_indices = @transform_15, window_bounds = array<i64: 8, 1, 320>}, {pipeline_mode = #tpu.pipeline_mode<synchronous>, transform_indices = @transform_16, window_bounds = array<i64: 8, 320, 640>}, {pipeline_mode = #tpu.pipeline_mode<synchronous>, transform_indices = @transform_17, window_bounds = array<i64: 8, 1, 640>}, {pipeline_mode = #tpu.pipeline_mode<synchronous>, transform_indices = @transform_18, window_bounds = array<i64: 8, 640, 1280>}, {pipeline_mode = #tpu.pipeline_mode<synchronous>, transform_indices = @transform_19, window_bounds = array<i64: 8, 1, 1280>}, {pipeline_mode = #tpu.pipeline_mode<synchronous>, transform_indices = @transform_20, window_bounds = array<i64: 8, 1280, 64>}, {pipeline_mode = #tpu.pipeline_mode<synchronous>, transform_indices = @transform_21, window_bounds = array<i64: 8, 1, 64>}, {pipeline_mode = #tpu.pipeline_mode<synchronous>, transform_indices = @transform_22, window_bounds = array<i64: 8, 64, 4>}, {pipeline_mode = #tpu.pipeline_mode<synchronous>, transform_indices = @transform_23, window_bounds = array<i64: 8, 1, 4>}, {pipeline_mode = #tpu.pipeline_mode<synchronous>, transform_indices = @transform_24, window_bounds = array<i64: 32, 32>}, {pipeline_mode = #tpu.pipeline_mode<synchronous>, transform_indices = @transform_25, window_bounds = array<i64: 8, 4, 32>}, {pipeline_mode = #tpu.pipeline_mode<synchronous>, transform_indices = @transform_26, window_bounds = array<i64: 1, 32>}, {pipeline_mode = #tpu.pipeline_mode<synchronous>, transform_indices = @transform_27, window_bounds = array<i64: 1, 32>}, {pipeline_mode = #tpu.pipeline_mode<synchronous>, transform_indices = @transform_28, window_bounds = array<i64: 1, 32>}, {pipeline_mode = #tpu.pipeline_mode<synchronous>, transform_indices = @transform_29, window_bounds = array<i64: 32, 32>}, {pipeline_mode = #tpu.pipeline_mode<synchronous>, transform_indices = @transform_30, window_bounds = array<i64: 1, 32>}, {pipeline_mode = #tpu.pipeline_mode<synchronous>, transform_indices = @transform_31, window_bounds = array<i64: 1, 32>}, {pipeline_mode = #tpu.pipeline_mode<synchronous>, transform_indices = @transform_32, window_bounds = array<i64: 1, 32>}, {pipeline_mode = #tpu.pipeline_mode<synchronous>, transform_indices = @transform_33, window_bounds = array<i64: 32, 16>}, {pipeline_mode = #tpu.pipeline_mode<synchronous>, transform_indices = @transform_34, window_bounds = array<i64: 1, 16>}, {pipeline_mode = #tpu.pipeline_mode<synchronous>, transform_indices = @transform_35, window_bounds = array<i64: 16, 3>}, {pipeline_mode = #tpu.pipeline_mode<synchronous>, transform_indices = @transform_36, window_bounds = array<i64: 1, 3>}, {pipeline_mode = #tpu.pipeline_mode<synchronous>, transform_indices = @transform_37, window_bounds = array<i64: 2, 3>}]} {
    %c0_i32 = arith.constant 0 : i32
    %0 = arith.cmpi eq, %arg0, %c0_i32 : i32
    %1 = arith.extui %0 : i1 to i32
    %c0_i32_0 = arith.constant 0 : i32
    %2 = arith.cmpi ne, %1, %c0_i32_0 : i32
    scf.if %2 {
      %c0_59 = arith.constant 0 : index
      %c0_60 = arith.constant 0 : index
      %93 = vector.load %arg1[%c0_59, %c0_60] : memref<16x49xf32, #tpu.memory_space<vmem>>, vector<16x49xf32>
      %c0_61 = arith.constant 0 : index
      %c0_62 = arith.constant 0 : index
      %94 = vector.load %arg9[%c0_61, %c0_62] : memref<49x32xf32, #tpu.memory_space<vmem>>, vector<49x32xf32>
      %cst_63 = arith.constant dense<0.000000e+00> : vector<16x32xf32>
      %95 = tpu.matmul %93, %94, %cst_63 {dimension_numbers = #tpu.dot_dimension_numbers<[1], [0], [0], [1], [0, 0, 1, 1], [], []>} : vector<16x49xf32>, vector<49x32xf32>, vector<16x32xf32> -> vector<16x32xf32>
      %c0_64 = arith.constant 0 : index
      %c0_65 = arith.constant 0 : index
      %96 = vector.load %arg10[%c0_64, %c0_65] : memref<1x32xf32, #tpu.memory_space<vmem>>, vector<1x32xf32>
      %97 = vector.broadcast %96 : vector<1x32xf32> to vector<16x32xf32>
      %98 = arith.addf %95, %97 : vector<16x32xf32>
      %cst_66 = arith.constant 0.000000e+00 : f32
      %99 = vector.broadcast %cst_66 : f32 to vector<16x32xf32>
      %100 = arith.maximumf %98, %99 : vector<16x32xf32>
      %c0_67 = arith.constant 0 : index
      %c0_68 = arith.constant 0 : index
      %101 = vector.load %arg11[%c0_67, %c0_68] : memref<32x32xf32, #tpu.memory_space<vmem>>, vector<32x32xf32>
      %cst_69 = arith.constant dense<0.000000e+00> : vector<16x32xf32>
      %102 = tpu.matmul %100, %101, %cst_69 {dimension_numbers = #tpu.dot_dimension_numbers<[1], [0], [0], [1], [0, 0, 1, 1], [], []>} : vector<16x32xf32>, vector<32x32xf32>, vector<16x32xf32> -> vector<16x32xf32>
      %c0_70 = arith.constant 0 : index
      %c0_71 = arith.constant 0 : index
      %103 = vector.load %arg12[%c0_70, %c0_71] : memref<1x32xf32, #tpu.memory_space<vmem>>, vector<1x32xf32>
      %104 = vector.broadcast %103 : vector<1x32xf32> to vector<16x32xf32>
      %105 = arith.addf %102, %104 : vector<16x32xf32>
      %c0_72 = arith.constant 0 : index
      %c0_73 = arith.constant 0 : index
      %106 = vector.load %arg39[%c0_72, %c0_73] : memref<16x32xf32, #tpu.memory_space<vmem>>, vector<16x32xf32>
      tpu.vector_store %arg39[%c0_72, %c0_73], %105 {strides = array<i32>} : memref<16x32xf32, #tpu.memory_space<vmem>>, vector<16x32xf32>,
      %c0_74 = arith.constant 0 : index
      %c0_75 = arith.constant 0 : index
      %107 = vector.load %arg7[%c0_74, %c0_75] : memref<8x1280xf32, #tpu.memory_space<vmem>>, vector<8x1280xf32>
      %c0_i32_76 = arith.constant 0 : i32
      %c8_i32_77 = arith.constant 8 : i32
      %108 = arith.addi %c0_i32_76, %c8_i32_77 : i32
      %c1_i32_78 = arith.constant 1 : i32
      scf.for %arg42 = %c0_i32_76 to %108 step %c1_i32_78  : i32 {
        %c1_i32_80 = arith.constant 1 : i32
        %109 = arith.muli %arg42, %c1_i32_80 : i32
        %c0_i32_81 = arith.constant 0 : i32
        %110 = arith.addi %c0_i32_81, %109 : i32
        %111 = arith.index_cast %110 : i32 to index
        %c0_82 = arith.constant 0 : index
        %c0_83 = arith.constant 0 : index
        %112 = vector.load %arg21[%111, %c0_82, %c0_83] : memref<8x1280x64xbf16, #tpu.memory_space<vmem>>, vector<1x1280x64xbf16>
        %113 = vector.shape_cast %112 : vector<1x1280x64xbf16> to vector<1280x64xbf16>
        %114 = arith.extf %113 : vector<1280x64xbf16> to vector<1280x64xf32>
        %cst_84 = arith.constant dense<0.000000e+00> : vector<8x64xf32>
        %115 = tpu.matmul %107, %114, %cst_84 {dimension_numbers = #tpu.dot_dimension_numbers<[1], [0], [0], [1], [0, 0, 1, 1], [], []>} : vector<8x1280xf32>, vector<1280x64xf32>, vector<8x64xf32> -> vector<8x64xf32>
        %116 = arith.index_cast %110 : i32 to index
        %c0_85 = arith.constant 0 : index
        %c0_86 = arith.constant 0 : index
        %117 = vector.load %arg22[%116, %c0_85, %c0_86] : memref<8x1x64xf32, #tpu.memory_space<vmem>>, vector<1x1x64xf32>
        %118 = vector.shape_cast %117 : vector<1x1x64xf32> to vector<1x64xf32>
        %119 = vector.broadcast %118 : vector<1x64xf32> to vector<8x64xf32>
        %120 = arith.addf %115, %119 : vector<8x64xf32>
        %cst_87 = arith.constant 0.000000e+00 : f32
        %121 = vector.broadcast %cst_87 : f32 to vector<8x64xf32>
        %122 = arith.maximumf %120, %121 : vector<8x64xf32>
        %123 = arith.index_cast %110 : i32 to index
        %c0_88 = arith.constant 0 : index
        %c0_89 = arith.constant 0 : index
        %124 = vector.load %arg23[%123, %c0_88, %c0_89] : memref<8x64x4xbf16, #tpu.memory_space<vmem>>, vector<1x64x4xbf16>
        %125 = vector.shape_cast %124 : vector<1x64x4xbf16> to vector<64x4xbf16>
        %126 = arith.extf %125 : vector<64x4xbf16> to vector<64x4xf32>
        %cst_90 = arith.constant dense<0.000000e+00> : vector<8x4xf32>
        %127 = tpu.matmul %122, %126, %cst_90 {dimension_numbers = #tpu.dot_dimension_numbers<[1], [0], [0], [1], [0, 0, 1, 1], [], []>} : vector<8x64xf32>, vector<64x4xf32>, vector<8x4xf32> -> vector<8x4xf32>
        %128 = arith.index_cast %110 : i32 to index
        %c0_91 = arith.constant 0 : index
        %c0_92 = arith.constant 0 : index
        %129 = vector.load %arg24[%128, %c0_91, %c0_92] : memref<8x1x4xf32, #tpu.memory_space<vmem>>, vector<1x1x4xf32>
        %130 = vector.shape_cast %129 : vector<1x1x4xf32> to vector<1x4xf32>
        %131 = vector.broadcast %130 : vector<1x4xf32> to vector<8x4xf32>
        %132 = arith.addf %127, %131 : vector<8x4xf32>
        %133 = arith.index_cast %110 : i32 to index
        %c0_93 = arith.constant 0 : index
        %c0_94 = arith.constant 0 : index
        %134 = vector.load %arg26[%133, %c0_93, %c0_94] : memref<8x4x32xf32, #tpu.memory_space<vmem>>, vector<1x4x32xf32>
        %135 = vector.shape_cast %134 : vector<1x4x32xf32> to vector<4x32xf32>
        %cst_95 = arith.constant dense<0.000000e+00> : vector<8x32xf32>
        %136 = tpu.matmul %132, %135, %cst_95 {dimension_numbers = #tpu.dot_dimension_numbers<[1], [0], [0], [1], [0, 0, 1, 1], [], []>} : vector<8x4xf32>, vector<4x32xf32>, vector<8x32xf32> -> vector<8x32xf32>
        %137 = arith.index_cast %110 : i32 to index
        %c0_96 = arith.constant 0 : index
        %c0_97 = arith.constant 0 : index
        %138 = vector.load %arg40[%137, %c0_96, %c0_97] : memref<8x8x32xf32, #tpu.memory_space<vmem>>, vector<1x8x32xf32>
        %139 = vector.shape_cast %138 : vector<1x8x32xf32> to vector<8x32xf32>
        %140 = vector.shape_cast %136 : vector<8x32xf32> to vector<1x8x32xf32>
        tpu.vector_store %arg40[%137, %c0_96, %c0_97], %140 {strides = array<i32>} : memref<8x8x32xf32, #tpu.memory_space<vmem>>, vector<1x8x32xf32>,
      }
      %c8_i32_79 = arith.constant 8 : i32
    } else {
    }
    %c0 = arith.constant 0 : index
    %c0_1 = arith.constant 0 : index
    %3 = vector.load %arg39[%c0, %c0_1] : memref<16x32xf32, #tpu.memory_space<vmem>>, vector<16x32xf32>
    %c0_2 = arith.constant 0 : index
    %c0_3 = arith.constant 0 : index
    %4 = vector.load %arg3[%c0_2, %c0_3] : memref<32x16xf32, #tpu.memory_space<vmem>>, vector<32x16xf32>
    %cst = arith.constant dense<0.000000e+00> : vector<32x32xf32>
    %5 = tpu.matmul %4, %3, %cst {dimension_numbers = #tpu.dot_dimension_numbers<[1], [0], [0], [1], [0, 0, 1, 1], [], []>} : vector<32x16xf32>, vector<16x32xf32>, vector<32x32xf32> -> vector<32x32xf32>
    %c0_4 = arith.constant 0 : index
    %c0_5 = arith.constant 0 : index
    %6 = vector.load %arg4[%c0_4, %c0_5] : memref<32x16xf32, #tpu.memory_space<vmem>>, vector<32x16xf32>
    %cst_6 = arith.constant dense<0.000000e+00> : vector<32x32xf32>
    %7 = tpu.matmul %6, %3, %cst_6 {dimension_numbers = #tpu.dot_dimension_numbers<[1], [0], [0], [1], [0, 0, 1, 1], [], []>} : vector<32x16xf32>, vector<16x32xf32>, vector<32x32xf32> -> vector<32x32xf32>
    %c0_7 = arith.constant 0 : index
    %c0_8 = arith.constant 0 : index
    %8 = vector.load %arg2[%c0_7, %c0_8] : memref<32x4xf32, #tpu.memory_space<vmem>>, vector<32x4xf32>
    %c0_9 = arith.constant 0 : index
    %c0_10 = arith.constant 0 : index
    %9 = vector.load %arg8[%c0_9, %c0_10] : memref<1280x8xf32, #tpu.memory_space<vmem>>, vector<1280x8xf32>
    %c0_i32_11 = arith.constant 0 : i32
    %c8_i32 = arith.constant 8 : i32
    %10 = arith.addi %c0_i32_11, %c8_i32 : i32
    %c1_i32 = arith.constant 1 : i32
    scf.for %arg42 = %c0_i32_11 to %10 step %c1_i32  : i32 {
      %c1_i32_59 = arith.constant 1 : i32
      %93 = arith.muli %arg42, %c1_i32_59 : i32
      %c0_i32_60 = arith.constant 0 : i32
      %94 = arith.addi %c0_i32_60, %93 : i32
      %95 = arith.index_cast %94 : i32 to index
      %c0_61 = arith.constant 0 : index
      %c0_62 = arith.constant 0 : index
      %96 = vector.load %arg13[%95, %c0_61, %c0_62] : memref<8x32x320xbf16, #tpu.memory_space<vmem>>, vector<1x32x320xbf16>
      %97 = vector.shape_cast %96 : vector<1x32x320xbf16> to vector<32x320xbf16>
      %98 = arith.extf %97 : vector<32x320xbf16> to vector<32x320xf32>
      %cst_63 = arith.constant dense<0.000000e+00> : vector<32x320xf32>
      %99 = tpu.matmul %5, %98, %cst_63 {dimension_numbers = #tpu.dot_dimension_numbers<[1], [0], [0], [1], [0, 0, 1, 1], [], []>} : vector<32x32xf32>, vector<32x320xf32>, vector<32x320xf32> -> vector<32x320xf32>
      %100 = arith.index_cast %94 : i32 to index
      %c0_64 = arith.constant 0 : index
      %c0_65 = arith.constant 0 : index
      %101 = vector.load %arg14[%100, %c0_64, %c0_65] : memref<8x32x320xbf16, #tpu.memory_space<vmem>>, vector<1x32x320xbf16>
      %102 = vector.shape_cast %101 : vector<1x32x320xbf16> to vector<32x320xbf16>
      %103 = arith.extf %102 : vector<32x320xbf16> to vector<32x320xf32>
      %cst_66 = arith.constant dense<0.000000e+00> : vector<32x320xf32>
      %104 = tpu.matmul %7, %103, %cst_66 {dimension_numbers = #tpu.dot_dimension_numbers<[1], [0], [0], [1], [0, 0, 1, 1], [], []>} : vector<32x32xf32>, vector<32x320xf32>, vector<32x320xf32> -> vector<32x320xf32>
      %105 = arith.addf %99, %104 : vector<32x320xf32>
      %106 = arith.index_cast %94 : i32 to index
      %c0_67 = arith.constant 0 : index
      %c0_68 = arith.constant 0 : index
      %107 = vector.load %arg15[%106, %c0_67, %c0_68] : memref<8x4x320xbf16, #tpu.memory_space<vmem>>, vector<1x4x320xbf16>
      %108 = vector.shape_cast %107 : vector<1x4x320xbf16> to vector<4x320xbf16>
      %109 = arith.extf %108 : vector<4x320xbf16> to vector<4x320xf32>
      %cst_69 = arith.constant dense<0.000000e+00> : vector<32x320xf32>
      %110 = tpu.matmul %8, %109, %cst_69 {dimension_numbers = #tpu.dot_dimension_numbers<[1], [0], [0], [1], [0, 0, 1, 1], [], []>} : vector<32x4xf32>, vector<4x320xf32>, vector<32x320xf32> -> vector<32x320xf32>
      %111 = arith.addf %105, %110 : vector<32x320xf32>
      %112 = arith.index_cast %94 : i32 to index
      %c0_70 = arith.constant 0 : index
      %c0_71 = arith.constant 0 : index
      %113 = vector.load %arg16[%112, %c0_70, %c0_71] : memref<8x1x320xf32, #tpu.memory_space<vmem>>, vector<1x1x320xf32>
      %114 = vector.shape_cast %113 : vector<1x1x320xf32> to vector<1x320xf32>
      %115 = vector.broadcast %114 : vector<1x320xf32> to vector<32x320xf32>
      %116 = arith.addf %111, %115 : vector<32x320xf32>
      %cst_72 = arith.constant 0.000000e+00 : f32
      %117 = vector.broadcast %cst_72 : f32 to vector<32x320xf32>
      %118 = arith.maximumf %116, %117 : vector<32x320xf32>
      %119 = arith.index_cast %94 : i32 to index
      %c0_73 = arith.constant 0 : index
      %c0_74 = arith.constant 0 : index
      %120 = vector.load %arg17[%119, %c0_73, %c0_74] : memref<8x320x640xbf16, #tpu.memory_space<vmem>>, vector<1x320x640xbf16>
      %121 = vector.shape_cast %120 : vector<1x320x640xbf16> to vector<320x640xbf16>
      %122 = arith.extf %121 : vector<320x640xbf16> to vector<320x640xf32>
      %cst_75 = arith.constant dense<0.000000e+00> : vector<32x640xf32>
      %123 = tpu.matmul %118, %122, %cst_75 {dimension_numbers = #tpu.dot_dimension_numbers<[1], [0], [0], [1], [0, 0, 1, 1], [], []>} : vector<32x320xf32>, vector<320x640xf32>, vector<32x640xf32> -> vector<32x640xf32>
      %124 = arith.index_cast %94 : i32 to index
      %c0_76 = arith.constant 0 : index
      %c0_77 = arith.constant 0 : index
      %125 = vector.load %arg18[%124, %c0_76, %c0_77] : memref<8x1x640xf32, #tpu.memory_space<vmem>>, vector<1x1x640xf32>
      %126 = vector.shape_cast %125 : vector<1x1x640xf32> to vector<1x640xf32>
      %127 = vector.broadcast %126 : vector<1x640xf32> to vector<32x640xf32>
      %128 = arith.addf %123, %127 : vector<32x640xf32>
      %cst_78 = arith.constant 0.000000e+00 : f32
      %129 = vector.broadcast %cst_78 : f32 to vector<32x640xf32>
      %130 = arith.maximumf %128, %129 : vector<32x640xf32>
      %131 = arith.index_cast %94 : i32 to index
      %c0_79 = arith.constant 0 : index
      %c0_80 = arith.constant 0 : index
      %132 = vector.load %arg19[%131, %c0_79, %c0_80] : memref<8x640x1280xbf16, #tpu.memory_space<vmem>>, vector<1x640x1280xbf16>
      %133 = vector.shape_cast %132 : vector<1x640x1280xbf16> to vector<640x1280xbf16>
      %134 = arith.extf %133 : vector<640x1280xbf16> to vector<640x1280xf32>
      %cst_81 = arith.constant dense<0.000000e+00> : vector<32x1280xf32>
      %135 = tpu.matmul %130, %134, %cst_81 {dimension_numbers = #tpu.dot_dimension_numbers<[1], [0], [0], [1], [0, 0, 1, 1], [], []>} : vector<32x640xf32>, vector<640x1280xf32>, vector<32x1280xf32> -> vector<32x1280xf32>
      %136 = arith.index_cast %94 : i32 to index
      %c0_82 = arith.constant 0 : index
      %c0_83 = arith.constant 0 : index
      %137 = vector.load %arg20[%136, %c0_82, %c0_83] : memref<8x1x1280xf32, #tpu.memory_space<vmem>>, vector<1x1x1280xf32>
      %138 = vector.shape_cast %137 : vector<1x1x1280xf32> to vector<1x1280xf32>
      %139 = vector.broadcast %138 : vector<1x1280xf32> to vector<32x1280xf32>
      %140 = arith.addf %135, %139 : vector<32x1280xf32>
      %cst_84 = arith.constant dense<0.000000e+00> : vector<32x8xf32>
      %141 = tpu.matmul %140, %9, %cst_84 {dimension_numbers = #tpu.dot_dimension_numbers<[1], [0], [0], [1], [0, 0, 1, 1], [], []>} : vector<32x1280xf32>, vector<1280x8xf32>, vector<32x8xf32> -> vector<32x8xf32>
      %142 = arith.index_cast %94 : i32 to index
      %c0_85 = arith.constant 0 : index
      %c0_86 = arith.constant 0 : index
      %143 = vector.load %arg41[%142, %c0_85, %c0_86] : memref<8x32x8xf32, #tpu.memory_space<vmem>>, vector<1x32x8xf32>
      %144 = vector.shape_cast %143 : vector<1x32x8xf32> to vector<32x8xf32>
      %145 = vector.shape_cast %141 : vector<32x8xf32> to vector<1x32x8xf32>
      tpu.vector_store %arg41[%142, %c0_85, %c0_86], %145 {strides = array<i32>} : memref<8x32x8xf32, #tpu.memory_space<vmem>>, vector<1x32x8xf32>,
    }
    %c8_i32_12 = arith.constant 8 : i32
    %c0_13 = arith.constant 0 : index
    %c0_14 = arith.constant 0 : index
    %c0_15 = arith.constant 0 : index
    %11 = vector.load %arg41[%c0_13, %c0_14, %c0_15] : memref<8x32x8xf32, #tpu.memory_space<vmem>>, vector<8x32x8xf32>
    %cst_16 = arith.constant dense<0xFF800000> : vector<32x8xf32>
    %12 = vector.multi_reduction <maximumf>, %11, %cst_16 [0] : vector<8x32x8xf32> to vector<32x8xf32>
    %13 = vector.shape_cast %12 : vector<32x8xf32> to vector<1x32x8xf32>
    %14 = vector.broadcast %13 : vector<1x32x8xf32> to vector<8x32x8xf32>
    %15 = arith.subf %11, %14 : vector<8x32x8xf32>
    %16 = math.exp %15 : vector<8x32x8xf32>
    %cst_17 = arith.constant dense<0.000000e+00> : vector<32x8xf32>
    %17 = vector.multi_reduction <add>, %16, %cst_17 [0] : vector<8x32x8xf32> to vector<32x8xf32>
    %18 = vector.shape_cast %17 : vector<32x8xf32> to vector<1x32x8xf32>
    %19 = vector.broadcast %18 : vector<1x32x8xf32> to vector<8x32x8xf32>
    %20 = arith.divf %16, %19 : vector<8x32x8xf32>
    %c0_18 = arith.constant 0 : index
    %c0_19 = arith.constant 0 : index
    %c0_20 = arith.constant 0 : index
    %21 = vector.load %arg40[%c0_18, %c0_19, %c0_20] : memref<8x8x32xf32, #tpu.memory_space<vmem>>, vector<8x8x32xf32>
    "tpu.trace_start"() <{level = 10 : i32, message = "hep,hpo->heo"}> : () -> ()
    %cst_21 = arith.constant dense<0.000000e+00> : vector<8x32x32xf32>
    %22 = tpu.matmul %20, %21, %cst_21 {dimension_numbers = #tpu.dot_dimension_numbers<[2], [1], [1], [2], [0, 0, 0, 1, 1, 2], [0], [0]>} : vector<8x32x8xf32>, vector<8x8x32xf32>, vector<8x32x32xf32> -> vector<8x32x32xf32>
    "tpu.trace_stop"() : () -> ()
    %cst_22 = arith.constant dense<0.000000e+00> : vector<32x32xf32>
    %23 = vector.multi_reduction <add>, %22, %cst_22 [0] : vector<8x32x32xf32> to vector<32x32xf32>
    %c0_23 = arith.constant 0 : index
    %c0_24 = arith.constant 0 : index
    %24 = vector.load %arg5[%c0_23, %c0_24] : memref<16x32xf32, #tpu.memory_space<vmem>>, vector<16x32xf32>
    %cst_25 = arith.constant dense<0.000000e+00> : vector<16x32xf32>
    %25 = tpu.matmul %24, %23, %cst_25 {dimension_numbers = #tpu.dot_dimension_numbers<[1], [0], [0], [1], [0, 0, 1, 1], [], []>} : vector<16x32xf32>, vector<32x32xf32>, vector<16x32xf32> -> vector<16x32xf32>
    %c0_26 = arith.constant 0 : index
    %c0_27 = arith.constant 0 : index
    %26 = vector.load %arg25[%c0_26, %c0_27] : memref<32x32xf32, #tpu.memory_space<vmem>>, vector<32x32xf32>
    %cst_28 = arith.constant dense<0.000000e+00> : vector<16x32xf32>
    %27 = tpu.matmul %3, %26, %cst_28 {dimension_numbers = #tpu.dot_dimension_numbers<[1], [0], [0], [1], [0, 0, 1, 1], [], []>} : vector<16x32xf32>, vector<32x32xf32>, vector<16x32xf32> -> vector<16x32xf32>
    %28 = arith.addf %27, %25 : vector<16x32xf32>
    %c0_29 = arith.constant 0 : index
    %c0_30 = arith.constant 0 : index
    %29 = vector.load %arg27[%c0_29, %c0_30] : memref<1x32xf32, #tpu.memory_space<vmem>>, vector<1x32xf32>
    %30 = vector.broadcast %29 : vector<1x32xf32> to vector<16x32xf32>
    %31 = arith.addf %28, %30 : vector<16x32xf32>
    %cst_31 = arith.constant dense<0.000000e+00> : vector<32xf32>
    %32 = vector.multi_reduction <add>, %31, %cst_31 [0] : vector<16x32xf32> to vector<32xf32>
    %33 = vector.shape_cast %32 : vector<32xf32> to vector<1x32xf32>
    %cst_32 = arith.constant 1.600000e+01 : f32
    %34 = vector.broadcast %cst_32 : f32 to vector<1x32xf32>
    %35 = arith.divf %33, %34 : vector<1x32xf32>
    %36 = vector.broadcast %35 : vector<1x32xf32> to vector<16x32xf32>
    %37 = arith.subf %31, %36 : vector<16x32xf32>
    %38 = arith.mulf %37, %37 : vector<16x32xf32>
    %cst_33 = arith.constant dense<0.000000e+00> : vector<32xf32>
    %39 = vector.multi_reduction <add>, %38, %cst_33 [0] : vector<16x32xf32> to vector<32xf32>
    %40 = vector.shape_cast %39 : vector<32xf32> to vector<1x32xf32>
    %cst_34 = arith.constant 1.600000e+01 : f32
    %41 = vector.broadcast %cst_34 : f32 to vector<1x32xf32>
    %42 = arith.divf %40, %41 : vector<1x32xf32>
    %43 = vector.broadcast %35 : vector<1x32xf32> to vector<16x32xf32>
    %44 = arith.subf %31, %43 : vector<16x32xf32>
    %cst_35 = arith.constant 9.99999974E-6 : f32
    %45 = vector.broadcast %cst_35 : f32 to vector<1x32xf32>
    %46 = arith.addf %42, %45 : vector<1x32xf32>
    %47 = math.sqrt %46 : vector<1x32xf32>
    %48 = vector.broadcast %47 : vector<1x32xf32> to vector<16x32xf32>
    %49 = arith.divf %44, %48 : vector<16x32xf32>
    %c0_36 = arith.constant 0 : index
    %c0_37 = arith.constant 0 : index
    %50 = vector.load %arg28[%c0_36, %c0_37] : memref<1x32xf32, #tpu.memory_space<vmem>>, vector<1x32xf32>
    %51 = vector.broadcast %50 : vector<1x32xf32> to vector<16x32xf32>
    %52 = arith.mulf %49, %51 : vector<16x32xf32>
    %c0_38 = arith.constant 0 : index
    %c0_39 = arith.constant 0 : index
    %53 = vector.load %arg29[%c0_38, %c0_39] : memref<1x32xf32, #tpu.memory_space<vmem>>, vector<1x32xf32>
    %54 = vector.broadcast %53 : vector<1x32xf32> to vector<16x32xf32>
    %55 = arith.addf %52, %54 : vector<16x32xf32>
    %cst_40 = arith.constant 0.000000e+00 : f32
    %56 = vector.broadcast %cst_40 : f32 to vector<16x32xf32>
    %57 = arith.maximumf %55, %56 : vector<16x32xf32>
    %c0_41 = arith.constant 0 : index
    %c0_42 = arith.constant 0 : index
    %58 = vector.load %arg30[%c0_41, %c0_42] : memref<32x32xf32, #tpu.memory_space<vmem>>, vector<32x32xf32>
    %cst_43 = arith.constant dense<0.000000e+00> : vector<16x32xf32>
    %59 = tpu.matmul %57, %58, %cst_43 {dimension_numbers = #tpu.dot_dimension_numbers<[1], [0], [0], [1], [0, 0, 1, 1], [], []>} : vector<16x32xf32>, vector<32x32xf32>, vector<16x32xf32> -> vector<16x32xf32>
    %c0_44 = arith.constant 0 : index
    %c0_45 = arith.constant 0 : index
    %60 = vector.load %arg31[%c0_44, %c0_45] : memref<1x32xf32, #tpu.memory_space<vmem>>, vector<1x32xf32>
    %61 = vector.broadcast %60 : vector<1x32xf32> to vector<16x32xf32>
    %62 = arith.addf %59, %61 : vector<16x32xf32>
    %cst_46 = arith.constant dense<0.000000e+00> : vector<32xf32>
    %63 = vector.multi_reduction <add>, %62, %cst_46 [0] : vector<16x32xf32> to vector<32xf32>
    %64 = vector.shape_cast %63 : vector<32xf32> to vector<1x32xf32>
    %cst_47 = arith.constant 1.600000e+01 : f32
    %65 = vector.broadcast %cst_47 : f32 to vector<1x32xf32>
    %66 = arith.divf %64, %65 : vector<1x32xf32>
    %67 = vector.broadcast %66 : vector<1x32xf32> to vector<16x32xf32>
    %68 = arith.subf %62, %67 : vector<16x32xf32>
    %69 = arith.mulf %68, %68 : vector<16x32xf32>
    %cst_48 = arith.constant dense<0.000000e+00> : vector<32xf32>
    %70 = vector.multi_reduction <add>, %69, %cst_48 [0] : vector<16x32xf32> to vector<32xf32>
    %71 = vector.shape_cast %70 : vector<32xf32> to vector<1x32xf32>
    %cst_49 = arith.constant 1.600000e+01 : f32
    %72 = vector.broadcast %cst_49 : f32 to vector<1x32xf32>
    %73 = arith.divf %71, %72 : vector<1x32xf32>
    %74 = vector.broadcast %66 : vector<1x32xf32> to vector<16x32xf32>
    %75 = arith.subf %62, %74 : vector<16x32xf32>
    %cst_50 = arith.constant 9.99999974E-6 : f32
    %76 = vector.broadcast %cst_50 : f32 to vector<1x32xf32>
    %77 = arith.addf %73, %76 : vector<1x32xf32>
    %78 = math.sqrt %77 : vector<1x32xf32>
    %79 = vector.broadcast %78 : vector<1x32xf32> to vector<16x32xf32>
    %80 = arith.divf %75, %79 : vector<16x32xf32>
    %c0_51 = arith.constant 0 : index
    %c0_52 = arith.constant 0 : index
    %81 = vector.load %arg32[%c0_51, %c0_52] : memref<1x32xf32, #tpu.memory_space<vmem>>, vector<1x32xf32>
    %82 = vector.broadcast %81 : vector<1x32xf32> to vector<16x32xf32>
    %83 = arith.mulf %80, %82 : vector<16x32xf32>
    %c0_53 = arith.constant 0 : index
    %c0_54 = arith.constant 0 : index
    %84 = vector.load %arg33[%c0_53, %c0_54] : memref<1x32xf32, #tpu.memory_space<vmem>>, vector<1x32xf32>
    %85 = vector.broadcast %84 : vector<1x32xf32> to vector<16x32xf32>
    %86 = arith.addf %83, %85 : vector<16x32xf32>
    %cst_55 = arith.constant 0.000000e+00 : f32
    %87 = vector.broadcast %cst_55 : f32 to vector<16x32xf32>
    %88 = arith.maximumf %86, %87 : vector<16x32xf32>
    %c0_56 = arith.constant 0 : index
    %c0_57 = arith.constant 0 : index
    %89 = vector.load %arg39[%c0_56, %c0_57] : memref<16x32xf32, #tpu.memory_space<vmem>>, vector<16x32xf32>
    tpu.vector_store %arg39[%c0_56, %c0_57], %88 {strides = array<i32>} : memref<16x32xf32, #tpu.memory_space<vmem>>, vector<16x32xf32>,
    %c2_i32 = arith.constant 2 : i32
    %90 = arith.cmpi eq, %arg0, %c2_i32 : i32
    %91 = arith.extui %90 : i1 to i32
    %c0_i32_58 = arith.constant 0 : i32
    %92 = arith.cmpi ne, %91, %c0_i32_58 : i32
    scf.if %92 {
      %c0_59 = arith.constant 0 : index
      %c0_60 = arith.constant 0 : index
      %93 = vector.load %arg6[%c0_59, %c0_60] : memref<2x16xf32, #tpu.memory_space<vmem>>, vector<2x16xf32>
      %c0_61 = arith.constant 0 : index
      %c0_62 = arith.constant 0 : index
      %94 = vector.load %arg39[%c0_61, %c0_62] : memref<16x32xf32, #tpu.memory_space<vmem>>, vector<16x32xf32>
      %cst_63 = arith.constant dense<0.000000e+00> : vector<2x32xf32>
      %95 = tpu.matmul %93, %94, %cst_63 {dimension_numbers = #tpu.dot_dimension_numbers<[1], [0], [0], [1], [0, 0, 1, 1], [], []>} : vector<2x16xf32>, vector<16x32xf32>, vector<2x32xf32> -> vector<2x32xf32>
      %c0_64 = arith.constant 0 : index
      %c0_65 = arith.constant 0 : index
      %96 = vector.load %arg34[%c0_64, %c0_65] : memref<32x16xf32, #tpu.memory_space<vmem>>, vector<32x16xf32>
      %cst_66 = arith.constant dense<0.000000e+00> : vector<2x16xf32>
      %97 = tpu.matmul %95, %96, %cst_66 {dimension_numbers = #tpu.dot_dimension_numbers<[1], [0], [0], [1], [0, 0, 1, 1], [], []>} : vector<2x32xf32>, vector<32x16xf32>, vector<2x16xf32> -> vector<2x16xf32>
      %c0_67 = arith.constant 0 : index
      %c0_68 = arith.constant 0 : index
      %98 = vector.load %arg35[%c0_67, %c0_68] : memref<1x16xf32, #tpu.memory_space<vmem>>, vector<1x16xf32>
      %99 = vector.broadcast %98 : vector<1x16xf32> to vector<2x16xf32>
      %100 = arith.addf %97, %99 : vector<2x16xf32>
      %cst_69 = arith.constant 0.000000e+00 : f32
      %101 = vector.broadcast %cst_69 : f32 to vector<2x16xf32>
      %102 = arith.maximumf %100, %101 : vector<2x16xf32>
      %c0_70 = arith.constant 0 : index
      %c0_71 = arith.constant 0 : index
      %103 = vector.load %arg36[%c0_70, %c0_71] : memref<16x3xf32, #tpu.memory_space<vmem>>, vector<16x3xf32>
      %cst_72 = arith.constant dense<0.000000e+00> : vector<2x3xf32>
      %104 = tpu.matmul %102, %103, %cst_72 {dimension_numbers = #tpu.dot_dimension_numbers<[1], [0], [0], [1], [0, 0, 1, 1], [], []>} : vector<2x16xf32>, vector<16x3xf32>, vector<2x3xf32> -> vector<2x3xf32>
      %c0_73 = arith.constant 0 : index
      %c0_74 = arith.constant 0 : index
      %105 = vector.load %arg37[%c0_73, %c0_74] : memref<1x3xf32, #tpu.memory_space<vmem>>, vector<1x3xf32>
      %106 = vector.broadcast %105 : vector<1x3xf32> to vector<2x3xf32>
      %107 = arith.addf %104, %106 : vector<2x3xf32>
      %c0_75 = arith.constant 0 : index
      %c0_76 = arith.constant 0 : index
      %108 = vector.load %arg38[%c0_75, %c0_76] : memref<2x3xf32, #tpu.memory_space<vmem>>, vector<2x3xf32>
      tpu.vector_store %arg38[%c0_75, %c0_76], %107 {strides = array<i32>} : memref<2x3xf32, #tpu.memory_space<vmem>>, vector<2x3xf32>,
    } else {
    }
    return
  }
  func.func @transform_0(%arg0: i32) -> (i32, i32) {
    %c0_i32 = arith.constant 0 : i32
    %c0_i32_0 = arith.constant 0 : i32
    %c0_i32_1 = arith.constant 0 : i32
    return %c0_i32, %c0_i32_0 : i32, i32
  }
  func.func @transform_1(%arg0: i32) -> (i32, i32) {
    %c0_i32 = arith.constant 0 : i32
    %c0_i32_0 = arith.constant 0 : i32
    %c0_i32_1 = arith.constant 0 : i32
    return %c0_i32, %c0_i32_0 : i32, i32
  }
  func.func @transform_2(%arg0: i32) -> (i32, i32) {
    %c0_i32 = arith.constant 0 : i32
    %c0_i32_0 = arith.constant 0 : i32
    %c0_i32_1 = arith.constant 0 : i32
    return %c0_i32, %c0_i32_0 : i32, i32
  }
  func.func @transform_3(%arg0: i32) -> (i32, i32) {
    %c0_i32 = arith.constant 0 : i32
    %c0_i32_0 = arith.constant 0 : i32
    %c0_i32_1 = arith.constant 0 : i32
    return %c0_i32, %c0_i32_0 : i32, i32
  }
  func.func @transform_4(%arg0: i32) -> (i32, i32) {
    %c0_i32 = arith.constant 0 : i32
    %c0_i32_0 = arith.constant 0 : i32
    %c0_i32_1 = arith.constant 0 : i32
    return %c0_i32, %c0_i32_0 : i32, i32
  }
  func.func @transform_5(%arg0: i32) -> (i32, i32) {
    %c0_i32 = arith.constant 0 : i32
    %c0_i32_0 = arith.constant 0 : i32
    %c0_i32_1 = arith.constant 0 : i32
    return %c0_i32, %c0_i32_0 : i32, i32
  }
  func.func @transform_6(%arg0: i32) -> (i32, i32) {
    %c0_i32 = arith.constant 0 : i32
    %c0_i32_0 = arith.constant 0 : i32
    %c0_i32_1 = arith.constant 0 : i32
    return %c0_i32, %c0_i32_0 : i32, i32
  }
  func.func @transform_7(%arg0: i32) -> (i32, i32) {
    %c0_i32 = arith.constant 0 : i32
    %c0_i32_0 = arith.constant 0 : i32
    %c0_i32_1 = arith.constant 0 : i32
    return %c0_i32, %c0_i32_0 : i32, i32
  }
  func.func @transform_8(%arg0: i32) -> (i32, i32) {
    %c0_i32 = arith.constant 0 : i32
    %c0_i32_0 = arith.constant 0 : i32
    %c0_i32_1 = arith.constant 0 : i32
    return %c0_i32, %c0_i32_0 : i32, i32
  }
  func.func @transform_9(%arg0: i32) -> (i32, i32) {
    %c0_i32 = arith.constant 0 : i32
    %c0_i32_0 = arith.constant 0 : i32
    %c0_i32_1 = arith.constant 0 : i32
    return %c0_i32, %c0_i32_0 : i32, i32
  }
  func.func @transform_10(%arg0: i32) -> (i32, i32) {
    %c0_i32 = arith.constant 0 : i32
    %c0_i32_0 = arith.constant 0 : i32
    %c0_i32_1 = arith.constant 0 : i32
    return %c0_i32, %c0_i32_0 : i32, i32
  }
  func.func @transform_11(%arg0: i32) -> (i32, i32) {
    %c0_i32 = arith.constant 0 : i32
    %c0_i32_0 = arith.constant 0 : i32
    %c0_i32_1 = arith.constant 0 : i32
    return %c0_i32, %c0_i32_0 : i32, i32
  }
  func.func @transform_12(%arg0: i32) -> (i32, i32, i32) {
    %c0_i32 = arith.constant 0 : i32
    %c0_i32_0 = arith.constant 0 : i32
    %c0_i32_1 = arith.constant 0 : i32
    %c0_i32_2 = arith.constant 0 : i32
    return %c0_i32, %c0_i32_0, %c0_i32_1 : i32, i32, i32
  }
  func.func @transform_13(%arg0: i32) -> (i32, i32, i32) {
    %c0_i32 = arith.constant 0 : i32
    %c0_i32_0 = arith.constant 0 : i32
    %c0_i32_1 = arith.constant 0 : i32
    %c0_i32_2 = arith.constant 0 : i32
    return %c0_i32, %c0_i32_0, %c0_i32_1 : i32, i32, i32
  }
  func.func @transform_14(%arg0: i32) -> (i32, i32, i32) {
    %c0_i32 = arith.constant 0 : i32
    %c0_i32_0 = arith.constant 0 : i32
    %c0_i32_1 = arith.constant 0 : i32
    %c0_i32_2 = arith.constant 0 : i32
    return %c0_i32, %c0_i32_0, %c0_i32_1 : i32, i32, i32
  }
  func.func @transform_15(%arg0: i32) -> (i32, i32, i32) {
    %c0_i32 = arith.constant 0 : i32
    %c0_i32_0 = arith.constant 0 : i32
    %c0_i32_1 = arith.constant 0 : i32
    %c0_i32_2 = arith.constant 0 : i32
    return %c0_i32, %c0_i32_0, %c0_i32_1 : i32, i32, i32
  }
  func.func @transform_16(%arg0: i32) -> (i32, i32, i32) {
    %c0_i32 = arith.constant 0 : i32
    %c0_i32_0 = arith.constant 0 : i32
    %c0_i32_1 = arith.constant 0 : i32
    %c0_i32_2 = arith.constant 0 : i32
    return %c0_i32, %c0_i32_0, %c0_i32_1 : i32, i32, i32
  }
  func.func @transform_17(%arg0: i32) -> (i32, i32, i32) {
    %c0_i32 = arith.constant 0 : i32
    %c0_i32_0 = arith.constant 0 : i32
    %c0_i32_1 = arith.constant 0 : i32
    %c0_i32_2 = arith.constant 0 : i32
    return %c0_i32, %c0_i32_0, %c0_i32_1 : i32, i32, i32
  }
  func.func @transform_18(%arg0: i32) -> (i32, i32, i32) {
    %c0_i32 = arith.constant 0 : i32
    %c0_i32_0 = arith.constant 0 : i32
    %c0_i32_1 = arith.constant 0 : i32
    %c0_i32_2 = arith.constant 0 : i32
    return %c0_i32, %c0_i32_0, %c0_i32_1 : i32, i32, i32
  }
  func.func @transform_19(%arg0: i32) -> (i32, i32, i32) {
    %c0_i32 = arith.constant 0 : i32
    %c0_i32_0 = arith.constant 0 : i32
    %c0_i32_1 = arith.constant 0 : i32
    %c0_i32_2 = arith.constant 0 : i32
    return %c0_i32, %c0_i32_0, %c0_i32_1 : i32, i32, i32
  }
  func.func @transform_20(%arg0: i32) -> (i32, i32, i32) {
    %c0_i32 = arith.constant 0 : i32
    %c0_i32_0 = arith.constant 0 : i32
    %c0_i32_1 = arith.constant 0 : i32
    %c0_i32_2 = arith.constant 0 : i32
    return %c0_i32, %c0_i32_0, %c0_i32_1 : i32, i32, i32
  }
  func.func @transform_21(%arg0: i32) -> (i32, i32, i32) {
    %c0_i32 = arith.constant 0 : i32
    %c0_i32_0 = arith.constant 0 : i32
    %c0_i32_1 = arith.constant 0 : i32
    %c0_i32_2 = arith.constant 0 : i32
    return %c0_i32, %c0_i32_0, %c0_i32_1 : i32, i32, i32
  }
  func.func @transform_22(%arg0: i32) -> (i32, i32, i32) {
    %c0_i32 = arith.constant 0 : i32
    %c0_i32_0 = arith.constant 0 : i32
    %c0_i32_1 = arith.constant 0 : i32
    %c0_i32_2 = arith.constant 0 : i32
    return %c0_i32, %c0_i32_0, %c0_i32_1 : i32, i32, i32
  }
  func.func @transform_23(%arg0: i32) -> (i32, i32, i32) {
    %c0_i32 = arith.constant 0 : i32
    %c0_i32_0 = arith.constant 0 : i32
    %c0_i32_1 = arith.constant 0 : i32
    %c0_i32_2 = arith.constant 0 : i32
    return %c0_i32, %c0_i32_0, %c0_i32_1 : i32, i32, i32
  }
  func.func @transform_24(%arg0: i32) -> (i32, i32) {
    %c0_i32 = arith.constant 0 : i32
    %c0_i32_0 = arith.constant 0 : i32
    %c0_i32_1 = arith.constant 0 : i32
    return %c0_i32, %c0_i32_0 : i32, i32
  }
  func.func @transform_25(%arg0: i32) -> (i32, i32, i32) {
    %c0_i32 = arith.constant 0 : i32
    %c0_i32_0 = arith.constant 0 : i32
    %c0_i32_1 = arith.constant 0 : i32
    %c0_i32_2 = arith.constant 0 : i32
    return %c0_i32, %c0_i32_0, %c0_i32_1 : i32, i32, i32
  }
  func.func @transform_26(%arg0: i32) -> (i32, i32) {
    %c0_i32 = arith.constant 0 : i32
    %c0_i32_0 = arith.constant 0 : i32
    %c0_i32_1 = arith.constant 0 : i32
    return %c0_i32, %c0_i32_0 : i32, i32
  }
  func.func @transform_27(%arg0: i32) -> (i32, i32) {
    %c0_i32 = arith.constant 0 : i32
    %c0_i32_0 = arith.constant 0 : i32
    %c0_i32_1 = arith.constant 0 : i32
    return %c0_i32, %c0_i32_0 : i32, i32
  }
  func.func @transform_28(%arg0: i32) -> (i32, i32) {
    %c0_i32 = arith.constant 0 : i32
    %c0_i32_0 = arith.constant 0 : i32
    %c0_i32_1 = arith.constant 0 : i32
    return %c0_i32, %c0_i32_0 : i32, i32
  }
  func.func @transform_29(%arg0: i32) -> (i32, i32) {
    %c0_i32 = arith.constant 0 : i32
    %c0_i32_0 = arith.constant 0 : i32
    %c0_i32_1 = arith.constant 0 : i32
    return %c0_i32, %c0_i32_0 : i32, i32
  }
  func.func @transform_30(%arg0: i32) -> (i32, i32) {
    %c0_i32 = arith.constant 0 : i32
    %c0_i32_0 = arith.constant 0 : i32
    %c0_i32_1 = arith.constant 0 : i32
    return %c0_i32, %c0_i32_0 : i32, i32
  }
  func.func @transform_31(%arg0: i32) -> (i32, i32) {
    %c0_i32 = arith.constant 0 : i32
    %c0_i32_0 = arith.constant 0 : i32
    %c0_i32_1 = arith.constant 0 : i32
    return %c0_i32, %c0_i32_0 : i32, i32
  }
  func.func @transform_32(%arg0: i32) -> (i32, i32) {
    %c0_i32 = arith.constant 0 : i32
    %c0_i32_0 = arith.constant 0 : i32
    %c0_i32_1 = arith.constant 0 : i32
    return %c0_i32, %c0_i32_0 : i32, i32
  }
  func.func @transform_33(%arg0: i32) -> (i32, i32) {
    %c0_i32 = arith.constant 0 : i32
    %c0_i32_0 = arith.constant 0 : i32
    %c0_i32_1 = arith.constant 0 : i32
    return %c0_i32, %c0_i32_0 : i32, i32
  }
  func.func @transform_34(%arg0: i32) -> (i32, i32) {
    %c0_i32 = arith.constant 0 : i32
    %c0_i32_0 = arith.constant 0 : i32
    %c0_i32_1 = arith.constant 0 : i32
    return %c0_i32, %c0_i32_0 : i32, i32
  }
  func.func @transform_35(%arg0: i32) -> (i32, i32) {
    %c0_i32 = arith.constant 0 : i32
    %c0_i32_0 = arith.constant 0 : i32
    %c0_i32_1 = arith.constant 0 : i32
    return %c0_i32, %c0_i32_0 : i32, i32
  }
  func.func @transform_36(%arg0: i32) -> (i32, i32) {
    %c0_i32 = arith.constant 0 : i32
    %c0_i32_0 = arith.constant 0 : i32
    %c0_i32_1 = arith.constant 0 : i32
    return %c0_i32, %c0_i32_0 : i32, i32
  }
  func.func @transform_37(%arg0: i32) -> (i32, i32) {
    %c0_i32 = arith.constant 0 : i32
    %c0_i32_0 = arith.constant 0 : i32
    %c0_i32_1 = arith.constant 0 : i32
    return %c0_i32, %c0_i32_0 : i32, i32
  }
}

</mosaic_0001>

<bundles_post_ra>
// kernel: tpu_custom_call.1
= control target key start
LH: loop header
LB: loop body
LE: loop exit
PB: predicated region body
PF: predicated region fallthrough
CT: control target
= control target key end

     0   :  { %s8330_s6 = smov 1   ;;  %s8331_s10 = smov 2   ;;  %s13019_s0 = inlined_call_operand.smem [shape: u32[38], index: -1, kind: input, shape index: {}] }
   0x1   :  { %s8380_s5 = sld [smem:[%s13019_s0]]   ;;  %s8332_s14 = smov 3  }
   0x2   :  { %s8385_s9 = sld [smem:[%s13019_s0 + %s8330_s6]]   ;;  %s8333_s18 = smov 4  }
   0x3   :  { %s8390_s13 = sld [smem:[%s13019_s0 + %s8331_s10]]   ;;  %s8334_s22 = smov 5  }
   0x4   :  { %s8395_s17 = sld [smem:[%s13019_s0 + %s8332_s14]]   ;;  %s8335_s26 = smov 6  }
   0x5   :  { %s8400_s21 = sld [smem:[%s13019_s0 + %s8333_s18]]   ;;  %s8336_s30 = smov 7  }
   0x6   :  { %s8405_s25 = sld [smem:[%s13019_s0 + %s8334_s22]]   ;;  %s8337_s4 = smov 8  }
   0x7   :  { %s8410_s29 = sld [smem:[%s13019_s0 + %s8335_s26]]   ;;  %s8338_s10 = smov 9  }
   0x8   :  { %13141 = sst [smem:[#allocation11_spill]] %s8385_s9  ;;  %s8339_s15 = smov 10  }
   0x9   :  { %s8415_s3 = sld [smem:[%s13019_s0 + %s8336_s30]]   ;;  %s8340_s20 = smov 11  }
   0xa   :  { %s8420_s8 = sld [smem:[%s13019_s0 + %s8337_s4]]   ;;  %s8341_s26 = smov 12  }
   0xb   :  { %13142 = sst [smem:[#allocation12_spill]] %s8400_s21  ;;  %s8342_s1 = smov 13  }
   0xc   :  { %13143 = sst [smem:[#allocation13_spill]] %s8405_s25  ;;  %s8343_s7 = smov 14  }
   0xd   :  { %s8425_s14 = sld [smem:[%s13019_s0 + %s8338_s10]]   ;;  %s8345_s22 = smov 16  }
   0xe   :  { %s8430_s19 = sld [smem:[%s13019_s0 + %s8339_s15]]   ;;  %s8344_s15 = smov 15  }
   0xf   :  { %13144 = sst [smem:[#allocation14_spill]] %s8415_s3  ;;  %s8346_s28 = smov 17  }
  0x10   :  { %s8435_s24 = sld [smem:[%s13019_s0 + %s8340_s20]]  }
  0x11   :  { %s8440_s30 = sld [smem:[%s13019_s0 + %s8341_s26]]  }
  0x12   :  { %s8445_s6 = sld [smem:[%s13019_s0 + %s8342_s1]]  }
  0x13   :  { %s8450_s12 = sld [smem:[%s13019_s0 + %s8343_s7]]   ;;  %s8347_s7 = smov 18  }
  0x14   :  { %s8455_s20 = sld [smem:[%s13019_s0 + %s8344_s15]]   ;;  %s8348_s15 = smov 19  }
  0x15   :  { %s8460_s27 = sld [smem:[%s13019_s0 + %s8345_s22]]   ;;  %s8349_s22 = smov 20  }
  0x16   :  { %s8465_s4 = sld [smem:[%s13019_s0 + %s8346_s28]]   ;;  %s8350_s28 = smov 21  }
  0x17   :  { %13145 = sst [smem:[#allocation15_spill]] %s8440_s30 }
  0x18   :  { %13146 = sst [smem:[#allocation16_spill]] %s8445_s6 }
  0x19   :  { %13147 = sst [smem:[#allocation17_spill]] %s8450_s12 }
  0x1a   :  { %13148 = sst [smem:[#allocation18_spill]] %s8455_s20 }
  0x1b   :  { %13149 = sst [smem:[#allocation19_spill]] %s8460_s27 }
  0x1c   :  { %13150 = sst [smem:[#allocation20_spill]] %s8465_s4 }
  0x1d   :  { %s8470_s25 = sld [smem:[%s13019_s0 + %s8347_s7]]   ;;  %s8351_s7 = smov 22  }
  0x1e   :  { %s8475_s21 = sld [smem:[%s13019_s0 + %s8348_s15]]   ;;  %s8352_s15 = smov 23  }
  0x1f   :  { %s8480_s20 = sld [smem:[%s13019_s0 + %s8349_s22]]   ;;  %s8353_s22 = smov 24  }
  0x20   :  { %s8485_s4 = sld [smem:[%s13019_s0 + %s8350_s28]]   ;;  %s8354_s28 = smov 25  }
  0x21   :  { %s8490_s27 = sld [smem:[%s13019_s0 + %s8351_s7]]   ;;  %s8355_s7 = smov 26  }
  0x22   :  { %s8500_s12 = sld [smem:[%s13019_s0 + %s8353_s22]]   ;;  %s8357_s22 = smov 28  }
  0x23   :  { %s8505_s30 = sld [smem:[%s13019_s0 + %s8354_s28]]   ;;  %s8358_s28 = smov 29  }
  0x24   :  { %13151 = sst [smem:[#allocation21_spill]] %s8475_s21 }
  0x25   :  { %s8495_s21 = sld [smem:[%s13019_s0 + %s8352_s15]]   ;;  %s8356_s15 = smov 27  }
  0x26   :  { %s8510_s6 = sld [smem:[%s13019_s0 + %s8355_s7]]   ;;  %s8359_s7 = smov 30  }
  0x27   :  { %s8515_s3 = sld [smem:[%s13019_s0 + %s8356_s15]]   ;;  %s8360_s15 = smov 31  }
  0x28   :  { %13152 = sst [smem:[#allocation22_spill]] %s8500_s12 }
  0x29   :  { %s8520_s12 = sld [smem:[%s13019_s0 + %s8357_s22]]   ;;  %s8361_s22 = smov 32  }
  0x2a   :  { %s8525_s9 = sld [smem:[%s13019_s0 + %s8358_s28]]   ;;  %s8362_s28 = smov 33  }
  0x2c   :  { %13153 = sst [smem:[#allocation23_spill]] %s8510_s6 }
  0x2d   :  { %13154 = sst [smem:[#allocation24_spill]] %s8515_s3 }
  0x2e   :  { %s8530_s6 = sld [smem:[%s13019_s0 + %s8359_s7]]   ;;  %s8363_s7 = smov 34  }
  0x2f   :  { %13155 = sst [smem:[#allocation25_spill]] %s8520_s12 }
  0x30   :  { %13156 = sst [smem:[#allocation26_spill]] %s8525_s9 }
  0x31   :  { %s8535_s3 = sld [smem:[%s13019_s0 + %s8360_s15]]   ;;  %s8364_s15 = smov 35  }
  0x32   :  { %s8540_s12 = sld [smem:[%s13019_s0 + %s8361_s22]]   ;;  %s8365_s22 = smov 36  }
  0x33   :  { %s8545_s9 = sld [smem:[%s13019_s0 + %s8362_s28]]   ;;  %s8366_s28 = smov 37  }
  0x34   :  { %13157 = sst [smem:[#allocation27_spill]] %s8530_s6 }
  0x35   :  { %s8550_s6 = sld [smem:[%s13019_s0 + %s8363_s7]]  }
  0x37   :  { %13158 = sst [smem:[#allocation28_spill]] %s8535_s3 }
  0x38   :  { %13159 = sst [smem:[#allocation29_spill]] %s8540_s12 }
  0x39   :  { %13160 = sst [smem:[#allocation30_spill]] %s8545_s9 }
  0x3a   :  { %s8555_s3 = sld [smem:[%s13019_s0 + %s8364_s15]]  }
  0x3b   :  { %s8560_s12 = sld [smem:[%s13019_s0 + %s8365_s22]]  }
  0x3c   :  { %s8565_s9 = sld [smem:[%s13019_s0 + %s8366_s28]]  }
  0x3d   :  { %80 = vsyncpa [#allocation6], 0 }
  0x3e   :  { %81 = vsyncpa [#allocation7], 0  ;;  %s8567_s7 = smov 0  }
  0x3f LB: > { %s955_s10 = sshll.u32 %s8470_s25, 4  ;;  %s8574_s11 = sadd.s32 4294967295, %s8320_s7   ;;  %s8320_s7 = sphi %s8567_s7, %s87_s7   ;;  %s956_s10 = int_to_ptr.hbm [resolvable:$true] %s955_s10 }
  0x40   : > { %p7484_p0 = scmp.ge.s32.totalorder %s8320_s7, 1  ;;  %p890_p1 = scmp.lt.s32.totalorder %s8320_s7, 4 }
  0x41   : > { %p7485_p2 = scmp.ne.s32.totalorder %s8574_s11, 0  ;;  %p8076_p3 = scmp.eq.s32.totalorder %s8574_s11, 0 }
  0x42   : > { %p8580_p4 = pnand %p7484_p0, %p890_p1  ;;  %s8367_s15 = smov [#allocation5]  }
  0x43   : > { %s957_s16 = sshll.u32 %s8367_s15, 4  ;;  %s8240_s22 = sshra.s32 %s956_s10, 4  ;;  %s958_s16 = int_to_ptr.vmem [resolvable:$true] %s957_s16  ;;  %s8241_s22 = int_to_ptr.hbm [resolvable:$true] %s8240_s22 }
  0x44   : > { %p8072_p5 = pneg %p8580_p4  ;;  %s8242_s23 = scalar_lea.hbm %s8241_s22, 25600 }
  0x45   : > { %p8243_p7 = scmp.ne.s32.totalorder %s8241_s22, %s8242_s23  ;;  %s8247_s26 = scalar_lea.hbm %s8470_s25, 25600 }
  0x46   : > { %p8588_p6 = pnand %p8076_p3, %p8072_p5  ;;  %p8248_p11 = scmp.lt.s32.totalorder %s8241_s22, %s8470_s25 }
  0x47   : > { %p8249_p12 = scmp.lt.s32.totalorder %s8247_s26, %s8242_s23 }
  0x48   : > { %p8244_p8 = pneg %p8588_p6 }
  0x49   : > { %p8250_p13 = por %p8249_p12, %p8248_p11 }
  0x4a   : > { %p8245_p9 = pnand %p8244_p8, %p8243_p7 }
  0x4c   : > { %p8246_p10 = pneg %p8245_p9 }
  0x4e   : > { %p8251_p0 = pnand %p8250_p13, %p8246_p10 }
  0x50   : > { %8254 = shalt.err (!%p8251_p0)
}
  0x51   : > { %s8368_s28 = smov 640   ;;  %s8369_s1 = smov 40  }
  0x52   : > { %8075 = dma.hbm_to_vmem [thread:$0]  (!%p8588_p6), %s956_s10, 409600, %s958_s16, [#allocation6], %s8368_s28, %s8368_s28, %s8369_s1  }
  0x53   : > { %1027 = sbr.rel (%p8580_p4) target bundleno = 3361 (0xd21), region = 168 }
  0x58   : > { %8311 = dma.done.wait (%p8076_p3), [#allocation6], 409600  }
  0x59   : > { %8313 = vsyncadd (%p8076_p3), [#allocation6], 4294557696  ;;  %1113 = sbr.rel (%p7485_p2) target bundleno = 879 (0x36f), region = 176  ;;  %s8655_s2 = smov (!%p7485_p2), 0  }
  0x5e   : > { %v1122_v0 = vld [vmem:[%s8420_s8 + $0x30] sm:$0x1]  ;;  %vm1134_vm0 = vcmask 1040384   ;;  %v1121_v1 = vld [vmem:[%s8420_s8 + $0x28] sm:$0xff]  ;;  %v1120_v2 = vld [vmem:[%s8420_s8 + $0x20] sm:$0xff]  ;;  %vm1127_vm1 = vcmask 400384  }
  0x5f   : > { %8045 = vmatpush.msk.msra.mxu2 %vm1134_vm0, %v1122_v0  ;;  %7489 = vmatpush.msk.msra.mxu0 %vm1134_vm0, %v1122_v0  ;;  %v1166_v3 = vld [vmem:[%s8430_s19 + $0x18] sm:$0xff]  ;;  %v1118_v5 = vld [vmem:[%s8420_s8 + $0x10] sm:$0xff]  ;;  %v1117_v6 = vld [vmem:[%s8420_s8 + $0x8] sm:$0xff]  ;;  %vm1171_vm2 = vcmask 261120  }
  0x60   : > { %v1119_v4 = vld [vmem:[%s8420_s8 + $0x18] sm:$0xff]  ;;  %8052 = vmatpush.msra.mxu3 %v1166_v3  ;;  %1190 = vmatpush.msra.mxu1 %v1166_v3  ;;  %v1116_v7 = vld [vmem:[%s8420_s8] sm:$0xff]  ;;  %v1115_v8 = vld [vmem:[%s8380_s5 + $0x8] sm:$0xff] }
  0x61   : > { %8046 = vmatpush.msra.mxu2 %v1121_v1  ;;  %1148 = vmatpush.msra.mxu0 %v1121_v1  ;;  %v1114_v9 = vld [vmem:[%s8380_s5] sm:$0xff]  ;;  %v1165_v10 = vld [vmem:[%s8430_s19 + $0x10] sm:$0xff]  ;;  %v1164_v11 = vld [vmem:[%s8430_s19 + $0x8] sm:$0xff] }
  0x62   : > { %8053 = vmatpush.msra.mxu3 %v1165_v10  ;;  %1191 = vmatpush.msra.mxu1 %v1165_v10  ;;  %v1163_v12 = vld [vmem:[%s8430_s19] sm:$0xff]  ;;  %v8626_v21 = vld [vmem:[%s8410_s29 + $0x8] sm:$0xff]  ;;  %v8629_v22 = vld [vmem:[%s8410_s29 + $0x10] sm:$0xff] }
  0x63   : > { %8047 = vmatpush.msra.mxu2 %v1120_v2  ;;  %1149 = vmatpush.msra.mxu0 %v1120_v2  ;;  %v8146_v13 = vld [vmem:[%s8425_s14] ss:$0 sm:$0xff]  ;;  %v8632_v23 = vld [vmem:[%s8410_s29 + $0x18] sm:$0xff]  ;;  %v8638_v25 = vld [vmem:[%s8410_s29 + $0x28] sm:$0xff] }
  0x64   : > { %8054 = vmatpush.msra.mxu3 %v1164_v11  ;;  %1192 = vmatpush.msra.mxu1 %v1164_v11  ;;  %v8623_v20 = vld [vmem:[%s8410_s29] sm:$0xff]  ;;  %v8641_v26 = vld [vmem:[%s8410_s29 + $0x30] sm:$0xff]  ;;  %v8644_v27 = vld [vmem:[%s8410_s29 + $0x38] sm:$0xff] }
  0x65   : > { %8048 = vmatpush.msra.mxu2 %v1119_v4  ;;  %1150 = vmatpush.msra.mxu0 %v1119_v4  ;;  %v8635_v24 = vld [vmem:[%s8410_s29 + $0x20] sm:$0xff]  ;;  %v8650_v29 = vld [vmem:[%s8410_s29 + $0x48] sm:$0xff] }
  0x66   : > { %8055 = vmatpush.msra.mxu3 %v1163_v12  ;;  %1193 = vmatpush.msra.mxu1 %v1163_v12  ;;  %v8647_v28 = vld [vmem:[%s8410_s29 + $0x40] sm:$0xff] }
  0x67   : > { %8049 = vmatpush.msra.mxu2 %v1118_v5  ;;  %1151 = vmatpush.msra.mxu0 %v1118_v5  ;;  %v8147_v30 = vld [vmem:[%s8435_s24] ss:$0 sm:$0xff] }
  0x69   : > { %8050 = vmatpush.msra.mxu2 %v1117_v6  ;;  %1152 = vmatpush.msra.mxu0 %v1117_v6 }
  0x6b   : > { %8051 = vmatpush.msra.mxu2 %v1116_v7  ;;  %1153 = vmatpush.msra.mxu0 %v1116_v7 }
  0x6c   : > { %7491 = vmatmul.msk.f32.vlgmr.msra.gmra.mxu2 %vm1127_vm1, %v1115_v8  ;;  %7490 = vmatmul.msk.f32.vlgmr.msra.gmra.mxu0 %vm1127_vm1, %v1114_v9 }
  0xe9   : > { %v1155_v14 = vpop.f32.mrf.mxu0 }
  0xea   : > { %v1156_v15 = vadd.f32 %v8146_v13, %v1155_v14 }
  0xec   : > { %v1161_v16 = vmax.f32 %v1156_v15, 0.0 }
  0xee   : > { %7492 = vmatmul.msk.f32.vlgmr.msra.gmra.mxu1 %vm1171_vm2, %v1161_v16 }
  0xef   : > { %v1158_v17 = vpop.f32.mrf.mxu2 }
  0xf0   : > { %v1159_v18 = vadd.f32 %v8146_v13, %v1158_v17 }
  0xf2   : > { %v1162_v19 = vmax.f32 %v1159_v18, 0.0 }
  0xf4   : > { %7493 = vmatmul.msk.f32.vlgmr.msra.gmra.mxu3 %vm1171_vm2, %v1162_v19 }
 0x16b   : > { %v1195_v31 = vpop.f32.mrf.mxu1 }
 0x16c   : > { %v1196_v32 = vadd.f32 %v8147_v30, %v1195_v31 }
 0x16e   : > { %1201 = vst.msk [vmem:[#allocation2] sm:$0xff] %vm1171_vm2, %v1196_v32 }
 0x177   : > { %v1198_v33 = vpop.f32.mrf.mxu3 }
 0x178   : > { %v1199_v34 = vadd.f32 %v8147_v30, %v1198_v33 }
 0x17a   : > { %1202 = vst.msk [vmem:[#allocation2 + $0x8] sm:$0xff] %vm1171_vm2, %v1199_v34 }
 0x17b LB: >> { %s7620_s10 = smul.u32 640, %s8324_s2  ;;  %s1542_s0 = scalar_lea.vmem %s8485_s4, %s8324_s2  ;;  %vm1803_vm3 = vcmask 1043456   ;;  %vm1772_vm4 = vcmask 523264   ;;  %vm1799_vm5 = vcmask 31744   ;;  %s8324_s2 = sphi %s8655_s2, %s1218_s2  }
 0x17c   : >> { %s1767_s16 = scalar_lea.vmem %s8495_s21, %s8324_s2  ;;  %s7621_s18 = sshll.u32 %s8324_s2, 5 }
 0x17d   : >> { %s8664_s15 = scalar_lea.vmem %s8480_s20, %s7620_s10  ;;  %s1750_s22 = scalar_lea.vmem %s8490_s27, %s7621_s18 }
 0x17e   : >> { %v7969_v35 = vld [vmem:[%s8664_s15 + $0x38] sm:$0xff]   ;;  %v7968_v37 = vld [vmem:[%s8664_s15 + $0x30] sm:$0xff]   ;;  %v7967_v52 = vld [vmem:[%s8664_s15 + $0x28] sm:$0xff]   ;;  %s7498_s23 = sshll.u32 %s8324_s2, 2  ;;  %s7495_s28 = sshll.u32 %s8324_s2, 3 }
 0x17f   : >> { %v7977_v36 = vld [vmem:[%s8664_s15 + $0x78] sm:$0xff]   ;;  %v7658_v38 = vunpack.c.h.bf16 %v7969_v35  ;;  %v7657_v39 = vunpack.c.l.bf16 %v7969_v35  ;;  %v7976_v41 = vld [vmem:[%s8664_s15 + $0x70] sm:$0xff]   ;;  %v7654_v47 = vunpack.c.h.bf16 %v7968_v37  ;;  %v7975_v53 = vld [vmem:[%s8664_s15 + $0x68] sm:$0xff]   ;;  %v7653_v56 = vunpack.c.l.bf16 %v7968_v37  ;;  %s1797_s26 = scalar_lea.vmem %s8505_s30, %s7498_s23  ;;  %s1827_s1 = scalar_lea.vmem [#allocation3], %s7495_s28 }
 0x180   : >> { %v7690_v40 = vunpack.c.h.bf16 %v7977_v36  ;;  %v7985_v42 = vld [vmem:[%s8664_s15 + $0xb8] sm:$0xff]   ;;  %v7689_v43 = vunpack.c.l.bf16 %v7977_v36  ;;  %v7984_v46 = vld [vmem:[%s8664_s15 + $0xb0] sm:$0xff]   ;;  %v7686_v48 = vunpack.c.h.bf16 %v7976_v41  ;;  %v7685_v57 = vunpack.c.l.bf16 %v7976_v41  ;;  %v7983_v58 = vld [vmem:[%s8664_s15 + $0xa8] sm:$0xff]   ;;  %s1218_s2 = sadd.s32 1, %s8324_s2  }
 0x181   : >> { %v7722_v44 = vunpack.c.h.bf16 %v7985_v42  ;;  %v7993_v45 = vld [vmem:[%s8664_s15 + $0xf8] sm:$0xff]   ;;  %1547 = vmatpush.msra.mxu0 %v7658_v38  ;;  %v7721_v49 = vunpack.c.l.bf16 %v7985_v42  ;;  %v7992_v51 = vld [vmem:[%s8664_s15 + $0xf0] sm:$0xff]   ;;  %v7718_v54 = vunpack.c.h.bf16 %v7984_v46  ;;  %v7717_v59 = vunpack.c.l.bf16 %v7984_v46  ;;  %v7991_v63 = vld [vmem:[%s8664_s15 + $0xe8] sm:$0xff]   ;;  %p1215_p1 = scmp.ge.s32.totalorder %s1218_s2, 8  }
 0x182   : >> { %1567 = vmatpush.msra.mxu1 %v7690_v40  ;;  %v7754_v50 = vunpack.c.h.bf16 %v7993_v45  ;;  %v7753_v55 = vunpack.c.l.bf16 %v7993_v45  ;;  %v7750_v60 = vunpack.c.h.bf16 %v7992_v51  ;;  %v7650_v61 = vunpack.c.h.bf16 %v7967_v52  ;;  %v7966_v0 = vld [vmem:[%s8664_s15 + $0x20] sm:$0xff]   ;;  %v7965_v12 = vld [vmem:[%s8664_s15 + $0x18] sm:$0xff]   ;;  %v7964_v34 = vld [vmem:[%s8664_s15 + $0x10] sm:$0xff]  }
 0x183   : >> { %1587 = vmatpush.msra.mxu2 %v7722_v44  ;;  %1548 = vmatpush.msra.mxu0 %v7657_v39  ;;  %v7682_v62 = vunpack.c.h.bf16 %v7975_v53  ;;  %v7974_v1 = vld [vmem:[%s8664_s15 + $0x60] sm:$0xff]   ;;  %v7714_v2 = vunpack.c.h.bf16 %v7983_v58  ;;  %v7749_v3 = vunpack.c.l.bf16 %v7992_v51  ;;  %v7649_v4 = vunpack.c.l.bf16 %v7967_v52  ;;  %v7973_v13 = vld [vmem:[%s8664_s15 + $0x58] sm:$0xff]   ;;  %v7972_v35 = vld [vmem:[%s8664_s15 + $0x50] sm:$0xff]  }
 0x184   : >> { %1568 = vmatpush.msra.mxu1 %v7689_v43  ;;  %1607 = vmatpush.msra.mxu3 %v7754_v50  ;;  %v7681_v5 = vunpack.c.l.bf16 %v7975_v53  ;;  %v7982_v6 = vld [vmem:[%s8664_s15 + $0xa0] sm:$0xff]   ;;  %v7713_v7 = vunpack.c.l.bf16 %v7983_v58  ;;  %v7746_v8 = vunpack.c.h.bf16 %v7991_v63  ;;  %v7646_v9 = vunpack.c.h.bf16 %v7966_v0  ;;  %v7981_v18 = vld [vmem:[%s8664_s15 + $0x98] sm:$0xff]   ;;  %v7980_v40 = vld [vmem:[%s8664_s15 + $0x90] sm:$0xff]  }
 0x185   : >> { %1588 = vmatpush.msra.mxu2 %v7721_v49  ;;  %1549 = vmatpush.msra.mxu0 %v7654_v47  ;;  %v7678_v10 = vunpack.c.h.bf16 %v7974_v1  ;;  %v7990_v11 = vld [vmem:[%s8664_s15 + $0xe0] sm:$0xff]   ;;  %v7710_v14 = vunpack.c.h.bf16 %v7982_v6  ;;  %v7745_v15 = vunpack.c.l.bf16 %v7991_v63  ;;  %v7645_v16 = vunpack.c.l.bf16 %v7966_v0  ;;  %v7989_v33 = vld [vmem:[%s8664_s15 + $0xd8] sm:$0xff]   ;;  %v7988_v45 = vld [vmem:[%s8664_s15 + $0xd0] sm:$0xff]  }
 0x186   : >> { %1569 = vmatpush.msra.mxu1 %v7686_v48  ;;  %1608 = vmatpush.msra.mxu3 %v7753_v55  ;;  %v7677_v17 = vunpack.c.l.bf16 %v7974_v1  ;;  %v7709_v19 = vunpack.c.l.bf16 %v7982_v6  ;;  %v7742_v30 = vunpack.c.h.bf16 %v7990_v11  ;;  %v7642_v31 = vunpack.c.h.bf16 %v7965_v12  ;;  %v7963_v46 = vld [vmem:[%s8664_s15 + $0x8] sm:$0xff]   ;;  %v7628_v58 = vld [vmem:[%s8664_s15] sm:$0xff]   ;;  %v8009_v6 = vld [vmem:[%s8664_s15 + $0x178] sm:$0xff]  }
 0x187   : >> { %1589 = vmatpush.msra.mxu2 %v7718_v54  ;;  %1550 = vmatpush.msra.mxu0 %v7653_v56  ;;  %v7674_v32 = vunpack.c.h.bf16 %v7973_v13  ;;  %v7706_v36 = vunpack.c.h.bf16 %v7981_v18  ;;  %v7741_v37 = vunpack.c.l.bf16 %v7990_v11  ;;  %v7641_v38 = vunpack.c.l.bf16 %v7965_v12  ;;  %v7971_v47 = vld [vmem:[%s8664_s15 + $0x48] sm:$0xff]   ;;  %v7978_v0 = vld [vmem:[%s8664_s15 + $0x80] sm:$0xff]  }
 0x188   : >> { %1570 = vmatpush.msra.mxu1 %v7685_v57  ;;  %1609 = vmatpush.msra.mxu3 %v7750_v60  ;;  %v7673_v39 = vunpack.c.l.bf16 %v7973_v13  ;;  %v7705_v41 = vunpack.c.l.bf16 %v7981_v18  ;;  %v7738_v42 = vunpack.c.h.bf16 %v7989_v33  ;;  %v7638_v43 = vunpack.c.h.bf16 %v7964_v34  ;;  %v7979_v52 = vld [vmem:[%s8664_s15 + $0x88] sm:$0xff]   ;;  %v8008_v18 = vld [vmem:[%s8664_s15 + $0x170] sm:$0xff]  }
 0x189   : >> { %1590 = vmatpush.msra.mxu2 %v7717_v59  ;;  %1551 = vmatpush.msra.mxu0 %v7650_v61  ;;  %v7670_v44 = vunpack.c.h.bf16 %v7972_v35  ;;  %v7702_v48 = vunpack.c.h.bf16 %v7980_v40  ;;  %v7737_v49 = vunpack.c.l.bf16 %v7989_v33  ;;  %v7637_v50 = vunpack.c.l.bf16 %v7964_v34  ;;  %v7987_v57 = vld [vmem:[%s8664_s15 + $0xc8] sm:$0xff]   ;;  %v7970_v59 = vld [vmem:[%s8664_s15 + $0x40] sm:$0xff]  }
 0x18a   : >> { %1571 = vmatpush.msra.mxu1 %v7682_v62  ;;  %1610 = vmatpush.msra.mxu3 %v7749_v3  ;;  %v7669_v51 = vunpack.c.l.bf16 %v7972_v35  ;;  %v7701_v53 = vunpack.c.l.bf16 %v7980_v40  ;;  %v7734_v54 = vunpack.c.h.bf16 %v7988_v45  ;;  %v7634_v55 = vunpack.c.h.bf16 %v7963_v46  ;;  %v8007_v40 = vld [vmem:[%s8664_s15 + $0x168] sm:$0xff]  }
 0x18b   : >> { %1591 = vmatpush.msra.mxu2 %v7714_v2  ;;  %1552 = vmatpush.msra.mxu0 %v7649_v4  ;;  %v7666_v56 = vunpack.c.h.bf16 %v7971_v47  ;;  %v7698_v60 = vunpack.c.h.bf16 %v7979_v52  ;;  %v7733_v61 = vunpack.c.l.bf16 %v7988_v45  ;;  %v7633_v62 = vunpack.c.l.bf16 %v7963_v46 }
 0x18c   : >> { %1572 = vmatpush.msra.mxu1 %v7681_v5  ;;  %1611 = vmatpush.msra.mxu3 %v7746_v8  ;;  %v7665_v63 = vunpack.c.l.bf16 %v7971_v47  ;;  %v7697_v1 = vunpack.c.l.bf16 %v7979_v52  ;;  %v7730_v2 = vunpack.c.h.bf16 %v7987_v57  ;;  %v7630_v3 = vunpack.c.h.bf16 %v7628_v58  ;;  %v8001_v5 = vld [vmem:[%s8664_s15 + $0x138] sm:$0xff]   ;;  %v8006_v52 = vld [vmem:[%s8664_s15 + $0x160] sm:$0xff]  }
 0x18d   : >> { %1592 = vmatpush.msra.mxu2 %v7713_v7  ;;  %1553 = vmatpush.msra.mxu0 %v7646_v9  ;;  %v7662_v4 = vunpack.c.h.bf16 %v7970_v59  ;;  %v7694_v7 = vunpack.c.h.bf16 %v7978_v0  ;;  %v7729_v8 = vunpack.c.l.bf16 %v7987_v57  ;;  %v7986_v9 = vld [vmem:[%s8664_s15 + $0xc0] sm:$0xff]   ;;  %v7661_v11 = vunpack.c.l.bf16 %v7970_v59 }
 0x18e   : >> { %1573 = vmatpush.msra.mxu1 %v7678_v10  ;;  %1612 = vmatpush.msra.mxu3 %v7745_v15  ;;  %v7629_v10 = vunpack.c.l.bf16 %v7628_v58  ;;  %v7786_v12 = vunpack.c.h.bf16 %v8001_v5  ;;  %v7818_v13 = vunpack.c.h.bf16 %v8009_v6  ;;  %v8000_v15 = vld [vmem:[%s8664_s15 + $0x130] sm:$0xff]   ;;  %v7725_v33 = vunpack.c.l.bf16 %v7986_v9 }
 0x18f   : >> { %1593 = vmatpush.msra.mxu2 %v7710_v14  ;;  %1554 = vmatpush.msra.mxu0 %v7645_v16  ;;  %v8017_v14 = vld [vmem:[%s8664_s15 + $0x1b8] sm:$0xff]   ;;  %v7693_v16 = vunpack.c.l.bf16 %v7978_v0  ;;  %v7782_v34 = vunpack.c.h.bf16 %v8000_v15  ;;  %v7814_v35 = vunpack.c.h.bf16 %v8008_v18  ;;  %v7810_v47 = vunpack.c.h.bf16 %v8007_v40 }
 0x190   : >> { %1574 = vmatpush.msra.mxu1 %v7677_v17  ;;  %1613 = vmatpush.msra.mxu3 %v7742_v30  ;;  %v7726_v17 = vunpack.c.h.bf16 %v7986_v9  ;;  %v7817_v30 = vunpack.c.l.bf16 %v8009_v6  ;;  %v7806_v59 = vunpack.c.h.bf16 %v8006_v52  ;;  %v8005_v0 = vld [vmem:[%s8664_s15 + $0x158] sm:$0xff]   ;;  %v7996_v9 = vld [vmem:[%s8664_s15 + $0x110] sm:$0xff]  }
 0x191   : >> { %1594 = vmatpush.msra.mxu2 %v7709_v19  ;;  %1555 = vmatpush.msra.mxu0 %v7642_v31  ;;  %v7785_v19 = vunpack.c.l.bf16 %v8001_v5  ;;  %v8025_v31 = vld [vmem:[%s8664_s15 + $0x1f8] sm:$0xff]  }
 0x192   : >> { %1575 = vmatpush.msra.mxu1 %v7674_v32  ;;  %1614 = vmatpush.msra.mxu3 %v7741_v37  ;;  %v7850_v32 = vunpack.c.h.bf16 %v8017_v14  ;;  %v7999_v37 = vld [vmem:[%s8664_s15 + $0x128] sm:$0xff]   ;;  %v7881_v45 = vunpack.c.l.bf16 %v8025_v31 }
 0x193   : >> { %1595 = vmatpush.msra.mxu2 %v7706_v36  ;;  %1556 = vmatpush.msra.mxu0 %v7641_v38  ;;  %v8016_v36 = vld [vmem:[%s8664_s15 + $0x1b0] sm:$0xff]   ;;  %v7849_v38 = vunpack.c.l.bf16 %v8017_v14  ;;  %v7778_v46 = vunpack.c.h.bf16 %v7999_v37  ;;  %v7801_v14 = vunpack.c.l.bf16 %v8005_v0 }
 0x194   : >> { %1576 = vmatpush.msra.mxu1 %v7673_v39  ;;  %1615 = vmatpush.msra.mxu3 %v7738_v42  ;;  %v7882_v39 = vunpack.c.h.bf16 %v8025_v31  ;;  %v7813_v42 = vunpack.c.l.bf16 %v8008_v18  ;;  %v7766_v18 = vunpack.c.h.bf16 %v7996_v9  ;;  %v7995_v31 = vld [vmem:[%s8664_s15 + $0x108] sm:$0xff]  }
 0x195   : >> { %1596 = vmatpush.msra.mxu2 %v7705_v41  ;;  %1557 = vmatpush.msra.mxu0 %v7638_v43  ;;  %v7781_v41 = vunpack.c.l.bf16 %v8000_v15  ;;  %v8024_v43 = vld [vmem:[%s8664_s15 + $0x1f0] sm:$0xff]   ;;  %v8021_v15 = vld [vmem:[%s8664_s15 + $0x1d8] sm:$0xff]  }
 0x196   : >> { %1577 = vmatpush.msra.mxu1 %v7670_v44  ;;  %1616 = vmatpush.msra.mxu3 %v7737_v49  ;;  %v7846_v44 = vunpack.c.h.bf16 %v8016_v36  ;;  %v7998_v49 = vld [vmem:[%s8664_s15 + $0x120] sm:$0xff]   ;;  %v7877_v57 = vunpack.c.l.bf16 %v8024_v43 }
 0x197   : >> { %1597 = vmatpush.msra.mxu2 %v7702_v48  ;;  %1558 = vmatpush.msra.mxu0 %v7637_v50  ;;  %v8015_v48 = vld [vmem:[%s8664_s15 + $0x1a8] sm:$0xff]   ;;  %v7845_v50 = vunpack.c.l.bf16 %v8016_v36  ;;  %v7774_v58 = vunpack.c.h.bf16 %v7998_v49 }
 0x198   : >> { %1578 = vmatpush.msra.mxu1 %v7669_v51  ;;  %1617 = vmatpush.msra.mxu3 %v7734_v54  ;;  %v7878_v51 = vunpack.c.h.bf16 %v8024_v43  ;;  %v7809_v54 = vunpack.c.l.bf16 %v8007_v40  ;;  %v7762_v40 = vunpack.c.h.bf16 %v7995_v31 }
 0x199   : >> { %1598 = vmatpush.msra.mxu2 %v7701_v53  ;;  %1559 = vmatpush.msra.mxu0 %v7634_v55  ;;  %v7777_v53 = vunpack.c.l.bf16 %v7999_v37  ;;  %v8023_v55 = vld [vmem:[%s8664_s15 + $0x1e8] sm:$0xff]   ;;  %v8020_v37 = vld [vmem:[%s8664_s15 + $0x1d0] sm:$0xff]  }
 0x19a   : >> { %1579 = vmatpush.msra.mxu1 %v7666_v56  ;;  %1618 = vmatpush.msra.mxu3 %v7733_v61  ;;  %v7842_v56 = vunpack.c.h.bf16 %v8015_v48  ;;  %v7997_v61 = vld [vmem:[%s8664_s15 + $0x118] sm:$0xff]   ;;  %v7873_v5 = vunpack.c.l.bf16 %v8023_v55 }
 0x19b   : >> { %1599 = vmatpush.msra.mxu2 %v7698_v60  ;;  %1560 = vmatpush.msra.mxu0 %v7633_v62  ;;  %v8014_v60 = vld [vmem:[%s8664_s15 + $0x1a0] sm:$0xff]   ;;  %v7841_v62 = vunpack.c.l.bf16 %v8015_v48  ;;  %v7770_v6 = vunpack.c.h.bf16 %v7997_v61  ;;  %v8011_v48 = vld [vmem:[%s8664_s15 + $0x188] sm:$0xff]  }
 0x19c   : >> { %1580 = vmatpush.msra.mxu1 %v7665_v63  ;;  %1619 = vmatpush.msra.mxu3 %v7730_v2  ;;  %v7874_v63 = vunpack.c.h.bf16 %v8023_v55  ;;  %v7805_v2 = vunpack.c.l.bf16 %v8006_v52  ;;  %v8033_v52 = vld [vmem:[%s8664_s15 + $0x238] sm:$0xff]  }
 0x19d   : >> { %1600 = vmatpush.msra.mxu2 %v7697_v1  ;;  %1561 = vmatpush.msra.mxu0 %v7630_v3  ;;  %v7773_v1 = vunpack.c.l.bf16 %v7998_v49  ;;  %v8022_v3 = vld [vmem:[%s8664_s15 + $0x1e0] sm:$0xff]   ;;  %v7861_v49 = vunpack.c.l.bf16 %v8020_v37 }
 0x19e   : >> { %1581 = vmatpush.msra.mxu1 %v7662_v4  ;;  %1620 = vmatpush.msra.mxu3 %v7729_v8  ;;  %v7838_v4 = vunpack.c.h.bf16 %v8014_v60  ;;  %v8013_v8 = vld [vmem:[%s8664_s15 + $0x198] sm:$0xff]  }
 0x19f   : >> { %1601 = vmatpush.msra.mxu2 %v7694_v7  ;;  %1562 = vmatpush.msra.mxu0 %v7629_v10  ;;  %v7802_v7 = vunpack.c.h.bf16 %v8005_v0  ;;  %v7837_v10 = vunpack.c.l.bf16 %v8014_v60  ;;  %v7825_v60 = vunpack.c.l.bf16 %v8011_v48 }
 0x1a0   : >> { %1582 = vmatpush.msra.mxu1 %v7661_v11  ;;  %1621 = vmatpush.msra.mxu3 %v7726_v17  ;;  %v7870_v11 = vunpack.c.h.bf16 %v8022_v3  ;;  %v7869_v17 = vunpack.c.l.bf16 %v8022_v3 }
 0x1a1   : >> { %1627 = vmatpush.msrb.mxu0 %v7786_v12  ;;  %1602 = vmatpush.msra.mxu2 %v7693_v16  ;;  %v8004_v12 = vld [vmem:[%s8664_s15 + $0x150] sm:$0xff]   ;;  %v7834_v16 = vunpack.c.h.bf16 %v8013_v8 }
 0x1a2   : >> { %1647 = vmatpush.msrb.mxu1 %v7818_v13  ;;  %1622 = vmatpush.msra.mxu3 %v7725_v33  ;;  %v7769_v13 = vunpack.c.l.bf16 %v7997_v61  ;;  %v7866_v33 = vunpack.c.h.bf16 %v8021_v15  ;;  %v7797_v36 = vunpack.c.l.bf16 %v8004_v12 }
 0x1a3   : >> { %1628 = vmatpush.msrb.mxu0 %v7785_v19  ;;  %1667 = vmatpush.msrb.mxu2 %v7850_v32  ;;  %v7798_v19 = vunpack.c.h.bf16 %v8004_v12  ;;  %v7833_v32 = vunpack.c.l.bf16 %v8013_v8 }
 0x1a4   : >> { %1648 = vmatpush.msrb.mxu1 %v7817_v30  ;;  %1687 = vmatpush.msrb.mxu3 %v7882_v39  ;;  %v8012_v30 = vld [vmem:[%s8664_s15 + $0x190] sm:$0xff]   ;;  %v7865_v39 = vunpack.c.l.bf16 %v8021_v15 }
 0x1a5   : >> { %1629 = vmatpush.msrb.mxu0 %v7782_v34  ;;  %1668 = vmatpush.msrb.mxu2 %v7849_v38  ;;  %v8003_v34 = vld [vmem:[%s8664_s15 + $0x148] sm:$0xff]   ;;  %v7830_v38 = vunpack.c.h.bf16 %v8012_v30  ;;  %v7829_v43 = vunpack.c.l.bf16 %v8012_v30  ;;  %v8038_v30 = vld [vmem:[%s8664_s15 + $0x260] sm:$0xff]  }
 0x1a6   : >> { %1649 = vmatpush.msrb.mxu1 %v7814_v35  ;;  %1688 = vmatpush.msrb.mxu3 %v7881_v45  ;;  %v7765_v35 = vunpack.c.l.bf16 %v7996_v9  ;;  %v8002_v45 = vld [vmem:[%s8664_s15 + $0x140] sm:$0xff]   ;;  %v8031_v9 = vld [vmem:[%s8664_s15 + $0x228] sm:$0xff]  }
 0x1a7   : >> { %1630 = vmatpush.msrb.mxu0 %v7781_v41  ;;  %1669 = vmatpush.msrb.mxu2 %v7846_v44  ;;  %v7794_v41 = vunpack.c.h.bf16 %v8003_v34  ;;  %v7862_v44 = vunpack.c.h.bf16 %v8020_v37  ;;  %v7933_v37 = vunpack.c.l.bf16 %v8038_v30 }
 0x1a8   : >> { %1650 = vmatpush.msrb.mxu1 %v7813_v42  ;;  %1689 = vmatpush.msrb.mxu3 %v7878_v51  ;;  %v7994_v42 = vld [vmem:[%s8664_s15 + $0x100] sm:$0xff]   ;;  %v7790_v51 = vunpack.c.h.bf16 %v8002_v45 }
 0x1a9   : >> { %1631 = vmatpush.msrb.mxu0 %v7778_v46  ;;  %1670 = vmatpush.msrb.mxu2 %v7845_v50  ;;  %v7761_v46 = vunpack.c.l.bf16 %v7995_v31  ;;  %v7758_v50 = vunpack.c.h.bf16 %v7994_v42  ;;  %v7757_v55 = vunpack.c.l.bf16 %v7994_v42  ;;  %v8036_v42 = vld [vmem:[%s8664_s15 + $0x250] sm:$0xff]  }
 0x1aa   : >> { %1651 = vmatpush.msrb.mxu1 %v7810_v47  ;;  %1690 = vmatpush.msrb.mxu3 %v7877_v57  ;;  %v7793_v47 = vunpack.c.l.bf16 %v8003_v34  ;;  %v7789_v57 = vunpack.c.l.bf16 %v8002_v45  ;;  %v7934_v34 = vunpack.c.h.bf16 %v8038_v30 }
 0x1ab   : >> { %1632 = vmatpush.msrb.mxu0 %v7777_v53  ;;  %1671 = vmatpush.msrb.mxu2 %v7842_v56  ;;  %v7826_v53 = vunpack.c.h.bf16 %v8011_v48  ;;  %v7914_v56 = vunpack.c.h.bf16 %v8033_v52  ;;  %v8035_v48 = vld [vmem:[%s8664_s15 + $0x248] sm:$0xff]  }
 0x1ac   : >> { %1652 = vmatpush.msrb.mxu1 %v7809_v54  ;;  %1691 = vmatpush.msrb.mxu3 %v7874_v63  ;;  %v8019_v54 = vld [vmem:[%s8664_s15 + $0x1c8] sm:$0xff]   ;;  %v7913_v63 = vunpack.c.l.bf16 %v8033_v52  ;;  %v7922_v52 = vunpack.c.h.bf16 %v8035_v48 }
 0x1ad   : >> { %1633 = vmatpush.msrb.mxu0 %v7774_v58  ;;  %1672 = vmatpush.msrb.mxu2 %v7841_v62  ;;  %v8041_v58 = vld [vmem:[%s8664_s15 + $0x278] sm:$0xff]   ;;  %v7858_v61 = vunpack.c.h.bf16 %v8019_v54  ;;  %v8032_v62 = vld [vmem:[%s8664_s15 + $0x230] sm:$0xff]   ;;  %v7857_v3 = vunpack.c.l.bf16 %v8019_v54  ;;  %v8034_v54 = vld [vmem:[%s8664_s15 + $0x240] sm:$0xff]  }
 0x1ae   : >> { %1653 = vmatpush.msrb.mxu1 %v7806_v59  ;;  %1692 = vmatpush.msrb.mxu3 %v7873_v5  ;;  %v8010_v59 = vld [vmem:[%s8664_s15 + $0x180] sm:$0xff]   ;;  %v7946_v0 = vunpack.c.h.bf16 %v8041_v58  ;;  %v8040_v5 = vld [vmem:[%s8664_s15 + $0x270] sm:$0xff]  }
 0x1af   : >> { %1634 = vmatpush.msrb.mxu0 %v7773_v1  ;;  %1673 = vmatpush.msrb.mxu2 %v7838_v4  ;;  %v7822_v1 = vunpack.c.h.bf16 %v8010_v59  ;;  %v7910_v4 = vunpack.c.h.bf16 %v8032_v62  ;;  %v7941_v15 = vunpack.c.l.bf16 %v8040_v5 }
 0x1b0   : >> { %1654 = vmatpush.msrb.mxu1 %v7805_v2  ;;  %1693 = vmatpush.msrb.mxu3 %v7870_v11  ;;  %v8018_v2 = vld [vmem:[%s8664_s15 + $0x1c0] sm:$0xff]   ;;  %v7942_v11 = vunpack.c.h.bf16 %v8040_v5 }
 0x1b1   : >> { %1635 = vmatpush.msrb.mxu0 %v7770_v6  ;;  %1674 = vmatpush.msrb.mxu2 %v7837_v10  ;;  %v7945_v6 = vunpack.c.l.bf16 %v8041_v58  ;;  %v7854_v8 = vunpack.c.h.bf16 %v8018_v2  ;;  %v7909_v10 = vunpack.c.l.bf16 %v8032_v62  ;;  %v7853_v12 = vunpack.c.l.bf16 %v8018_v2  ;;  %v8148_v2 = vld [vmem:[%s1542_s0] ss:$0 sm:$0xff] }
 0x1b2   : >> { %1655 = vmatpush.msrb.mxu1 %v7802_v7  ;;  %1694 = vmatpush.msrb.mxu3 %v7869_v17  ;;  %v7821_v7 = vunpack.c.l.bf16 %v8010_v59  ;;  %v7905_v17 = vunpack.c.l.bf16 %v8031_v9  ;;  %v7917_v58 = vunpack.c.l.bf16 %v8034_v54  ;;  %v8044_v59 = vld [vmem:[%s1750_s22 + $0x18] sm:$0xff]  }
 0x1b3   : >> { %1636 = vmatpush.msrb.mxu0 %v7769_v13  ;;  %1675 = vmatpush.msrb.mxu2 %v7834_v16  ;;  %v7906_v13 = vunpack.c.h.bf16 %v8031_v9  ;;  %v8030_v16 = vld [vmem:[%s8664_s15 + $0x220] sm:$0xff]   ;;  %v7961_v62 = vunpack.c.l.bf16 %v8044_v59 }
 0x1b4   : >> { %1656 = vmatpush.msrb.mxu1 %v7801_v14  ;;  %1695 = vmatpush.msrb.mxu3 %v7866_v33  ;;  %v8039_v14 = vld [vmem:[%s8664_s15 + $0x268] sm:$0xff]   ;;  %v7901_v33 = vunpack.c.l.bf16 %v8030_v16 }
 0x1b5   : >> { %1637 = vmatpush.msrb.mxu0 %v7766_v18  ;;  %1676 = vmatpush.msrb.mxu2 %v7833_v32  ;;  %v7938_v18 = vunpack.c.h.bf16 %v8039_v14  ;;  %v7937_v31 = vunpack.c.l.bf16 %v8039_v14  ;;  %v8029_v32 = vld [vmem:[%s8664_s15 + $0x218] sm:$0xff]  }
 0x1b6   : >> { %1657 = vmatpush.msrb.mxu1 %v7798_v19  ;;  %1696 = vmatpush.msrb.mxu3 %v7865_v39  ;;  %v7902_v19 = vunpack.c.h.bf16 %v8030_v16  ;;  %v7897_v39 = vunpack.c.l.bf16 %v8029_v32 }
 0x1b7   : >> { %1638 = vmatpush.msrb.mxu0 %v7765_v35  ;;  %1677 = vmatpush.msrb.mxu2 %v7830_v38  ;;  %v7898_v35 = vunpack.c.h.bf16 %v8029_v32  ;;  %v8028_v38 = vld [vmem:[%s8664_s15 + $0x210] sm:$0xff]  }
 0x1b8   : >> { %1658 = vmatpush.msrb.mxu1 %v7797_v36  ;;  %1697 = vmatpush.msrb.mxu3 %v7862_v44  ;;  %v8037_v36 = vld [vmem:[%s8664_s15 + $0x258] sm:$0xff]   ;;  %v8027_v44 = vld [vmem:[%s8664_s15 + $0x208] sm:$0xff]   ;;  %v7893_v45 = vunpack.c.l.bf16 %v8028_v38 }
 0x1b9   : >> { %1639 = vmatpush.msrb.mxu0 %v7762_v40  ;;  %1678 = vmatpush.msrb.mxu2 %v7829_v43  ;;  %v7930_v40 = vunpack.c.h.bf16 %v8037_v36  ;;  %v7929_v43 = vunpack.c.l.bf16 %v8037_v36 }
 0x1ba   : >> { %1659 = vmatpush.msrb.mxu1 %v7794_v41  ;;  %1603 = vmatmul.f32.vlgmr.msra.gmra.mxu2 %v8629_v22  ;;  %v7894_v41 = vunpack.c.h.bf16 %v8028_v38 }
 0x1bb   : >> { %1640 = vmatpush.msrb.mxu0 %v7761_v46  ;;  %1698 = vmatpush.msrb.mxu3 %v7861_v49  ;;  %v7926_v46 = vunpack.c.h.bf16 %v8036_v42  ;;  %v7925_v49 = vunpack.c.l.bf16 %v8036_v42 }
 0x1bc   : >> { %1660 = vmatpush.msrb.mxu1 %v7793_v47  ;;  %1679 = vmatpush.msrb.mxu2 %v7826_v53  ;;  %v7890_v47 = vunpack.c.h.bf16 %v8027_v44 }
 0x1bd   : >> { %1641 = vmatpush.msrb.mxu0 %v7758_v50  ;;  %1623 = vmatmul.f32.vlgmr.msra.gmra.mxu3 %v8632_v23  ;;  %v8026_v50 = vld [vmem:[%s8664_s15 + $0x200] sm:$0xff]  }
 0x1be   : >> { %1661 = vmatpush.msrb.mxu1 %v7790_v51  ;;  %1563 = vmatmul.f32.vlgmr.msra.gmra.mxu0 %v8623_v20  ;;  %v7889_v51 = vunpack.c.l.bf16 %v8027_v44  ;;  %v7886_v53 = vunpack.c.h.bf16 %v8026_v50 }
 0x1bf   : >> { %1642 = vmatpush.msrb.mxu0 %v7757_v55  ;;  %1680 = vmatpush.msrb.mxu2 %v7825_v60  ;;  %v7921_v55 = vunpack.c.l.bf16 %v8035_v48  ;;  %v8043_v60 = vld [vmem:[%s1750_s22 + $0x10] sm:$0xff]  }
 0x1c0   : >> { %1662 = vmatpush.msrb.mxu1 %v7789_v57  ;;  %1699 = vmatpush.msrb.mxu3 %v7858_v61  ;;  %v7918_v57 = vunpack.c.h.bf16 %v8034_v54  ;;  %v7962_v61 = vunpack.c.h.bf16 %v8044_v59 }
 0x1c1   : >> { %1707 = vmatpush.msra.mxu0 %v7914_v56  ;;  %1583 = vmatmul.f32.vlgmr.msra.gmra.mxu1 %v8626_v21  ;;  %v7885_v56 = vunpack.c.l.bf16 %v8026_v50 }
 0x1c2   : >> { %1727 = vmatpush.msra.mxu1 %v7946_v0  ;;  %1681 = vmatpush.msrb.mxu2 %v7822_v1  ;;  %v7957_v0 = vunpack.c.l.bf16 %v8043_v60  ;;  %v8042_v1 = vld [vmem:[%s1750_s22 + $0x8] sm:$0xff]  }
 0x1c3   : >> { %1708 = vmatpush.msra.mxu0 %v7913_v63  ;;  %1700 = vmatpush.msrb.mxu3 %v7857_v3  ;;  %v7958_v63 = vunpack.c.h.bf16 %v8043_v60  ;;  %v7954_v3 = vunpack.c.h.bf16 %v8042_v1  ;;  %v7953_v5 = vunpack.c.l.bf16 %v8042_v1 }
 0x1c4   : >> { %1728 = vmatpush.msra.mxu1 %v7945_v6  ;;  %1682 = vmatpush.msrb.mxu2 %v7821_v7  ;;  %v7948_v6 = vld [vmem:[%s1750_s22] sm:$0xff]  }
 0x1c5   : >> { %1709 = vmatpush.msra.mxu0 %v7910_v4  ;;  %1701 = vmatpush.msrb.mxu3 %v7854_v8  ;;  %v7950_v8 = vunpack.c.h.bf16 %v7948_v6 }
 0x1c6   : >> { %1683 = vmatmul.f32.vlgmr.msrb.gmra.mxu2 %v8641_v26  ;;  %1729 = vmatpush.msra.mxu1 %v7942_v11 }
 0x1c7   : >> { %1710 = vmatpush.msra.mxu0 %v7909_v10  ;;  %1702 = vmatpush.msrb.mxu3 %v7853_v12  ;;  %v7949_v10 = vunpack.c.l.bf16 %v7948_v6 }
 0x1c8   : >> { %1643 = vmatmul.f32.vlgmr.msrb.gmra.mxu0 %v8635_v24  ;;  %1703 = vmatmul.f32.vlgmr.msrb.gmra.mxu3 %v8644_v27 }
 0x1c9   : >> { %1711 = vmatpush.msra.mxu0 %v7906_v13  ;;  %1730 = vmatpush.msra.mxu1 %v7941_v15  ;;  %v1798_v13 = vld [vmem:[%s1797_s26] sm:$0xf] }
 0x1ca   : >> { %1663 = vmatmul.f32.vlgmr.msrb.gmra.mxu1 %v8638_v25  ;;  %1784 = vmatpush.msra.mxu2 %v7962_v61 }
 0x1cb   : >> { %1712 = vmatpush.msra.mxu0 %v7905_v17  ;;  %1731 = vmatpush.msra.mxu1 %v7938_v18 }
 0x1cc   : >> { %1785 = vmatpush.msra.mxu2 %v7961_v62  ;;  %7499 = vmatpush.msk.msra.mxu3 %vm1803_vm3, %v1798_v13 }
 0x1cd   : >> { %1713 = vmatpush.msra.mxu0 %v7902_v19  ;;  %1732 = vmatpush.msra.mxu1 %v7937_v31 }
 0x1ce   : >> { %1786 = vmatpush.msra.mxu2 %v7958_v63 }
 0x1cf   : >> { %1714 = vmatpush.msra.mxu0 %v7901_v33  ;;  %1733 = vmatpush.msra.mxu1 %v7934_v34 }
 0x1d0   : >> { %1787 = vmatpush.msra.mxu2 %v7957_v0 }
 0x1d1   : >> { %1715 = vmatpush.msra.mxu0 %v7898_v35  ;;  %1734 = vmatpush.msra.mxu1 %v7933_v37 }
 0x1d2   : >> { %1788 = vmatpush.msra.mxu2 %v7954_v3 }
 0x1d3   : >> { %1716 = vmatpush.msra.mxu0 %v7897_v39  ;;  %1735 = vmatpush.msra.mxu1 %v7930_v40  ;;  %v8149_v40 = vld [vmem:[%s1767_s16] ss:$0 sm:$0xff] }
 0x1d4   : >> { %1789 = vmatpush.msra.mxu2 %v7953_v5 }
 0x1d5   : >> { %1717 = vmatpush.msra.mxu0 %v7894_v41  ;;  %1736 = vmatpush.msra.mxu1 %v7929_v43 }
 0x1d6   : >> { %1790 = vmatpush.msra.mxu2 %v7950_v8 }
 0x1d7   : >> { %1718 = vmatpush.msra.mxu0 %v7893_v45  ;;  %1737 = vmatpush.msra.mxu1 %v7926_v46 }
 0x1d8   : >> { %1791 = vmatpush.msra.mxu2 %v7949_v10 }
 0x1d9   : >> { %1719 = vmatpush.msra.mxu0 %v7890_v47  ;;  %1738 = vmatpush.msra.mxu1 %v7925_v49 }
 0x1db   : >> { %1720 = vmatpush.msra.mxu0 %v7889_v51  ;;  %1739 = vmatpush.msra.mxu1 %v7922_v52 }
 0x1dd   : >> { %1721 = vmatpush.msra.mxu0 %v7886_v53  ;;  %1740 = vmatpush.msra.mxu1 %v7921_v55 }
 0x1df   : >> { %1722 = vmatpush.msra.mxu0 %v7885_v56  ;;  %1741 = vmatpush.msra.mxu1 %v7918_v57 }
 0x1e0   : >> { %1723 = vmatmul.f32.vlgmr.msra.gmra.mxu0 %v8647_v28 }
 0x1e1   : >> { %1742 = vmatpush.msra.mxu1 %v7917_v58 }
 0x1e2   : >> { %1743 = vmatmul.f32.vlgmr.msra.gmra.mxu1 %v8650_v29 }
 0x23b   : >> { %v1564_v4 = vpop.f32.mrf.mxu0 }
 0x23c   : >> { %v1565_v7 = vadd.f32 %v8148_v2, %v1564_v4 }
 0x23d   : >> { %v1604_v12 = vpop.f32.mrf.mxu2 }
 0x23e   : >> { %v1584_v9 = vpop.f32.mrf.mxu1 }
 0x23f   : >> { %v1585_v11 = vadd.f32 %v1584_v9, %v1565_v7 }
 0x240   : >> { %v1624_v15 = vpop.f32.mrf.mxu3 }
 0x241   : >> { %v1605_v14 = vadd.f32 %v1604_v12, %v1585_v11 }
 0x243   : >> { %v1625_v16 = vadd.f32 %v1624_v15, %v1605_v14 }
 0x245   : >> { %v1644_v17 = vpop.f32.mrf.mxu0 }
 0x246   : >> { %v1645_v18 = vadd.f32 %v1644_v17, %v1625_v16 }
 0x247   : >> { %v1664_v19 = vpop.f32.mrf.mxu1 }
 0x248   : >> { %v1665_v30 = vadd.f32 %v1664_v19, %v1645_v18 }
 0x249   : >> { %v1684_v31 = vpop.f32.mrf.mxu2 }
 0x24a   : >> { %v1685_v32 = vadd.f32 %v1684_v31, %v1665_v30 }
 0x24b   : >> { %v1704_v33 = vpop.f32.mrf.mxu3 }
 0x24c   : >> { %v1705_v34 = vadd.f32 %v1704_v33, %v1685_v32 }
 0x25d   : >> { %v1724_v35 = vpop.f32.mrf.mxu0 }
 0x25e   : >> { %v1725_v36 = vadd.f32 %v1724_v35, %v1705_v34 }
 0x25f   : >> { %v1744_v37 = vpop.f32.mrf.mxu1 }
 0x260   : >> { %v1745_v38 = vadd.f32 %v1744_v37, %v1725_v36 }
 0x262   : >> { %v1747_v39 = vmax.f32 %v1745_v38, 0.0 }
 0x264   : >> { %7497 = vmatmul.msk.f32.vlgmr.msra.gmra.mxu2 %vm1772_vm4, %v1747_v39 }
 0x2e7   : >> { %v1793_v41 = vpop.f32.mrf.mxu2 }
 0x2e8   : >> { %v1794_v42 = vadd.f32 %v8149_v40, %v1793_v41 }
 0x2ea   : >> { %7500 = vmatmul.msk.f32.vlgmr.msra.gmra.mxu3 %vm1799_vm5, %v1794_v42 }
 0x36a   : > { %1217 = sbr.rel (!%p1215_p1) target bundleno = 379 (0x17b), region = 272 }
 0x36d   : >> { %v1824_v43 = vpop.f32.mrf.mxu3 }
 0x36e   : >> { %1828 = vst.msk [vmem:[%s1827_s1] sm:$0xff] %vm1171_vm2, %v1824_v43 }
 0x36f PF: > { %v8773_v44 = vld [vmem:[#allocation2 + $0x8] sm:$0xff]  ;;  %v8775_v45 = vld [vmem:[#allocation2] sm:$0xff]  ;;  %vm1835_vm6 = vcmask 130048   ;;  %v1831_v20 = vld [vmem:[%s8390_s13] sm:$0xff]  ;;  %s13165_s2 = sld [smem:[#allocation11_spill]]  ;;  %s9309_s0 = smov 0  }
 0x370   : > { %13163 = vst [vmem:[#allocation31_spill] sm:$0xff] %v8773_v44  ;;  %8056 = vmatpush.msra.mxu2 %v8773_v44  ;;  %8058 = vmatpush.msra.mxu3 %v8773_v44  ;;  %v1833_v46 = vld [vmem:[%s8390_s13 + $0x10] sm:$0xff]  ;;  %v1877_v21 = vld [vmem:[%s8395_s17] sm:$0xff]  ;;  %s13166_s10 = sld [smem:[#allocation14_spill]]  ;;  %v1834_v22 = vld [vmem:[%s8390_s13 + $0x18] sm:$0xff] }
 0x371   : > { %13164 = vst [vmem:[#allocation32_spill] sm:$0xff] %v8775_v45  ;;  %v1879_v47 = vld [vmem:[%s8395_s17 + $0x10] sm:$0xff]  ;;  %1862 = vmatpush.msra.mxu0 %v8773_v44  ;;  %1907 = vmatpush.msra.mxu1 %v8773_v44  ;;  %v1880_v23 = vld [vmem:[%s8395_s17 + $0x18] sm:$0xff]  ;;  %v1832_v24 = vld [vmem:[%s8390_s13 + $0x8] sm:$0xff] }
 0x372   : > { %8057 = vmatpush.msra.mxu2 %v8775_v45  ;;  %8059 = vmatpush.msra.mxu3 %v8775_v45  ;;  %v1878_v25 = vld [vmem:[%s8395_s17 + $0x8] sm:$0xff] }
 0x373   : > { %7503 = vmatmul.msk.f32.vlgmr.msra.gmra.mxu2 %vm1835_vm6, %v1833_v46  ;;  %7507 = vmatmul.msk.f32.vlgmr.msra.gmra.mxu3 %vm1835_vm6, %v1879_v47 }
 0x374   : > { %1863 = vmatpush.msra.mxu0 %v8775_v45  ;;  %1908 = vmatpush.msra.mxu1 %v8775_v45 }
 0x375   : > { %7501 = vmatmul.msk.f32.vlgmr.msra.gmra.mxu0 %vm1835_vm6, %v1831_v20  ;;  %7505 = vmatmul.msk.f32.vlgmr.msra.gmra.mxu1 %vm1835_vm6, %v1877_v21  ;;  %v8802_v26 = vld [vmem:[%s13165_s2] sm:$0xff]  ;;  %v8805_v27 = vld [vmem:[%s13165_s2 + $0x8] sm:$0xff]  ;;  %v8808_v28 = vld [vmem:[%s13165_s2 + $0x10] sm:$0xff] }
 0x376   : > { %13167 = vst [vmem:[#allocation33_spill] sm:$0xff] %v8802_v26  ;;  %v8811_v29 = vld [vmem:[%s13165_s2 + $0x18] sm:$0xff]  ;;  %v8814_v48 = vld [vmem:[%s13166_s10] sm:$0xff]  ;;  %v8817_v49 = vld [vmem:[%s13166_s10 + $0x8] sm:$0xff] }
 0x377   : > { %13168 = vst [vmem:[#allocation34_spill] sm:$0xff] %v8805_v27  ;;  %v8820_v50 = vld [vmem:[%s13166_s10 + $0x10] sm:$0xff]  ;;  %v8823_v51 = vld [vmem:[%s13166_s10 + $0x18] sm:$0xff]  ;;  %v8826_v52 = vld [vmem:[%s13166_s10 + $0x20] sm:$0xff] }
 0x378   : > { %13169 = vst [vmem:[#allocation35_spill] sm:$0xff] %v8808_v28  ;;  %v8829_v53 = vld [vmem:[%s13166_s10 + $0x28] sm:$0xff]  ;;  %v8832_v54 = vld [vmem:[%s13166_s10 + $0x30] sm:$0xff]  ;;  %v8835_v55 = vld [vmem:[%s13166_s10 + $0x38] sm:$0xff] }
 0x379   : > { %13170 = vst [vmem:[#allocation36_spill] sm:$0xff] %v8811_v29  ;;  %v8838_v56 = vld [vmem:[%s13166_s10 + $0x40] sm:$0xff]  ;;  %v8841_v57 = vld [vmem:[%s13166_s10 + $0x48] sm:$0xff]  ;;  %v8844_v58 = vld [vmem:[%s13166_s10 + $0x50] sm:$0xff] }
 0x37a   : > { %13171 = vst [vmem:[#allocation37_spill] sm:$0xff] %v8814_v48  ;;  %v8847_v59 = vld [vmem:[%s13166_s10 + $0x58] sm:$0xff]  ;;  %v8850_v60 = vld [vmem:[%s13166_s10 + $0x60] sm:$0xff]  ;;  %v8853_v61 = vld [vmem:[%s13166_s10 + $0x68] sm:$0xff] }
 0x37b   : > { %7504 = vmatmul.msk.f32.gmra.mxu2 %vm1835_vm6, %v1834_v22  ;;  %7508 = vmatmul.msk.f32.gmra.mxu3 %vm1835_vm6, %v1880_v23  ;;  %13172 = vst [vmem:[#allocation38_spill] sm:$0xff] %v8817_v49  ;;  %v8856_v62 = vld [vmem:[%s13166_s10 + $0x70] sm:$0xff]  ;;  %v8859_v63 = vld [vmem:[%s13166_s10 + $0x78] sm:$0xff]  ;;  %v8862_v0 = vld [vmem:[%s13166_s10 + $0x80] sm:$0xff] }
 0x37c   : > { %13173 = vst [vmem:[#allocation39_spill] sm:$0xff] %v8820_v50  ;;  %v8865_v1 = vld [vmem:[%s13166_s10 + $0x88] sm:$0xff]  ;;  %v8868_v2 = vld [vmem:[%s13166_s10 + $0x90] sm:$0xff]  ;;  %v8871_v3 = vld [vmem:[%s13166_s10 + $0x98] sm:$0xff] }
 0x37d   : > { %7502 = vmatmul.msk.f32.gmra.mxu0 %vm1835_vm6, %v1832_v24  ;;  %7506 = vmatmul.msk.f32.gmra.mxu1 %vm1835_vm6, %v1878_v25  ;;  %13174 = vst [vmem:[#allocation40_spill] sm:$0xff] %v8823_v51  ;;  %v8874_v4 = vld [vmem:[%s13166_s10 + $0xa0] sm:$0xff]  ;;  %v8877_v5 = vld [vmem:[%s13166_s10 + $0xa8] sm:$0xff]  ;;  %v8880_v6 = vld [vmem:[%s13166_s10 + $0xb0] sm:$0xff] }
 0x37e   : > { %13175 = vst [vmem:[#allocation41_spill] sm:$0xff] %v8826_v52  ;;  %v8883_v7 = vld [vmem:[%s13166_s10 + $0xb8] sm:$0xff]  ;;  %v8886_v8 = vld [vmem:[%s13166_s10 + $0xc0] sm:$0xff]  ;;  %v8889_v9 = vld [vmem:[%s13166_s10 + $0xc8] sm:$0xff] }
 0x37f   : > { %13176 = vst [vmem:[#allocation42_spill] sm:$0xff] %v8829_v53  ;;  %v8892_v10 = vld [vmem:[%s13166_s10 + $0xd0] sm:$0xff]  ;;  %v8895_v11 = vld [vmem:[%s13166_s10 + $0xd8] sm:$0xff]  ;;  %v8898_v12 = vld [vmem:[%s13166_s10 + $0xe0] sm:$0xff] }
 0x380   : > { %13177 = vst [vmem:[#allocation43_spill] sm:$0xff] %v8832_v54  ;;  %v8901_v13 = vld [vmem:[%s13166_s10 + $0xe8] sm:$0xff]  ;;  %v8904_v14 = vld [vmem:[%s13166_s10 + $0xf0] sm:$0xff]  ;;  %v8907_v15 = vld [vmem:[%s13166_s10 + $0xf8] sm:$0xff] }
 0x381   : > { %13178 = vst [vmem:[#allocation44_spill] sm:$0xff] %v8835_v55  ;;  %v8910_v16 = vld [vmem:[%s13166_s10 + $0x100] sm:$0xff]  ;;  %v8913_v17 = vld [vmem:[%s13166_s10 + $0x108] sm:$0xff]  ;;  %v8916_v18 = vld [vmem:[%s13166_s10 + $0x110] sm:$0xff] }
 0x382   : > { %13179 = vst [vmem:[#allocation45_spill] sm:$0xff] %v8838_v56  ;;  %v8919_v19 = vld [vmem:[%s13166_s10 + $0x118] sm:$0xff]  ;;  %v8922_v30 = vld [vmem:[%s13166_s10 + $0x120] sm:$0xff]  ;;  %v8925_v31 = vld [vmem:[%s13166_s10 + $0x128] sm:$0xff] }
 0x383   : > { %13180 = vst [vmem:[#allocation46_spill] sm:$0xff] %v8841_v57  ;;  %v8928_v32 = vld [vmem:[%s13166_s10 + $0x130] sm:$0xff]  ;;  %v8931_v33 = vld [vmem:[%s13166_s10 + $0x138] sm:$0xff]  ;;  %v8934_v34 = vld [vmem:[%s13166_s10 + $0x140] sm:$0xff] }
 0x384   : > { %13181 = vst [vmem:[#allocation47_spill] sm:$0xff] %v8844_v58  ;;  %v8937_v35 = vld [vmem:[%s13166_s10 + $0x148] sm:$0xff]  ;;  %v8940_v36 = vld [vmem:[%s13166_s10 + $0x150] sm:$0xff]  ;;  %v8943_v37 = vld [vmem:[%s13166_s10 + $0x158] sm:$0xff] }
 0x385   : > { %13182 = vst [vmem:[#allocation48_spill] sm:$0xff] %v8847_v59  ;;  %v8946_v38 = vld [vmem:[%s13166_s10 + $0x160] sm:$0xff]  ;;  %v8949_v39 = vld [vmem:[%s13166_s10 + $0x168] sm:$0xff]  ;;  %v8952_v40 = vld [vmem:[%s13166_s10 + $0x170] sm:$0xff] }
 0x386   : > { %13183 = vst [vmem:[#allocation49_spill] sm:$0xff] %v8850_v60  ;;  %v8955_v41 = vld [vmem:[%s13166_s10 + $0x178] sm:$0xff]  ;;  %v8958_v42 = vld [vmem:[%s13166_s10 + $0x180] sm:$0xff]  ;;  %v8961_v43 = vld [vmem:[%s13166_s10 + $0x188] sm:$0xff] }
 0x387   : > { %13184 = vst [vmem:[#allocation50_spill] sm:$0xff] %v8853_v61  ;;  %v8964_v46 = vld [vmem:[%s13166_s10 + $0x190] sm:$0xff]  ;;  %v8967_v47 = vld [vmem:[%s13166_s10 + $0x198] sm:$0xff]  ;;  %v8970_v20 = vld [vmem:[%s13166_s10 + $0x1a0] sm:$0xff] }
 0x388   : > { %13185 = vst [vmem:[#allocation51_spill] sm:$0xff] %v8856_v62  ;;  %v8973_v21 = vld [vmem:[%s13166_s10 + $0x1a8] sm:$0xff]  ;;  %v8976_v22 = vld [vmem:[%s13166_s10 + $0x1b0] sm:$0xff]  ;;  %v8979_v23 = vld [vmem:[%s13166_s10 + $0x1b8] sm:$0xff] }
 0x389   : > { %13186 = vst [vmem:[#allocation52_spill] sm:$0xff] %v8859_v63  ;;  %v8986_v44 = vld [vmem:[%s13166_s10 + $0x1c0] sm:$0xff]  ;;  %v8989_v45 = vld [vmem:[%s13166_s10 + $0x1c8] sm:$0xff] }
 0x38a   : > { %13187 = vst [vmem:[#allocation53_spill] sm:$0xff] %v8862_v0  ;;  %v9044_v0 = vld [vmem:[%s13166_s10 + $0x250] sm:$0xff] }
 0x38b   : > { %13188 = vst [vmem:[#allocation54_spill] sm:$0xff] %v8865_v1  ;;  %v9053_v1 = vld [vmem:[%s13166_s10 + $0x268] sm:$0xff] }
 0x38c   : > { %13189 = vst [vmem:[#allocation55_spill] sm:$0xff] %v8868_v2 }
 0x38d   : > { %13190 = vst [vmem:[#allocation56_spill] sm:$0xff] %v8871_v3  ;;  %v9069_v3 = vld [vmem:[%s13166_s10 + $0x288] sm:$0xff] }
 0x38e   : > { %13191 = vst [vmem:[#allocation57_spill] sm:$0xff] %v8874_v4  ;;  %v9078_v4 = vld [vmem:[%s13166_s10 + $0x2a0] sm:$0xff] }
 0x38f   : > { %13192 = vst [vmem:[#allocation58_spill] sm:$0xff] %v8877_v5  ;;  %v9121_v5 = vld [vmem:[%s13166_s10 + $0x308] sm:$0xff] }
 0x390   : > { %13193 = vst [vmem:[#allocation59_spill] sm:$0xff] %v8880_v6  ;;  %v9274_v6 = vld [vmem:[%s13166_s10 + $0x4a0] sm:$0xff] }
 0x391   : > { %13194 = vst [vmem:[#allocation60_spill] sm:$0xff] %v8883_v7 }
 0x392   : > { %13195 = vst [vmem:[#allocation61_spill] sm:$0xff] %v8886_v8 }
 0x393   : > { %13196 = vst [vmem:[#allocation62_spill] sm:$0xff] %v8889_v9 }
 0x394   : > { %13197 = vst [vmem:[#allocation63_spill] sm:$0xff] %v8892_v10 }
 0x395   : > { %13198 = vst [vmem:[#allocation64_spill] sm:$0xff] %v8895_v11 }
 0x396   : > { %13199 = vst [vmem:[#allocation65_spill] sm:$0xff] %v8898_v12 }
 0x397   : > { %13200 = vst [vmem:[#allocation66_spill] sm:$0xff] %v8901_v13 }
 0x398   : > { %13201 = vst [vmem:[#allocation67_spill] sm:$0xff] %v8904_v14 }
 0x399   : > { %13202 = vst [vmem:[#allocation68_spill] sm:$0xff] %v8907_v15 }
 0x39a   : > { %13203 = vst [vmem:[#allocation69_spill] sm:$0xff] %v8910_v16  ;;  %v8992_v16 = vld [vmem:[%s13166_s10 + $0x1d0] sm:$0xff] }
 0x39b   : > { %13204 = vst [vmem:[#allocation70_spill] sm:$0xff] %v8913_v17  ;;  %v8995_v17 = vld [vmem:[%s13166_s10 + $0x1d8] sm:$0xff] }
 0x39c   : > { %13205 = vst [vmem:[#allocation71_spill] sm:$0xff] %v8916_v18  ;;  %v8998_v18 = vld [vmem:[%s13166_s10 + $0x1e0] sm:$0xff] }
 0x39d   : > { %13206 = vst [vmem:[#allocation72_spill] sm:$0xff] %v8919_v19  ;;  %v9001_v19 = vld [vmem:[%s13166_s10 + $0x1e8] sm:$0xff] }
 0x39e   : > { %13207 = vst [vmem:[#allocation73_spill] sm:$0xff] %v8922_v30  ;;  %v9004_v30 = vld [vmem:[%s13166_s10 + $0x1f0] sm:$0xff] }
 0x39f   : > { %13208 = vst [vmem:[#allocation74_spill] sm:$0xff] %v8925_v31  ;;  %v9007_v31 = vld [vmem:[%s13166_s10 + $0x1f8] sm:$0xff] }
 0x3a0   : > { %13209 = vst [vmem:[#allocation75_spill] sm:$0xff] %v8928_v32  ;;  %v9010_v32 = vld [vmem:[%s13166_s10 + $0x200] sm:$0xff] }
 0x3a1   : > { %13210 = vst [vmem:[#allocation76_spill] sm:$0xff] %v8931_v33  ;;  %v9013_v33 = vld [vmem:[%s13166_s10 + $0x208] sm:$0xff] }
 0x3a2   : > { %13211 = vst [vmem:[#allocation77_spill] sm:$0xff] %v8934_v34  ;;  %v9016_v34 = vld [vmem:[%s13166_s10 + $0x210] sm:$0xff] }
 0x3a3   : > { %13212 = vst [vmem:[#allocation78_spill] sm:$0xff] %v8937_v35  ;;  %v9019_v35 = vld [vmem:[%s13166_s10 + $0x218] sm:$0xff] }
 0x3a4   : > { %13213 = vst [vmem:[#allocation79_spill] sm:$0xff] %v8940_v36 }
 0x3a5   : > { %13214 = vst [vmem:[#allocation80_spill] sm:$0xff] %v8943_v37 }
 0x3a6   : > { %13215 = vst [vmem:[#allocation81_spill] sm:$0xff] %v8946_v38  ;;  %v9026_v38 = vld [vmem:[%s13166_s10 + $0x220] sm:$0xff] }
 0x3a7   : > { %13216 = vst [vmem:[#allocation82_spill] sm:$0xff] %v8949_v39  ;;  %v9029_v39 = vld [vmem:[%s13166_s10 + $0x228] sm:$0xff] }
 0x3a8   : > { %13217 = vst [vmem:[#allocation83_spill] sm:$0xff] %v8952_v40  ;;  %v9035_v40 = vld [vmem:[%s13166_s10 + $0x238] sm:$0xff] }
 0x3a9   : > { %13218 = vst [vmem:[#allocation84_spill] sm:$0xff] %v8955_v41  ;;  %v9041_v41 = vld [vmem:[%s13166_s10 + $0x248] sm:$0xff] }
 0x3aa   : > { %13219 = vst [vmem:[#allocation85_spill] sm:$0xff] %v8958_v42  ;;  %v9050_v42 = vld [vmem:[%s13166_s10 + $0x260] sm:$0xff] }
 0x3ab   : > { %13220 = vst [vmem:[#allocation86_spill] sm:$0xff] %v8961_v43  ;;  %v9059_v43 = vld [vmem:[%s13166_s10 + $0x278] sm:$0xff] }
 0x3ac   : > { %13221 = vst [vmem:[#allocation87_spill] sm:$0xff] %v8964_v46  ;;  %v9066_v46 = vld [vmem:[%s13166_s10 + $0x280] sm:$0xff] }
 0x3ad   : > { %13222 = vst [vmem:[#allocation88_spill] sm:$0xff] %v8967_v47  ;;  %v9075_v47 = vld [vmem:[%s13166_s10 + $0x298] sm:$0xff] }
 0x3ae   : > { %13223 = vst [vmem:[#allocation89_spill] sm:$0xff] %v8970_v20  ;;  %v9084_v20 = vld [vmem:[%s13166_s10 + $0x2b0] sm:$0xff] }
 0x3af   : > { %13224 = vst [vmem:[#allocation90_spill] sm:$0xff] %v8973_v21  ;;  %v9265_v21 = vld [vmem:[%s13166_s10 + $0x488] sm:$0xff] }
 0x3b0   : > { %13225 = vst [vmem:[#allocation91_spill] sm:$0xff] %v8976_v22  ;;  %v9292_v22 = vld [vmem:[%s13166_s10 + $0x4d0] sm:$0xff] }
 0x3b1   : > { %13226 = vst [vmem:[#allocation92_spill] sm:$0xff] %v8979_v23 }
 0x3b2   : > { %13229 = vst [vmem:[#allocation95_spill] sm:$0xff] %v8986_v44 }
 0x3b3   : > { %13230 = vst [vmem:[#allocation96_spill] sm:$0xff] %v8989_v45 }
 0x3b4   : > { %13231 = vst [vmem:[#allocation97_spill] sm:$0xff] %v8992_v16 }
 0x3b5   : > { %13232 = vst [vmem:[#allocation98_spill] sm:$0xff] %v8995_v17 }
 0x3b6   : > { %13233 = vst [vmem:[#allocation99_spill] sm:$0xff] %v8998_v18 }
 0x3b7   : > { %13234 = vst [vmem:[#allocation100_spill] sm:$0xff] %v9001_v19 }
 0x3b8   : > { %13235 = vst [vmem:[#allocation101_spill] sm:$0xff] %v9004_v30 }
 0x3b9   : > { %13236 = vst [vmem:[#allocation102_spill] sm:$0xff] %v9007_v31 }
 0x3ba   : > { %13237 = vst [vmem:[#allocation103_spill] sm:$0xff] %v9010_v32  ;;  %v9032_v32 = vld [vmem:[%s13166_s10 + $0x230] sm:$0xff] }
 0x3bb   : > { %13238 = vst [vmem:[#allocation104_spill] sm:$0xff] %v9013_v33  ;;  %v9038_v33 = vld [vmem:[%s13166_s10 + $0x240] sm:$0xff] }
 0x3bc   : > { %13239 = vst [vmem:[#allocation105_spill] sm:$0xff] %v9016_v34  ;;  %v9047_v34 = vld [vmem:[%s13166_s10 + $0x258] sm:$0xff] }
 0x3bd   : > { %13240 = vst [vmem:[#allocation106_spill] sm:$0xff] %v9019_v35  ;;  %v9056_v35 = vld [vmem:[%s13166_s10 + $0x270] sm:$0xff] }
 0x3be   : > { %13243 = vst [vmem:[#allocation109_spill] sm:$0xff] %v9026_v38 }
 0x3bf   : > { %13244 = vst [vmem:[#allocation110_spill] sm:$0xff] %v9029_v39  ;;  %v9072_v39 = vld [vmem:[%s13166_s10 + $0x290] sm:$0xff] }
 0x3c0   : > { %13245 = vst [vmem:[#allocation111_spill] sm:$0xff] %v9032_v32  ;;  %v9081_v32 = vld [vmem:[%s13166_s10 + $0x2a8] sm:$0xff] }
 0x3c1   : > { %13246 = vst [vmem:[#allocation112_spill] sm:$0xff] %v9035_v40  ;;  %v9124_v40 = vld [vmem:[%s13166_s10 + $0x310] sm:$0xff] }
 0x3c2   : > { %13247 = vst [vmem:[#allocation113_spill] sm:$0xff] %v9038_v33  ;;  %v9283_v33 = vld [vmem:[%s13166_s10 + $0x4b8] sm:$0xff] }
 0x3c3   : > { %13248 = vst [vmem:[#allocation114_spill] sm:$0xff] %v9041_v41 }
 0x3c4   : > { %13249 = vst [vmem:[#allocation115_spill] sm:$0xff] %v9044_v0 }
 0x3c5   : > { %13250 = vst [vmem:[#allocation116_spill] sm:$0xff] %v9047_v34 }
 0x3c6   : > { %13251 = vst [vmem:[#allocation117_spill] sm:$0xff] %v9050_v42 }
 0x3c7   : > { %13252 = vst [vmem:[#allocation118_spill] sm:$0xff] %v9053_v1 }
 0x3c8   : > { %13253 = vst [vmem:[#allocation119_spill] sm:$0xff] %v9056_v35 }
 0x3c9   : > { %13254 = vst [vmem:[#allocation120_spill] sm:$0xff] %v9059_v43 }
 0x3ca   : > { %13257 = vst [vmem:[#allocation123_spill] sm:$0xff] %v9066_v46  ;;  %v9087_v46 = vld [vmem:[%s13166_s10 + $0x2b8] sm:$0xff] }
 0x3cb   : > { %13258 = vst [vmem:[#allocation124_spill] sm:$0xff] %v9069_v3  ;;  %v9090_v3 = vld [vmem:[%s13166_s10 + $0x2c0] sm:$0xff] }
 0x3cc   : > { %13259 = vst [vmem:[#allocation125_spill] sm:$0xff] %v9072_v39  ;;  %v9093_v39 = vld [vmem:[%s13166_s10 + $0x2c8] sm:$0xff] }
 0x3cd   : > { %13260 = vst [vmem:[#allocation126_spill] sm:$0xff] %v9075_v47  ;;  %v9096_v47 = vld [vmem:[%s13166_s10 + $0x2d0] sm:$0xff] }
 0x3ce   : > { %13261 = vst [vmem:[#allocation127_spill] sm:$0xff] %v9078_v4  ;;  %v9099_v4 = vld [vmem:[%s13166_s10 + $0x2d8] sm:$0xff] }
 0x3cf   : > { %13262 = vst [vmem:[#allocation128_spill] sm:$0xff] %v9081_v32 }
 0x3d0   : > { %13263 = vst [vmem:[#allocation129_spill] sm:$0xff] %v9084_v20 }
 0x3d1   : > { %13264 = vst [vmem:[#allocation130_spill] sm:$0xff] %v9087_v46  ;;  %v9106_v46 = vld [vmem:[%s13166_s10 + $0x2e0] sm:$0xff] }
 0x3d2   : > { %13265 = vst [vmem:[#allocation131_spill] sm:$0xff] %v9090_v3  ;;  %v9109_v3 = vld [vmem:[%s13166_s10 + $0x2e8] sm:$0xff] }
 0x3d3   : > { %13266 = vst [vmem:[#allocation132_spill] sm:$0xff] %v9093_v39  ;;  %v9112_v39 = vld [vmem:[%s13166_s10 + $0x2f0] sm:$0xff] }
 0x3d4   : > { %13267 = vst [vmem:[#allocation133_spill] sm:$0xff] %v9096_v47  ;;  %v9115_v47 = vld [vmem:[%s13166_s10 + $0x2f8] sm:$0xff] }
 0x3d5   : > { %13268 = vst [vmem:[#allocation134_spill] sm:$0xff] %v9099_v4  ;;  %v9118_v4 = vld [vmem:[%s13166_s10 + $0x300] sm:$0xff] }
 0x3d6   : > { %13271 = vst [vmem:[#allocation137_spill] sm:$0xff] %v9106_v46  ;;  %v9127_v46 = vld [vmem:[%s13166_s10 + $0x318] sm:$0xff] }
 0x3d7   : > { %13272 = vst [vmem:[#allocation138_spill] sm:$0xff] %v9109_v3  ;;  %v9130_v3 = vld [vmem:[%s13166_s10 + $0x320] sm:$0xff] }
 0x3d8   : > { %13273 = vst [vmem:[#allocation139_spill] sm:$0xff] %v9112_v39  ;;  %v9133_v39 = vld [vmem:[%s13166_s10 + $0x328] sm:$0xff] }
 0x3d9   : > { %13274 = vst [vmem:[#allocation140_spill] sm:$0xff] %v9115_v47  ;;  %v9136_v47 = vld [vmem:[%s13166_s10 + $0x330] sm:$0xff] }
 0x3da   : > { %13275 = vst [vmem:[#allocation141_spill] sm:$0xff] %v9118_v4  ;;  %v9139_v4 = vld [vmem:[%s13166_s10 + $0x338] sm:$0xff] }
 0x3db   : > { %13276 = vst [vmem:[#allocation142_spill] sm:$0xff] %v9121_v5  ;;  %v9142_v5 = vld [vmem:[%s13166_s10 + $0x340] sm:$0xff] }
 0x3dc   : > { %13277 = vst [vmem:[#allocation143_spill] sm:$0xff] %v9124_v40  ;;  %v9145_v40 = vld [vmem:[%s13166_s10 + $0x348] sm:$0xff] }
 0x3dd   : > { %13278 = vst [vmem:[#allocation144_spill] sm:$0xff] %v9127_v46  ;;  %v9148_v46 = vld [vmem:[%s13166_s10 + $0x350] sm:$0xff] }
 0x3de   : > { %13279 = vst [vmem:[#allocation145_spill] sm:$0xff] %v9130_v3  ;;  %v9151_v3 = vld [vmem:[%s13166_s10 + $0x358] sm:$0xff] }
 0x3df   : > { %13280 = vst [vmem:[#allocation146_spill] sm:$0xff] %v9133_v39  ;;  %v9154_v39 = vld [vmem:[%s13166_s10 + $0x360] sm:$0xff] }
 0x3e0   : > { %13281 = vst [vmem:[#allocation147_spill] sm:$0xff] %v9136_v47  ;;  %v9157_v47 = vld [vmem:[%s13166_s10 + $0x368] sm:$0xff] }
 0x3e1   : > { %13282 = vst [vmem:[#allocation148_spill] sm:$0xff] %v9139_v4  ;;  %v9160_v4 = vld [vmem:[%s13166_s10 + $0x370] sm:$0xff] }
 0x3e2   : > { %13283 = vst [vmem:[#allocation149_spill] sm:$0xff] %v9142_v5  ;;  %v9163_v5 = vld [vmem:[%s13166_s10 + $0x378] sm:$0xff] }
 0x3e3   : > { %13284 = vst [vmem:[#allocation150_spill] sm:$0xff] %v9145_v40  ;;  %v9166_v40 = vld [vmem:[%s13166_s10 + $0x380] sm:$0xff] }
 0x3e4   : > { %13285 = vst [vmem:[#allocation151_spill] sm:$0xff] %v9148_v46  ;;  %v9169_v46 = vld [vmem:[%s13166_s10 + $0x388] sm:$0xff] }
 0x3e5   : > { %13286 = vst [vmem:[#allocation152_spill] sm:$0xff] %v9151_v3  ;;  %v9172_v3 = vld [vmem:[%s13166_s10 + $0x390] sm:$0xff] }
 0x3e6   : > { %13287 = vst [vmem:[#allocation153_spill] sm:$0xff] %v9154_v39  ;;  %v9175_v39 = vld [vmem:[%s13166_s10 + $0x398] sm:$0xff] }
 0x3e7   : > { %13288 = vst [vmem:[#allocation154_spill] sm:$0xff] %v9157_v47  ;;  %v9178_v47 = vld [vmem:[%s13166_s10 + $0x3a0] sm:$0xff] }
 0x3e8   : > { %13289 = vst [vmem:[#allocation155_spill] sm:$0xff] %v9160_v4  ;;  %v9181_v4 = vld [vmem:[%s13166_s10 + $0x3a8] sm:$0xff] }
 0x3e9   : > { %13290 = vst [vmem:[#allocation156_spill] sm:$0xff] %v9163_v5  ;;  %v9184_v5 = vld [vmem:[%s13166_s10 + $0x3b0] sm:$0xff] }
 0x3ea   : > { %13291 = vst [vmem:[#allocation157_spill] sm:$0xff] %v9166_v40  ;;  %v9187_v40 = vld [vmem:[%s13166_s10 + $0x3b8] sm:$0xff] }
 0x3eb   : > { %13292 = vst [vmem:[#allocation158_spill] sm:$0xff] %v9169_v46  ;;  %v9190_v46 = vld [vmem:[%s13166_s10 + $0x3c0] sm:$0xff] }
 0x3ec   : > { %13293 = vst [vmem:[#allocation159_spill] sm:$0xff] %v9172_v3  ;;  %v9193_v3 = vld [vmem:[%s13166_s10 + $0x3c8] sm:$0xff] }
 0x3ed   : > { %13294 = vst [vmem:[#allocation160_spill] sm:$0xff] %v9175_v39  ;;  %v9196_v39 = vld [vmem:[%s13166_s10 + $0x3d0] sm:$0xff] }
 0x3ee   : > { %13295 = vst [vmem:[#allocation161_spill] sm:$0xff] %v9178_v47  ;;  %v9199_v47 = vld [vmem:[%s13166_s10 + $0x3d8] sm:$0xff] }
 0x3ef   : > { %13296 = vst [vmem:[#allocation162_spill] sm:$0xff] %v9181_v4  ;;  %v9202_v4 = vld [vmem:[%s13166_s10 + $0x3e0] sm:$0xff] }
 0x3f0   : > { %13297 = vst [vmem:[#allocation163_spill] sm:$0xff] %v9184_v5  ;;  %v9205_v5 = vld [vmem:[%s13166_s10 + $0x3e8] sm:$0xff] }
 0x3f1   : > { %13298 = vst [vmem:[#allocation164_spill] sm:$0xff] %v9187_v40  ;;  %v9208_v40 = vld [vmem:[%s13166_s10 + $0x3f0] sm:$0xff] }
 0x3f2   : > { %v8981_v24 = vpop.f32.mrf.mxu0  ;;  %v8983_v25 = vpop.f32.mrf.mxu1  ;;  %13299 = vst [vmem:[#allocation165_spill] sm:$0xff] %v9190_v46  ;;  %v9211_v46 = vld [vmem:[%s13166_s10 + $0x3f8] sm:$0xff] }
 0x3f3   : > { %13227 = vst [vmem:[#allocation93_spill] sm:$0xff] %v8981_v24 }
 0x3f4   : > { %13228 = vst [vmem:[#allocation94_spill] sm:$0xff] %v8983_v25 }
 0x3f5   : > { %13300 = vst [vmem:[#allocation166_spill] sm:$0xff] %v9193_v3  ;;  %v9214_v3 = vld [vmem:[%s13166_s10 + $0x400] sm:$0xff] }
 0x3f6   : > { %v9021_v36 = vpop.f32.mrf.mxu2  ;;  %v9023_v37 = vpop.f32.mrf.mxu3  ;;  %13301 = vst [vmem:[#allocation167_spill] sm:$0xff] %v9196_v39  ;;  %v9217_v39 = vld [vmem:[%s13166_s10 + $0x408] sm:$0xff] }
 0x3f7   : > { %13241 = vst [vmem:[#allocation107_spill] sm:$0xff] %v9021_v36 }
 0x3f8   : > { %13242 = vst [vmem:[#allocation108_spill] sm:$0xff] %v9023_v37 }
 0x3f9   : > { %13302 = vst [vmem:[#allocation168_spill] sm:$0xff] %v9199_v47  ;;  %v9220_v47 = vld [vmem:[%s13166_s10 + $0x410] sm:$0xff] }
 0x3fa   : > { %v9061_v2 = vpop.f32.mrf.mxu0  ;;  %v9063_v38 = vpop.f32.mrf.mxu1  ;;  %13303 = vst [vmem:[#allocation169_spill] sm:$0xff] %v9202_v4  ;;  %v9223_v4 = vld [vmem:[%s13166_s10 + $0x418] sm:$0xff] }
 0x3fb   : > { %13255 = vst [vmem:[#allocation121_spill] sm:$0xff] %v9061_v2 }
 0x3fc   : > { %13256 = vst [vmem:[#allocation122_spill] sm:$0xff] %v9063_v38 }
 0x3fd   : > { %13304 = vst [vmem:[#allocation170_spill] sm:$0xff] %v9205_v5  ;;  %v9226_v5 = vld [vmem:[%s13166_s10 + $0x420] sm:$0xff] }
 0x3fe   : > { %v9101_v32 = vpop.f32.mrf.mxu2  ;;  %v9103_v20 = vpop.f32.mrf.mxu3  ;;  %13305 = vst [vmem:[#allocation171_spill] sm:$0xff] %v9208_v40  ;;  %v9229_v40 = vld [vmem:[%s13166_s10 + $0x428] sm:$0xff] }
 0x3ff   : > { %13269 = vst [vmem:[#allocation135_spill] sm:$0xff] %v9101_v32 }
 0x400   : > { %13270 = vst [vmem:[#allocation136_spill] sm:$0xff] %v9103_v20 }
 0x401   : > { %13306 = vst [vmem:[#allocation172_spill] sm:$0xff] %v9211_v46  ;;  %v9232_v46 = vld [vmem:[%s13166_s10 + $0x430] sm:$0xff] }
 0x402   : > { %13307 = vst [vmem:[#allocation173_spill] sm:$0xff] %v9214_v3  ;;  %v9235_v3 = vld [vmem:[%s13166_s10 + $0x438] sm:$0xff] }
 0x403   : > { %13308 = vst [vmem:[#allocation174_spill] sm:$0xff] %v9217_v39  ;;  %v9238_v39 = vld [vmem:[%s13166_s10 + $0x440] sm:$0xff] }
 0x404   : > { %13309 = vst [vmem:[#allocation175_spill] sm:$0xff] %v9220_v47  ;;  %v9241_v47 = vld [vmem:[%s13166_s10 + $0x448] sm:$0xff] }
 0x405   : > { %13310 = vst [vmem:[#allocation176_spill] sm:$0xff] %v9223_v4  ;;  %v9244_v4 = vld [vmem:[%s13166_s10 + $0x450] sm:$0xff] }
 0x406   : > { %13311 = vst [vmem:[#allocation177_spill] sm:$0xff] %v9226_v5  ;;  %v9247_v5 = vld [vmem:[%s13166_s10 + $0x458] sm:$0xff] }
 0x407   : > { %13312 = vst [vmem:[#allocation178_spill] sm:$0xff] %v9229_v40  ;;  %v9250_v40 = vld [vmem:[%s13166_s10 + $0x460] sm:$0xff] }
 0x408   : > { %13313 = vst [vmem:[#allocation179_spill] sm:$0xff] %v9232_v46  ;;  %v9253_v46 = vld [vmem:[%s13166_s10 + $0x468] sm:$0xff] }
 0x409   : > { %13314 = vst [vmem:[#allocation180_spill] sm:$0xff] %v9235_v3  ;;  %v9256_v3 = vld [vmem:[%s13166_s10 + $0x470] sm:$0xff] }
 0x40a   : > { %13315 = vst [vmem:[#allocation181_spill] sm:$0xff] %v9238_v39  ;;  %v9259_v39 = vld [vmem:[%s13166_s10 + $0x478] sm:$0xff] }
 0x40b   : > { %13316 = vst [vmem:[#allocation182_spill] sm:$0xff] %v9241_v47  ;;  %v9262_v47 = vld [vmem:[%s13166_s10 + $0x480] sm:$0xff] }
 0x40c   : > { %13317 = vst [vmem:[#allocation183_spill] sm:$0xff] %v9244_v4  ;;  %v9268_v4 = vld [vmem:[%s13166_s10 + $0x490] sm:$0xff] }
 0x40d   : > { %13318 = vst [vmem:[#allocation184_spill] sm:$0xff] %v9247_v5  ;;  %v9271_v5 = vld [vmem:[%s13166_s10 + $0x498] sm:$0xff] }
 0x40e   : > { %13319 = vst [vmem:[#allocation185_spill] sm:$0xff] %v9250_v40  ;;  %v9277_v40 = vld [vmem:[%s13166_s10 + $0x4a8] sm:$0xff] }
 0x40f   : > { %13320 = vst [vmem:[#allocation186_spill] sm:$0xff] %v9253_v46  ;;  %v9280_v46 = vld [vmem:[%s13166_s10 + $0x4b0] sm:$0xff] }
 0x410   : > { %13321 = vst [vmem:[#allocation187_spill] sm:$0xff] %v9256_v3  ;;  %v9286_v3 = vld [vmem:[%s13166_s10 + $0x4c0] sm:$0xff] }
 0x411   : > { %13322 = vst [vmem:[#allocation188_spill] sm:$0xff] %v9259_v39  ;;  %v9289_v39 = vld [vmem:[%s13166_s10 + $0x4c8] sm:$0xff] }
 0x412   : > { %13323 = vst [vmem:[#allocation189_spill] sm:$0xff] %v9262_v47  ;;  %v9295_v47 = vld [vmem:[%s13166_s10 + $0x4d8] sm:$0xff] }
 0x413   : > { %13324 = vst [vmem:[#allocation190_spill] sm:$0xff] %v9265_v21  ;;  %v9298_v21 = vld [vmem:[%s13166_s10 + $0x4e0] sm:$0xff] }
 0x414   : > { %13325 = vst [vmem:[#allocation191_spill] sm:$0xff] %v9268_v4  ;;  %v9301_v4 = vld [vmem:[%s13166_s10 + $0x4e8] sm:$0xff] }
 0x415   : > { %13326 = vst [vmem:[#allocation192_spill] sm:$0xff] %v9271_v5  ;;  %v9304_v5 = vld [vmem:[%s13166_s10 + $0x4f0] sm:$0xff] }
 0x416   : > { %13327 = vst [vmem:[#allocation193_spill] sm:$0xff] %v9274_v6  ;;  %v9307_v6 = vld [vmem:[%s13166_s10 + $0x4f8] sm:$0xff] }
 0x417   : > { %13328 = vst [vmem:[#allocation194_spill] sm:$0xff] %v9277_v40 }
 0x418   : > { %13329 = vst [vmem:[#allocation195_spill] sm:$0xff] %v9280_v46 }
 0x419   : > { %13330 = vst [vmem:[#allocation196_spill] sm:$0xff] %v9283_v33 }
 0x41a   : > { %13331 = vst [vmem:[#allocation197_spill] sm:$0xff] %v9286_v3 }
 0x41b   : > { %13332 = vst [vmem:[#allocation198_spill] sm:$0xff] %v9289_v39 }
 0x41c   : > { %13333 = vst [vmem:[#allocation199_spill] sm:$0xff] %v9292_v22 }
 0x41d   : > { %13334 = vst [vmem:[#allocation200_spill] sm:$0xff] %v9295_v47 }
 0x41e   : > { %13335 = vst [vmem:[#allocation201_spill] sm:$0xff] %v9298_v21 }
 0x41f   : > { %13336 = vst [vmem:[#allocation202_spill] sm:$0xff] %v9301_v4 }
 0x420   : > { %13337 = vst [vmem:[#allocation203_spill] sm:$0xff] %v9304_v5 }
 0x421   : > { %13338 = vst [vmem:[#allocation204_spill] sm:$0xff] %v9307_v6 }
 0x422 LB: >> { %v13339_v38 = vld [vmem:[#allocation122_spill] sm:$0xff]  ;;  %v13340_v37 = vld [vmem:[#allocation108_spill] sm:$0xff]  ;;  %v13341_v36 = vld [vmem:[#allocation107_spill] sm:$0xff]  ;;  %s13351_s15 = sld [smem:[#allocation16_spill]]  ;;  %s7622_s18 = smul.u32 48, %s8328_s0  ;;  %vm2137_vm7 = vcmask 261120   ;;  %s8328_s0 = sphi %s9309_s0, %s2091_s0  }
 0x423   : >> { %v13342_v32 = vld [vmem:[#allocation135_spill] sm:$0xff]  ;;  %v13343_v29 = vld [vmem:[#allocation36_spill] sm:$0xff]  ;;  %v13345_v27 = vld [vmem:[#allocation34_spill] sm:$0xff]  ;;  %s13352_s16 = sld [smem:[#allocation15_spill]]  ;;  %s7624_s28 = smul.u32 6, %s8328_s0  ;;  %vm2363_vm8 = vcmask 1043456  }
 0x424   : >> { %v13344_v28 = vld [vmem:[#allocation35_spill] sm:$0xff]  ;;  %v13346_v26 = vld [vmem:[#allocation33_spill] sm:$0xff]  ;;  %v13347_v25 = vld [vmem:[#allocation94_spill] sm:$0xff]  ;;  %s13353_s26 = sld [smem:[#allocation17_spill]]  ;;  %vm2350_vm9 = vcmask 31744   ;;  %vm2839_vm10 = vcmask 523264  }
 0x425   : >> { %v13348_v24 = vld [vmem:[#allocation93_spill] sm:$0xff]  ;;  %v13349_v20 = vld [vmem:[#allocation136_spill] sm:$0xff]  ;;  %vm6278_vm11 = vcmask 64512  }
 0x426   : >> { %v13350_v2 = vld [vmem:[#allocation121_spill] sm:$0xff] }
 0x428   : >> { %s2116_s22 = scalar_lea.vmem %s13351_s15, %s7622_s18  ;;  %s13354_s15 = sld [smem:[#allocation19_spill]] }
 0x429   : >> { %v2123_v40 = vld [vmem:[%s2116_s22 + $0x24] sm:$0xff]  ;;  %v2124_v46 = vld [vmem:[%s2116_s22 + $0x2c] sm:$0xf]  ;;  %s9317_s23 = scalar_lea.vmem %s13352_s16, %s7622_s18  ;;  %v2121_v33 = vld [vmem:[%s2116_s22 + $0x18] sm:$0xff]  ;;  %s7625_s16 = smul.u32 800, %s8328_s0 }
 0x42a   : >> { %v2134_v3 = vunpack.c.l.bf16 %v2123_v40  ;;  %v2136_v39 = vunpack.c.l.bf16 %v2124_v46  ;;  %v2101_v22 = vld [vmem:[%s9317_s23 + $0x24] sm:$0xff]  ;;  %v2131_v47 = vunpack.c.l.bf16 %v2121_v33  ;;  %v2135_v21 = vunpack.c.h.bf16 %v2123_v40  ;;  %v2122_v4 = vld [vmem:[%s2116_s22 + $0x20] sm:$0xf]  ;;  %v2099_v5 = vld [vmem:[%s9317_s23 + $0x18] sm:$0xff]  ;;  %s2338_s1 = scalar_lea.vmem %s13353_s26, %s7624_s28  ;;  %s7626_s28 = smul.u32 3200, %s8328_s0 }
 0x42b   : >> { %v2112_v6 = vunpack.c.l.bf16 %v2101_v22  ;;  %v2133_v7 = vunpack.c.l.bf16 %v2122_v4  ;;  %v2109_v41 = vunpack.c.l.bf16 %v2099_v5  ;;  %v2119_v23 = vld [vmem:[%s2116_s22 + $0xc] sm:$0xff]  ;;  %v2132_v8 = vunpack.c.h.bf16 %v2121_v33  ;;  %v2120_v0 = vld [vmem:[%s2116_s22 + $0x14] sm:$0xf]  ;;  %v2117_v46 = vld [vmem:[%s2116_s22] sm:$0xff] }
 0x42c   : >> { %v2097_v44 = vld [vmem:[%s9317_s23 + $0xc] sm:$0xff]  ;;  %2162 = vmatpush.msra.mxu0 %v2134_v3  ;;  %2220 = vmatpush.msra.mxu2 %v2136_v39  ;;  %v2128_v9 = vunpack.c.l.bf16 %v2119_v23  ;;  %v2130_v34 = vunpack.c.l.bf16 %v2120_v0  ;;  %v2118_v45 = vld [vmem:[%s2116_s22 + $0x8] sm:$0xf]  ;;  %v2095_v10 = vld [vmem:[%s9317_s23] sm:$0xff]  ;;  %v2129_v42 = vunpack.c.h.bf16 %v2119_v23  ;;  %v2125_v4 = vunpack.c.l.bf16 %v2117_v46  ;;  %s2336_s22 = smul.u32 3, %s8328_s0 }
 0x42d   : >> { %2261 = vmatpush.msra.mxu3 %v2112_v6  ;;  %2191 = vmatpush.msra.mxu1 %v2135_v21  ;;  %v2106_v40 = vunpack.c.l.bf16 %v2097_v44  ;;  %v2339_v16 = vld [vmem:[%s2338_s1] sm:$0x3f]  ;;  %v2127_v33 = vunpack.c.l.bf16 %v2118_v45  ;;  %v2103_v3 = vunpack.c.l.bf16 %v2095_v10  ;;  %v2102_v0 = vld [vmem:[%s9317_s23 + $0x2c] sm:$0xf]  ;;  %v2113_v6 = vunpack.c.h.bf16 %v2101_v22  ;;  %s9882_s1 = scalar_lea.vmem [#allocation5], %s7626_s28  ;;  %s7573_s28 = sshll.u32 %s8328_s0, 5 }
 0x42e   : >> { %2163 = vmatpush.msra.mxu0 %v2131_v47  ;;  %2221 = vmatpush.msra.mxu2 %v2133_v7  ;;  %v2340_v39 = vunpack.c.l.bf16 %v2339_v16  ;;  %v2341_v11 = vunpack.c.h.bf16 %v2339_v16  ;;  %v2126_v21 = vunpack.c.h.bf16 %v2117_v46  ;;  %v2110_v45 = vunpack.c.h.bf16 %v2099_v5  ;;  %v2098_v16 = vld [vmem:[%s9317_s23 + $0x14] sm:$0xf]  ;;  %v2096_v5 = vld [vmem:[%s9317_s23 + $0x8] sm:$0xf]  ;;  %s9406_s18 = scalar_lea.vmem %s13354_s15, %s7625_s16  ;;  %s13356_s15 = sld [smem:[#allocation20_spill]] }
 0x42f   : >> { %2262 = vmatpush.msra.mxu3 %v2109_v41  ;;  %2192 = vmatpush.msra.mxu1 %v2132_v8  ;;  %v2114_v7 = vunpack.c.l.bf16 %v2102_v0  ;;  %v2100_v8 = vld [vmem:[%s9317_s23 + $0x20] sm:$0xf]  ;;  %v2108_v47 = vunpack.c.l.bf16 %v2098_v16  ;;  %v2105_v22 = vunpack.c.l.bf16 %v2096_v5  ;;  %v9410_v23 = vld [vmem:[%s9406_s18 + $0x26c] sm:$0xff]  ;;  %v9531_v1 = vld [vmem:[%s9406_s18 + $0x2e4] sm:$0xff]  ;;  %s13355_s23 = sld [smem:[#allocation18_spill]]  ;;  %s2825_s16 = smul.u32 5, %s8328_s0 }
 0x430   : >> { %2164 = vmatpush.msra.mxu0 %v2128_v9  ;;  %2222 = vmatpush.msra.mxu2 %v2130_v34  ;;  %2344 = vst [vmem:[#allocation1] ss:$2 sm:$0xff] %v2340_v39  ;;  %v2107_v9 = vunpack.c.h.bf16 %v2097_v44  ;;  %v9425_v16 = vld [vmem:[%s9406_s18 + $0x230] sm:$0xff]  ;;  %v9565_v13 = vld [vmem:[%s9406_s18 + $0x1e8] sm:$0xff]  ;;  %v9568_v43 = vld [vmem:[%s9406_s18 + $0x2bc] sm:$0xff] }
 0x431   : >> { %2263 = vmatpush.msra.mxu3 %v2106_v40  ;;  %2193 = vmatpush.msra.mxu1 %v2129_v42  ;;  %2346 = vst [vmem:[#allocation1 + $0x10] ss:$2 sm:$0xff] %v2341_v11  ;;  %v2111_v11 = vunpack.c.l.bf16 %v2100_v8  ;;  %v2104_v42 = vunpack.c.h.bf16 %v2095_v10  ;;  %v2550_v10 = vld [vmem:[%s9406_s18 + $0x12c] sm:$0xff]  ;;  %v2780_v40 = vunpack.c.l.bf16 %v9410_v23  ;;  %v9589_v14 = vld [vmem:[%s9406_s18 + $0x1c0] sm:$0xff] }
 0x432   : >> { %2165 = vmatpush.msra.mxu0 %v2125_v4  ;;  %2223 = vmatpush.msra.mxu2 %v2127_v33  ;;  %v2700_v46 = vunpack.c.l.bf16 %v2550_v10  ;;  %v2701_v4 = vunpack.c.h.bf16 %v2550_v10  ;;  %v2547_v33 = vld [vmem:[%s9406_s18 + $0x118] sm:$0xff]  ;;  %v9620_v31 = vld [vmem:[%s9406_s18 + $0x280] sm:$0xff]  ;;  %v9632_v49 = vld [vmem:[%s9406_s18 + $0x170] sm:$0xff] }
 0x433   : >> { %2264 = vmatpush.msra.mxu3 %v2103_v3  ;;  %7511 = vmatmul.msk.f32.vlgmr.msra.gmra.mxu0 %vm2137_vm7, %v13347_v25  ;;  %v9415_v3 = vld [vmem:[%s9406_s18 + $0x258] sm:$0xff]  ;;  %v2695_v39 = vunpack.c.l.bf16 %v2547_v33  ;;  %v9726_v55 = vld [vmem:[%s9406_s18 + $0x30] sm:$0xff] }
 0x434   : >> { %7519 = vmatmul.msk.f32.vlgmr.msra.gmra.mxu2 %vm2137_vm7, %v13347_v25  ;;  %7523 = vmatmul.msk.f32.vlgmr.msra.gmra.mxu3 %vm2137_vm7, %v13348_v24  ;;  %v2775_v0 = vunpack.c.l.bf16 %v9415_v3  ;;  %v9639_v52 = vld [vmem:[%s9406_s18 + $0x15c] sm:$0xff]  ;;  %v10130_v59 = vld [vmem:[%s9882_s1 + $0x550] sm:$0xff] }
 0x435   : >> { %2290 = vmatpush.msrb.mxu0 %v2113_v6  ;;  %2194 = vmatpush.msra.mxu1 %v2126_v21  ;;  %v2696_v6 = vunpack.c.h.bf16 %v2547_v33  ;;  %v2544_v21 = vld [vmem:[%s9406_s18 + $0x104] sm:$0xff]  ;;  %s2469_s26 = scalar_lea.vmem %s13355_s23, %s2336_s22  ;;  %v10155_v60 = vld [vmem:[%s9882_s1 + $0x9b0] sm:$0xff]  ;;  %s4510_s22 = smul.u32 10, %s8328_s0 }
 0x436   : >> { %7515 = vmatmul.msk.f32.vlgmr.msra.gmra.mxu1 %vm2137_vm7, %v13347_v25  ;;  %s13633_s23 = sld [smem:[#allocation21_spill]]  ;;  %s2091_s0 = sadd.s32 1, %s8328_s0  }
 0x437   : >> { %2291 = vmatpush.msrb.mxu0 %v2110_v45  ;;  %2319 = vmatpush.msrb.mxu1 %v2114_v7  ;;  %v2348_v34 = vld.sshfl [vmem:[#allocation1 + $0x8] sm:$0xff pattern:$0x75316420]  ;;  %v2347_v41 = vld.sshfl [vmem:[#allocation1] sm:$0xff pattern:$0x75316420]  ;;  %v2690_v7 = vunpack.c.l.bf16 %v2544_v21 }
 0x438   : >> { %7541 = vmatpush.msk.msrb.mxu3 %vm2363_vm8, %v2348_v34  ;;  %7536 = vmatpush.msk.msrb.mxu2 %vm2363_vm8, %v2347_v41  ;;  %v2349_v44 = vld.sshfl [vmem:[#allocation1 + $0x10] sm:$0xff pattern:$0x75316420]  ;;  %v9420_v45 = vld [vmem:[%s9406_s18 + $0x244] sm:$0xff]  ;;  %v2765_v34 = vunpack.c.l.bf16 %v9425_v16  ;;  %p2088_p2 = scmp.ge.s32.totalorder %s2091_s0, 8  }
 0x439   : >> { %2292 = vmatpush.msrb.mxu0 %v2107_v9  ;;  %2320 = vmatpush.msrb.mxu1 %v2111_v11  ;;  %v2770_v8 = vunpack.c.l.bf16 %v9420_v45  ;;  %v2691_v9 = vunpack.c.h.bf16 %v2544_v21  ;;  %v2541_v11 = vld [vmem:[%s9406_s18 + $0xf0] sm:$0xff]  ;;  %s13913_s0 = sld [smem:[#allocation22_spill]] (%p2088_p2)  ;;  %p7612_p3 = scmp.ne.s32.totalorder (%p2088_p2), %s8574_s11, 2 }
 0x43a   : >> { %2881 = vmatpush.msra.mxu2 %v2780_v40  ;;  %v2685_v5 = vunpack.c.l.bf16 %v2541_v11  ;;  %v2686_v41 = vunpack.c.h.bf16 %v2541_v11  ;;  %v9435_v40 = vld [vmem:[%s9406_s18 + $0x208] sm:$0xff]  ;;  %v9445_v11 = vld [vmem:[%s9406_s18 + $0x1e0] sm:$0xff] }
 0x43b   : >> { %7512 = vmatmul.msk.f32.gmra.mxu0 %vm2137_vm7, %v13339_v38  ;;  %2321 = vmatpush.msrb.mxu1 %v2108_v47  ;;  %v9430_v47 = vld [vmem:[%s9406_s18 + $0x21c] sm:$0xff]  ;;  %v2755_v33 = vunpack.c.l.bf16 %v9435_v40 }
 0x43c   : >> { %7520 = vmatmul.msk.f32.gmra.mxu2 %vm2137_vm7, %v13339_v38  ;;  %7524 = vmatmul.msk.f32.gmra.mxu3 %vm2137_vm7, %v13350_v2 }
 0x43d   : >> { %2293 = vmatpush.msrb.mxu0 %v2104_v42  ;;  %2322 = vmatpush.msrb.mxu1 %v2105_v22  ;;  %v2538_v42 = vld [vmem:[%s9406_s18 + $0xdc] sm:$0xff]  ;;  %v2760_v22 = vunpack.c.l.bf16 %v9430_v47 }
 0x43e   : >> { %7516 = vmatmul.msk.f32.gmra.mxu1 %vm2137_vm7, %v13339_v38  ;;  %2882 = vmatpush.msra.mxu2 %v2775_v0  ;;  %v2681_v10 = vunpack.c.h.bf16 %v2538_v42  ;;  %v2532_v0 = vld [vmem:[%s9406_s18 + $0xb4] sm:$0xff] }
 0x43f   : >> { %7546 = vmatpush.msk.msra.mxu0 %vm2363_vm8, %v2349_v44  ;;  %2852 = vmatpush.msra.mxu1 %v2700_v46  ;;  %v2680_v44 = vunpack.c.l.bf16 %v2538_v42  ;;  %v2535_v46 = vld [vmem:[%s9406_s18 + $0xc8] sm:$0xff]  ;;  %v2670_v21 = vunpack.c.l.bf16 %v2532_v0  ;;  %v9528_v38 = vld [vmem:[%s9406_s18 + $0x238] sm:$0xff] }
 0x440   : >> { %2883 = vmatpush.msra.mxu2 %v2770_v8  ;;  %v2671_v8 = vunpack.c.h.bf16 %v2532_v0  ;;  %v2526_v42 = vld [vmem:[%s9406_s18 + $0x8c] sm:$0xff] }
 0x441   : >> { %2853 = vmatpush.msra.mxu1 %v2695_v39  ;;  %v2676_v39 = vunpack.c.h.bf16 %v2535_v46 }
 0x442   : >> { %2884 = vmatpush.msra.mxu2 %v2765_v34  ;;  %v2745_v34 = vunpack.c.l.bf16 %v9445_v11 }
 0x443   : >> { %7513 = vmatmul.msk.f32.gmra.mxu0 %vm2137_vm7, %v13340_v37  ;;  %2854 = vmatpush.msra.mxu1 %v2690_v7 }
 0x444   : >> { %7521 = vmatmul.msk.f32.gmra.mxu2 %vm2137_vm7, %v13340_v37  ;;  %7525 = vmatmul.msk.f32.gmra.mxu3 %vm2137_vm7, %v13341_v36 }
 0x445   : >> { %2855 = vmatpush.msra.mxu1 %v2685_v5  ;;  %2885 = vmatpush.msra.mxu2 %v2760_v22  ;;  %v2660_v22 = vunpack.c.l.bf16 %v2526_v42 }
 0x446   : >> { %7517 = vmatmul.msk.f32.gmra.mxu1 %vm2137_vm7, %v13340_v37  ;;  %v2771_v37 = vunpack.c.h.bf16 %v9420_v45  ;;  %v9541_v45 = vld [vmem:[%s9406_s18 + $0x224] sm:$0xff] }
 0x447   : >> { %2856 = vmatpush.msra.mxu1 %v2680_v44  ;;  %2886 = vmatpush.msra.mxu2 %v2755_v33  ;;  %v9450_v44 = vld [vmem:[%s9406_s18 + $0x1cc] sm:$0xff]  ;;  %v9455_v33 = vld [vmem:[%s9406_s18 + $0x1b8] sm:$0xff] }
 0x448   : >> { %v2735_v0 = vunpack.c.l.bf16 %v9455_v33 }
 0x44b   : >> { %7514 = vmatmul.msk.f32.gmra.mxu0 %vm2137_vm7, %v13349_v20 }
 0x44c   : >> { %7522 = vmatmul.msk.f32.gmra.mxu2 %vm2137_vm7, %v13349_v20  ;;  %7526 = vmatmul.msk.f32.gmra.mxu3 %vm2137_vm7, %v13342_v32 }
 0x44e   : >> { %7518 = vmatmul.msk.f32.gmra.mxu1 %vm2137_vm7, %v13349_v20  ;;  %v2511_v20 = vld [vmem:[%s9406_s18 + $0x28] sm:$0xff] }
 0x453   : >> { %7527 = vmatmul.msk.f32.vlgmr.msrb.gmra.mxu0 %vm2137_vm7, %v13348_v24 }
 0x454   : >> { %7537 = vmatmul.msk.f32.vlgmr.msrb.gmra.mxu2 %vm2350_vm9, %v13346_v26  ;;  %7542 = vmatmul.msk.f32.vlgmr.msrb.gmra.mxu3 %vm2350_vm9, %v13346_v26 }
 0x455   : >> { %2939 = vmatpush.msrb.mxu0 %v2701_v4  ;;  %v2675_v4 = vunpack.c.l.bf16 %v2535_v46  ;;  %v2661_v46 = vunpack.c.h.bf16 %v2526_v42  ;;  %v2517_v42 = vld [vmem:[%s9406_s18 + $0x50] sm:$0xff] }
 0x456   : >> { %7531 = vmatmul.msk.f32.vlgmr.msrb.gmra.mxu1 %vm2137_vm7, %v13348_v24 }
 0x457   : >> { %2940 = vmatpush.msrb.mxu0 %v2696_v6  ;;  %v9440_v6 = vld [vmem:[%s9406_s18 + $0x1f4] sm:$0xff]  ;;  %2857 = vmatpush.msra.mxu1 %v2675_v4 }
 0x458   : >> { %v2750_v7 = vunpack.c.l.bf16 %v9440_v6  ;;  %v2523_v4 = vld [vmem:[%s9406_s18 + $0x78] sm:$0xff] }
 0x459   : >> { %2941 = vmatpush.msrb.mxu0 %v2691_v9  ;;  %v2529_v9 = vld [vmem:[%s9406_s18 + $0xa0] sm:$0xff]  ;;  %2858 = vmatpush.msra.mxu1 %v2670_v21  ;;  %v2656_v21 = vunpack.c.h.bf16 %v2523_v4 }
 0x45a   : >> { %2887 = vmatpush.msra.mxu2 %v2750_v7  ;;  %v2665_v5 = vunpack.c.l.bf16 %v2529_v9 }
 0x45b   : >> { %7528 = vmatmul.msk.f32.gmra.mxu0 %vm2137_vm7, %v13350_v2 }
 0x45c   : >> { %7538 = vmatmul.msk.f32.gmra.mxu2 %vm2350_vm9, %v13345_v27  ;;  %7543 = vmatmul.msk.f32.gmra.mxu3 %vm2350_vm9, %v13345_v27 }
 0x45d   : >> { %2942 = vmatpush.msrb.mxu0 %v2686_v41  ;;  %v2666_v41 = vunpack.c.h.bf16 %v2529_v9  ;;  %2859 = vmatpush.msra.mxu1 %v2665_v5  ;;  %v9462_v9 = vld [vmem:[%s9406_s18 + $0x1a4] sm:$0xff] }
 0x45e   : >> { %7532 = vmatmul.msk.f32.gmra.mxu1 %vm2137_vm7, %v13350_v2  ;;  %2888 = vmatpush.msra.mxu2 %v2745_v34  ;;  %v2730_v34 = vunpack.c.l.bf16 %v9462_v9  ;;  %v2514_v2 = vld [vmem:[%s9406_s18 + $0x3c] sm:$0xff] }
 0x45f   : >> { %2943 = vmatpush.msrb.mxu0 %v2681_v10  ;;  %v2740_v10 = vunpack.c.l.bf16 %v9450_v44  ;;  %2860 = vmatpush.msra.mxu1 %v2660_v22  ;;  %v9467_v22 = vld [vmem:[%s9406_s18 + $0x190] sm:$0xff] }
 0x461   : >> { %2944 = vmatpush.msrb.mxu0 %v2676_v39  ;;  %2889 = vmatpush.msra.mxu2 %v2740_v10  ;;  %v2655_v39 = vunpack.c.l.bf16 %v2523_v4  ;;  %v2645_v10 = vunpack.c.l.bf16 %v2517_v42  ;;  %v2646_v4 = vunpack.c.h.bf16 %v2517_v42 }
 0x463   : >> { %7529 = vmatmul.msk.f32.gmra.mxu0 %vm2137_vm7, %v13341_v36  ;;  %2861 = vmatpush.msra.mxu1 %v2655_v39  ;;  %v9472_v39 = vld [vmem:[%s9406_s18 + $0x17c] sm:$0xff] }
 0x464   : >> { %7539 = vmatmul.msk.f32.gmra.mxu2 %vm2350_vm9, %v13344_v28  ;;  %7544 = vmatmul.msk.f32.gmra.mxu3 %vm2350_vm9, %v13344_v28 }
 0x465   : >> { %2945 = vmatpush.msrb.mxu0 %v2671_v8  ;;  %v2520_v8 = vld [vmem:[%s9406_s18 + $0x64] sm:$0xff]  ;;  %2890 = vmatpush.msra.mxu2 %v2735_v0  ;;  %v2640_v0 = vunpack.c.l.bf16 %v2514_v2 }
 0x466   : >> { %7533 = vmatmul.msk.f32.gmra.mxu1 %vm2137_vm7, %v13341_v36  ;;  %v2650_v5 = vunpack.c.l.bf16 %v2520_v8  ;;  %v9516_v36 = vld [vmem:[%s9406_s18 + $0x260] sm:$0xff] }
 0x467   : >> { %2946 = vmatpush.msrb.mxu0 %v2666_v41  ;;  %v2651_v41 = vunpack.c.h.bf16 %v2520_v8  ;;  %2891 = vmatpush.msra.mxu2 %v2730_v34  ;;  %v2641_v8 = vunpack.c.h.bf16 %v2514_v2  ;;  %v2508_v2 = vld [vmem:[%s9406_s18 + $0x14] sm:$0xff] }
 0x468   : >> { %2862 = vmatpush.msra.mxu1 %v2650_v5  ;;  %v9477_v5 = vld [vmem:[%s9406_s18 + $0x168] sm:$0xff]  ;;  %v2630_v25 = vunpack.c.l.bf16 %v2508_v2 }
 0x469   : >> { %2947 = vmatpush.msrb.mxu0 %v2661_v46  ;;  %v2725_v46 = vunpack.c.l.bf16 %v9467_v22  ;;  %v2715_v42 = vunpack.c.l.bf16 %v9477_v5 }
 0x46a   : >> { %2863 = vmatpush.msra.mxu1 %v2645_v10  ;;  %v2636_v10 = vunpack.c.h.bf16 %v2511_v20 }
 0x46b   : >> { %7530 = vmatmul.msk.f32.gmra.mxu0 %vm2137_vm7, %v13342_v32  ;;  %2892 = vmatpush.msra.mxu2 %v2725_v46 }
 0x46c   : >> { %7540 = vmatmul.msk.f32.gmra.mxu2 %vm2350_vm9, %v13343_v29  ;;  %7545 = vmatmul.msk.f32.gmra.mxu3 %vm2350_vm9, %v13343_v29 }
 0x46d   : >> { %2948 = vmatpush.msrb.mxu0 %v2656_v21  ;;  %v2720_v21 = vunpack.c.l.bf16 %v9472_v39  ;;  %2864 = vmatpush.msra.mxu1 %v2640_v0  ;;  %v2631_v0 = vunpack.c.h.bf16 %v2508_v2 }
 0x46e   : >> { %7534 = vmatmul.msk.f32.gmra.mxu1 %vm2137_vm7, %v13342_v32 }
 0x46f   : >> { %2949 = vmatpush.msrb.mxu0 %v2651_v41  ;;  %2893 = vmatpush.msra.mxu2 %v2720_v21  ;;  %v2635_v41 = vunpack.c.l.bf16 %v2511_v20  ;;  %v2505_v21 = vld [vmem:[%s9406_s18] sm:$0xff] }
 0x470   : >> { %v2625_v20 = vunpack.c.l.bf16 %v2505_v21 }
 0x471   : >> { %2950 = vmatpush.msrb.mxu0 %v2646_v4  ;;  %v9488_v4 = vld [vmem:[%s9406_s18 + $0x154] sm:$0xff]  ;;  %2865 = vmatpush.msra.mxu1 %v2635_v41 }
 0x472   : >> { %2894 = vmatpush.msra.mxu2 %v2715_v42  ;;  %v9500_v41 = vld [vmem:[%s9406_s18 + $0x2f8] sm:$0xff] }
 0x473   : >> { %7547 = vmatmul.msk.f32.vlgmr.msra.gmra.mxu0 %vm2350_vm9, %v13346_v26  ;;  %v2710_v26 = vunpack.c.l.bf16 %v9488_v4  ;;  %2866 = vmatpush.msra.mxu1 %v2630_v25  ;;  %v2815_v2 = vunpack.c.l.bf16 %v9500_v41  ;;  %v2781_v25 = vunpack.c.h.bf16 %v9410_v23  ;;  %v2777_v23 = vunpack.c.l.bf16 %v9516_v36 }
 0x474   : >> { %2951 = vmatpush.msrb.mxu0 %v2641_v8 }
 0x475   : >> { %2895 = vmatpush.msra.mxu2 %v2710_v26  ;;  %2867 = vmatpush.msra.mxu1 %v2625_v20 }
 0x476   : >> { %2952 = vmatpush.msrb.mxu0 %v2636_v10  ;;  %v9505_v10 = vld [vmem:[%s9406_s18 + $0x274] sm:$0xff] }
 0x477   : >> { %2968 = vmatpush.msrb.mxu1 %v2781_v25  ;;  %v2766_v25 = vunpack.c.h.bf16 %v9425_v16  ;;  %v9550_v16 = vld [vmem:[%s9406_s18 + $0x210] sm:$0xff] }
 0x478   : >> { %2953 = vmatpush.msrb.mxu0 %v2631_v0 }
 0x47b   : >> { %7548 = vmatmul.msk.f32.gmra.mxu0 %vm2350_vm9, %v13345_v27  ;;  %v9493_v27 = vld [vmem:[%s9406_s18 + $0x140] sm:$0xff] }
 0x47c   : >> { %v2705_v8 = vunpack.c.l.bf16 %v9493_v27 }
 0x47e   : >> { %2896 = vmatpush.msra.mxu2 %v2705_v8  ;;  %v9523_v8 = vld [vmem:[%s9406_s18 + $0x24c] sm:$0xff] }
 0x483   : >> { %7549 = vmatmul.msk.f32.gmra.mxu0 %vm2350_vm9, %v13344_v28  ;;  %v2626_v28 = vunpack.c.h.bf16 %v2505_v21  ;;  %v2782_v21 = vunpack.c.l.bf16 %v9505_v10 }
 0x485   : >> { %2954 = vmatpush.msrb.mxu0 %v2626_v28  ;;  %v2776_v28 = vunpack.c.h.bf16 %v9415_v3  ;;  %v9534_v3 = vld [vmem:[%s9406_s18 + $0x2d0] sm:$0xff] }
 0x487   : >> { %3055 = vmatpush.msra.mxu0 %v2782_v21  ;;  %2969 = vmatpush.msrb.mxu1 %v2776_v28  ;;  %v2810_v21 = vunpack.c.l.bf16 %v9531_v1  ;;  %v2805_v28 = vunpack.c.l.bf16 %v9534_v3 }
 0x489   : >> { %3056 = vmatpush.msra.mxu0 %v2777_v23  ;;  %2970 = vmatpush.msrb.mxu1 %v2771_v37  ;;  %v2761_v23 = vunpack.c.h.bf16 %v9430_v47  ;;  %v2762_v37 = vunpack.c.l.bf16 %v9541_v45  ;;  %v2756_v47 = vunpack.c.h.bf16 %v9435_v40  ;;  %v9571_v40 = vld [vmem:[%s9406_s18 + $0x2a8] sm:$0xff] }
 0x48b   : >> { %7550 = vmatmul.msk.f32.gmra.mxu0 %vm2350_vm9, %v13343_v29  ;;  %v9497_v29 = vld [vmem:[%s9406_s18 + $0x30c] sm:$0xff]  ;;  %2971 = vmatpush.msrb.mxu1 %v2766_v25  ;;  %v2757_v25 = vunpack.c.l.bf16 %v9550_v16 }
 0x48c   : >> { %v2820_v42 = vunpack.c.l.bf16 %v9497_v29 }
 0x48d   : >> { %2972 = vmatpush.msrb.mxu1 %v2761_v23  ;;  %v2747_v23 = vunpack.c.l.bf16 %v9565_v13 }
 0x48e   : >> { %2918 = vmatpush.msra.mxu3 %v2820_v42  ;;  %v2772_v42 = vunpack.c.l.bf16 %v9523_v8 }
 0x48f   : >> { %2973 = vmatpush.msrb.mxu1 %v2756_v47  ;;  %v9578_v47 = vld [vmem:[%s9406_s18 + $0x1d4] sm:$0xff] }
 0x490   : >> { %2919 = vmatpush.msra.mxu3 %v2815_v2  ;;  %3057 = vmatpush.msra.mxu0 %v2772_v42  ;;  %v2767_v2 = vunpack.c.l.bf16 %v9528_v38 }
 0x492   : >> { %3058 = vmatpush.msra.mxu0 %v2767_v2  ;;  %2920 = vmatpush.msra.mxu3 %v2810_v21  ;;  %v9559_v2 = vld [vmem:[%s9406_s18 + $0x1fc] sm:$0xff]  ;;  %v2751_v21 = vunpack.c.h.bf16 %v9440_v6  ;;  %v2795_v6 = vunpack.c.l.bf16 %v9571_v40 }
 0x493   : >> { %v2752_v18 = vunpack.c.l.bf16 %v9559_v2 }
 0x494   : >> { %3059 = vmatpush.msra.mxu0 %v2762_v37  ;;  %2921 = vmatpush.msra.mxu3 %v2805_v28  ;;  %v2746_v28 = vunpack.c.h.bf16 %v9445_v11  ;;  %v2800_v37 = vunpack.c.l.bf16 %v9568_v43 }
 0x495   : >> { %2974 = vmatpush.msrb.mxu1 %v2751_v21  ;;  %v2742_v21 = vunpack.c.l.bf16 %v9578_v47 }
 0x496   : >> { %3060 = vmatpush.msra.mxu0 %v2757_v25  ;;  %v2741_v25 = vunpack.c.h.bf16 %v9450_v44  ;;  %2922 = vmatpush.msra.mxu3 %v2800_v37  ;;  %v2736_v44 = vunpack.c.h.bf16 %v9455_v33  ;;  %v9599_v37 = vld [vmem:[%s2469_s26] sm:$0x7]  ;;  %s11983_s26 = scalar_lea.vmem %s13633_s23, %s4510_s22  ;;  %s13919_s22 = sld [smem:[#allocation24_spill]] (%p2088_p2) }
 0x497   : >> { %2975 = vmatpush.msrb.mxu1 %v2746_v28  ;;  %v2816_v28 = vunpack.c.h.bf16 %v9500_v41  ;;  %v2604_v41 = vld [vmem:[%s9406_s18 + $0x294] sm:$0xff]  ;;  %s13920_s23 = sld [smem:[#allocation25_spill]] (%p2088_p2) }
 0x498   : >> { %3061 = vmatpush.msra.mxu0 %v2752_v18  ;;  %v2821_v18 = vunpack.c.h.bf16 %v9497_v29  ;;  %v2737_v29 = vunpack.c.l.bf16 %v9589_v14  ;;  %2923 = vmatpush.msra.mxu3 %v2795_v6  ;;  %v9606_v6 = vld [vmem:[%s9406_s18 + $0x198] sm:$0xff]  ;;  %v2790_v48 = vunpack.c.l.bf16 %v2604_v41 }
 0x499   : >> { %2976 = vmatpush.msrb.mxu1 %v2741_v25  ;;  %v2731_v25 = vunpack.c.h.bf16 %v9462_v9  ;;  %v2806_v9 = vunpack.c.h.bf16 %v9534_v3 }
 0x49a   : >> { %3062 = vmatpush.msra.mxu0 %v2747_v23  ;;  %3005 = vmatpush.msrb.mxu2 %v2821_v18  ;;  %v9595_v23 = vld [vmem:[%s9406_s18 + $0x1ac] sm:$0xff]  ;;  %v2811_v18 = vunpack.c.h.bf16 %v9531_v1  ;;  %v9614_v1 = vperm.slane %v9599_v37, 0 }
 0x49b   : >> { %2977 = vmatpush.msrb.mxu1 %v2736_v44  ;;  %v2732_v33 = vunpack.c.l.bf16 %v9595_v23  ;;  %v2726_v44 = vunpack.c.h.bf16 %v9467_v22  ;;  %2924 = vmatpush.msra.mxu3 %v2790_v48  ;;  %v2785_v22 = vunpack.c.l.bf16 %v9620_v31 }
 0x49c   : >> { %3063 = vmatpush.msra.mxu0 %v2742_v21  ;;  %3006 = vmatpush.msrb.mxu2 %v2816_v28 }
 0x49d   : >> { %2978 = vmatpush.msrb.mxu1 %v2731_v25  ;;  %2925 = vmatpush.msra.mxu3 %v2785_v22 }
 0x49e   : >> { %3064 = vmatpush.msra.mxu0 %v2737_v29  ;;  %3007 = vmatpush.msrb.mxu2 %v2811_v18  ;;  %v9617_v29 = vperm.slane %v9599_v37, 1 }
 0x49f   : >> { %2979 = vmatpush.msrb.mxu1 %v2726_v44 }
 0x4a0   : >> { %3065 = vmatpush.msra.mxu0 %v2732_v33  ;;  %3008 = vmatpush.msrb.mxu2 %v2806_v9  ;;  %v2551_v33 = vld [vmem:[%s9406_s18 + $0x134] sm:$0xff]  ;;  %v2717_v9 = vunpack.c.l.bf16 %v9632_v49 }
 0x4a1   : >> { %v2702_v44 = vunpack.c.l.bf16 %v2551_v33 }
 0x4a3   : >> { %3026 = vmatpush.msrb.mxu3 %v2702_v44 }
 0x4b0   : >> { %v9458_v7 = vpop.f32.mrf.mxu0 }
 0x4b3   : >> { %v9507_v26 = vpop.f32.mrf.mxu1 }
 0x4b7   : >> { %v9479_v34 = vpop.f32.mrf.mxu2  ;;  %v9481_v24 = vpop.f32.mrf.mxu3 }
 0x4b8   : >> { %v9484_v46 = vpop.f32.mrf.mxu0  ;;  %v2267_v21 = vadd.f32 %v9481_v24, %v9458_v7  ;;  %v2727_v24 = vunpack.c.l.bf16 %v9606_v6  ;;  %v9624_v7 = vld [vmem:[%s9406_s18 + $0x184] sm:$0xff] }
 0x4b9   : >> { %v2722_v3 = vunpack.c.l.bf16 %v9624_v7 }
 0x4ba   : >> { %3066 = vmatpush.msra.mxu0 %v2727_v24  ;;  %v2548_v24 = vld [vmem:[%s9406_s18 + $0x120] sm:$0xff] }
 0x4bb   : >> { %v9552_v12 = vpop.f32.mrf.mxu1  ;;  %v2697_v22 = vunpack.c.l.bf16 %v2548_v24 }
 0x4bc   : >> { %3067 = vmatpush.msra.mxu0 %v2722_v3  ;;  %v9647_v3 = vld [vmem:[%s9406_s18 + $0x148] sm:$0xff] }
 0x4bd   : >> { %3027 = vmatpush.msrb.mxu3 %v2697_v22  ;;  %v2707_v44 = vunpack.c.l.bf16 %v9647_v3 }
 0x4be   : >> { %3068 = vmatpush.msra.mxu0 %v2717_v9 }
 0x4bf   : >> { %v9511_v0 = vpop.f32.mrf.mxu2  ;;  %v9513_v32 = vpop.f32.mrf.mxu3 }
 0x4c0   : >> { %v9518_v20 = vpop.f32.mrf.mxu0 }
 0x4c3   : >> { %v9597_v15 = vpop.f32.mrf.mxu1 }
 0x4c7   : >> { %v9545_v42 = vpop.f32.mrf.mxu2  ;;  %v9547_v17 = vpop.f32.mrf.mxu3 }
 0x4c8   : >> { %v9554_v35 = vpop.f32.mrf.mxu0 }
 0x4cf   : >> { %v9583_v19 = vpop.f32.mrf.mxu2  ;;  %v9585_v11 = vpop.f32.mrf.mxu3 }
 0x4d0   : >> { %v2295_v30 = vpop.f32.mrf.mxu0 }
 0x4d1   : >> { %v2296_v28 = vadd.f32 %v2295_v30, %v9507_v26  ;;  %v2721_v30 = vunpack.c.h.bf16 %v9472_v39  ;;  %v2801_v26 = vunpack.c.h.bf16 %v9568_v43  ;;  %v2716_v39 = vunpack.c.h.bf16 %v9477_v5 }
 0x4d2   : >> { %v2796_v43 = vunpack.c.h.bf16 %v9571_v40  ;;  %v2711_v5 = vunpack.c.h.bf16 %v9488_v4  ;;  %v2712_v40 = vunpack.c.l.bf16 %v9639_v52  ;;  %v2706_v4 = vunpack.c.h.bf16 %v9493_v27 }
 0x4d3   : >> { %2980 = vmatpush.msrb.mxu1 %v2721_v30  ;;  %3009 = vmatpush.msrb.mxu2 %v2801_v26  ;;  %v2791_v30 = vunpack.c.h.bf16 %v2604_v41  ;;  %v2545_v26 = vld [vmem:[%s9406_s18 + $0x10c] sm:$0xff]  ;;  %v2786_v41 = vunpack.c.h.bf16 %v9620_v31  ;;  %v2539_v31 = vld [vmem:[%s9406_s18 + $0xe4] sm:$0xff] }
 0x4d4   : >> { %3069 = vmatpush.msra.mxu0 %v2712_v40 }
 0x4d5   : >> { %2981 = vmatpush.msrb.mxu1 %v2716_v39  ;;  %3010 = vmatpush.msrb.mxu2 %v2796_v43  ;;  %v2542_v39 = vld [vmem:[%s9406_s18 + $0xf8] sm:$0xff]  ;;  %v2270_v43 = vadd.f32 %v9513_v32, %v9484_v46  ;;  %v2536_v32 = vld [vmem:[%s9406_s18 + $0xd0] sm:$0xff] }
 0x4d6   : >> { %3070 = vmatpush.msra.mxu0 %v2707_v44  ;;  %v2677_v53 = vunpack.c.l.bf16 %v2536_v32  ;;  %v2273_v44 = vadd.f32 %v9547_v17, %v9518_v20 }
 0x4d7   : >> { %v2387_v25 = vpop.f32.mrf.mxu2  ;;  %v2416_v18 = vpop.f32.mrf.mxu3  ;;  %2982 = vmatpush.msrb.mxu1 %v2711_v5  ;;  %3011 = vmatpush.msrb.mxu2 %v2791_v30 }
 0x4d8   : >> { %v2457_v50 = vadd.f32 %v2387_v25, %v2267_v21  ;;  %v2458_v48 = vadd.f32 %v2416_v18, %v2296_v28  ;;  %v2298_v51 = vpop.f32.mrf.mxu0  ;;  %v9649_v25 = vpop.f32.mrf.mxu1 }
 0x4d9   : >> { %v2299_v9 = vadd.f32 %v2298_v51, %v9552_v12  ;;  %2983 = vmatpush.msrb.mxu1 %v2706_v4  ;;  %3012 = vmatpush.msrb.mxu2 %v2786_v41  ;;  %v2682_v51 = vunpack.c.l.bf16 %v2539_v31  ;;  %v2698_v12 = vunpack.c.h.bf16 %v2548_v24  ;;  %v2688_v4 = vunpack.c.h.bf16 %v2542_v39  ;;  %v9675_v41 = vld [vmem:[%s9406_s18 + $0xa8] sm:$0xff] }
 0x4da   : >> { %v2478_v21 = vadd.f32 %v9614_v1, %v2457_v50  ;;  %v2479_v28 = vadd.f32 %v9617_v29, %v2458_v48  ;;  %v2692_v48 = vunpack.c.l.bf16 %v2545_v26 }
 0x4dc   : >> { %v9651_v18 = vmax.f32 %v2478_v21, 0.0  ;;  %v9653_v50 = vmax.f32 %v2479_v28, 0.0  ;;  %v2687_v21 = vunpack.c.l.bf16 %v2542_v39  ;;  %v2703_v28 = vunpack.c.h.bf16 %v2551_v33  ;;  %3028 = vmatpush.msrb.mxu3 %v2692_v48 }
 0x4dd   : >> { %v2693_v48 = vunpack.c.h.bf16 %v2545_v26  ;;  %v2667_v26 = vunpack.c.l.bf16 %v9675_v41  ;;  %v2683_v39 = vunpack.c.h.bf16 %v2539_v31 }
 0x4de   : >> { %2868 = vmatmul.f32.vlgmr.msra.gmra.mxu1 %v9651_v18  ;;  %2897 = vmatmul.f32.vlgmr.msra.gmra.mxu2 %v9653_v50 }
 0x4df   : >> { %2955 = vmatmul.f32.vlgmr.msrb.gmra.mxu0 %v9651_v18  ;;  %v2390_v27 = vpop.f32.mrf.mxu2  ;;  %v2419_v22 = vpop.f32.mrf.mxu3  ;;  %3029 = vmatpush.msrb.mxu3 %v2687_v21 }
 0x4e0   : >> { %v2460_v5 = vadd.f32 %v2390_v27, %v2270_v43  ;;  %v2461_v30 = vadd.f32 %v2419_v22, %v2299_v9  ;;  %v2301_v40 = vpop.f32.mrf.mxu0  ;;  %3113 = vmatpush.msra.mxu2 %v2703_v28  ;;  %v2533_v43 = vld [vmem:[%s9406_s18 + $0xbc] sm:$0xff]  ;;  %v2324_v21 = vpop.f32.mrf.mxu1 }
 0x4e1   : >> { %3030 = vmatpush.msrb.mxu3 %v2682_v51  ;;  %v2672_v24 = vunpack.c.l.bf16 %v2533_v43  ;;  %v2302_v28 = vadd.f32 %v2301_v40, %v9597_v15  ;;  %v2678_v40 = vunpack.c.h.bf16 %v2536_v32  ;;  %v9689_v51 = vld [vmem:[%s9406_s18 + $0x80] sm:$0xff]  ;;  %v2276_v32 = vadd.f32 %v9585_v11, %v9554_v35 }
 0x4e2   : >> { %v2481_v46 = vadd.f32 %v9614_v1, %v2460_v5  ;;  %v2482_v33 = vadd.f32 %v9617_v29, %v2461_v30  ;;  %3114 = vmatpush.msra.mxu2 %v2698_v12  ;;  %v9685_v5 = vld [vmem:[%s9406_s18 + $0x94] sm:$0xff]  ;;  %v2657_v31 = vunpack.c.l.bf16 %v9689_v51  ;;  %v2325_v35 = vadd.f32 %v2324_v21, %v9479_v34 }
 0x4e3   : >> { %3031 = vmatpush.msrb.mxu3 %v2677_v53  ;;  %v2662_v15 = vunpack.c.l.bf16 %v9685_v5  ;;  %v2663_v34 = vunpack.c.h.bf16 %v9685_v5  ;;  %v2614_v5 = vld [vmem:[%s9406_s18 + $0x2d8] sm:$0xff] }
 0x4e4   : >> { %v9670_v27 = vmax.f32 %v2481_v46, 0.0  ;;  %v9672_v9 = vmax.f32 %v2482_v33, 0.0  ;;  %3115 = vmatpush.msra.mxu2 %v2693_v48  ;;  %v9695_v33 = vld [vmem:[%s9406_s18 + $0x6c] sm:$0xff] }
 0x4e5   : >> { %3032 = vmatpush.msrb.mxu3 %v2672_v24 }
 0x4e6   : >> { %2871 = vmatmul.f32.gmra.mxu1 %v9670_v27  ;;  %2900 = vmatmul.f32.gmra.mxu2 %v9672_v9 }
 0x4e7   : >> { %2958 = vmatmul.f32.gmra.mxu0 %v9670_v27  ;;  %v2393_v22 = vpop.f32.mrf.mxu2  ;;  %v2422_v53 = vpop.f32.mrf.mxu3  ;;  %3116 = vmatpush.msra.mxu2 %v2688_v4  ;;  %v2673_v4 = vunpack.c.h.bf16 %v2533_v43 }
 0x4e8   : >> { %v2463_v17 = vadd.f32 %v2393_v22, %v2273_v44  ;;  %v2464_v20 = vadd.f32 %v2422_v53, %v2302_v28  ;;  %v2304_v30 = vpop.f32.mrf.mxu0  ;;  %3033 = vmatpush.msrb.mxu3 %v2667_v26  ;;  %v2652_v44 = vunpack.c.l.bf16 %v9695_v33  ;;  %v9705_v28 = vld [vmem:[%s9406_s18 + $0x58] sm:$0xff]  ;;  %v2668_v53 = vunpack.c.h.bf16 %v9675_v41  ;;  %v2327_v41 = vpop.f32.mrf.mxu1 }
 0x4e9   : >> { %3117 = vmatpush.msra.mxu2 %v2683_v39  ;;  %v2623_v26 = vld [vmem:[%s9406_s18 + $0x314] sm:$0xff]  ;;  %v2305_v22 = vadd.f32 %v2304_v30, %v9649_v25  ;;  %v2647_v25 = vunpack.c.l.bf16 %v9705_v28  ;;  %v9719_v30 = vld [vmem:[%s9406_s18 + $0x44] sm:$0xff] }
 0x4ea   : >> { %v2484_v12 = vadd.f32 %v9614_v1, %v2463_v17  ;;  %v2485_v46 = vadd.f32 %v9617_v29, %v2464_v20  ;;  %3034 = vmatpush.msrb.mxu3 %v2662_v15  ;;  %v2822_v43 = vunpack.c.l.bf16 %v2623_v26  ;;  %v2823_v39 = vunpack.c.h.bf16 %v2623_v26  ;;  %v2620_v15 = vld [vmem:[%s9406_s18 + $0x300] sm:$0xff]  ;;  %v2617_v26 = vld [vmem:[%s9406_s18 + $0x2ec] sm:$0xff] }
 0x4eb   : >> { %3118 = vmatpush.msra.mxu2 %v2678_v40  ;;  %v9715_v20 = vperm.slane %v9599_v37, 2  ;;  %v2817_v21 = vunpack.c.l.bf16 %v2620_v15  ;;  %v2818_v54 = vunpack.c.h.bf16 %v2620_v15  ;;  %v2812_v56 = vunpack.c.l.bf16 %v2617_v26 }
 0x4ec   : >> { %v9697_v48 = vmax.f32 %v2484_v12, 0.0  ;;  %v9699_v24 = vmax.f32 %v2485_v46, 0.0  ;;  %3035 = vmatpush.msrb.mxu3 %v2657_v31  ;;  %3092 = vmatpush.msra.mxu1 %v2822_v43  ;;  %v2642_v31 = vunpack.c.l.bf16 %v9719_v30  ;;  %v2653_v15 = vunpack.c.h.bf16 %v9695_v33 }
 0x4ed   : >> { %3119 = vmatpush.msra.mxu2 %v2673_v4  ;;  %3179 = vmatpush.msrb.mxu0 %v2823_v39 }
 0x4ee   : >> { %2874 = vmatmul.f32.gmra.mxu1 %v9697_v48  ;;  %2903 = vmatmul.f32.gmra.mxu2 %v9699_v24 }
 0x4ef   : >> { %2961 = vmatmul.f32.gmra.mxu0 %v9697_v48  ;;  %v2396_v11 = vpop.f32.mrf.mxu2  ;;  %v2425_v17 = vpop.f32.mrf.mxu3  ;;  %3036 = vmatpush.msrb.mxu3 %v2652_v44  ;;  %v9733_v44 = vld [vmem:[%s9406_s18 + $0x1c] sm:$0xff] }
 0x4f0   : >> { %v2466_v40 = vadd.f32 %v2396_v11, %v2276_v32  ;;  %v2467_v12 = vadd.f32 %v2425_v17, %v2305_v22  ;;  %v2445_v46 = vpop.f32.mrf.mxu0  ;;  %3120 = vmatpush.msra.mxu2 %v2668_v53  ;;  %3093 = vmatpush.msra.mxu1 %v2817_v21  ;;  %v2813_v22 = vunpack.c.h.bf16 %v2617_v26  ;;  %v2807_v11 = vunpack.c.l.bf16 %v2614_v5 }
 0x4f1   : >> { %v2459_v37 = vadd.f32 %v2445_v46, %v2325_v35  ;;  %3037 = vmatpush.msrb.mxu3 %v2647_v25  ;;  %3180 = vmatpush.msrb.mxu0 %v2818_v54  ;;  %v2808_v17 = vunpack.c.h.bf16 %v2614_v5  ;;  %v9744_v54 = vld [vmem:[%s9406_s18 + $0x8] sm:$0xff]  ;;  %v2608_v46 = vld [vmem:[%s9406_s18 + $0x2b0] sm:$0xff]  ;;  %v2648_v21 = vunpack.c.h.bf16 %v9705_v28  ;;  %v2643_v28 = vunpack.c.h.bf16 %v9719_v30 }
 0x4f2   : >> { %v2487_v32 = vadd.f32 %v9614_v1, %v2466_v40  ;;  %v2488_v4 = vadd.f32 %v9617_v29, %v2467_v12  ;;  %3121 = vmatpush.msra.mxu2 %v2663_v34  ;;  %v2658_v1 = vunpack.c.h.bf16 %v9689_v51  ;;  %v2637_v29 = vunpack.c.l.bf16 %v9726_v55  ;;  %3094 = vmatpush.msra.mxu1 %v2812_v56  ;;  %v2611_v25 = vld [vmem:[%s9406_s18 + $0x2c4] sm:$0xff] }
 0x4f3   : >> { %v2480_v43 = vadd.f32 %v9715_v20, %v2459_v37  ;;  %3038 = vmatpush.msrb.mxu3 %v2642_v31  ;;  %3181 = vmatpush.msrb.mxu0 %v2813_v22  ;;  %v2632_v51 = vunpack.c.l.bf16 %v9733_v44  ;;  %v2328_v56 = vadd.f32 %v2327_v41, %v9511_v0  ;;  %v2802_v40 = vunpack.c.l.bf16 %v2611_v25  ;;  %v2330_v37 = vpop.f32.mrf.mxu1  ;;  %v2605_v31 = vld [vmem:[%s9406_s18 + $0x29c] sm:$0xff]  ;;  %v2602_v22 = vld [vmem:[%s9406_s18 + $0x288] sm:$0xff] }
 0x4f4   : >> { %v9735_v39 = vmax.f32 %v2487_v32, 0.0  ;;  %v9737_v35 = vmax.f32 %v2488_v4, 0.0  ;;  %v2803_v12 = vunpack.c.h.bf16 %v2611_v25  ;;  %3122 = vmatpush.msra.mxu2 %v2658_v1  ;;  %v2627_v33 = vunpack.c.l.bf16 %v9744_v54  ;;  %3095 = vmatpush.msra.mxu1 %v2807_v11  ;;  %v2552_v11 = vld [vmem:[%s9406_s18 + $0x13c] sm:$0xf] }
 0x4f5   : >> { %v9741_v53 = vmax.f32 %v2480_v43, 0.0  ;;  %3039 = vmatpush.msrb.mxu3 %v2637_v29  ;;  %3182 = vmatpush.msrb.mxu0 %v2808_v17  ;;  %v2783_v0 = vunpack.c.h.bf16 %v9505_v10  ;;  %v2797_v41 = vunpack.c.l.bf16 %v2608_v46  ;;  %v2798_v4 = vunpack.c.h.bf16 %v2608_v46 }
 0x4f6   : >> { %2877 = vmatmul.f32.gmra.mxu1 %v9735_v39  ;;  %2906 = vmatmul.f32.gmra.mxu2 %v9737_v35  ;;  %v2778_v10 = vunpack.c.h.bf16 %v9516_v36  ;;  %v2792_v43 = vunpack.c.l.bf16 %v2605_v31  ;;  %v2638_v1 = vunpack.c.h.bf16 %v9726_v55  ;;  %v2793_v29 = vunpack.c.h.bf16 %v2605_v31 }
 0x4f7   : >> { %2964 = vmatmul.f32.gmra.mxu0 %v9735_v39  ;;  %7552 = vmatmul.msk.f32.vlgmr.msra.gmra.mxu3 %vm2839_vm10, %v9741_v53  ;;  %v2331_v30 = vadd.f32 %v2330_v37, %v9545_v42  ;;  %v2773_v36 = vunpack.c.h.bf16 %v9523_v8  ;;  %v2787_v17 = vunpack.c.l.bf16 %v2602_v22  ;;  %v2788_v55 = vunpack.c.h.bf16 %v2602_v22  ;;  %v2594_v37 = vld [vmem:[%s9406_s18 + $0x254] sm:$0xf] }
 0x4f8   : >> { %v2448_v34 = vpop.f32.mrf.mxu0  ;;  %3123 = vmatpush.msra.mxu2 %v2653_v15  ;;  %3040 = vmatpush.msrb.mxu3 %v2632_v51  ;;  %v2633_v15 = vunpack.c.h.bf16 %v9733_v44  ;;  %v2768_v42 = vunpack.c.h.bf16 %v9528_v38  ;;  %v2628_v44 = vunpack.c.h.bf16 %v9744_v54  ;;  %v2546_v38 = vld [vmem:[%s9406_s18 + $0x114] sm:$0xf]  ;;  %v2543_v54 = vld [vmem:[%s9406_s18 + $0x100] sm:$0xf]  ;;  %v2774_v22 = vunpack.c.l.bf16 %v2594_v37 }
 0x4f9   : >> { %v2462_v26 = vadd.f32 %v2448_v34, %v2328_v56  ;;  %3096 = vmatpush.msra.mxu1 %v2802_v40  ;;  %3183 = vmatpush.msrb.mxu0 %v2803_v12  ;;  %v2704_v56 = vunpack.c.l.bf16 %v2552_v11  ;;  %v2600_v40 = vld [vmem:[%s9406_s18 + $0x27c] sm:$0xf]  ;;  %v2549_v12 = vld [vmem:[%s9406_s18 + $0x128] sm:$0xf]  ;;  %v2763_v34 = vunpack.c.h.bf16 %v9541_v45 }
 0x4fa   : >> { %3124 = vmatpush.msra.mxu2 %v2648_v21  ;;  %3041 = vmatpush.msrb.mxu3 %v2627_v33  ;;  %v2597_v21 = vld [vmem:[%s9406_s18 + $0x268] sm:$0xf] }
 0x4fb   : >> { %v2483_v32 = vadd.f32 %v9715_v20, %v2462_v26  ;;  %3097 = vmatpush.msra.mxu1 %v2797_v41  ;;  %3184 = vmatpush.msrb.mxu0 %v2798_v4  ;;  %v2333_v46 = vpop.f32.mrf.mxu1  ;;  %v2784_v26 = vunpack.c.l.bf16 %v2600_v40  ;;  %v2758_v41 = vunpack.c.h.bf16 %v9550_v16  ;;  %v2779_v31 = vunpack.c.l.bf16 %v2597_v21  ;;  %v2582_v40 = vld [vmem:[%s9406_s18 + $0x204] sm:$0xf] }
 0x4fc   : >> { %3142 = vmatpush.msra.mxu3 %v2783_v0  ;;  %3125 = vmatpush.msra.mxu2 %v2643_v28  ;;  %v2699_v0 = vunpack.c.l.bf16 %v2549_v12  ;;  %v2334_v45 = vadd.f32 %v2333_v46, %v9583_v19  ;;  %v2753_v4 = vunpack.c.h.bf16 %v9559_v2  ;;  %v2689_v19 = vunpack.c.l.bf16 %v2543_v54  ;;  %v2579_v12 = vld [vmem:[%s9406_s18 + $0x1f0] sm:$0xf]  ;;  %v2573_v54 = vld [vmem:[%s9406_s18 + $0x1c8] sm:$0xf] }
 0x4fd   : >> { %v9763_v5 = vmax.f32 %v2483_v32, 0.0  ;;  %3098 = vmatpush.msra.mxu1 %v2792_v43  ;;  %3185 = vmatpush.msrb.mxu0 %v2793_v29  ;;  %v2694_v32 = vunpack.c.l.bf16 %v2546_v38  ;;  %v2540_v43 = vld [vmem:[%s9406_s18 + $0xec] sm:$0xf]  ;;  %v2748_v2 = vunpack.c.h.bf16 %v9565_v13  ;;  %v2733_v46 = vunpack.c.h.bf16 %v9595_v23 }
 0x4fe   : >> { %2984 = vmatmul.f32.vlgmr.msrb.gmra.mxu1 %v9653_v50  ;;  %7556 = vmatmul.msk.f32.vlgmr.msrb.gmra.mxu2 %vm2839_vm10, %v9741_v53  ;;  %v2588_v29 = vld [vmem:[%s9406_s18 + $0x22c] sm:$0xf]  ;;  %v2749_v21 = vunpack.c.l.bf16 %v2579_v12  ;;  %v2728_v38 = vunpack.c.h.bf16 %v9606_v6  ;;  %v2522_v6 = vld [vmem:[%s9406_s18 + $0x74] sm:$0xf] }
 0x4ff   : >> { %3071 = vmatmul.f32.vlgmr.msra.gmra.mxu0 %v9653_v50  ;;  %7553 = vmatmul.msk.f32.gmra.mxu3 %vm2839_vm10, %v9763_v5 }
 0x500   : >> { %v2451_v25 = vpop.f32.mrf.mxu0  ;;  %3143 = vmatpush.msra.mxu3 %v2778_v10  ;;  %3126 = vmatpush.msra.mxu2 %v2638_v1  ;;  %v2591_v10 = vld [vmem:[%s9406_s18 + $0x240] sm:$0xf] }
 0x501   : >> { %v2465_v51 = vadd.f32 %v2451_v25, %v2331_v30  ;;  %3099 = vmatpush.msra.mxu1 %v2787_v17  ;;  %3186 = vmatpush.msrb.mxu0 %v2788_v55  ;;  %v2769_v11 = vunpack.c.l.bf16 %v2591_v10  ;;  %v2537_v30 = vld [vmem:[%s9406_s18 + $0xd8] sm:$0xf]  ;;  %v2684_v17 = vunpack.c.l.bf16 %v2540_v43  ;;  %v2534_v55 = vld [vmem:[%s9406_s18 + $0xc4] sm:$0xf]  ;;  %v2624_v10 = vld [vmem:[%s9406_s18 + $0x31c] sm:$0xf] }
 0x502   : >> { %3144 = vmatpush.msra.mxu3 %v2773_v36  ;;  %3127 = vmatpush.msra.mxu2 %v2633_v15  ;;  %v2585_v25 = vld [vmem:[%s9406_s18 + $0x218] sm:$0xf]  ;;  %v2743_v15 = vunpack.c.h.bf16 %v9578_v47  ;;  %v2679_v13 = vunpack.c.l.bf16 %v2537_v30  ;;  %v2531_v47 = vld [vmem:[%s9406_s18 + $0xb0] sm:$0xf]  ;;  %v2621_v30 = vld [vmem:[%s9406_s18 + $0x308] sm:$0xf] }
 0x503   : >> { %v2486_v8 = vadd.f32 %v9715_v20, %v2465_v51  ;;  %3200 = vmatpush.msrb.mxu1 %v2704_v56  ;;  %v2759_v51 = vunpack.c.l.bf16 %v2585_v25  ;;  %v2674_v56 = vunpack.c.l.bf16 %v2534_v55  ;;  %v2510_v25 = vld [vmem:[%s9406_s18 + $0x24] sm:$0xf] }
 0x504   : >> { %3145 = vmatpush.msra.mxu3 %v2768_v42  ;;  %3128 = vmatpush.msra.mxu2 %v2628_v44  ;;  %v2738_v42 = vunpack.c.h.bf16 %v9589_v14  ;;  %v2528_v44 = vld [vmem:[%s9406_s18 + $0x9c] sm:$0xf]  ;;  %v2558_v55 = vld [vmem:[%s9406_s18 + $0x164] sm:$0xf] }
 0x505   : >> { %v9785_v33 = vmax.f32 %v2486_v8, 0.0  ;;  %3201 = vmatpush.msrb.mxu1 %v2699_v0  ;;  %v2754_v8 = vunpack.c.l.bf16 %v2582_v40  ;;  %v2576_v14 = vld [vmem:[%s9406_s18 + $0x1dc] sm:$0xf]  ;;  %v2664_v23 = vunpack.c.l.bf16 %v2528_v44  ;;  %v2615_v40 = vld [vmem:[%s9406_s18 + $0x2e0] sm:$0xf]  ;;  %v2714_v12 = vunpack.c.l.bf16 %v2558_v55  ;;  %v9954_v55 = vld [vmem:[%s9882_s1 + $0x3e8] sm:$0xff] }
 0x506   : >> { %2987 = vmatmul.f32.gmra.mxu1 %v9672_v9  ;;  %7557 = vmatmul.msk.f32.gmra.mxu2 %vm2839_vm10, %v9763_v5  ;;  %v2744_v0 = vunpack.c.l.bf16 %v2576_v14  ;;  %v2809_v44 = vunpack.c.l.bf16 %v2615_v40  ;;  %v2609_v14 = vld [vmem:[%s9406_s18 + $0x2b8] sm:$0xf] }
 0x507   : >> { %3074 = vmatmul.f32.gmra.mxu0 %v9672_v9  ;;  %7554 = vmatmul.msk.f32.gmra.mxu3 %vm2839_vm10, %v9785_v33 }
 0x508   : >> { %v2454_v28 = vpop.f32.mrf.mxu0  ;;  %3146 = vmatpush.msra.mxu3 %v2763_v34  ;;  %3229 = vmatpush.msrb.mxu2 %v2784_v26  ;;  %v2669_v34 = vunpack.c.l.bf16 %v2531_v47  ;;  %v2525_v26 = vld [vmem:[%s9406_s18 + $0x88] sm:$0xf] }
 0x509   : >> { %v2468_v16 = vadd.f32 %v2454_v28, %v2334_v45  ;;  %3202 = vmatpush.msrb.mxu1 %v2694_v32  ;;  %v2659_v37 = vunpack.c.l.bf16 %v2525_v26  ;;  %v2570_v45 = vld [vmem:[%s9406_s18 + $0x1b4] sm:$0xf]  ;;  %v2718_v32 = vunpack.c.h.bf16 %v9632_v49  ;;  %v2519_v28 = vld [vmem:[%s9406_s18 + $0x60] sm:$0xf]  ;;  %v2799_v26 = vunpack.c.l.bf16 %v2609_v14 }
 0x50a   : >> { %3147 = vmatpush.msra.mxu3 %v2758_v41  ;;  %3230 = vmatpush.msrb.mxu2 %v2779_v31  ;;  %v2723_v41 = vunpack.c.h.bf16 %v9624_v7  ;;  %v2739_v31 = vunpack.c.l.bf16 %v2573_v54  ;;  %v2567_v7 = vld [vmem:[%s9406_s18 + $0x1a0] sm:$0xf]  ;;  %v2649_v49 = vunpack.c.l.bf16 %v2519_v28  ;;  %v9885_v54 = vld [vmem:[%s9882_s1 + $0x258] sm:$0xff]  ;;  %v9982_v14 = vld [vmem:[%s9882_s1 + $0x370] sm:$0xff] }
 0x50b   : >> { %v2489_v1 = vadd.f32 %v9715_v20, %v2468_v16  ;;  %3203 = vmatpush.msrb.mxu1 %v2689_v19  ;;  %v2764_v20 = vunpack.c.l.bf16 %v2588_v29  ;;  %v2734_v16 = vunpack.c.l.bf16 %v2570_v45  ;;  %v2516_v19 = vld [vmem:[%s9406_s18 + $0x4c] sm:$0xf]  ;;  %v2729_v43 = vunpack.c.l.bf16 %v2567_v7  ;;  %v9889_v45 = vld [vmem:[%s9882_s1 + $0x230] sm:$0xff]  ;;  %v9900_v28 = vld [vmem:[%s9882_s1 + $0x4d8] sm:$0xff] }
 0x50c   : >> { %3148 = vmatpush.msra.mxu3 %v2753_v4  ;;  %3231 = vmatpush.msrb.mxu2 %v2774_v22  ;;  %v2654_v4 = vunpack.c.l.bf16 %v2522_v6  ;;  %v2713_v22 = vunpack.c.h.bf16 %v9639_v52  ;;  %v2644_v29 = vunpack.c.l.bf16 %v2516_v19  ;;  %v2564_v52 = vld [vmem:[%s9406_s18 + $0x18c] sm:$0xf]  ;;  %v3860_v6 = vunpack.c.l.bf16 %v9885_v54 }
 0x50d   : >> { %v9804_v36 = vmax.f32 %v2489_v1, 0.0  ;;  %3204 = vmatpush.msrb.mxu1 %v2684_v17  ;;  %v2708_v1 = vunpack.c.h.bf16 %v9647_v3  ;;  %v2561_v17 = vld [vmem:[%s9406_s18 + $0x178] sm:$0xf]  ;;  %v2618_v3 = vld [vmem:[%s9406_s18 + $0x2f4] sm:$0xf]  ;;  %v4020_v7 = vunpack.c.l.bf16 %v9900_v28 }
 0x50e   : >> { %2990 = vmatmul.f32.gmra.mxu1 %v9699_v24  ;;  %7558 = vmatmul.msk.f32.gmra.mxu2 %vm2839_vm10, %v9785_v33  ;;  %v2814_v47 = vunpack.c.l.bf16 %v2618_v3 }
 0x50f   : >> { %3077 = vmatmul.f32.gmra.mxu0 %v9699_v24  ;;  %7555 = vmatmul.msk.f32.gmra.mxu3 %vm2839_vm10, %v9804_v36 }
 0x510   : >> { %3232 = vmatpush.msrb.mxu2 %v2769_v11  ;;  %3149 = vmatpush.msra.mxu3 %v2748_v2  ;;  %v2824_v11 = vunpack.c.l.bf16 %v2624_v10  ;;  %v2513_v2 = vld [vmem:[%s9406_s18 + $0x38] sm:$0xf]  ;;  %v9919_v10 = vld [vmem:[%s9882_s1 + $0x488] sm:$0xff] }
 0x511   : >> { %3205 = vmatpush.msrb.mxu1 %v2679_v13  ;;  %v2819_v13 = vunpack.c.l.bf16 %v2621_v30  ;;  %4536 = vmatpush.msra.mxu0 %v3860_v6  ;;  %v9935_v30 = vld [vmem:[%s9882_s1 + $0x438] sm:$0xff] }
 0x512   : >> { %3233 = vmatpush.msrb.mxu2 %v2764_v20  ;;  %3150 = vmatpush.msra.mxu3 %v2743_v15  ;;  %v2724_v20 = vunpack.c.l.bf16 %v2564_v52  ;;  %v2639_v15 = vunpack.c.l.bf16 %v2513_v2  ;;  %v9932_v2 = vld [vmem:[%s9882_s1 + $0x140] sm:$0xff] }
 0x513   : >> { %3206 = vmatpush.msrb.mxu1 %v2674_v56  ;;  %v2634_v56 = vunpack.c.l.bf16 %v2510_v25  ;;  %v3980_v25 = vunpack.c.l.bf16 %v9935_v30 }
 0x514   : >> { %3234 = vmatpush.msrb.mxu2 %v2759_v51  ;;  %3151 = vmatpush.msra.mxu3 %v2738_v42  ;;  %v2507_v51 = vld [vmem:[%s9406_s18 + $0x10] sm:$0xf]  ;;  %v2719_v42 = vunpack.c.l.bf16 %v2561_v17  ;;  %v3790_v17 = vunpack.c.l.bf16 %v9932_v2 }
 0x515   : >> { %3207 = vmatpush.msrb.mxu1 %v2669_v34  ;;  %v2612_v34 = vld [vmem:[%s9406_s18 + $0x2cc] sm:$0xf] }
 0x516   : >> { %2993 = vmatmul.f32.gmra.mxu1 %v9737_v35  ;;  %7559 = vmatmul.msk.f32.gmra.mxu2 %vm2839_vm10, %v9804_v36 }
 0x517   : >> { %3080 = vmatmul.f32.gmra.mxu0 %v9737_v35  ;;  %3042 = vmatmul.f32.vlgmr.msrb.gmra.mxu3 %v9651_v18 }
 0x518   : >> { %3235 = vmatpush.msrb.mxu2 %v2754_v8  ;;  %3152 = vmatpush.msra.mxu3 %v2733_v46  ;;  %v2629_v8 = vunpack.c.l.bf16 %v2507_v51  ;;  %v2555_v46 = vld [vmem:[%s9406_s18 + $0x150] sm:$0xf]  ;;  %v3960_v51 = vunpack.c.l.bf16 %v9954_v55 }
 0x519   : >> { %3208 = vmatpush.msrb.mxu1 %v2664_v23  ;;  %v2606_v23 = vld [vmem:[%s9406_s18 + $0x2a4] sm:$0xf] }
 0x51a   : >> { %3236 = vmatpush.msrb.mxu2 %v2749_v21  ;;  %3153 = vmatpush.msra.mxu3 %v2728_v38  ;;  %v2709_v21 = vunpack.c.l.bf16 %v2555_v46  ;;  %v2804_v38 = vunpack.c.l.bf16 %v2612_v34  ;;  %v9979_v34 = vld [vmem:[%s9882_s1 + $0x78] sm:$0xff] }
 0x51b   : >> { %3209 = vmatpush.msrb.mxu1 %v2659_v37 }
 0x51c   : >> { %3237 = vmatpush.msrb.mxu2 %v2744_v0  ;;  %3154 = vmatpush.msra.mxu3 %v2723_v41  ;;  %v2794_v0 = vunpack.c.l.bf16 %v2606_v23  ;;  %v2603_v41 = vld [vmem:[%s9406_s18 + $0x290] sm:$0xf]  ;;  %s2826_s18 = scalar_lea.vmem %s13356_s15, %s2825_s16  ;;  %s13916_s15 = sld [smem:[#allocation12_spill]] (%p2088_p2) }
 0x51d   : >> { %3210 = vmatpush.msrb.mxu1 %v2654_v4  ;;  %v2789_v37 = vunpack.c.l.bf16 %v2603_v41  ;;  %v10000_v41 = vld [vmem:[%s9882_s1 + $0x320] sm:$0xff]  ;;  %s13917_s16 = sld [smem:[#allocation23_spill]] (%p2088_p2) }
 0x51e   : >> { %7560 = vmatmul.msk.f32.vlgmr.msra.gmra.mxu1 %vm2839_vm10, %v9741_v53  ;;  %3129 = vmatmul.f32.vlgmr.msra.gmra.mxu2 %v9651_v18  ;;  %v3910_v6 = vunpack.c.l.bf16 %v10000_v41 }
 0x51f   : >> { %7564 = vmatmul.msk.f32.vlgmr.msrb.gmra.mxu0 %vm2839_vm10, %v9741_v53  ;;  %3045 = vmatmul.f32.gmra.mxu3 %v9670_v27 }
 0x520   : >> { %3238 = vmatpush.msrb.mxu2 %v2739_v31  ;;  %3155 = vmatpush.msra.mxu3 %v2718_v32  ;;  %v9897_v32 = vld [vmem:[%s9882_s1 + $0x1e0] sm:$0xff] }
 0x521   : >> { %3211 = vmatpush.msrb.mxu1 %v2649_v49  ;;  %v3830_v4 = vunpack.c.l.bf16 %v9897_v32 }
 0x522   : >> { %3239 = vmatpush.msrb.mxu2 %v2734_v16  ;;  %3156 = vmatpush.msra.mxu3 %v2713_v22  ;;  %v9908_v16 = vld [vmem:[%s9882_s1 + $0x1b8] sm:$0xff]  ;;  %v9911_v22 = vld [vmem:[%s9882_s1 + $0x4b0] sm:$0xff] }
 0x523   : >> { %3212 = vmatpush.msrb.mxu1 %v2644_v29  ;;  %v3820_v19 = vunpack.c.l.bf16 %v9908_v16  ;;  %v9927_v29 = vld [vmem:[%s9882_s1 + $0x460] sm:$0xff] }
 0x524   : >> { %3240 = vmatpush.msrb.mxu2 %v2729_v43  ;;  %3157 = vmatpush.msra.mxu3 %v2708_v1  ;;  %v4000_v43 = vunpack.c.l.bf16 %v9919_v10  ;;  %v9924_v1 = vld [vmem:[%s9882_s1 + $0x168] sm:$0xff] }
 0x525   : >> { %3213 = vmatpush.msrb.mxu1 %v2639_v15  ;;  %v3800_v52 = vunpack.c.l.bf16 %v9924_v1  ;;  %v9946_v15 = vld [vmem:[%s9882_s1 + $0x410] sm:$0xff] }
 0x526   : >> { %3266 = vmatpush.msrb.mxu3 %v2824_v11  ;;  %7561 = vmatmul.msk.f32.gmra.mxu1 %vm2839_vm10, %v9763_v5  ;;  %v3990_v11 = vunpack.c.l.bf16 %v9927_v29 }
 0x527   : >> { %3132 = vmatmul.f32.gmra.mxu2 %v9670_v27  ;;  %7565 = vmatmul.msk.f32.gmra.mxu0 %vm2839_vm10, %v9763_v5 }
 0x528   : >> { %3048 = vmatmul.f32.gmra.mxu3 %v9697_v48  ;;  %3241 = vmatpush.msrb.mxu2 %v2724_v20  ;;  %v9943_v20 = vld [vmem:[%s9882_s1 + $0x118] sm:$0xff] }
 0x529   : >> { %3267 = vmatpush.msrb.mxu3 %v2819_v13  ;;  %3214 = vmatpush.msrb.mxu1 %v2634_v56  ;;  %v3780_v3 = vunpack.c.l.bf16 %v9943_v20  ;;  %v9962_v56 = vld [vmem:[%s9882_s1 + $0x3c0] sm:$0xff] }
 0x52a   : >> { %3242 = vmatpush.msrb.mxu2 %v2719_v42  ;;  %v9959_v42 = vld [vmem:[%s9882_s1 + $0xc8] sm:$0xff] }
 0x52b   : >> { %3268 = vmatpush.msrb.mxu3 %v2814_v47  ;;  %3215 = vmatpush.msrb.mxu1 %v2629_v8  ;;  %v3760_v40 = vunpack.c.l.bf16 %v9959_v42  ;;  %v3950_v47 = vunpack.c.l.bf16 %v9962_v56  ;;  %v9970_v8 = vld [vmem:[%s9882_s1 + $0x398] sm:$0xff] }
 0x52c   : >> { %3243 = vmatpush.msrb.mxu2 %v2714_v12  ;;  %v9967_v12 = vld [vmem:[%s9882_s1 + $0xa0] sm:$0xff] }
 0x52d   : >> { %3269 = vmatpush.msrb.mxu3 %v2809_v44  ;;  %4565 = vmatpush.msra.mxu1 %v4020_v7  ;;  %v3750_v46 = vunpack.c.l.bf16 %v9967_v12  ;;  %v3940_v44 = vunpack.c.l.bf16 %v9970_v8  ;;  %v3751_v57 = vunpack.c.h.bf16 %v9967_v12  ;;  %v10140_v12 = vld [vmem:[%s9882_s1 + $0x528] sm:$0xff] }
 0x52e   : >> { %7562 = vmatmul.msk.f32.gmra.mxu1 %vm2839_vm10, %v9785_v33  ;;  %3244 = vmatpush.msrb.mxu2 %v2709_v21  ;;  %v3740_v21 = vunpack.c.l.bf16 %v9979_v34 }
 0x52f   : >> { %3135 = vmatmul.f32.gmra.mxu2 %v9697_v48  ;;  %7566 = vmatmul.msk.f32.gmra.mxu0 %vm2839_vm10, %v9785_v33 }
 0x530   : >> { %3051 = vmatmul.f32.gmra.mxu3 %v9735_v39 }
 0x531   : >> { %3270 = vmatpush.msrb.mxu3 %v2804_v38 }
 0x533   : >> { %3271 = vmatpush.msrb.mxu3 %v2799_v26 }
 0x535   : >> { %3272 = vmatpush.msrb.mxu3 %v2794_v0  ;;  %v9997_v0 = vld [vmem:[%s9882_s1 + $0x28] sm:$0xff] }
 0x536   : >> { %7563 = vmatmul.msk.f32.gmra.mxu1 %vm2839_vm10, %v9804_v36 }
 0x537   : >> { %3138 = vmatmul.f32.gmra.mxu2 %v9735_v39  ;;  %7567 = vmatmul.msk.f32.gmra.mxu0 %vm2839_vm10, %v9804_v36 }
 0x538   : >> { %3158 = vmatmul.f32.vlgmr.msra.gmra.mxu3 %v9653_v50 }
 0x539   : >> { %3273 = vmatpush.msrb.mxu3 %v2789_v37  ;;  %v3720_v37 = vunpack.c.l.bf16 %v9997_v0 }
 0x53e   : >> { %3216 = vmatmul.f32.vlgmr.msrb.gmra.mxu1 %v9651_v18  ;;  %v3850_v18 = vunpack.c.l.bf16 %v9889_v45 }
 0x53f   : >> { %3245 = vmatmul.f32.vlgmr.msrb.gmra.mxu2 %v9653_v50  ;;  %v9893_v50 = vld [vmem:[%s9882_s1 + $0x208] sm:$0xff] }
 0x540   : >> { %3161 = vmatmul.f32.gmra.mxu3 %v9672_v9  ;;  %4537 = vmatpush.msra.mxu0 %v3850_v18  ;;  %v3840_v31 = vunpack.c.l.bf16 %v9893_v50  ;;  %v10005_v18 = vld [vmem:[%s9882_s1] sm:$0xff] }
 0x542   : >> { %4538 = vmatpush.msra.mxu0 %v3840_v31  ;;  %v10008_v31 = vld [vmem:[%s9882_s1 + $0x2f8] sm:$0xff] }
 0x543   : >> { %v3900_v7 = vunpack.c.l.bf16 %v10008_v31 }
 0x544   : >> { %4539 = vmatpush.msra.mxu0 %v3830_v4  ;;  %v3710_v4 = vunpack.c.l.bf16 %v10005_v18 }
 0x546   : >> { %3219 = vmatmul.f32.gmra.mxu1 %v9670_v27  ;;  %v4010_v27 = vunpack.c.l.bf16 %v9911_v22  ;;  %4540 = vmatpush.msra.mxu0 %v3820_v19  ;;  %v10015_v19 = vld [vmem:[%s9882_s1 + $0x2d0] sm:$0xff] }
 0x547   : >> { %3248 = vmatmul.f32.gmra.mxu2 %v9672_v9  ;;  %v9916_v9 = vld [vmem:[%s9882_s1 + $0x190] sm:$0xff] }
 0x548   : >> { %3164 = vmatmul.f32.gmra.mxu3 %v9699_v24  ;;  %4566 = vmatpush.msra.mxu1 %v4010_v27  ;;  %v3810_v49 = vunpack.c.l.bf16 %v9916_v9 }
 0x54a   : >> { %4567 = vmatpush.msra.mxu1 %v4000_v43  ;;  %4541 = vmatpush.msra.mxu0 %v3810_v49  ;;  %v3890_v49 = vunpack.c.l.bf16 %v10015_v19  ;;  %v10021_v43 = vld [vmem:[%s9882_s1 + $0x2a8] sm:$0xff] }
 0x54c   : >> { %4542 = vmatpush.msra.mxu0 %v3800_v52  ;;  %4568 = vmatpush.msra.mxu1 %v3990_v11  ;;  %v10027_v11 = vld [vmem:[%s9882_s1 + $0x280] sm:$0xff] }
 0x54e   : >> { %3222 = vmatmul.f32.gmra.mxu1 %v9697_v48  ;;  %v3970_v48 = vunpack.c.l.bf16 %v9946_v15  ;;  %4543 = vmatpush.msra.mxu0 %v3790_v17  ;;  %v10030_v17 = vld [vmem:[%s9882_s1 + $0x758] sm:$0xff] }
 0x54f   : >> { %3251 = vmatmul.f32.gmra.mxu2 %v9699_v24  ;;  %v9951_v24 = vld [vmem:[%s9882_s1 + $0xf0] sm:$0xff]  ;;  %4569 = vmatpush.msra.mxu1 %v3980_v25  ;;  %v4180_v25 = vunpack.c.l.bf16 %v10030_v17 }
 0x550   : >> { %3167 = vmatmul.f32.gmra.mxu3 %v9737_v35  ;;  %v3770_v13 = vunpack.c.l.bf16 %v9951_v24  ;;  %4544 = vmatpush.msra.mxu0 %v3780_v3  ;;  %v3870_v3 = vunpack.c.l.bf16 %v10027_v11 }
 0x551   : >> { %4570 = vmatpush.msra.mxu1 %v3970_v48  ;;  %v10035_v48 = vld [vmem:[%s9882_s1 + $0x730] sm:$0xff]  ;;  %4594 = vmatpush.msra.mxu2 %v4180_v25  ;;  %v3811_v25 = vunpack.c.h.bf16 %v9916_v9 }
 0x552   : >> { %4545 = vmatpush.msra.mxu0 %v3770_v13 }
 0x553   : >> { %4571 = vmatpush.msra.mxu1 %v3960_v51  ;;  %v4170_v51 = vunpack.c.l.bf16 %v10035_v48 }
 0x554   : >> { %4546 = vmatpush.msra.mxu0 %v3760_v40  ;;  %v3861_v40 = vunpack.c.h.bf16 %v9885_v54  ;;  %v3841_v54 = vunpack.c.h.bf16 %v9893_v50  ;;  %v3821_v50 = vunpack.c.h.bf16 %v9908_v16  ;;  %v10083_v16 = vld [vmem:[%s9882_s1 + $0x640] sm:$0xff] }
 0x555   : >> { %4572 = vmatpush.msra.mxu1 %v3950_v47  ;;  %v10044_v47 = vld [vmem:[%s9882_s1 + $0x708] sm:$0xff]  ;;  %4595 = vmatpush.msra.mxu2 %v4170_v51  ;;  %v3801_v51 = vunpack.c.h.bf16 %v9924_v1 }
 0x556   : >> { %3225 = vmatmul.f32.gmra.mxu1 %v9735_v39  ;;  %v3930_v39 = vunpack.c.l.bf16 %v9982_v14  ;;  %4547 = vmatpush.msra.mxu0 %v3750_v46  ;;  %v4160_v46 = vunpack.c.l.bf16 %v10044_v47 }
 0x557   : >> { %3254 = vmatmul.f32.gmra.mxu2 %v9737_v35  ;;  %v9987_v35 = vld [vmem:[%s9882_s1 + $0x50] sm:$0xff]  ;;  %4573 = vmatpush.msra.mxu1 %v3940_v44  ;;  %v3851_v44 = vunpack.c.h.bf16 %v9889_v45 }
 0x558   : >> { %7568 = vmatmul.msk.f32.vlgmr.msrb.gmra.mxu3 %vm2839_vm10, %v9741_v53  ;;  %v9990_v53 = vld [vmem:[%s9882_s1 + $0x348] sm:$0xff]  ;;  %v3730_v38 = vunpack.c.l.bf16 %v9987_v35  ;;  %4548 = vmatpush.msra.mxu0 %v3740_v21 }
 0x559   : >> { %v3920_v23 = vunpack.c.l.bf16 %v9990_v53  ;;  %4574 = vmatpush.msra.mxu1 %v3930_v39  ;;  %v10052_v39 = vld [vmem:[%s9882_s1 + $0x6e0] sm:$0xff]  ;;  %4596 = vmatpush.msra.mxu2 %v4160_v46 }
 0x55a   : >> { %4549 = vmatpush.msra.mxu0 %v3730_v38 }
 0x55b   : >> { %v9993_v26 = vpop.f32.mrf.mxu1  ;;  %4575 = vmatpush.msra.mxu1 %v3920_v23  ;;  %v10059_v23 = vld [vmem:[%s9882_s1 + $0x6b8] sm:$0xff] }
 0x55c   : >> { %4550 = vmatpush.msra.mxu0 %v3720_v37  ;;  %v10037_v13 = vpop.f32.mrf.mxu0  ;;  %v4140_v45 = vunpack.c.l.bf16 %v10059_v23  ;;  %v3831_v37 = vunpack.c.h.bf16 %v9897_v32 }
 0x55d   : >> { %4576 = vmatpush.msra.mxu1 %v3910_v6  ;;  %v10065_v6 = vld [vmem:[%s9882_s1 + $0x690] sm:$0xff] }
 0x55e   : >> { %4551 = vmatpush.msra.mxu0 %v3710_v4  ;;  %v4130_v4 = vunpack.c.l.bf16 %v10065_v6  ;;  %v4131_v63 = vunpack.c.h.bf16 %v10065_v6 }
 0x55f   : >> { %4577 = vmatpush.msra.mxu1 %v3900_v7  ;;  %v10072_v7 = vld [vmem:[%s9882_s1 + $0x668] sm:$0xff] }
 0x560   : >> { %7569 = vmatmul.msk.f32.gmra.mxu3 %vm2839_vm10, %v9763_v5  ;;  %v3880_v5 = vunpack.c.l.bf16 %v10021_v43  ;;  %v4120_v32 = vunpack.c.l.bf16 %v10072_v7  ;;  %v4121_v6 = vunpack.c.h.bf16 %v10072_v7  ;;  %v10335_v7 = vld [vmem:[%s9882_s1 + $0x148] sm:$0xff] }
 0x561   : >> { %v10017_v27 = vpop.f32.mrf.mxu2  ;;  %4578 = vmatpush.msra.mxu1 %v3890_v49  ;;  %v10074_v49 = vld [vmem:[%s2826_s18] sm:$0x1f]  ;;  %13368 = vst [vmem:[#allocation216_spill] sm:$0xff] %v10335_v7  ;;  %s13918_s18 = sld [smem:[#allocation26_spill]] (%p2088_p2) }
 0x563   : >> { %v10023_v52 = vpop.f32.mrf.mxu1  ;;  %4579 = vmatpush.msra.mxu1 %v3880_v5 }
 0x564   : >> { %v10076_v5 = vpop.f32.mrf.mxu0 }
 0x565   : >> { %4580 = vmatpush.msra.mxu1 %v3870_v3 }
 0x567   : >> { %4681 = vmatpush.msrb.mxu1 %v3861_v40  ;;  %v10088_v40 = vperm.slane %v10074_v49, 0 }
 0x568   : >> { %7570 = vmatmul.msk.f32.gmra.mxu3 %vm2839_vm10, %v9785_v33  ;;  %v4150_v33 = vunpack.c.l.bf16 %v10052_v39 }
 0x569   : >> { %v10049_v21 = vpop.f32.mrf.mxu2  ;;  %4682 = vmatpush.msrb.mxu1 %v3851_v44  ;;  %v10093_v44 = vld [vmem:[%s9882_s1 + $0x618] sm:$0xff] }
 0x56a   : >> { %4597 = vmatpush.msra.mxu2 %v4150_v33  ;;  %v4100_v9 = vunpack.c.l.bf16 %v10093_v44  ;;  %v3791_v33 = vunpack.c.h.bf16 %v9932_v2  ;;  %v3771_v2 = vunpack.c.h.bf16 %v9951_v24 }
 0x56b   : >> { %v10056_v38 = vpop.f32.mrf.mxu1  ;;  %4683 = vmatpush.msrb.mxu1 %v3841_v54  ;;  %v10098_v54 = vld [vmem:[%s9882_s1 + $0x5f0] sm:$0xff] }
 0x56c   : >> { %4598 = vmatpush.msra.mxu2 %v4140_v45  ;;  %v4090_v1 = vunpack.c.l.bf16 %v10098_v54  ;;  %v3781_v45 = vunpack.c.h.bf16 %v9943_v20  ;;  %v10116_v20 = vperm.slane %v10074_v49, 1 }
 0x56d   : >> { %4684 = vmatpush.msrb.mxu1 %v3831_v37  ;;  %v2870_v37 = vadd.f32 %v9993_v26, %v10088_v40  ;;  %v10118_v26 = vpop.f32.mrf.mxu0 }
 0x56e   : >> { %4599 = vmatpush.msra.mxu2 %v4130_v4  ;;  %v10105_v4 = vld [vmem:[%s9882_s1 + $0x5c8] sm:$0xff] }
 0x56f   : >> { %4685 = vmatpush.msrb.mxu1 %v3821_v50  ;;  %v4080_v50 = vunpack.c.l.bf16 %v10105_v4 }
 0x570   : >> { %7571 = vmatmul.msk.f32.gmra.mxu3 %vm2839_vm10, %v9804_v36  ;;  %4600 = vmatpush.msra.mxu2 %v4120_v32  ;;  %v4110_v36 = vunpack.c.l.bf16 %v10083_v16  ;;  %v2899_v32 = vadd.f32 %v10017_v27, %v2870_v37 }
 0x571   : >> { %v10080_v3 = vpop.f32.mrf.mxu2  ;;  %4686 = vmatpush.msrb.mxu1 %v3811_v25 }
 0x572   : >> { %4601 = vmatpush.msra.mxu2 %v4110_v36  ;;  %v10113_v36 = vld [vmem:[%s9882_s1 + $0x5a0] sm:$0xff] }
 0x573   : >> { %v10090_v46 = vpop.f32.mrf.mxu1  ;;  %4687 = vmatpush.msrb.mxu1 %v3801_v51 }
 0x574   : >> { %4602 = vmatpush.msra.mxu2 %v4100_v9  ;;  %v4070_v9 = vunpack.c.l.bf16 %v10113_v36 }
 0x575   : >> { %4688 = vmatpush.msrb.mxu1 %v3791_v33  ;;  %v3761_v33 = vunpack.c.h.bf16 %v9959_v42  ;;  %v4050_v42 = vunpack.c.l.bf16 %v10130_v59 }
 0x576   : >> { %4603 = vmatpush.msra.mxu2 %v4090_v1  ;;  %v10123_v1 = vld [vmem:[%s9882_s1 + $0x578] sm:$0xff] }
 0x577   : >> { %4689 = vmatpush.msrb.mxu1 %v3781_v45  ;;  %v4060_v37 = vunpack.c.l.bf16 %v10123_v1  ;;  %v2957_v45 = vadd.f32 %v10037_v13, %v10116_v20  ;;  %v4040_v13 = vunpack.c.l.bf16 %v10140_v12 }
 0x578   : >> { %4604 = vmatpush.msra.mxu2 %v4080_v50  ;;  %v3741_v50 = vunpack.c.h.bf16 %v9979_v34  ;;  %v10149_v34 = vld [vmem:[%s9882_s1 + $0x9d8] sm:$0xff] }
 0x579   : >> { %v10110_v25 = vpop.f32.mrf.mxu2  ;;  %4690 = vmatpush.msrb.mxu1 %v3771_v2  ;;  %v2873_v2 = vadd.f32 %v10023_v52, %v10088_v40 }
 0x57a   : >> { %v2927_v51 = vpop.f32.mrf.mxu3  ;;  %4605 = vmatpush.msra.mxu2 %v4070_v9 }
 0x57b   : >> { %v2928_v24 = vadd.f32 %v2927_v51, %v2899_v32  ;;  %v2985_v27 = vpop.f32.mrf.mxu1  ;;  %4691 = vmatpush.msrb.mxu1 %v3761_v33  ;;  %v3731_v51 = vunpack.c.h.bf16 %v9987_v35  ;;  %v2902_v9 = vadd.f32 %v10049_v21, %v2873_v2  ;;  %v3721_v35 = vunpack.c.h.bf16 %v9997_v0  ;;  %v10157_v21 = vpop.f32.mrf.mxu0 }
 0x57c   : >> { %4606 = vmatpush.msra.mxu2 %v4060_v37  ;;  %v2986_v32 = vadd.f32 %v2985_v27, %v2957_v45  ;;  %v4340_v27 = vunpack.c.l.bf16 %v10149_v34  ;;  %v2960_v0 = vadd.f32 %v10076_v5, %v10116_v20 }
 0x57d   : >> { %v10127_v58 = vmax.f32 %v2928_v24, 0.0  ;;  %4692 = vmatpush.msrb.mxu1 %v3751_v57  ;;  %v10146_v24 = vld [vmem:[%s9882_s1 + $0x500] sm:$0xff] }
 0x57e   : >> { %4607 = vmatpush.msra.mxu2 %v4050_v42  ;;  %v4030_v57 = vunpack.c.l.bf16 %v10146_v24  ;;  %4623 = vmatpush.msra.mxu3 %v4340_v27 }
 0x57f   : >> { %13357 = vst [vmem:[#allocation205_spill] sm:$0xff] %v10127_v58  ;;  %4552 = vmatmul.f32.vlgmr.msra.gmra.mxu0 %v10127_v58  ;;  %4693 = vmatpush.msrb.mxu1 %v3741_v50  ;;  %v4330_v50 = vunpack.c.l.bf16 %v10155_v60 }
 0x580   : >> { %4608 = vmatpush.msra.mxu2 %v4040_v13  ;;  %v3711_v13 = vunpack.c.h.bf16 %v10005_v18  ;;  %v10178_v18 = vld [vmem:[%s9882_s1 + $0x960] sm:$0xff] }
 0x581   : >> { %v3014_v33 = vpop.f32.mrf.mxu2  ;;  %4694 = vmatpush.msrb.mxu1 %v3731_v51  ;;  %4624 = vmatpush.msra.mxu3 %v4330_v50  ;;  %v4310_v5 = vunpack.c.l.bf16 %v10178_v18 }
 0x582   : >> { %v3015_v52 = vadd.f32 %v3014_v33, %v2986_v32  ;;  %v2930_v37 = vpop.f32.mrf.mxu3  ;;  %4609 = vmatpush.msra.mxu2 %v4030_v57  ;;  %v10167_v33 = vld [vmem:[%s9882_s1 + $0x988] sm:$0xff]  ;;  %v4001_v57 = vunpack.c.h.bf16 %v9919_v10 }
 0x583   : >> { %v2931_v45 = vadd.f32 %v2930_v37, %v2902_v9  ;;  %v2988_v42 = vpop.f32.mrf.mxu1  ;;  %v4021_v9 = vunpack.c.h.bf16 %v9900_v28  ;;  %v4320_v51 = vunpack.c.l.bf16 %v10167_v33  ;;  %v2876_v37 = vadd.f32 %v10056_v38, %v10088_v40  ;;  %4695 = vmatpush.msrb.mxu1 %v3721_v35 }
 0x584   : >> { %v10159_v2 = vmax.f32 %v3015_v52, 0.0  ;;  %v4011_v52 = vunpack.c.h.bf16 %v9911_v22  ;;  %v2989_v28 = vadd.f32 %v2988_v42, %v2960_v0  ;;  %v10184_v22 = vld [vmem:[%s9882_s1 + $0x938] sm:$0xff]  ;;  %v10189_v0 = vld [vmem:[%s9882_s1 + $0x910] sm:$0xff] }
 0x585   : >> { %v10162_v32 = vmax.f32 %v2931_v45, 0.0  ;;  %4710 = vmatpush.msrb.mxu2 %v4021_v9  ;;  %v2905_v27 = vadd.f32 %v10080_v3, %v2876_v37  ;;  %4696 = vmatpush.msrb.mxu1 %v3711_v13  ;;  %v4300_v42 = vunpack.c.l.bf16 %v10184_v22  ;;  %v3991_v9 = vunpack.c.h.bf16 %v9927_v29  ;;  %v3072_v37 = vpop.f32.mrf.mxu0 }
 0x586   : >> { %4581 = vmatmul.f32.vlgmr.msra.gmra.mxu1 %v10159_v2  ;;  %4625 = vmatpush.msra.mxu3 %v4320_v51  ;;  %v4290_v3 = vunpack.c.l.bf16 %v10189_v0  ;;  %v3981_v51 = vunpack.c.h.bf16 %v9935_v30  ;;  %v3971_v30 = vunpack.c.h.bf16 %v9946_v15 }
 0x587   : >> { %13358 = vst [vmem:[#allocation206_spill] sm:$0xff] %v10162_v32  ;;  %4555 = vmatmul.f32.gmra.mxu0 %v10162_v32  ;;  %4711 = vmatpush.msrb.mxu2 %v4011_v52  ;;  %v10198_v52 = vld [vmem:[%s9882_s1 + $0x8e8] sm:$0xff] }
 0x588   : >> { %4626 = vmatpush.msra.mxu3 %v4310_v5  ;;  %v4280_v29 = vunpack.c.l.bf16 %v10198_v52  ;;  %v10209_v5 = vld [vmem:[%s9882_s1 + $0x8c0] sm:$0xff] }
 0x589   : >> { %v3017_v45 = vpop.f32.mrf.mxu2  ;;  %4712 = vmatpush.msrb.mxu2 %v4001_v57 }
 0x58a   : >> { %v3018_v38 = vadd.f32 %v3017_v45, %v2989_v28  ;;  %v2933_v61 = vpop.f32.mrf.mxu3  ;;  %4627 = vmatpush.msra.mxu3 %v4300_v42  ;;  %v2879_v28 = vadd.f32 %v10090_v46, %v10088_v40  ;;  %v10215_v42 = vld [vmem:[%s9882_s1 + $0x898] sm:$0xff] }
 0x58b   : >> { %v2934_v35 = vadd.f32 %v2933_v61, %v2905_v27  ;;  %v2991_v50 = vpop.f32.mrf.mxu1  ;;  %v2963_v61 = vadd.f32 %v10118_v26, %v10116_v20  ;;  %4713 = vmatpush.msrb.mxu2 %v3991_v9  ;;  %v4270_v26 = vunpack.c.l.bf16 %v10209_v5  ;;  %v4260_v15 = vunpack.c.l.bf16 %v10215_v42 }
 0x58c   : >> { %v10191_v10 = vmax.f32 %v3018_v38, 0.0  ;;  %4628 = vmatpush.msra.mxu3 %v4290_v3  ;;  %v2908_v27 = vadd.f32 %v10110_v25, %v2879_v28  ;;  %v3961_v38 = vunpack.c.h.bf16 %v9954_v55  ;;  %v3951_v9 = vunpack.c.h.bf16 %v9962_v56  ;;  %v10220_v3 = vld [vmem:[%s9882_s1 + $0x870] sm:$0xff] }
 0x58d   : >> { %v10194_v13 = vmax.f32 %v2934_v35, 0.0  ;;  %v2992_v57 = vadd.f32 %v2991_v50, %v2963_v61  ;;  %4714 = vmatpush.msrb.mxu2 %v3981_v51  ;;  %v4250_v55 = vunpack.c.l.bf16 %v10220_v3  ;;  %v3941_v61 = vunpack.c.h.bf16 %v9970_v8  ;;  %v10241_v8 = vld [vmem:[%s9882_s1 + $0x820] sm:$0xff] }
 0x58e   : >> { %4584 = vmatmul.f32.gmra.mxu1 %v10191_v10  ;;  %4629 = vmatpush.msra.mxu3 %v4280_v29  ;;  %v10229_v29 = vld [vmem:[%s9882_s1 + $0x848] sm:$0xff]  ;;  %v2966_v28 = vadd.f32 %v10157_v21, %v10116_v20  ;;  %v4230_v20 = vunpack.c.l.bf16 %v10241_v8 }
 0x58f   : >> { %13359 = vst [vmem:[#allocation207_spill] sm:$0xff] %v10194_v13  ;;  %4558 = vmatmul.f32.gmra.mxu0 %v10194_v13  ;;  %4715 = vmatpush.msrb.mxu2 %v3971_v30  ;;  %v4240_v56 = vunpack.c.l.bf16 %v10229_v29  ;;  %v10237_v30 = vperm.slane %v10074_v49, 2 }
 0x590   : >> { %4630 = vmatpush.msra.mxu3 %v4270_v26  ;;  %v3075_v26 = vpop.f32.mrf.mxu0 }
 0x591   : >> { %v3020_v45 = vpop.f32.mrf.mxu2  ;;  %4716 = vmatpush.msrb.mxu2 %v3961_v38  ;;  %v10246_v38 = vld [vmem:[%s9882_s1 + $0x7f8] sm:$0xff] }
 0x592   : >> { %v3021_v40 = vadd.f32 %v3020_v45, %v2992_v57  ;;  %v2936_v46 = vpop.f32.mrf.mxu3  ;;  %4631 = vmatpush.msra.mxu3 %v4260_v15  ;;  %v3931_v57 = vunpack.c.h.bf16 %v9982_v14  ;;  %v3921_v45 = vunpack.c.h.bf16 %v9990_v53  ;;  %v4220_v14 = vunpack.c.l.bf16 %v10246_v38 }
 0x593   : >> { %v2937_v35 = vadd.f32 %v2936_v46, %v2908_v27  ;;  %v2994_v50 = vpop.f32.mrf.mxu1  ;;  %4717 = vmatpush.msrb.mxu2 %v3951_v9  ;;  %v10252_v9 = vld [vmem:[%s9882_s1 + $0x7d0] sm:$0xff] }
 0x594   : >> { %v10222_v25 = vmax.f32 %v3021_v40, 0.0  ;;  %v2995_v27 = vadd.f32 %v2994_v50, %v2966_v28  ;;  %4632 = vmatpush.msra.mxu3 %v4250_v55  ;;  %v3911_v50 = vunpack.c.h.bf16 %v10000_v41  ;;  %v4210_v53 = vunpack.c.l.bf16 %v10252_v9 }
 0x595   : >> { %v10225_v51 = vmax.f32 %v2937_v35, 0.0  ;;  %4718 = vmatpush.msrb.mxu2 %v3941_v61  ;;  %v3901_v28 = vunpack.c.h.bf16 %v10008_v31 }
 0x596   : >> { %4587 = vmatmul.f32.gmra.mxu1 %v10222_v25  ;;  %4633 = vmatpush.msra.mxu3 %v4240_v56  ;;  %v10259_v56 = vld [vmem:[%s9882_s1 + $0x7a8] sm:$0xff] }
 0x597   : >> { %13360 = vst [vmem:[#allocation208_spill] sm:$0xff] %v10225_v51  ;;  %4561 = vmatmul.f32.gmra.mxu0 %v10225_v51  ;;  %4719 = vmatpush.msrb.mxu2 %v3931_v57  ;;  %v4200_v57 = vunpack.c.l.bf16 %v10259_v56 }
 0x598   : >> { %4634 = vmatpush.msra.mxu3 %v4230_v20  ;;  %v3891_v20 = vunpack.c.h.bf16 %v10015_v19  ;;  %v4181_v19 = vunpack.c.h.bf16 %v10030_v17 }
 0x599   : >> { %v3023_v21 = vpop.f32.mrf.mxu2  ;;  %4720 = vmatpush.msrb.mxu2 %v3921_v45 }
 0x59a   : >> { %v3024_v40 = vadd.f32 %v3023_v21, %v2995_v27  ;;  %v3043_v46 = vpop.f32.mrf.mxu3  ;;  %4635 = vmatpush.msra.mxu3 %v4220_v14  ;;  %v3705_v27 = vld [vmem:[%s9882_s1 + $0xc58] sm:$0xff]  ;;  %v10265_v21 = vld [vmem:[%s9882_s1 + $0x780] sm:$0xff]  ;;  %v10272_v14 = vpop.f32.mrf.mxu0 }
 0x59b   : >> { %v3044_v15 = vadd.f32 %v3043_v46, %v10237_v30  ;;  %v3101_v35 = vpop.f32.mrf.mxu1  ;;  %4721 = vmatpush.msrb.mxu2 %v3911_v50  ;;  %v4190_v45 = vunpack.c.l.bf16 %v10265_v21  ;;  %v4501_v31 = vunpack.c.h.bf16 %v3705_v27  ;;  %v3700_v46 = vld [vmem:[%s9882_s1 + $0xc30] sm:$0xff] }
 0x59c   : >> { %v10254_v55 = vmax.f32 %v3024_v40, 0.0  ;;  %4636 = vmatpush.msra.mxu3 %v4210_v53  ;;  %v4490_v50 = vunpack.c.l.bf16 %v3700_v46 }
 0x59d   : >> { %v3073_v61 = vadd.f32 %v3072_v37, %v3044_v15  ;;  %v4500_v37 = vunpack.c.l.bf16 %v3705_v27  ;;  %4722 = vmatpush.msrb.mxu2 %v3901_v28  ;;  %4797 = vmatpush.msra.mxu1 %v4501_v31  ;;  %v4491_v28 = vunpack.c.h.bf16 %v3700_v46  ;;  %v10280_v27 = vld [vmem:[%s9882_s1 + $0x260] sm:$0xff]  ;;  %v10287_v46 = vld [vmem:[%s9882_s1 + $0x238] sm:$0xff] }
 0x59e   : >> { %13361 = vst [vmem:[#allocation209_spill] sm:$0xff] %v10254_v55  ;;  %4590 = vmatmul.f32.gmra.mxu1 %v10254_v55  ;;  %4637 = vmatpush.msra.mxu3 %v4200_v57  ;;  %v3871_v57 = vunpack.c.h.bf16 %v10027_v11  ;;  %v3862_v62 = vunpack.c.l.bf16 %v10280_v27  ;;  %v3690_v31 = vld [vmem:[%s9882_s1 + $0xbe0] sm:$0xff]  ;;  %v4161_v11 = vunpack.c.h.bf16 %v10044_v47  ;;  %v4151_v47 = vunpack.c.h.bf16 %v10052_v39 }
 0x59f   : >> { %v3102_v41 = vadd.f32 %v3101_v35, %v3073_v61  ;;  %4652 = vmatpush.msrb.mxu0 %v4500_v37  ;;  %v3881_v35 = vunpack.c.h.bf16 %v10021_v43  ;;  %4723 = vmatpush.msrb.mxu2 %v3891_v20  ;;  %v4171_v37 = vunpack.c.h.bf16 %v10035_v48  ;;  %v4470_v20 = vunpack.c.l.bf16 %v3690_v31  ;;  %v10311_v39 = vld [vmem:[%s9882_s1 + $0x1c0] sm:$0xff] }
 0x5a0   : >> { %4638 = vmatpush.msra.mxu3 %v4190_v45  ;;  %4798 = vmatpush.msra.mxu1 %v4491_v28  ;;  %v4471_v48 = vunpack.c.h.bf16 %v3690_v31  ;;  %v3680_v28 = vld [vmem:[%s9882_s1 + $0xb90] sm:$0xff]  ;;  %v3675_v31 = vld [vmem:[%s9882_s1 + $0xb68] sm:$0xff] }
 0x5a1   : >> { %v10269_v40 = vmax.f32 %v3102_v41, 0.0  ;;  %v3695_v41 = vld [vmem:[%s9882_s1 + $0xc08] sm:$0xff]  ;;  %4653 = vmatpush.msrb.mxu0 %v4490_v50  ;;  %4724 = vmatpush.msrb.mxu2 %v3881_v35  ;;  %v10293_v50 = vld [vmem:[%s9882_s1 + $0x210] sm:$0xff] }
 0x5a2   : >> { %v3046_v15 = vpop.f32.mrf.mxu3  ;;  %v4480_v43 = vunpack.c.l.bf16 %v3695_v41  ;;  %4739 = vmatpush.msrb.mxu3 %v4181_v19  ;;  %13363 = vst [vmem:[#allocation211_spill] sm:$0xff] %v10293_v50  ;;  %v10295_v19 = vpop.f32.mrf.mxu2 }
 0x5a3   : >> { %13362 = vst [vmem:[#allocation210_spill] sm:$0xff] %v10269_v40  ;;  %v3047_v53 = vadd.f32 %v3046_v15, %v10237_v30  ;;  %v3104_v61 = vpop.f32.mrf.mxu1  ;;  %4610 = vmatmul.f32.vlgmr.msra.gmra.mxu2 %v10269_v40  ;;  %v4481_v15 = vunpack.c.h.bf16 %v3695_v41 }
 0x5a4   : >> { %4654 = vmatpush.msrb.mxu0 %v4480_v43  ;;  %4725 = vmatpush.msrb.mxu2 %v3871_v57  ;;  %v10303_v43 = vld [vmem:[%s9882_s1 + $0x1e8] sm:$0xff]  ;;  %v3842_v57 = vunpack.c.l.bf16 %v10293_v50  ;;  %v4441_v50 = vunpack.c.h.bf16 %v3675_v31 }
 0x5a5   : >> { %v3076_v17 = vadd.f32 %v3075_v26, %v3047_v53  ;;  %v3685_v26 = vld [vmem:[%s9882_s1 + $0xbb8] sm:$0xff]  ;;  %4740 = vmatpush.msrb.mxu3 %v4171_v37  ;;  %v3852_v53 = vunpack.c.l.bf16 %v10287_v46  ;;  %4799 = vmatpush.msra.mxu1 %v4481_v15  ;;  %v4450_v15 = vunpack.c.l.bf16 %v3680_v28 }
 0x5a6   : >> { %4697 = vmatmul.f32.vlgmr.msrb.gmra.mxu1 %v10127_v58  ;;  %v4460_v41 = vunpack.c.l.bf16 %v3685_v26  ;;  %4826 = vmatpush.msra.mxu2 %v3862_v62  ;;  %v4141_v62 = vunpack.c.h.bf16 %v10059_v23  ;;  %v3670_v23 = vld [vmem:[%s9882_s1 + $0xb40] sm:$0xff] }
 0x5a7   : >> { %v3105_v45 = vadd.f32 %v3104_v61, %v3076_v17  ;;  %v4461_v61 = vunpack.c.h.bf16 %v3685_v26  ;;  %4655 = vmatpush.msrb.mxu0 %v4470_v20  ;;  %4741 = vmatpush.msrb.mxu3 %v4161_v11  ;;  %v4451_v20 = vunpack.c.h.bf16 %v3680_v28  ;;  %v3832_v11 = vunpack.c.l.bf16 %v10303_v43 }
 0x5a8   : >> { %4800 = vmatpush.msra.mxu1 %v4471_v48  ;;  %4827 = vmatpush.msra.mxu2 %v3852_v53  ;;  %v4440_v48 = vunpack.c.l.bf16 %v3675_v31  ;;  %v3822_v53 = vunpack.c.l.bf16 %v10311_v39 }
 0x5a9   : >> { %v10298_v35 = vmax.f32 %v3105_v45, 0.0  ;;  %v3081_v45 = vpop.f32.mrf.mxu0  ;;  %4656 = vmatpush.msrb.mxu0 %v4460_v41  ;;  %4742 = vmatpush.msrb.mxu3 %v4151_v47  ;;  %v10320_v41 = vld [vmem:[%s9882_s1 + $0x198] sm:$0xff] }
 0x5aa   : >> { %4801 = vmatpush.msra.mxu1 %v4461_v61  ;;  %4828 = vmatpush.msra.mxu2 %v3842_v57  ;;  %13365 = vst [vmem:[#allocation213_spill] sm:$0xff] %v10320_v41  ;;  %v3665_v47 = vld [vmem:[%s9882_s1 + $0xb18] sm:$0xff]  ;;  %v4431_v61 = vunpack.c.h.bf16 %v3670_v23  ;;  %v3812_v31 = vunpack.c.l.bf16 %v10320_v41 }
 0x5ab   : >> { %13364 = vst [vmem:[#allocation212_spill] sm:$0xff] %v10298_v35  ;;  %v3049_v17 = vpop.f32.mrf.mxu3  ;;  %4613 = vmatmul.f32.gmra.mxu2 %v10298_v35  ;;  %v3107_v26 = vpop.f32.mrf.mxu1  ;;  %4657 = vmatpush.msrb.mxu0 %v4450_v15  ;;  %v3660_v15 = vld [vmem:[%s9882_s1 + $0xaf0] sm:$0xff] }
 0x5ac   : >> { %v3050_v37 = vadd.f32 %v3049_v17, %v10237_v30  ;;  %4743 = vmatpush.msrb.mxu3 %v4141_v62  ;;  %4802 = vmatpush.msra.mxu1 %v4451_v20  ;;  %v10331_v62 = vpop.f32.mrf.mxu2  ;;  %v4111_v20 = vunpack.c.h.bf16 %v10083_v16  ;;  %v10343_v16 = vperm.slane %v10074_v49, 3 }
 0x5ad   : >> { %4829 = vmatpush.msra.mxu2 %v3832_v11  ;;  %4658 = vmatpush.msrb.mxu0 %v4440_v48 }
 0x5ae   : >> { %v3079_v17 = vadd.f32 %v10272_v14, %v3050_v37  ;;  %4700 = vmatmul.f32.gmra.mxu1 %v10162_v32  ;;  %v4430_v14 = vunpack.c.l.bf16 %v3670_v23  ;;  %v10325_v37 = vld [vmem:[%s9882_s1 + $0x170] sm:$0xff]  ;;  %4744 = vmatpush.msrb.mxu3 %v4131_v63  ;;  %v4421_v63 = vunpack.c.h.bf16 %v3665_v47  ;;  %v3655_v23 = vld [vmem:[%s9882_s1 + $0xac8] sm:$0xff] }
 0x5af   : >> { %13366 = vst [vmem:[#allocation214_spill] sm:$0xff] %v10325_v37  ;;  %4803 = vmatpush.msra.mxu1 %v4441_v50  ;;  %4830 = vmatpush.msra.mxu2 %v3822_v53  ;;  %v3802_v48 = vunpack.c.l.bf16 %v10325_v37  ;;  %v4101_v50 = vunpack.c.h.bf16 %v10093_v44  ;;  %v4400_v44 = vunpack.c.l.bf16 %v3655_v23 }
 0x5b0   : >> { %v3108_v28 = vadd.f32 %v3107_v26, %v3079_v17  ;;  %v4420_v26 = vunpack.c.l.bf16 %v3665_v47  ;;  %4659 = vmatpush.msrb.mxu0 %v4430_v14  ;;  %4745 = vmatpush.msrb.mxu3 %v4121_v6  ;;  %v10347_v14 = vld [vmem:[%s9882_s1 + $0x120] sm:$0xff] }
 0x5b1   : >> { %4804 = vmatpush.msra.mxu1 %v4431_v61  ;;  %4831 = vmatpush.msra.mxu2 %v3812_v31  ;;  %v3650_v47 = vld [vmem:[%s9882_s1 + $0xaa0] sm:$0xff]  ;;  %v3188_v37 = vpop.f32.mrf.mxu0  ;;  %v4091_v61 = vunpack.c.h.bf16 %v10098_v54  ;;  %v10353_v31 = vld [vmem:[%s9882_s1 + $0xf8] sm:$0xff]  ;;  %v4081_v54 = vunpack.c.h.bf16 %v10105_v4 }
 0x5b2   : >> { %v10327_v57 = vmax.f32 %v3108_v28, 0.0  ;;  %v4410_v28 = vunpack.c.l.bf16 %v3660_v15  ;;  %4660 = vmatpush.msrb.mxu0 %v4420_v26  ;;  %4746 = vmatpush.msrb.mxu3 %v4111_v20  ;;  %v3782_v26 = vunpack.c.l.bf16 %v10347_v14  ;;  %v3131_v20 = vadd.f32 %v10295_v19, %v10343_v16 }
 0x5b3   : >> { %v3052_v17 = vpop.f32.mrf.mxu3  ;;  %v3110_v6 = vpop.f32.mrf.mxu1  ;;  %4805 = vmatpush.msra.mxu1 %v4421_v63  ;;  %4832 = vmatpush.msra.mxu2 %v3802_v48  ;;  %v4391_v63 = vunpack.c.h.bf16 %v3650_v47  ;;  %v10363_v48 = vld [vmem:[%s9882_s1 + $0xd0] sm:$0xff] }
 0x5b4   : >> { %13367 = vst [vmem:[#allocation215_spill] sm:$0xff] %v10327_v57  ;;  %v3053_v11 = vadd.f32 %v3052_v17, %v10237_v30  ;;  %4616 = vmatmul.f32.gmra.mxu2 %v10327_v57  ;;  %v4411_v30 = vunpack.c.h.bf16 %v3660_v15  ;;  %v3792_v17 = vunpack.c.l.bf16 %v10335_v7  ;;  %4661 = vmatpush.msrb.mxu0 %v4410_v28  ;;  %v4390_v15 = vunpack.c.l.bf16 %v3650_v47  ;;  %v10369_v4 = vpop.f32.mrf.mxu2  ;;  %v3635_v47 = vld [vmem:[%s9882_s1 + $0xa28] sm:$0xff] }
 0x5b5   : >> { %4747 = vmatpush.msrb.mxu3 %v4101_v50  ;;  %v3772_v28 = vunpack.c.l.bf16 %v10353_v31  ;;  %v3640_v50 = vld [vmem:[%s9882_s1 + $0xa50] sm:$0xff] }
 0x5b6   : >> { %v3082_v53 = vadd.f32 %v3081_v45, %v3053_v11  ;;  %4703 = vmatmul.f32.gmra.mxu1 %v10194_v13  ;;  %v4401_v45 = vunpack.c.h.bf16 %v3655_v23  ;;  %v3645_v11 = vld [vmem:[%s9882_s1 + $0xa78] sm:$0xff]  ;;  %4833 = vmatpush.msra.mxu2 %v3792_v17  ;;  %v3762_v17 = vunpack.c.l.bf16 %v10363_v48 }
 0x5b7   : >> { %4806 = vmatpush.msra.mxu1 %v4411_v30  ;;  %4662 = vmatpush.msrb.mxu0 %v4400_v44  ;;  %v4380_v19 = vunpack.c.l.bf16 %v3645_v11  ;;  %v4381_v30 = vunpack.c.h.bf16 %v3645_v11  ;;  %v4370_v44 = vunpack.c.l.bf16 %v3640_v50  ;;  %v10382_v11 = vld [vmem:[%s9882_s1 + $0x80] sm:$0xff] }
 0x5b8   : >> { %v3111_v41 = vadd.f32 %v3110_v6, %v3082_v53  ;;  %4748 = vmatpush.msrb.mxu3 %v4091_v61  ;;  %4834 = vmatpush.msra.mxu2 %v3782_v26  ;;  %v10374_v61 = vld [vmem:[%s9882_s1 + $0xa8] sm:$0xff] }
 0x5b9   : >> { %4807 = vmatpush.msra.mxu1 %v4401_v45  ;;  %4663 = vmatpush.msrb.mxu0 %v4390_v15  ;;  %v4371_v45 = vunpack.c.h.bf16 %v3640_v50  ;;  %v4360_v15 = vunpack.c.l.bf16 %v3635_v47  ;;  %v10390_v50 = vld [vmem:[%s9882_s1 + $0x58] sm:$0xff] }
 0x5ba   : >> { %v10359_v7 = vmax.f32 %v3111_v41, 0.0  ;;  %v4071_v41 = vunpack.c.h.bf16 %v10113_v36  ;;  %4749 = vmatpush.msrb.mxu3 %v4081_v54  ;;  %4835 = vmatpush.msra.mxu2 %v3772_v28  ;;  %v4061_v36 = vunpack.c.h.bf16 %v10123_v1  ;;  %v3752_v54 = vunpack.c.l.bf16 %v10374_v61 }
 0x5bb   : >> { %v3159_v23 = vpop.f32.mrf.mxu3  ;;  %4808 = vmatpush.msra.mxu1 %v4391_v63  ;;  %4664 = vmatpush.msrb.mxu0 %v4380_v19  ;;  %v4051_v63 = vunpack.c.h.bf16 %v10130_v59  ;;  %v3134_v1 = vadd.f32 %v10331_v62, %v10343_v16  ;;  %v3742_v19 = vunpack.c.l.bf16 %v10382_v11  ;;  %v10395_v59 = vld [vmem:[%s9882_s1 + $0x9e0] sm:$0xff] }
 0x5bc   : >> { %13369 = vst [vmem:[#allocation217_spill] sm:$0xff] %v10359_v7  ;;  %v3160_v53 = vadd.f32 %v3159_v23, %v3131_v20  ;;  %4619 = vmatmul.f32.gmra.mxu2 %v10359_v7  ;;  %v3630_v20 = vld [vmem:[%s9882_s1 + $0xa00] sm:$0xff]  ;;  %4750 = vmatpush.msrb.mxu3 %v4071_v41  ;;  %v4361_v23 = vunpack.c.h.bf16 %v3635_v47  ;;  %v4041_v41 = vunpack.c.h.bf16 %v10140_v12  ;;  %v10400_v47 = vld [vmem:[%s9882_s1 + $0x30] sm:$0xff]  ;;  %v4031_v12 = vunpack.c.h.bf16 %v10146_v24 }
 0x5bd   : >> { %4809 = vmatpush.msra.mxu1 %v4381_v30  ;;  %4836 = vmatpush.msra.mxu2 %v3762_v17  ;;  %v4350_v28 = vunpack.c.l.bf16 %v3630_v20  ;;  %v4351_v30 = vunpack.c.h.bf16 %v3630_v20  ;;  %v4341_v17 = vunpack.c.h.bf16 %v10149_v34  ;;  %13370 = vst [vmem:[#allocation218_spill] sm:$0xff] %v10400_v47  ;;  %v10409_v20 = vld [vmem:[%s9882_s1 + $0x8] sm:$0xff]  ;;  %v10412_v34 = vld [vmem:[%s9882_s1 + $0x9b8] sm:$0xff]  ;;  %v3722_v24 = vunpack.c.l.bf16 %v10400_v47  ;;  %v10455_v47 = vld [vmem:[%s9882_s1 + $0x940] sm:$0xff] }
 0x5be   : >> { %v3189_v6 = vadd.f32 %v3188_v37, %v3160_v53  ;;  %4706 = vmatmul.f32.gmra.mxu1 %v10225_v51  ;;  %v3191_v37 = vpop.f32.mrf.mxu0  ;;  %4665 = vmatpush.msrb.mxu0 %v4370_v44  ;;  %v10405_v44 = vld [vmem:[%s9882_s1 + $0x4e0] sm:$0xff]  ;;  %13372 = vst [vmem:[#allocation220_spill] sm:$0xff] %v10409_v20 }
 0x5bf   : >> { %4751 = vmatpush.msrb.mxu3 %v4061_v36  ;;  %4810 = vmatpush.msra.mxu1 %v4371_v45  ;;  %13371 = vst [vmem:[#allocation219_spill] sm:$0xff] %v10405_v44  ;;  %v4342_v45 = vunpack.c.l.bf16 %v10395_v59 }
 0x5c0   : >> { %v10379_v26 = vmax.f32 %v3189_v6, 0.0  ;;  %4666 = vmatpush.msrb.mxu0 %v4360_v15  ;;  %4837 = vmatpush.msra.mxu2 %v3752_v54  ;;  %v3732_v6 = vunpack.c.l.bf16 %v10390_v50  ;;  %v10414_v15 = vpop.f32.mrf.mxu2  ;;  %v4331_v54 = vunpack.c.h.bf16 %v10155_v60  ;;  %v4332_v60 = vunpack.c.l.bf16 %v10412_v34 }
 0x5c1   : >> { %4752 = vmatpush.msrb.mxu3 %v4051_v63  ;;  %4811 = vmatpush.msra.mxu1 %v4361_v23  ;;  %v10425_v23 = vld [vmem:[%s9882_s1 + $0x990] sm:$0xff] }
 0x5c2   : >> { %4639 = vmatmul.f32.vlgmr.msra.gmra.mxu3 %v10379_v26  ;;  %4667 = vmatpush.msrb.mxu0 %v4350_v28  ;;  %v10428_v28 = vld [vmem:[%s9882_s1 + $0xc60] sm:$0xff] }
 0x5c3   : >> { %v3162_v53 = vpop.f32.mrf.mxu3  ;;  %4838 = vmatpush.msra.mxu2 %v3742_v19  ;;  %4753 = vmatpush.msrb.mxu3 %v4041_v41  ;;  %13374 = vst [vmem:[#allocation222_spill] sm:$0xff] %v10428_v28  ;;  %v10433_v19 = vld [vmem:[%s9882_s1 + $0x490] sm:$0xff]  ;;  %v3137_v41 = vadd.f32 %v10369_v4, %v10343_v16  ;;  %v4502_v4 = vunpack.c.l.bf16 %v10428_v28 }
 0x5c4   : >> { %v3163_v62 = vadd.f32 %v3162_v53, %v3134_v1  ;;  %4726 = vmatmul.f32.vlgmr.msrb.gmra.mxu2 %v10159_v2  ;;  %4812 = vmatpush.msra.mxu1 %v4351_v30  ;;  %v4022_v1 = vunpack.c.l.bf16 %v10405_v44  ;;  %v3712_v53 = vunpack.c.l.bf16 %v10409_v20  ;;  %13375 = vst [vmem:[#allocation223_spill] sm:$0xff] %v10433_v19  ;;  %v4322_v20 = vunpack.c.l.bf16 %v10425_v23  ;;  %v10452_v44 = vld [vmem:[%s9882_s1 + $0x468] sm:$0xff]  ;;  %v10520_v28 = vld [vmem:[%s9882_s1 + $0xb70] sm:$0xff] }
 0x5c5   : >> { %4768 = vmatpush.msra.mxu0 %v4341_v17  ;;  %4839 = vmatpush.msra.mxu2 %v3732_v6  ;;  %v10441_v17 = vld [vmem:[%s9882_s1 + $0x968] sm:$0xff]  ;;  %v10444_v6 = vld [vmem:[%s9882_s1 + $0xc38] sm:$0xff]  ;;  %13377 = vst [vmem:[#allocation225_spill] sm:$0xff] %v10452_v44 }
 0x5c6   : >> { %v3192_v36 = vadd.f32 %v3191_v37, %v3163_v62  ;;  %v10419_v37 = vld [vmem:[%s9882_s1 + $0x4b8] sm:$0xff]  ;;  %4754 = vmatpush.msrb.mxu3 %v4031_v12  ;;  %4913 = vmatpush.msrb.mxu1 %v4342_v45  ;;  %v4321_v62 = vunpack.c.h.bf16 %v10167_v33  ;;  %13376 = vst [vmem:[#allocation224_spill] sm:$0xff] %v10444_v6  ;;  %v3194_v12 = vpop.f32.mrf.mxu0  ;;  %v4311_v33 = vunpack.c.h.bf16 %v10178_v18  ;;  %v4301_v18 = vunpack.c.h.bf16 %v10184_v22 }
 0x5c7   : >> { %13373 = vst [vmem:[#allocation221_spill] sm:$0xff] %v10419_v37  ;;  %v4012_v30 = vunpack.c.l.bf16 %v10419_v37  ;;  %4840 = vmatpush.msra.mxu2 %v3722_v24  ;;  %4769 = vmatpush.msra.mxu0 %v4331_v54  ;;  %v4002_v37 = vunpack.c.l.bf16 %v10433_v19  ;;  %v4312_v24 = vunpack.c.l.bf16 %v10441_v17  ;;  %v4492_v54 = vunpack.c.l.bf16 %v10444_v6  ;;  %v3217_v19 = vpop.f32.mrf.mxu1  ;;  %v10469_v6 = vld [vmem:[%s9882_s1 + $0x918] sm:$0xff] }
 0x5c8   : >> { %v10421_v63 = vmax.f32 %v3192_v36, 0.0  ;;  %4855 = vmatpush.msra.mxu3 %v4022_v1  ;;  %4914 = vmatpush.msrb.mxu1 %v4332_v60  ;;  %v10461_v1 = vld [vmem:[%s9882_s1 + $0xc10] sm:$0xff]  ;;  %v4302_v60 = vunpack.c.l.bf16 %v10455_v47  ;;  %v4291_v22 = vunpack.c.h.bf16 %v10189_v0  ;;  %v4292_v0 = vunpack.c.l.bf16 %v10469_v6  ;;  %13387 = vst [vmem:[#allocation235_spill] sm:$0xff] %v10520_v28 }
 0x5c9   : >> { %4841 = vmatpush.msra.mxu2 %v3712_v53  ;;  %4770 = vmatpush.msra.mxu0 %v4321_v62  ;;  %13378 = vst [vmem:[#allocation226_spill] sm:$0xff] %v10461_v1  ;;  %v3992_v53 = vunpack.c.l.bf16 %v10452_v44  ;;  %v10475_v62 = vld [vmem:[%s9882_s1 + $0xbe8] sm:$0xff] }
 0x5ca   : >> { %4642 = vmatmul.f32.gmra.mxu3 %v10421_v63  ;;  %4915 = vmatpush.msrb.mxu1 %v4322_v20  ;;  %13381 = vst [vmem:[#allocation229_spill] sm:$0xff] %v10475_v62  ;;  %v3246_v20 = vpop.f32.mrf.mxu2 }
 0x5cb   : >> { %v3165_v36 = vpop.f32.mrf.mxu3  ;;  %4856 = vmatpush.msra.mxu3 %v4012_v30  ;;  %4942 = vmatpush.msrb.mxu2 %v4502_v4  ;;  %v10478_v30 = vld [vmem:[%s9882_s1 + $0x418] sm:$0xff]  ;;  %v4482_v4 = vunpack.c.l.bf16 %v10461_v1 }
 0x5cc   : >> { %v3166_v45 = vadd.f32 %v3165_v36, %v3137_v41  ;;  %4729 = vmatmul.f32.gmra.mxu2 %v10191_v10  ;;  %v10464_v36 = vld [vmem:[%s9882_s1 + $0x440] sm:$0xff]  ;;  %4771 = vmatpush.msra.mxu0 %v4311_v33  ;;  %13382 = vst [vmem:[#allocation230_spill] sm:$0xff] %v10478_v30  ;;  %v4281_v33 = vunpack.c.h.bf16 %v10198_v52 }
 0x5cd   : >> { %13379 = vst [vmem:[#allocation227_spill] sm:$0xff] %v10464_v36  ;;  %4857 = vmatpush.msra.mxu3 %v4002_v37  ;;  %4916 = vmatpush.msrb.mxu1 %v4312_v24  ;;  %v3140_v37 = vadd.f32 %v10414_v15, %v10343_v16  ;;  %v10491_v24 = vld [vmem:[%s9882_s1 + $0xbc0] sm:$0xff]  ;;  %v3972_v16 = vunpack.c.l.bf16 %v10478_v30  ;;  %v10499_v15 = vld [vmem:[%s9882_s1 + $0x8c8] sm:$0xff] }
 0x5ce   : >> { %v3195_v41 = vadd.f32 %v3194_v12, %v3166_v45  ;;  %4943 = vmatpush.msrb.mxu2 %v4492_v54  ;;  %v3982_v45 = vunpack.c.l.bf16 %v10464_v36  ;;  %4772 = vmatpush.msra.mxu0 %v4301_v18  ;;  %13383 = vst [vmem:[#allocation231_spill] sm:$0xff] %v10491_v24  ;;  %v10494_v54 = vld [vmem:[%s9882_s1 + $0x3f0] sm:$0xff]  ;;  %v4472_v36 = vunpack.c.l.bf16 %v10475_v62  ;;  %v10502_v18 = vperm.slane %v10074_v49, 4  ;;  %v3197_v62 = vpop.f32.mrf.mxu0 }
 0x5cf   : >> { %13384 = vst [vmem:[#allocation232_spill] sm:$0xff] %v10494_v54  ;;  %4858 = vmatpush.msra.mxu3 %v3992_v53  ;;  %4917 = vmatpush.msrb.mxu1 %v4302_v60  ;;  %v4271_v53 = vunpack.c.h.bf16 %v10209_v5  ;;  %v10508_v60 = vld [vmem:[%s9882_s1 + $0xb98] sm:$0xff]  ;;  %v4462_v30 = vunpack.c.l.bf16 %v10491_v24  ;;  %v3962_v49 = vunpack.c.l.bf16 %v10494_v54  ;;  %v10517_v5 = vld [vmem:[%s9882_s1 + $0x8a0] sm:$0xff]  ;;  %v10535_v24 = vld [vmem:[%s9882_s1 + $0xb48] sm:$0xff] }
 0x5d0   : >> { %v10471_v12 = vmax.f32 %v3195_v41, 0.0  ;;  %v10483_v41 = vld [vmem:[%s9882_s1 + $0x8f0] sm:$0xff]  ;;  %4773 = vmatpush.msra.mxu0 %v4291_v22  ;;  %13385 = vst [vmem:[#allocation233_spill] sm:$0xff] %v10508_v60  ;;  %4944 = vmatpush.msrb.mxu2 %v4482_v4  ;;  %v4272_v22 = vunpack.c.l.bf16 %v10499_v15  ;;  %v4452_v4 = vunpack.c.l.bf16 %v10508_v60  ;;  %v10525_v54 = vld [vmem:[%s9882_s1 + $0x3a0] sm:$0xff]  ;;  %v10636_v60 = vld [vmem:[%s9882_s1 + $0x288] sm:$0xff] }
 0x5d1   : >> { %v4282_v52 = vunpack.c.l.bf16 %v10483_v41  ;;  %4859 = vmatpush.msra.mxu3 %v3982_v45  ;;  %4918 = vmatpush.msrb.mxu1 %v4292_v0  ;;  %v4261_v45 = vunpack.c.h.bf16 %v10215_v42  ;;  %13388 = vst [vmem:[#allocation236_spill] sm:$0xff] %v10525_v54  ;;  %v4262_v42 = vunpack.c.l.bf16 %v10517_v5 }
 0x5d2   : >> { %13380 = vst [vmem:[#allocation228_spill] sm:$0xff] %v10471_v12  ;;  %4645 = vmatmul.f32.gmra.mxu3 %v10471_v12  ;;  %4774 = vmatpush.msra.mxu0 %v4281_v33  ;;  %v10532_v33 = vld [vmem:[%s9882_s1 + $0x878] sm:$0xff] }
 0x5d3   : >> { %v3168_v1 = vpop.f32.mrf.mxu3  ;;  %4945 = vmatpush.msrb.mxu2 %v4472_v36  ;;  %4860 = vmatpush.msra.mxu3 %v3972_v16  ;;  %13390 = vst [vmem:[#allocation238_spill] sm:$0xff] %v10535_v24  ;;  %v3220_v36 = vpop.f32.mrf.mxu1  ;;  %v4442_v16 = vunpack.c.l.bf16 %v10520_v28 }
 0x5d4   : >> { %v3169_v44 = vadd.f32 %v3168_v1, %v3140_v37  ;;  %4732 = vmatmul.f32.gmra.mxu2 %v10222_v25  ;;  %v10513_v1 = vld [vmem:[%s9882_s1 + $0x3c8] sm:$0xff]  ;;  %4919 = vmatpush.msrb.mxu1 %v4282_v52  ;;  %v4251_v52 = vunpack.c.h.bf16 %v10220_v3  ;;  %v10552_v3 = vld [vmem:[%s9882_s1 + $0xb20] sm:$0xff] }
 0x5d5   : >> { %13386 = vst [vmem:[#allocation234_spill] sm:$0xff] %v10513_v1  ;;  %4775 = vmatpush.msra.mxu0 %v4271_v53  ;;  %v3952_v0 = vunpack.c.l.bf16 %v10513_v1  ;;  %4946 = vmatpush.msrb.mxu2 %v4462_v30  ;;  %v3942_v53 = vunpack.c.l.bf16 %v10525_v54  ;;  %v3249_v1 = vpop.f32.mrf.mxu2  ;;  %v10557_v54 = vld [vmem:[%s9882_s1 + $0x350] sm:$0xff] }
 0x5d6   : >> { %v3198_v37 = vadd.f32 %v3197_v62, %v3169_v44  ;;  %v3218_v44 = vadd.f32 %v3217_v19, %v10502_v18  ;;  %4861 = vmatpush.msra.mxu3 %v3962_v49  ;;  %4920 = vmatpush.msrb.mxu1 %v4272_v22  ;;  %v4252_v49 = vunpack.c.l.bf16 %v10532_v33  ;;  %13392 = vst [vmem:[#allocation240_spill] sm:$0xff] %v10552_v3 }
 0x5d7   : >> { %4947 = vmatpush.msrb.mxu2 %v4452_v4  ;;  %4776 = vmatpush.msra.mxu0 %v4261_v45  ;;  %v4241_v4 = vunpack.c.h.bf16 %v10229_v29  ;;  %13393 = vst [vmem:[#allocation241_spill] sm:$0xff] %v10557_v54  ;;  %v4422_v29 = vunpack.c.l.bf16 %v10552_v3  ;;  %v10589_v3 = vld [vmem:[%s9882_s1 + $0x300] sm:$0xff] }
 0x5d8   : >> { %v10528_v62 = vmax.f32 %v3198_v37, 0.0  ;;  %v3247_v19 = vadd.f32 %v3246_v20, %v3218_v44  ;;  %v10543_v37 = vld [vmem:[%s9882_s1 + $0x378] sm:$0xff]  ;;  %v4432_v20 = vunpack.c.l.bf16 %v10535_v24  ;;  %v10548_v44 = vld [vmem:[%s9882_s1 + $0x850] sm:$0xff]  ;;  %4862 = vmatpush.msra.mxu3 %v3952_v0  ;;  %4921 = vmatpush.msrb.mxu1 %v4262_v42  ;;  %v10563_v0 = vld [vmem:[%s9882_s1 + $0x828] sm:$0xff]  ;;  %v4231_v42 = vunpack.c.h.bf16 %v10241_v8  ;;  %13397 = vst [vmem:[#allocation245_spill] sm:$0xff] %v10589_v3 }
 0x5d9   : >> { %13391 = vst [vmem:[#allocation239_spill] sm:$0xff] %v10543_v37  ;;  %4948 = vmatpush.msrb.mxu2 %v4442_v16  ;;  %v3932_v45 = vunpack.c.l.bf16 %v10543_v37  ;;  %4777 = vmatpush.msra.mxu0 %v4251_v52  ;;  %v10571_v16 = vld [vmem:[%s9882_s1 + $0x328] sm:$0xff]  ;;  %v3922_v52 = vunpack.c.l.bf16 %v10557_v54  ;;  %v10581_v37 = vld [vmem:[%s9882_s1 + $0xad0] sm:$0xff]  ;;  %v4232_v8 = vunpack.c.l.bf16 %v10563_v0 }
 0x5da   : >> { %13389 = vst [vmem:[#allocation237_spill] sm:$0xff] %v10528_v62  ;;  %4648 = vmatmul.f32.gmra.mxu3 %v10528_v62  ;;  %4922 = vmatpush.msrb.mxu1 %v4252_v49  ;;  %v3912_v54 = vunpack.c.l.bf16 %v10571_v16 }
 0x5db   : >> { %v3275_v30 = vpop.f32.mrf.mxu3  ;;  %4863 = vmatpush.msra.mxu3 %v3942_v53  ;;  %4949 = vmatpush.msrb.mxu2 %v4432_v20  ;;  %13395 = vst [vmem:[#allocation243_spill] sm:$0xff] %v10571_v16  ;;  %v10578_v53 = vld [vmem:[%s9882_s1 + $0x800] sm:$0xff]  ;;  %v3223_v28 = vpop.f32.mrf.mxu1  ;;  %v10603_v16 = vld [vmem:[%s9882_s1 + $0x2d8] sm:$0xff] }
 0x5dc   : >> { %v3276_v22 = vadd.f32 %v3275_v30, %v3247_v19  ;;  %4735 = vmatmul.f32.gmra.mxu2 %v10254_v55  ;;  %v4242_v19 = vunpack.c.l.bf16 %v10548_v44  ;;  %v10566_v30 = vld [vmem:[%s9882_s1 + $0xaf8] sm:$0xff]  ;;  %13396 = vst [vmem:[#allocation244_spill] sm:$0xff] %v10581_v37  ;;  %4778 = vmatpush.msra.mxu0 %v4241_v4 }
 0x5dd   : >> { %13394 = vst [vmem:[#allocation242_spill] sm:$0xff] %v10566_v30  ;;  %4864 = vmatpush.msra.mxu3 %v3932_v45  ;;  %v4412_v49 = vunpack.c.l.bf16 %v10566_v30  ;;  %4950 = vmatpush.msrb.mxu2 %v4422_v29  ;;  %v4222_v45 = vunpack.c.l.bf16 %v10578_v53  ;;  %v4402_v30 = vunpack.c.l.bf16 %v10581_v37  ;;  %v4211_v29 = vunpack.c.h.bf16 %v10252_v9 }
 0x5de   : >> { %v10559_v24 = vmax.f32 %v3276_v22, 0.0  ;;  %v3221_v22 = vadd.f32 %v3220_v36, %v10502_v18  ;;  %4923 = vmatpush.msrb.mxu1 %v4242_v19  ;;  %v4221_v36 = vunpack.c.h.bf16 %v10246_v38  ;;  %4779 = vmatpush.msra.mxu0 %v4231_v42  ;;  %v10598_v38 = vld [vmem:[%s9882_s1 + $0xaa8] sm:$0xff]  ;;  %v3902_v42 = vunpack.c.l.bf16 %v10589_v3  ;;  %13399 = vst [vmem:[#allocation247_spill] sm:$0xff] %v10603_v16  ;;  %v3546_v3 = vld [vmem:[%s9882_s1 + $0x760] sm:$0xff] }
 0x5df   : >> { %4865 = vmatpush.msra.mxu3 %v3922_v52  ;;  %13398 = vst [vmem:[#allocation246_spill] sm:$0xff] %v10598_v38  ;;  %4951 = vmatpush.msrb.mxu2 %v4412_v49  ;;  %v4392_v9 = vunpack.c.l.bf16 %v10598_v38  ;;  %v10617_v49 = vld [vmem:[%s9882_s1 + $0x2b0] sm:$0xff] }
 0x5e0   : >> { %4668 = vmatmul.f32.vlgmr.msrb.gmra.mxu0 %v10559_v24  ;;  %4813 = vmatmul.f32.vlgmr.msra.gmra.mxu1 %v10559_v24  ;;  %v3250_v20 = vadd.f32 %v3249_v1, %v3221_v22  ;;  %v10594_v1 = vld [vmem:[%s9882_s1 + $0x7d8] sm:$0xff]  ;;  %v3252_v22 = vpop.f32.mrf.mxu2  ;;  %13401 = vst [vmem:[#allocation249_spill] sm:$0xff] %v10617_v49 }
 0x5e1   : >> { %4924 = vmatpush.msrb.mxu1 %v4232_v8  ;;  %4780 = vmatpush.msra.mxu0 %v4221_v36  ;;  %v4212_v52 = vunpack.c.l.bf16 %v10594_v1  ;;  %v4201_v8 = vunpack.c.h.bf16 %v10259_v56  ;;  %v10624_v36 = vld [vmem:[%s9882_s1 + $0x788] sm:$0xff] }
 0x5e2   : >> { %4755 = vmatmul.f32.vlgmr.msrb.gmra.mxu3 %v10269_v40  ;;  %4952 = vmatpush.msrb.mxu2 %v4402_v30 }
 0x5e3   : >> { %v3278_v4 = vpop.f32.mrf.mxu3  ;;  %4866 = vmatpush.msra.mxu3 %v3912_v54  ;;  %4925 = vmatpush.msrb.mxu1 %v4222_v45  ;;  %v3892_v54 = vunpack.c.l.bf16 %v10603_v16  ;;  %v10627_v45 = vld [vmem:[%s9882_s1 + $0xa58] sm:$0xff]  ;;  %v3882_v16 = vunpack.c.l.bf16 %v10617_v49  ;;  %v4182_v49 = vunpack.c.l.bf16 %v3546_v3 }
 0x5e4   : >> { %v3279_v19 = vadd.f32 %v3278_v4, %v3250_v20  ;;  %4842 = vmatmul.f32.vlgmr.msra.gmra.mxu2 %v10127_v58  ;;  %v10609_v20 = vld [vmem:[%s9882_s1 + $0x7b0] sm:$0xff]  ;;  %v10612_v4 = vld [vmem:[%s9882_s1 + $0xa80] sm:$0xff]  ;;  %13402 = vst [vmem:[#allocation250_spill] sm:$0xff] %v10627_v45  ;;  %4781 = vmatpush.msra.mxu0 %v4211_v29  ;;  %v4192_v29 = vunpack.c.l.bf16 %v10624_v36 }
 0x5e5   : >> { %13400 = vst [vmem:[#allocation248_spill] sm:$0xff] %v10612_v4  ;;  %4867 = vmatpush.msra.mxu3 %v3902_v42  ;;  %v4202_v56 = vunpack.c.l.bf16 %v10609_v20  ;;  %v4382_v30 = vunpack.c.l.bf16 %v10612_v4  ;;  %4926 = vmatpush.msrb.mxu1 %v4212_v52  ;;  %v4372_v42 = vunpack.c.l.bf16 %v10627_v45  ;;  %v3226_v52 = vpop.f32.mrf.mxu1  ;;  %v10650_v4 = vld [vmem:[%s9882_s1 + $0xa08] sm:$0xff] }
 0x5e6   : >> { %v10605_v37 = vmax.f32 %v3279_v19, 0.0  ;;  %v3224_v19 = vadd.f32 %v3223_v28, %v10502_v18  ;;  %v4191_v28 = vunpack.c.h.bf16 %v10265_v21  ;;  %4953 = vmatpush.msrb.mxu2 %v4392_v9  ;;  %4782 = vmatpush.msra.mxu0 %v4201_v8  ;;  %v3541_v21 = vld [vmem:[%s9882_s1 + $0x738] sm:$0xff]  ;;  %v3872_v9 = vunpack.c.l.bf16 %v10636_v60 }
 0x5e7   : >> { %4868 = vmatpush.msra.mxu3 %v3892_v54  ;;  %4927 = vmatpush.msrb.mxu1 %v4202_v56  ;;  %v4172_v54 = vunpack.c.l.bf16 %v3541_v21  ;;  %v3227_v56 = vadd.f32 %v3226_v52, %v10502_v18  ;;  %v3531_v18 = vld [vmem:[%s9882_s1 + $0x6e8] sm:$0xff] }
 0x5e8   : >> { %4671 = vmatmul.f32.gmra.mxu0 %v10605_v37  ;;  %4816 = vmatmul.f32.gmra.mxu1 %v10605_v37  ;;  %v3253_v38 = vadd.f32 %v3252_v22, %v3224_v19  ;;  %v10641_v22 = vld [vmem:[%s9882_s1 + $0xa30] sm:$0xff] }
 0x5e9   : >> { %4954 = vmatpush.msrb.mxu2 %v4382_v30  ;;  %4783 = vmatpush.msra.mxu0 %v4191_v28  ;;  %v4362_v45 = vunpack.c.l.bf16 %v10641_v22  ;;  %v3863_v30 = vunpack.c.h.bf16 %v10280_v27  ;;  %v4173_v28 = vunpack.c.h.bf16 %v3541_v21  ;;  %v4343_v27 = vunpack.c.h.bf16 %v10395_v59  ;;  %v3526_v21 = vld [vmem:[%s9882_s1 + $0x6c0] sm:$0xff] }
 0x5ea   : >> { %4758 = vmatmul.f32.gmra.mxu3 %v10298_v35  ;;  %4928 = vmatpush.msrb.mxu1 %v4192_v29  ;;  %v4142_v59 = vunpack.c.l.bf16 %v3526_v21 }
 0x5eb   : >> { %v3281_v58 = vpop.f32.mrf.mxu3  ;;  %4869 = vmatpush.msra.mxu3 %v3882_v16  ;;  %4955 = vmatpush.msrb.mxu2 %v4372_v42  ;;  %v4352_v16 = vunpack.c.l.bf16 %v10650_v4  ;;  %v3853_v42 = vunpack.c.h.bf16 %v10287_v46  ;;  %v4153_v46 = vunpack.c.h.bf16 %v3531_v18 }
 0x5ec   : >> { %v3282_v19 = vadd.f32 %v3281_v58, %v3253_v38  ;;  %4845 = vmatmul.f32.gmra.mxu2 %v10162_v32  ;;  %v3255_v58 = vpop.f32.mrf.mxu2  ;;  %v4183_v38 = vunpack.c.h.bf16 %v3546_v3  ;;  %v3536_v32 = vld [vmem:[%s9882_s1 + $0x710] sm:$0xff]  ;;  %4884 = vmatpush.msrb.mxu0 %v4182_v49 }
 0x5ed   : >> { %4870 = vmatpush.msra.mxu3 %v3872_v9  ;;  %v3256_v29 = vadd.f32 %v3255_v58, %v3227_v56  ;;  %4956 = vmatpush.msrb.mxu2 %v4362_v45  ;;  %v4162_v3 = vunpack.c.l.bf16 %v3536_v32  ;;  %v4163_v52 = vunpack.c.h.bf16 %v3536_v32  ;;  %v4152_v9 = vunpack.c.l.bf16 %v3531_v18  ;;  %v13403_v45 = vld [vmem:[#allocation211_spill] sm:$0xff]  ;;  %v13405_v18 = vld [vmem:[#allocation213_spill] sm:$0xff] }
 0x5ee   : >> { %v10646_v8 = vmax.f32 %v3282_v19, 0.0  ;;  %5029 = vmatpush.msra.mxu1 %v4183_v38  ;;  %4885 = vmatpush.msrb.mxu0 %v4172_v54  ;;  %v3843_v58 = vunpack.c.h.bf16 %v13403_v45  ;;  %v4333_v32 = vunpack.c.h.bf16 %v10412_v34  ;;  %v3521_v38 = vld [vmem:[%s9882_s1 + $0x698] sm:$0xff]  ;;  %v3833_v54 = vunpack.c.h.bf16 %v10303_v43  ;;  %v3511_v43 = vld [vmem:[%s9882_s1 + $0x648] sm:$0xff] }
 0x5ef   : >> { %4971 = vmatpush.msrb.mxu3 %v3863_v30  ;;  %4957 = vmatpush.msrb.mxu2 %v4352_v16  ;;  %v4143_v30 = vunpack.c.h.bf16 %v3526_v21  ;;  %v4323_v16 = vunpack.c.h.bf16 %v10425_v23  ;;  %v3823_v34 = vunpack.c.h.bf16 %v10311_v39  ;;  %v4303_v39 = vunpack.c.h.bf16 %v10455_v47 }
 0x5f0   : >> { %4674 = vmatmul.f32.gmra.mxu0 %v10646_v8  ;;  %4819 = vmatmul.f32.gmra.mxu1 %v10646_v8  ;;  %v4293_v45 = vunpack.c.h.bf16 %v10469_v6 }
 0x5f1   : >> { %5030 = vmatpush.msra.mxu1 %v4173_v28  ;;  %4886 = vmatpush.msrb.mxu0 %v4162_v3  ;;  %v4132_v28 = vunpack.c.l.bf16 %v3521_v38  ;;  %v4133_v3 = vunpack.c.h.bf16 %v3521_v38  ;;  %v4283_v38 = vunpack.c.h.bf16 %v10483_v41  ;;  %v3773_v41 = vunpack.c.h.bf16 %v10353_v31  ;;  %v3481_v31 = vld [vmem:[%s9882_s1 + $0x558] sm:$0xff] }
 0x5f2   : >> { %4761 = vmatmul.f32.gmra.mxu3 %v10327_v57  ;;  %5058 = vmatpush.msra.mxu2 %v4343_v27  ;;  %v4112_v27 = vunpack.c.l.bf16 %v3511_v43 }
 0x5f3   : >> { %v3284_v19 = vpop.f32.mrf.mxu3  ;;  %4972 = vmatpush.msrb.mxu3 %v3853_v42  ;;  %5031 = vmatpush.msra.mxu1 %v4163_v52  ;;  %v4313_v42 = vunpack.c.h.bf16 %v10441_v17  ;;  %v13406_v17 = vld [vmem:[#allocation214_spill] sm:$0xff] }
 0x5f4   : >> { %v3285_v49 = vadd.f32 %v3284_v19, %v3256_v29  ;;  %4848 = vmatmul.f32.gmra.mxu2 %v10194_v13  ;;  %4887 = vmatpush.msrb.mxu0 %v4152_v9  ;;  %v3516_v29 = vld [vmem:[%s9882_s1 + $0x670] sm:$0xff]  ;;  %v3813_v19 = vunpack.c.h.bf16 %v13405_v18  ;;  %v3803_v21 = vunpack.c.h.bf16 %v13406_v17  ;;  %v4113_v9 = vunpack.c.h.bf16 %v3511_v43  ;;  %v3486_v43 = vld [vmem:[%s9882_s1 + $0x580] sm:$0xff] }
 0x5f5   : >> { %4973 = vmatpush.msrb.mxu3 %v3843_v58  ;;  %5032 = vmatpush.msra.mxu1 %v4153_v46  ;;  %v4122_v23 = vunpack.c.l.bf16 %v3516_v29  ;;  %v4123_v52 = vunpack.c.h.bf16 %v3516_v29  ;;  %v13407_v46 = vld [vmem:[#allocation216_spill] sm:$0xff]  ;;  %v4253_v18 = vunpack.c.h.bf16 %v10532_v33  ;;  %v3743_v33 = vunpack.c.h.bf16 %v10382_v11 }
 0x5f6   : >> { %v10665_v56 = vmax.f32 %v3285_v49, 0.0  ;;  %5059 = vmatpush.msra.mxu2 %v4333_v32  ;;  %4888 = vmatpush.msrb.mxu0 %v4142_v59  ;;  %v3506_v49 = vld [vmem:[%s9882_s1 + $0x620] sm:$0xff]  ;;  %v3793_v47 = vunpack.c.h.bf16 %v13407_v46  ;;  %v3501_v32 = vld [vmem:[%s9882_s1 + $0x5f8] sm:$0xff]  ;;  %v3491_v29 = vld [vmem:[%s9882_s1 + $0x5a8] sm:$0xff] }
 0x5f7   : >> { %4974 = vmatpush.msrb.mxu3 %v3833_v54  ;;  %5033 = vmatpush.msra.mxu1 %v4143_v30  ;;  %v4102_v58 = vunpack.c.l.bf16 %v3506_v49  ;;  %v4103_v59 = vunpack.c.h.bf16 %v3506_v49  ;;  %v3496_v54 = vld [vmem:[%s9882_s1 + $0x5d0] sm:$0xff]  ;;  %v4092_v6 = vunpack.c.l.bf16 %v3501_v32  ;;  %v3783_v30 = vunpack.c.h.bf16 %v10347_v14 }
 0x5f8   : >> { %13404 = vst [vmem:[#allocation211_spill] sm:$0xff] %v10665_v56  ;;  %4677 = vmatmul.f32.gmra.mxu0 %v10665_v56  ;;  %4822 = vmatmul.f32.gmra.mxu1 %v10665_v56  ;;  %v4083_v14 = vunpack.c.h.bf16 %v3496_v54  ;;  %v4053_v49 = vunpack.c.h.bf16 %v3481_v31 }
 0x5f9   : >> { %5060 = vmatpush.msra.mxu2 %v4323_v16  ;;  %4889 = vmatpush.msrb.mxu0 %v4132_v28  ;;  %v4093_v16 = vunpack.c.h.bf16 %v3501_v32  ;;  %v4273_v28 = vunpack.c.h.bf16 %v10499_v15  ;;  %v3763_v15 = vunpack.c.h.bf16 %v10363_v48  ;;  %v4243_v48 = vunpack.c.h.bf16 %v10548_v44  ;;  %v13409_v32 = vld [vmem:[#allocation219_spill] sm:$0xff] }
 0x5fa   : >> { %4764 = vmatmul.f32.gmra.mxu3 %v10359_v7  ;;  %5034 = vmatpush.msra.mxu1 %v4133_v3  ;;  %v4263_v3 = vunpack.c.h.bf16 %v10517_v5  ;;  %v4062_v5 = vunpack.c.l.bf16 %v3486_v43  ;;  %v3733_v44 = vunpack.c.h.bf16 %v10390_v50  ;;  %v4213_v50 = vunpack.c.h.bf16 %v10594_v1  ;;  %v13411_v1 = vld [vmem:[#allocation221_spill] sm:$0xff] }
 0x5fb   : >> { %4975 = vmatpush.msrb.mxu3 %v3823_v34  ;;  %5061 = vmatpush.msra.mxu2 %v4313_v42  ;;  %v4082_v34 = vunpack.c.l.bf16 %v3496_v54  ;;  %v4072_v42 = vunpack.c.l.bf16 %v3491_v29  ;;  %v10727_v54 = vld [vmem:[%s9882_s1 + $0x4c0] sm:$0xff] }
 0x5fc   : >> { %4851 = vmatmul.f32.gmra.mxu2 %v10225_v51  ;;  %4890 = vmatpush.msrb.mxu0 %v4122_v23  ;;  %v4073_v23 = vunpack.c.h.bf16 %v3491_v29  ;;  %v4193_v29 = vunpack.c.h.bf16 %v10624_v36 }
 0x5fd   : >> { %4976 = vmatpush.msrb.mxu3 %v3813_v19  ;;  %5035 = vmatpush.msra.mxu1 %v4123_v52  ;;  %v3753_v19 = vunpack.c.h.bf16 %v10374_v61  ;;  %v4063_v52 = vunpack.c.h.bf16 %v3486_v43  ;;  %v4233_v61 = vunpack.c.h.bf16 %v10563_v0  ;;  %v13408_v0 = vld [vmem:[#allocation218_spill] sm:$0xff] }
 0x5fe   : >> { %5062 = vmatpush.msra.mxu2 %v4303_v39  ;;  %4891 = vmatpush.msrb.mxu0 %v4112_v27  ;;  %v4052_v39 = vunpack.c.l.bf16 %v3481_v31  ;;  %v3476_v27 = vld [vmem:[%s9882_s1 + $0x530] sm:$0xff]  ;;  %v10752_v31 = vld [vmem:[%s9882_s1 + $0x740] sm:$0xff] }
 0x5ff   : >> { %4977 = vmatpush.msrb.mxu3 %v3803_v21  ;;  %5036 = vmatpush.msra.mxu1 %v4113_v9  ;;  %v4042_v17 = vunpack.c.l.bf16 %v3476_v27  ;;  %v3471_v21 = vld [vmem:[%s9882_s1 + $0x508] sm:$0xff]  ;;  %v4043_v9 = vunpack.c.h.bf16 %v3476_v27 }
 0x600   : >> { %4784 = vmatmul.f32.vlgmr.msra.gmra.mxu0 %v10379_v26  ;;  %4929 = vmatmul.f32.vlgmr.msrb.gmra.mxu1 %v10379_v26  ;;  %v4032_v11 = vunpack.c.l.bf16 %v3471_v21  ;;  %v4033_v46 = vunpack.c.h.bf16 %v3471_v21  ;;  %v10760_v27 = vld [vmem:[%s9882_s1 + $0x448] sm:$0xff] }
 0x601   : >> { %5063 = vmatpush.msra.mxu2 %v4293_v45  ;;  %4892 = vmatpush.msrb.mxu0 %v4102_v58  ;;  %v4223_v45 = vunpack.c.h.bf16 %v10578_v53  ;;  %v3723_v58 = vunpack.c.h.bf16 %v13408_v0  ;;  %v4023_v53 = vunpack.c.h.bf16 %v13409_v32 }
 0x602   : >> { %4871 = vmatmul.f32.vlgmr.msra.gmra.mxu3 %v10159_v2  ;;  %5037 = vmatpush.msra.mxu1 %v4103_v59  ;;  %v13410_v59 = vld [vmem:[#allocation220_spill] sm:$0xff] }
 0x603   : >> { %4978 = vmatpush.msrb.mxu3 %v3793_v47  ;;  %5064 = vmatpush.msra.mxu2 %v4283_v38  ;;  %v10719_v47 = vld [vmem:[%s9882_s1 + $0x4e8] sm:$0xff]  ;;  %v3713_v38 = vunpack.c.h.bf16 %v13410_v59 }
 0x604   : >> { %4958 = vmatmul.f32.vlgmr.msrb.gmra.mxu2 %v10559_v24  ;;  %4893 = vmatpush.msrb.mxu0 %v4092_v6  ;;  %v4203_v6 = vunpack.c.h.bf16 %v10609_v20  ;;  %v10741_v20 = vld [vmem:[%s9882_s1 + $0x768] sm:$0xff] }
 0x605   : >> { %4979 = vmatpush.msrb.mxu3 %v3783_v30  ;;  %5038 = vmatpush.msra.mxu1 %v4093_v16  ;;  %v4024_v30 = vunpack.c.l.bf16 %v10719_v47  ;;  %v4013_v16 = vunpack.c.h.bf16 %v13411_v1 }
 0x606   : >> { %5065 = vmatpush.msra.mxu2 %v4273_v28  ;;  %4894 = vmatpush.msrb.mxu0 %v4082_v34  ;;  %v13412_v28 = vld [vmem:[#allocation222_spill] sm:$0xff] }
 0x607   : >> { %4980 = vmatpush.msrb.mxu3 %v3773_v41  ;;  %5039 = vmatpush.msra.mxu1 %v4083_v14  ;;  %v4503_v34 = vunpack.c.h.bf16 %v13412_v28  ;;  %v4014_v41 = vunpack.c.l.bf16 %v10727_v54  ;;  %v10737_v14 = vld [vmem:[%s9882_s1 + $0x498] sm:$0xff] }
 0x608   : >> { %4787 = vmatmul.f32.gmra.mxu0 %v10421_v63  ;;  %4932 = vmatmul.f32.gmra.mxu1 %v10421_v63  ;;  %v4004_v36 = vunpack.c.l.bf16 %v10737_v14 }
 0x609   : >> { %5066 = vmatpush.msra.mxu2 %v4263_v3  ;;  %4895 = vmatpush.msrb.mxu0 %v4072_v42  ;;  %v13413_v3 = vld [vmem:[#allocation223_spill] sm:$0xff] }
 0x60a   : >> { %4874 = vmatmul.f32.gmra.mxu3 %v10191_v10  ;;  %5040 = vmatpush.msra.mxu1 %v4073_v23  ;;  %v4003_v42 = vunpack.c.h.bf16 %v13413_v3  ;;  %v10745_v23 = vpop.f32.mrf.mxu1  ;;  %v10796_v3 = vld [vmem:[%s9882_s1 + $0x3d0] sm:$0xff] }
 0x60b   : >> { %4981 = vmatpush.msrb.mxu3 %v3763_v15  ;;  %5067 = vmatpush.msra.mxu2 %v4253_v18  ;;  %v13414_v15 = vld [vmem:[#allocation224_spill] sm:$0xff]  ;;  %13415 = vst [vmem:[#allocation213_spill] sm:$0xff] %v10745_v23  ;;  %v10749_v18 = vld [vmem:[%s9882_s1 + $0x470] sm:$0xff] }
 0x60c   : >> { %4961 = vmatmul.f32.gmra.mxu2 %v10605_v37  ;;  %4896 = vmatpush.msrb.mxu0 %v4062_v5  ;;  %v4493_v43 = vunpack.c.h.bf16 %v13414_v15  ;;  %v4184_v5 = vunpack.c.l.bf16 %v10741_v20 }
 0x60d   : >> { %4982 = vmatpush.msrb.mxu3 %v3753_v19  ;;  %5041 = vmatpush.msra.mxu1 %v4063_v52  ;;  %v13416_v19 = vld [vmem:[#allocation225_spill] sm:$0xff] }
 0x60e   : >> { %5068 = vmatpush.msra.mxu2 %v4243_v48  ;;  %4897 = vmatpush.msrb.mxu0 %v4052_v39  ;;  %v3993_v52 = vunpack.c.h.bf16 %v13416_v19  ;;  %v13417_v48 = vld [vmem:[#allocation226_spill] sm:$0xff] }
 0x60f   : >> { %4983 = vmatpush.msrb.mxu3 %v3743_v33  ;;  %5042 = vmatpush.msra.mxu1 %v4053_v49  ;;  %v4483_v39 = vunpack.c.h.bf16 %v13417_v48  ;;  %v10763_v33 = vld [vmem:[%s9882_s1 + $0x718] sm:$0xff]  ;;  %v3994_v49 = vunpack.c.l.bf16 %v10749_v18 }
 0x610   : >> { %4790 = vmatmul.f32.gmra.mxu0 %v10471_v12  ;;  %4935 = vmatmul.f32.gmra.mxu1 %v10471_v12  ;;  %v4164_v0 = vunpack.c.l.bf16 %v10763_v33 }
 0x611   : >> { %5069 = vmatpush.msra.mxu2 %v4233_v61  ;;  %4898 = vmatpush.msrb.mxu0 %v4042_v17  ;;  %v4174_v61 = vunpack.c.l.bf16 %v10752_v31  ;;  %v13418_v17 = vld [vmem:[#allocation205_spill] sm:$0xff] }
 0x612   : >> { %4877 = vmatmul.f32.gmra.mxu3 %v10222_v25  ;;  %5043 = vmatpush.msra.mxu1 %v4043_v9  ;;  %v13420_v9 = vld [vmem:[#allocation229_spill] sm:$0xff] }
 0x613   : >> { %4984 = vmatpush.msrb.mxu3 %v3733_v44  ;;  %5070 = vmatpush.msra.mxu2 %v4223_v45  ;;  %v13419_v44 = vld [vmem:[#allocation227_spill] sm:$0xff]  ;;  %v4473_v45 = vunpack.c.h.bf16 %v13420_v9 }
 0x614   : >> { %4964 = vmatmul.f32.gmra.mxu2 %v10646_v8  ;;  %4899 = vmatpush.msrb.mxu0 %v4032_v11  ;;  %v3983_v21 = vunpack.c.h.bf16 %v13419_v44  ;;  %v3984_v11 = vunpack.c.l.bf16 %v10760_v27  ;;  %v10812_v44 = vld [vmem:[%s9882_s1 + $0x678] sm:$0xff] }
 0x615   : >> { %4985 = vmatpush.msrb.mxu3 %v3723_v58  ;;  %5044 = vmatpush.msra.mxu1 %v4033_v46  ;;  %v10773_v58 = vld [vmem:[%s9882_s1 + $0x420] sm:$0xff]  ;;  %v10777_v46 = vld [vmem:[%s9882_s1 + $0x6f0] sm:$0xff] }
 0x616   : >> { %5071 = vmatpush.msra.mxu2 %v4213_v50  ;;  %5000 = vmatpush.msra.mxu0 %v4023_v53  ;;  %v13421_v50 = vld [vmem:[#allocation230_spill] sm:$0xff]  ;;  %v13422_v53 = vld [vmem:[#allocation231_spill] sm:$0xff]  ;;  %v4154_v1 = vunpack.c.l.bf16 %v10777_v46 }
 0x617   : >> { %4986 = vmatpush.msrb.mxu3 %v3713_v38  ;;  %5145 = vmatpush.msrb.mxu1 %v4024_v30  ;;  %v3973_v32 = vunpack.c.h.bf16 %v13421_v50  ;;  %v4463_v59 = vunpack.c.h.bf16 %v13422_v53  ;;  %v3974_v38 = vunpack.c.l.bf16 %v10773_v58  ;;  %v10786_v30 = vld [vmem:[%s9882_s1 + $0x6c8] sm:$0xff]  ;;  %v10823_v53 = vld [vmem:[%s9882_s1 + $0x650] sm:$0xff] }
 0x618   : >> { %4793 = vmatmul.f32.gmra.mxu0 %v10528_v62  ;;  %4938 = vmatmul.f32.gmra.mxu1 %v10528_v62 }
 0x619   : >> { %5072 = vmatpush.msra.mxu2 %v4203_v6  ;;  %5001 = vmatpush.msra.mxu0 %v4013_v16  ;;  %v10783_v6 = vld [vmem:[%s9882_s1 + $0x3f8] sm:$0xff]  ;;  %v13423_v16 = vld [vmem:[#allocation232_spill] sm:$0xff] }
 0x61a   : >> { %4880 = vmatmul.f32.gmra.mxu3 %v10254_v55  ;;  %5146 = vmatpush.msrb.mxu1 %v4014_v41  ;;  %v3963_v28 = vunpack.c.h.bf16 %v13423_v16  ;;  %v3964_v15 = vunpack.c.l.bf16 %v10783_v6 }
 0x61b   : >> { %5087 = vmatpush.msra.mxu3 %v4503_v34  ;;  %5073 = vmatpush.msra.mxu2 %v4193_v29  ;;  %v10790_v34 = vpop.f32.mrf.mxu1  ;;  %v13425_v29 = vld [vmem:[#allocation233_spill] sm:$0xff] }
 0x61c   : >> { %4967 = vmatmul.f32.gmra.mxu2 %v10665_v56  ;;  %5002 = vmatpush.msra.mxu0 %v4003_v42  ;;  %13424 = vst [vmem:[#allocation214_spill] sm:$0xff] %v10790_v34  ;;  %v4453_v41 = vunpack.c.h.bf16 %v13425_v29  ;;  %v10799_v42 = vld [vmem:[%s9882_s1 + $0x6a0] sm:$0xff]  ;;  %v10831_v29 = vld [vmem:[%s9882_s1 + $0x358] sm:$0xff]  ;;  %v10873_v34 = vld [vmem:[%s9882_s1 + $0x5b0] sm:$0xff] }
 0x61d   : >> { %5088 = vmatpush.msra.mxu3 %v4493_v43  ;;  %5147 = vmatpush.msrb.mxu1 %v4004_v36  ;;  %v4144_v43 = vunpack.c.l.bf16 %v10786_v30  ;;  %v13426_v36 = vld [vmem:[#allocation206_spill] sm:$0xff] }
 0x61e   : >> { %5174 = vmatpush.msrb.mxu2 %v4184_v5  ;;  %5003 = vmatpush.msra.mxu0 %v3993_v52  ;;  %v13427_v5 = vld [vmem:[#allocation234_spill] sm:$0xff]  ;;  %v13428_v52 = vld [vmem:[#allocation235_spill] sm:$0xff] }
 0x61f   : >> { %5089 = vmatpush.msra.mxu3 %v4483_v39  ;;  %5148 = vmatpush.msrb.mxu1 %v3994_v49  ;;  %v3953_v19 = vunpack.c.h.bf16 %v13427_v5  ;;  %v4443_v48 = vunpack.c.h.bf16 %v13428_v52  ;;  %v3954_v39 = vunpack.c.l.bf16 %v10796_v3  ;;  %v4134_v49 = vunpack.c.l.bf16 %v10799_v42  ;;  %v13435_v52 = vld [vmem:[#allocation242_spill] sm:$0xff] }
 0x620   : >> { %4900 = vmatmul.f32.vlgmr.msrb.gmra.mxu0 %v10269_v40  ;;  %5045 = vmatmul.f32.vlgmr.msra.gmra.mxu1 %v10269_v40 }
 0x621   : >> { %5175 = vmatpush.msrb.mxu2 %v4174_v61  ;;  %5004 = vmatpush.msra.mxu0 %v3983_v21  ;;  %v10809_v61 = vld [vmem:[%s9882_s1 + $0x3a8] sm:$0xff] }
 0x622   : >> { %4987 = vmatmul.f32.vlgmr.msrb.gmra.mxu3 %v13418_v17  ;;  %5149 = vmatpush.msrb.mxu1 %v3984_v11  ;;  %v13429_v21 = vld [vmem:[#allocation236_spill] sm:$0xff]  ;;  %v3944_v50 = vunpack.c.l.bf16 %v10809_v61 }
 0x623   : >> { %5090 = vmatpush.msra.mxu3 %v4473_v45  ;;  %5176 = vmatpush.msrb.mxu2 %v4164_v0  ;;  %v3943_v9 = vunpack.c.h.bf16 %v13429_v21  ;;  %v13430_v45 = vld [vmem:[#allocation238_spill] sm:$0xff]  ;;  %v10818_v0 = vld [vmem:[%s9882_s1 + $0x380] sm:$0xff]  ;;  %v3924_v21 = vunpack.c.l.bf16 %v10831_v29 }
 0x624   : >> { %5074 = vmatmul.f32.vlgmr.msra.gmra.mxu2 %v10379_v26  ;;  %5005 = vmatpush.msra.mxu0 %v3973_v32  ;;  %v4433_v11 = vunpack.c.h.bf16 %v13430_v45  ;;  %v4124_v32 = vunpack.c.l.bf16 %v10812_v44  ;;  %v13436_v45 = vld [vmem:[#allocation243_spill] sm:$0xff] }
 0x625   : >> { %5091 = vmatpush.msra.mxu3 %v4463_v59  ;;  %5150 = vmatpush.msrb.mxu1 %v3974_v38  ;;  %v13431_v59 = vld [vmem:[#allocation239_spill] sm:$0xff] }
 0x626   : >> { %5177 = vmatpush.msrb.mxu2 %v4154_v1  ;;  %5006 = vmatpush.msra.mxu0 %v3963_v28  ;;  %v3933_v38 = vunpack.c.h.bf16 %v13431_v59  ;;  %v13432_v1 = vld [vmem:[#allocation240_spill] sm:$0xff]  ;;  %v3934_v28 = vunpack.c.l.bf16 %v10818_v0 }
 0x627   : >> { %5092 = vmatpush.msra.mxu3 %v4453_v41  ;;  %5151 = vmatpush.msrb.mxu1 %v3964_v15  ;;  %v4423_v16 = vunpack.c.h.bf16 %v13432_v1  ;;  %v10834_v41 = vld [vmem:[%s9882_s1 + $0x628] sm:$0xff]  ;;  %v4114_v15 = vunpack.c.l.bf16 %v10823_v53 }
 0x628   : >> { %4903 = vmatmul.f32.gmra.mxu0 %v10298_v35  ;;  %5048 = vmatmul.f32.gmra.mxu1 %v10298_v35 }
 0x629   : >> { %5178 = vmatpush.msrb.mxu2 %v4144_v43  ;;  %5007 = vmatpush.msra.mxu0 %v3953_v19  ;;  %v13433_v43 = vld [vmem:[#allocation241_spill] sm:$0xff]  ;;  %v10838_v19 = vpop.f32.mrf.mxu1 }
 0x62a   : >> { %4990 = vmatmul.f32.gmra.mxu3 %v13426_v36  ;;  %5152 = vmatpush.msrb.mxu1 %v3954_v39  ;;  %v3923_v5 = vunpack.c.h.bf16 %v13433_v43  ;;  %13434 = vst [vmem:[#allocation216_spill] sm:$0xff] %v10838_v19  ;;  %v10842_v39 = vld [vmem:[%s9882_s1 + $0x330] sm:$0xff]  ;;  %v10855_v43 = vld [vmem:[%s9882_s1 + $0x308] sm:$0xff] }
 0x62b   : >> { %5093 = vmatpush.msra.mxu3 %v4443_v48  ;;  %5179 = vmatpush.msrb.mxu2 %v4134_v49  ;;  %v4413_v48 = vunpack.c.h.bf16 %v13435_v52  ;;  %v10845_v49 = vld [vmem:[%s9882_s1 + $0x600] sm:$0xff]  ;;  %v3914_v59 = vunpack.c.l.bf16 %v10842_v39  ;;  %v3904_v19 = vunpack.c.l.bf16 %v10855_v43 }
 0x62c   : >> { %5077 = vmatmul.f32.gmra.mxu2 %v10421_v63  ;;  %5008 = vmatpush.msra.mxu0 %v3943_v9  ;;  %v4104_v9 = vunpack.c.l.bf16 %v10834_v41  ;;  %v4094_v1 = vunpack.c.l.bf16 %v10845_v49 }
 0x62d   : >> { %5094 = vmatpush.msra.mxu3 %v4433_v11  ;;  %5153 = vmatpush.msrb.mxu1 %v3944_v50  ;;  %v3913_v11 = vunpack.c.h.bf16 %v13436_v45  ;;  %v13437_v50 = vld [vmem:[#allocation244_spill] sm:$0xff] }
 0x62e   : >> { %5180 = vmatpush.msrb.mxu2 %v4124_v32  ;;  %5009 = vmatpush.msra.mxu0 %v3933_v38  ;;  %v4403_v32 = vunpack.c.h.bf16 %v13437_v50  ;;  %v10858_v38 = vld [vmem:[%s9882_s1 + $0x5d8] sm:$0xff]  ;;  %v10866_v45 = vld [vmem:[%s9882_s1 + $0x2e0] sm:$0xff]  ;;  %v10868_v50 = vpop.f32.mrf.mxu2 }
 0x62f   : >> { %5095 = vmatpush.msra.mxu3 %v4423_v16  ;;  %5154 = vmatpush.msrb.mxu1 %v3934_v28  ;;  %13438 = vst [vmem:[#allocation218_spill] sm:$0xff] %v10858_v38  ;;  %v10861_v16 = vpop.f32.mrf.mxu0  ;;  %v13440_v28 = vld [vmem:[#allocation245_spill] sm:$0xff] }
 0x630   : >> { %4906 = vmatmul.f32.gmra.mxu0 %v10327_v57  ;;  %5051 = vmatmul.f32.gmra.mxu1 %v10327_v57  ;;  %13439 = vst [vmem:[#allocation219_spill] sm:$0xff] %v10861_v16  ;;  %v3903_v52 = vunpack.c.h.bf16 %v13440_v28  ;;  %v13444_v28 = vld [vmem:[#allocation248_spill] sm:$0xff]  ;;  %v13448_v16 = vld [vmem:[#allocation250_spill] sm:$0xff] }
 0x631   : >> { %5181 = vmatpush.msrb.mxu2 %v4114_v15  ;;  %5010 = vmatpush.msra.mxu0 %v3923_v5  ;;  %v13441_v15 = vld [vmem:[#allocation246_spill] sm:$0xff]  ;;  %13442 = vst [vmem:[#allocation220_spill] sm:$0xff] %v10868_v50  ;;  %v10884_v50 = vld [vmem:[%s9882_s1 + $0x588] sm:$0xff]  ;;  %v10888_v23 = vpop.f32.mrf.mxu1 }
 0x632   : >> { %4993 = vmatmul.f32.gmra.mxu3 %v10194_v13  ;;  %5155 = vmatpush.msrb.mxu1 %v3924_v21  ;;  %v4393_v5 = vunpack.c.h.bf16 %v13441_v15  ;;  %v13443_v21 = vld [vmem:[#allocation247_spill] sm:$0xff]  ;;  %v4383_v15 = vunpack.c.h.bf16 %v13444_v28  ;;  %13445 = vst [vmem:[#allocation221_spill] sm:$0xff] %v10884_v50  ;;  %v10892_v28 = vld [vmem:[%s9882_s1 + $0x290] sm:$0xff] }
 0x633   : >> { %5096 = vmatpush.msra.mxu3 %v4413_v48  ;;  %5182 = vmatpush.msrb.mxu2 %v4104_v9  ;;  %v4084_v48 = vunpack.c.l.bf16 %v10858_v38  ;;  %v3893_v9 = vunpack.c.h.bf16 %v13443_v21  ;;  %13447 = vst [vmem:[#allocation222_spill] sm:$0xff] %v10888_v23  ;;  %v4373_v38 = vunpack.c.h.bf16 %v13448_v16  ;;  %v4363_v16 = vunpack.c.h.bf16 %v10641_v22 }
 0x634   : >> { %5080 = vmatmul.f32.gmra.mxu2 %v10471_v12  ;;  %5011 = vmatpush.msra.mxu0 %v3913_v11  ;;  %v3894_v11 = vunpack.c.l.bf16 %v10866_v45  ;;  %v10895_v12 = vld [vmem:[%s9882_s1 + $0x560] sm:$0xff]  ;;  %v4353_v22 = vunpack.c.h.bf16 %v10650_v4 }
 0x635   : >> { %5097 = vmatpush.msra.mxu3 %v4403_v32  ;;  %5156 = vmatpush.msrb.mxu1 %v3914_v59  ;;  %v10881_v32 = vld [vmem:[%s9882_s1 + $0x2b8] sm:$0xff]  ;;  %v4074_v59 = vunpack.c.l.bf16 %v10873_v34  ;;  %13449 = vst [vmem:[#allocation223_spill] sm:$0xff] %v10895_v12  ;;  %v4054_v23 = vunpack.c.l.bf16 %v10895_v12 }
 0x636   : >> { %5183 = vmatpush.msrb.mxu2 %v4094_v1  ;;  %5012 = vmatpush.msra.mxu0 %v3903_v52  ;;  %v13446_v1 = vld [vmem:[#allocation249_spill] sm:$0xff]  ;;  %v3884_v52 = vunpack.c.l.bf16 %v10881_v32  ;;  %v10919_v12 = vpop.f32.mrf.mxu2 }
 0x637   : >> { %5098 = vmatpush.msra.mxu3 %v4393_v5  ;;  %v3883_v21 = vunpack.c.h.bf16 %v13446_v1  ;;  %5157 = vmatpush.msrb.mxu1 %v3904_v19  ;;  %v4064_v5 = vunpack.c.l.bf16 %v10884_v50  ;;  %v3873_v19 = vunpack.c.h.bf16 %v10636_v60  ;;  %v3874_v1 = vunpack.c.l.bf16 %v10892_v28  ;;  %13454 = vst [vmem:[#allocation229_spill] sm:$0xff] %v10919_v12 }
 0x638   : >> { %4909 = vmatmul.f32.gmra.mxu0 %v10359_v7  ;;  %5054 = vmatmul.f32.gmra.mxu1 %v10359_v7 }
 0x639   : >> { %5184 = vmatpush.msrb.mxu2 %v4084_v48  ;;  %5013 = vmatpush.msra.mxu0 %v3893_v9  ;;  %v3387_v48 = vld [vmem:[%s9882_s1 + $0x268] sm:$0xff]  ;;  %v10906_v9 = vld [vmem:[%s9882_s1 + $0x538] sm:$0xff] }
 0x63a   : >> { %4996 = vmatmul.f32.gmra.mxu3 %v10225_v51  ;;  %5158 = vmatpush.msrb.mxu1 %v3894_v11  ;;  %13450 = vst [vmem:[#allocation224_spill] sm:$0xff] %v10906_v9  ;;  %v10910_v11 = vpop.f32.mrf.mxu0  ;;  %v3864_v60 = vunpack.c.l.bf16 %v3387_v48 }
 0x63b   : >> { %5099 = vmatpush.msra.mxu3 %v4383_v15  ;;  %5185 = vmatpush.msrb.mxu2 %v4074_v59  ;;  %v3382_v15 = vld [vmem:[%s9882_s1 + $0x240] sm:$0xff]  ;;  %13451 = vst [vmem:[#allocation225_spill] sm:$0xff] %v10910_v11  ;;  %v10914_v59 = vld [vmem:[%s9882_s1 + $0x510] sm:$0xff]  ;;  %v3377_v11 = vld [vmem:[%s9882_s1 + $0x218] sm:$0xff] }
 0x63c   : >> { %5014 = vmatpush.msra.mxu0 %v3883_v21  ;;  %5083 = vmatmul.f32.gmra.mxu2 %v10528_v62  ;;  %13452 = vst [vmem:[#allocation226_spill] sm:$0xff] %v10914_v59  ;;  %v10917_v21 = vld [vmem:[%s9882_s1 + $0x9e8] sm:$0xff]  ;;  %v4044_v62 = vunpack.c.l.bf16 %v10906_v9  ;;  %v4034_v4 = vunpack.c.l.bf16 %v10914_v59  ;;  %v3844_v12 = vunpack.c.l.bf16 %v3377_v11  ;;  %v10936_v9 = vpop.f32.mrf.mxu1 }
 0x63d   : >> { %5100 = vmatpush.msra.mxu3 %v4373_v38  ;;  %5159 = vmatpush.msrb.mxu1 %v3884_v52  ;;  %13453 = vst [vmem:[#allocation227_spill] sm:$0xff] %v10917_v21  ;;  %v3865_v38 = vunpack.c.h.bf16 %v3387_v48  ;;  %v3854_v52 = vunpack.c.l.bf16 %v3382_v15  ;;  %v3367_v59 = vld [vmem:[%s9882_s1 + $0x1c8] sm:$0xff] }
 0x63e   : >> { %5186 = vmatpush.msrb.mxu2 %v4064_v5  ;;  %5015 = vmatpush.msra.mxu0 %v3873_v19  ;;  %v10924_v5 = vld [vmem:[%s9882_s1 + $0x9c0] sm:$0xff]  ;;  %v4344_v19 = vunpack.c.l.bf16 %v10917_v21  ;;  %13456 = vst [vmem:[#allocation231_spill] sm:$0xff] %v10936_v9  ;;  %v10944_v21 = vld [vmem:[%s9882_s1 + $0x970] sm:$0xff] }
 0x63f   : >> { %5101 = vmatpush.msra.mxu3 %v4363_v16  ;;  %5160 = vmatpush.msrb.mxu1 %v3874_v1  ;;  %v3855_v16 = vunpack.c.h.bf16 %v3382_v15  ;;  %v10934_v1 = vld [vmem:[%s9882_s1 + $0x998] sm:$0xff]  ;;  %v4334_v50 = vunpack.c.l.bf16 %v10924_v5  ;;  %v4025_v15 = vunpack.c.h.bf16 %v10719_v47 }
 0x640   : >> { %5187 = vmatpush.msrb.mxu2 %v4054_v23  ;;  %5016 = vmatmul.f32.vlgmr.msra.gmra.mxu0 %v10159_v2  ;;  %v3372_v23 = vld [vmem:[%s9882_s1 + $0x1f0] sm:$0xff] }
 0x641   : >> { %5161 = vmatmul.f32.vlgmr.msrb.gmra.mxu1 %v10159_v2  ;;  %5116 = vmatpush.msrb.mxu0 %v3864_v60  ;;  %v3845_v60 = vunpack.c.h.bf16 %v3377_v11  ;;  %v3362_v11 = vld [vmem:[%s9882_s1 + $0x1a0] sm:$0xff] }
 0x642   : >> { %5102 = vmatpush.msra.mxu3 %v4353_v22  ;;  %5188 = vmatpush.msrb.mxu2 %v4044_v62  ;;  %v3834_v22 = vunpack.c.l.bf16 %v3372_v23  ;;  %v3835_v62 = vunpack.c.h.bf16 %v3372_v23  ;;  %v10949_v47 = vpop.f32.mrf.mxu0  ;;  %v3814_v23 = vunpack.c.l.bf16 %v3362_v11 }
 0x643   : >> { %5261 = vmatpush.msra.mxu1 %v3865_v38  ;;  %5103 = vmatmul.f32.vlgmr.msra.gmra.mxu3 %v10559_v24  ;;  %v4015_v38 = vunpack.c.h.bf16 %v10727_v54  ;;  %13457 = vst [vmem:[#allocation232_spill] sm:$0xff] %v10949_v47  ;;  %v4005_v54 = vunpack.c.h.bf16 %v10737_v14  ;;  %v3995_v14 = vunpack.c.h.bf16 %v10749_v18  ;;  %v3347_v47 = vld [vmem:[%s9882_s1 + $0x128] sm:$0xff] }
 0x644   : >> { %5117 = vmatpush.msrb.mxu0 %v3854_v52  ;;  %5189 = vmatpush.msrb.mxu2 %v4034_v4  ;;  %v3824_v52 = vunpack.c.l.bf16 %v3367_v59  ;;  %v4314_v4 = vunpack.c.l.bf16 %v10944_v21  ;;  %v10972_v9 = vpop.f32.mrf.mxu1 }
 0x645   : >> { %v10930_v48 = vpop.f32.mrf.mxu3  ;;  %5203 = vmatpush.msrb.mxu3 %v4344_v19  ;;  %5262 = vmatpush.msra.mxu1 %v3855_v16  ;;  %v10953_v19 = vld [vmem:[%s9882_s1 + $0x948] sm:$0xff]  ;;  %v10955_v16 = vpop.f32.mrf.mxu2  ;;  %13460 = vst [vmem:[#allocation235_spill] sm:$0xff] %v10972_v9 }
 0x646   : >> { %13455 = vst [vmem:[#allocation230_spill] sm:$0xff] %v10930_v48  ;;  %v4324_v48 = vunpack.c.l.bf16 %v10934_v1  ;;  %5118 = vmatpush.msrb.mxu0 %v3844_v12  ;;  %5190 = vmatmul.f32.vlgmr.msrb.gmra.mxu2 %v10269_v40  ;;  %v3825_v12 = vunpack.c.h.bf16 %v3367_v59 }
 0x647   : >> { %5204 = vmatpush.msrb.mxu3 %v4334_v50  ;;  %5263 = vmatpush.msra.mxu1 %v3845_v60  ;;  %13458 = vst [vmem:[#allocation233_spill] sm:$0xff] %v10955_v16  ;;  %v3357_v50 = vld [vmem:[%s9882_s1 + $0x178] sm:$0xff] }
 0x648   : >> { %5290 = vmatpush.msra.mxu2 %v4025_v15  ;;  %5119 = vmatpush.msrb.mxu0 %v3834_v22  ;;  %v10962_v15 = vld [vmem:[%s9882_s1 + $0x920] sm:$0xff]  ;;  %v4304_v22 = vunpack.c.l.bf16 %v10953_v19  ;;  %v3804_v59 = vunpack.c.l.bf16 %v3357_v50 }
 0x649   : >> { %5205 = vmatpush.msrb.mxu3 %v4324_v48  ;;  %5264 = vmatpush.msra.mxu1 %v3835_v62  ;;  %v3815_v48 = vunpack.c.h.bf16 %v3362_v11  ;;  %v3352_v62 = vld [vmem:[%s9882_s1 + $0x150] sm:$0xff]  ;;  %v4294_v16 = vunpack.c.l.bf16 %v10962_v15  ;;  %v3805_v11 = vunpack.c.h.bf16 %v3357_v50  ;;  %v3342_v50 = vld [vmem:[%s9882_s1 + $0x100] sm:$0xff] }
 0x64a   : >> { %5291 = vmatpush.msra.mxu2 %v4015_v38  ;;  %5019 = vmatmul.f32.gmra.mxu0 %v10191_v10  ;;  %v10970_v38 = vld [vmem:[%s9882_s1 + $0x8f8] sm:$0xff]  ;;  %v3794_v18 = vunpack.c.l.bf16 %v3352_v62 }
 0x64b   : >> { %5164 = vmatmul.f32.gmra.mxu1 %v10191_v10  ;;  %5120 = vmatpush.msrb.mxu0 %v3824_v52  ;;  %v3985_v52 = vunpack.c.h.bf16 %v10760_v27  ;;  %v10985_v27 = vpop.f32.mrf.mxu0 }
 0x64c   : >> { %5206 = vmatpush.msrb.mxu3 %v4314_v4  ;;  %5265 = vmatpush.msra.mxu1 %v3825_v12  ;;  %v4284_v4 = vunpack.c.l.bf16 %v10970_v38  ;;  %v3795_v12 = vunpack.c.h.bf16 %v3352_v62  ;;  %13461 = vst [vmem:[#allocation236_spill] sm:$0xff] %v10985_v27  ;;  %v3337_v62 = vld [vmem:[%s9882_s1 + $0xd8] sm:$0xff]  ;;  %v3327_v27 = vld [vmem:[%s9882_s1 + $0x88] sm:$0xff] }
 0x64d   : >> { %v10959_v60 = vpop.f32.mrf.mxu3  ;;  %5292 = vmatpush.msra.mxu2 %v4005_v54  ;;  %5106 = vmatmul.f32.gmra.mxu3 %v10605_v37  ;;  %v3975_v54 = vunpack.c.h.bf16 %v10773_v58  ;;  %v3785_v58 = vunpack.c.h.bf16 %v3347_v47 }
 0x64e   : >> { %13459 = vst [vmem:[#allocation234_spill] sm:$0xff] %v10959_v60  ;;  %5121 = vmatpush.msrb.mxu0 %v3814_v23  ;;  %5207 = vmatpush.msrb.mxu3 %v4304_v22  ;;  %v10980_v60 = vld [vmem:[%s9882_s1 + $0x8d0] sm:$0xff]  ;;  %v3784_v23 = vunpack.c.l.bf16 %v3347_v47  ;;  %v3955_v47 = vunpack.c.h.bf16 %v10796_v3 }
 0x64f   : >> { %5266 = vmatpush.msra.mxu1 %v3815_v48  ;;  %5293 = vmatpush.msra.mxu2 %v3995_v14  ;;  %v4274_v22 = vunpack.c.l.bf16 %v10980_v60  ;;  %v10989_v48 = vld [vmem:[%s9882_s1 + $0x8a8] sm:$0xff] }
 0x650   : >> { %5122 = vmatpush.msrb.mxu0 %v3804_v59  ;;  %5193 = vmatmul.f32.gmra.mxu2 %v10298_v35  ;;  %v10993_v59 = vpop.f32.mrf.mxu2  ;;  %v4264_v9 = vunpack.c.l.bf16 %v10989_v48 }
 0x651   : >> { %5208 = vmatpush.msrb.mxu3 %v4294_v16  ;;  %5267 = vmatpush.msra.mxu1 %v3805_v11  ;;  %13463 = vst [vmem:[#allocation239_spill] sm:$0xff] %v10993_v59  ;;  %v3965_v16 = vunpack.c.h.bf16 %v10783_v6  ;;  %v3774_v11 = vunpack.c.l.bf16 %v3342_v50  ;;  %v3775_v59 = vunpack.c.h.bf16 %v3342_v50  ;;  %v3332_v6 = vld [vmem:[%s9882_s1 + $0xb0] sm:$0xff]  ;;  %v3765_v50 = vunpack.c.h.bf16 %v3337_v62 }
 0x652   : >> { %5294 = vmatpush.msra.mxu2 %v3985_v52  ;;  %5123 = vmatpush.msrb.mxu0 %v3794_v18  ;;  %v10998_v52 = vld [vmem:[%s9882_s1 + $0x880] sm:$0xff]  ;;  %v3764_v18 = vunpack.c.l.bf16 %v3337_v62  ;;  %v3754_v3 = vunpack.c.l.bf16 %v3332_v6 }
 0x653   : >> { %5209 = vmatpush.msrb.mxu3 %v4284_v4  ;;  %5268 = vmatpush.msra.mxu1 %v3795_v12  ;;  %v11006_v4 = vld [vmem:[%s9882_s1 + $0x858] sm:$0xff]  ;;  %v11008_v12 = vpop.f32.mrf.mxu1 }
 0x654   : >> { %5295 = vmatpush.msra.mxu2 %v3975_v54  ;;  %5022 = vmatmul.f32.gmra.mxu0 %v10222_v25  ;;  %13464 = vst [vmem:[#allocation240_spill] sm:$0xff] %v11008_v12  ;;  %v4254_v54 = vunpack.c.l.bf16 %v10998_v52  ;;  %v3317_v12 = vld [vmem:[%s9882_s1 + $0x38] sm:$0xff] }
 0x655   : >> { %v10991_v14 = vpop.f32.mrf.mxu3  ;;  %5167 = vmatmul.f32.gmra.mxu1 %v10222_v25  ;;  %5124 = vmatpush.msrb.mxu0 %v3784_v23  ;;  %v3945_v23 = vunpack.c.h.bf16 %v10809_v61  ;;  %v3322_v61 = vld [vmem:[%s9882_s1 + $0x60] sm:$0xff] }
 0x656   : >> { %13462 = vst [vmem:[#allocation238_spill] sm:$0xff] %v10991_v14  ;;  %5210 = vmatpush.msrb.mxu3 %v4274_v22  ;;  %5269 = vmatpush.msra.mxu1 %v3785_v58  ;;  %v4244_v22 = vunpack.c.l.bf16 %v11006_v4  ;;  %v11016_v14 = vld [vmem:[%s9882_s1 + $0x830] sm:$0xff]  ;;  %v3755_v58 = vunpack.c.h.bf16 %v3332_v6  ;;  %v3925_v6 = vunpack.c.h.bf16 %v10831_v29  ;;  %v11042_v29 = vld [vmem:[%s9882_s1 + $0x7b8] sm:$0xff] }
 0x657   : >> { %5296 = vmatpush.msra.mxu2 %v3965_v16  ;;  %5109 = vmatmul.f32.gmra.mxu3 %v10646_v8  ;;  %v3935_v16 = vunpack.c.h.bf16 %v10818_v0  ;;  %v3745_v0 = vunpack.c.h.bf16 %v3327_v27 }
 0x658   : >> { %5125 = vmatpush.msrb.mxu0 %v3774_v11  ;;  %5211 = vmatpush.msrb.mxu3 %v4264_v9  ;;  %v3744_v9 = vunpack.c.l.bf16 %v3327_v27  ;;  %v3915_v27 = vunpack.c.h.bf16 %v10842_v39 }
 0x659   : >> { %5270 = vmatpush.msra.mxu1 %v3775_v59  ;;  %5297 = vmatpush.msra.mxu2 %v3955_v47  ;;  %v4234_v59 = vunpack.c.l.bf16 %v11016_v14  ;;  %v11027_v47 = vld [vmem:[%s9882_s1 + $0x808] sm:$0xff] }
 0x65a   : >> { %5126 = vmatpush.msrb.mxu0 %v3764_v18  ;;  %5196 = vmatmul.f32.gmra.mxu2 %v10327_v57  ;;  %v11029_v18 = vpop.f32.mrf.mxu2 }
 0x65b   : >> { %5212 = vmatpush.msrb.mxu3 %v4254_v54  ;;  %5271 = vmatpush.msra.mxu1 %v3765_v50  ;;  %13467 = vst [vmem:[#allocation243_spill] sm:$0xff] %v11029_v18  ;;  %v3734_v54 = vunpack.c.l.bf16 %v3322_v61  ;;  %v11034_v50 = vld [vmem:[%s9882_s1 + $0x7e0] sm:$0xff] }
 0x65c   : >> { %5298 = vmatpush.msra.mxu2 %v3945_v23  ;;  %5127 = vmatpush.msrb.mxu0 %v3754_v3  ;;  %v4224_v23 = vunpack.c.l.bf16 %v11027_v47  ;;  %v3724_v3 = vunpack.c.l.bf16 %v3317_v12 }
 0x65d   : >> { %v11019_v11 = vpop.f32.mrf.mxu3  ;;  %v11021_v62 = vpop.f32.mrf.mxu0  ;;  %5213 = vmatpush.msrb.mxu3 %v4244_v22  ;;  %5272 = vmatpush.msra.mxu1 %v3755_v58  ;;  %v3312_v22 = vld [vmem:[%s9882_s1 + $0x10] sm:$0xff] }
 0x65e   : >> { %13465 = vst [vmem:[#allocation241_spill] sm:$0xff] %v11019_v11  ;;  %5299 = vmatpush.msra.mxu2 %v3935_v16  ;;  %5025 = vmatmul.f32.gmra.mxu0 %v10254_v55  ;;  %v3735_v11 = vunpack.c.h.bf16 %v3322_v61  ;;  %v11044_v58 = vpop.f32.mrf.mxu1  ;;  %v4214_v16 = vunpack.c.l.bf16 %v11034_v50  ;;  %v3725_v61 = vunpack.c.h.bf16 %v3317_v12  ;;  %v3714_v18 = vunpack.c.l.bf16 %v3312_v22 }
 0x65f   : >> { %13466 = vst [vmem:[#allocation242_spill] sm:$0xff] %v11021_v62  ;;  %5170 = vmatmul.f32.gmra.mxu1 %v10254_v55  ;;  %5128 = vmatpush.msrb.mxu0 %v3744_v9  ;;  %v3905_v9 = vunpack.c.h.bf16 %v10855_v43  ;;  %v3895_v12 = vunpack.c.h.bf16 %v10866_v45  ;;  %v3702_v43 = vld [vmem:[%s9882_s1 + $0xc40] sm:$0xff]  ;;  %v11190_v62 = vld [vmem:[%s9882_s1 + $0x68] sm:$0xff] }
 0x660   : >> { %5214 = vmatpush.msrb.mxu3 %v4234_v59  ;;  %13468 = vst [vmem:[#allocation244_spill] sm:$0xff] %v11044_v58  ;;  %5273 = vmatpush.msra.mxu1 %v3745_v0  ;;  %v4204_v58 = vunpack.c.l.bf16 %v11042_v29  ;;  %v3707_v0 = vld [vmem:[%s9882_s1 + $0xc68] sm:$0xff]  ;;  %v4494_v45 = vunpack.c.l.bf16 %v3702_v43 }
 0x661   : >> { %5300 = vmatpush.msra.mxu2 %v3925_v6  ;;  %5112 = vmatmul.f32.gmra.mxu3 %v10665_v56  ;;  %v11056_v6 = vld [vmem:[%s9882_s1 + $0x790] sm:$0xff] }
 0x662   : >> { %5129 = vmatpush.msrb.mxu0 %v3734_v54  ;;  %5215 = vmatpush.msrb.mxu3 %v4224_v23  ;;  %v3715_v54 = vunpack.c.h.bf16 %v3312_v22  ;;  %v4504_v23 = vunpack.c.l.bf16 %v3707_v0  ;;  %v3697_v22 = vld [vmem:[%s9882_s1 + $0xc18] sm:$0xff] }
 0x663   : >> { %5274 = vmatpush.msra.mxu1 %v3735_v11  ;;  %5301 = vmatpush.msra.mxu2 %v3915_v27  ;;  %v4194_v11 = vunpack.c.l.bf16 %v11056_v6  ;;  %v3885_v27 = vunpack.c.h.bf16 %v10881_v32  ;;  %v4495_v32 = vunpack.c.h.bf16 %v3702_v43 }
 0x664   : >> { %5130 = vmatpush.msrb.mxu0 %v3724_v3  ;;  %5199 = vmatmul.f32.gmra.mxu2 %v10359_v7  ;;  %v4505_v3 = vunpack.c.h.bf16 %v3707_v0  ;;  %v3692_v0 = vld [vmem:[%s9882_s1 + $0xbf0] sm:$0xff] }
 0x665   : >> { %v11049_v39 = vpop.f32.mrf.mxu0  ;;  %v11051_v59 = vpop.f32.mrf.mxu3  ;;  %5216 = vmatpush.msrb.mxu3 %v4214_v16  ;;  %5275 = vmatpush.msra.mxu1 %v3725_v61  ;;  %v3875_v61 = vunpack.c.h.bf16 %v10892_v28  ;;  %v11082_v28 = vld [vmem:[%s9882_s1 + $0x248] sm:$0xff] }
 0x666   : >> { %13469 = vst [vmem:[#allocation245_spill] sm:$0xff] %v11049_v39  ;;  %5302 = vmatpush.msra.mxu2 %v3905_v9  ;;  %5131 = vmatpush.msrb.mxu0 %v3714_v18  ;;  %v11066_v16 = vpop.f32.mrf.mxu1  ;;  %v4185_v18 = vunpack.c.h.bf16 %v10741_v20  ;;  %v4484_v9 = vunpack.c.l.bf16 %v3697_v22  ;;  %v4485_v20 = vunpack.c.h.bf16 %v3697_v22  ;;  %v3682_v22 = vld [vmem:[%s9882_s1 + $0xba0] sm:$0xff] }
 0x667   : >> { %13470 = vst [vmem:[#allocation246_spill] sm:$0xff] %v11051_v59  ;;  %v11062_v59 = vpop.f32.mrf.mxu2  ;;  %5217 = vmatpush.msrb.mxu3 %v4204_v58  ;;  %5276 = vmatpush.msra.mxu1 %v3715_v54  ;;  %v11073_v58 = vld [vmem:[%s9882_s1 + $0x270] sm:$0xff] }
 0x668   : >> { %13471 = vst [vmem:[#allocation247_spill] sm:$0xff] %v11062_v59  ;;  %5303 = vmatpush.msra.mxu2 %v3895_v12  ;;  %5132 = vmatmul.f32.vlgmr.msrb.gmra.mxu0 %v13418_v17  ;;  %v3866_v43 = vunpack.c.l.bf16 %v11073_v58  ;;  %v11118_v59 = vld [vmem:[%s9882_s1 + $0x1a8] sm:$0xff] }
 0x669   : >> { %13472 = vst [vmem:[#allocation248_spill] sm:$0xff] %v11066_v16  ;;  %5277 = vmatmul.f32.vlgmr.msra.gmra.mxu1 %v13418_v17  ;;  %5232 = vmatpush.msra.mxu0 %v4504_v23  ;;  %v4175_v16 = vunpack.c.h.bf16 %v10752_v31  ;;  %v4474_v23 = vunpack.c.l.bf16 %v3692_v0  ;;  %v3856_v31 = vunpack.c.l.bf16 %v11082_v28 }
 0x66a   : >> { %5218 = vmatpush.msrb.mxu3 %v4194_v11  ;;  %5304 = vmatpush.msra.mxu2 %v3885_v27  ;;  %v4165_v11 = vunpack.c.h.bf16 %v10763_v33  ;;  %v4475_v27 = vunpack.c.h.bf16 %v3692_v0  ;;  %v3677_v0 = vld [vmem:[%s9882_s1 + $0xb78] sm:$0xff] }
 0x66b   : >> { %5377 = vmatpush.msrb.mxu1 %v4505_v3  ;;  %5219 = vmatmul.f32.vlgmr.msrb.gmra.mxu3 %v10379_v26  ;;  %v11090_v3 = vld [vmem:[%s9882_s1 + $0x220] sm:$0xff] }
 0x66c   : >> { %5233 = vmatpush.msra.mxu0 %v4494_v45  ;;  %5305 = vmatpush.msra.mxu2 %v3875_v61  ;;  %v4155_v61 = vunpack.c.h.bf16 %v10777_v46  ;;  %v4145_v46 = vunpack.c.h.bf16 %v10786_v30  ;;  %v4445_v30 = vunpack.c.h.bf16 %v3677_v0 }
 0x66d   : >> { %v11076_v54 = vpop.f32.mrf.mxu0  ;;  %v11078_v12 = vpop.f32.mrf.mxu3  ;;  %5319 = vmatpush.msra.mxu3 %v4185_v18  ;;  %5378 = vmatpush.msrb.mxu1 %v4495_v32  ;;  %v3846_v32 = vunpack.c.l.bf16 %v11090_v3 }
 0x66e   : >> { %13473 = vst [vmem:[#allocation249_spill] sm:$0xff] %v11076_v54  ;;  %5234 = vmatpush.msra.mxu0 %v4484_v9  ;;  %5306 = vmatmul.f32.vlgmr.msra.gmra.mxu2 %v10159_v2  ;;  %v11099_v9 = vld [vmem:[%s9882_s1 + $0x1f8] sm:$0xff]  ;;  %v3647_v54 = vld [vmem:[%s9882_s1 + $0xa88] sm:$0xff] }
 0x66f   : >> { %13474 = vst [vmem:[#allocation250_spill] sm:$0xff] %v11078_v12  ;;  %v3687_v12 = vld [vmem:[%s9882_s1 + $0xbc8] sm:$0xff]  ;;  %5320 = vmatpush.msra.mxu3 %v4175_v16  ;;  %5379 = vmatpush.msrb.mxu1 %v4485_v20  ;;  %v11095_v33 = vpop.f32.mrf.mxu2  ;;  %v4454_v16 = vunpack.c.l.bf16 %v3682_v22 }
 0x670   : >> { %5406 = vmatpush.msrb.mxu2 %v3866_v43  ;;  %v4464_v45 = vunpack.c.l.bf16 %v3687_v12  ;;  %13475 = vst [vmem:[#allocation251_spill] sm:$0xff] %v11095_v33  ;;  %5235 = vmatpush.msra.mxu0 %v4474_v23  ;;  %v4465_v18 = vunpack.c.h.bf16 %v3687_v12  ;;  %v4455_v12 = vunpack.c.h.bf16 %v3682_v22  ;;  %v11110_v23 = vld [vmem:[%s9882_s1 + $0x1d0] sm:$0xff] }
 0x671   : >> { %5321 = vmatpush.msra.mxu3 %v4165_v11  ;;  %5380 = vmatpush.msrb.mxu1 %v4475_v27  ;;  %v11112_v11 = vpop.f32.mrf.mxu1  ;;  %v3836_v27 = vunpack.c.l.bf16 %v11099_v9  ;;  %v3672_v33 = vld [vmem:[%s9882_s1 + $0xb50] sm:$0xff]  ;;  %v3826_v22 = vunpack.c.l.bf16 %v11110_v23 }
 0x672   : >> { %5407 = vmatpush.msrb.mxu2 %v3856_v31  ;;  %5135 = vmatmul.f32.gmra.mxu0 %v13426_v36  ;;  %13478 = vst [vmem:[#allocation254_spill] sm:$0xff] %v11112_v11  ;;  %v4444_v31 = vunpack.c.l.bf16 %v3677_v0  ;;  %v3667_v11 = vld [vmem:[%s9882_s1 + $0xb28] sm:$0xff]  ;;  %v3662_v0 = vld [vmem:[%s9882_s1 + $0xb00] sm:$0xff] }
 0x673   : >> { %5280 = vmatmul.f32.gmra.mxu1 %v13426_v36  ;;  %5236 = vmatpush.msra.mxu0 %v4464_v45  ;;  %v4434_v45 = vunpack.c.l.bf16 %v3672_v33 }
 0x674   : >> { %5322 = vmatpush.msra.mxu3 %v4155_v61  ;;  %5381 = vmatpush.msrb.mxu1 %v4465_v18  ;;  %v4125_v61 = vunpack.c.h.bf16 %v10812_v44  ;;  %v4435_v18 = vunpack.c.h.bf16 %v3672_v33  ;;  %v4425_v33 = vunpack.c.h.bf16 %v3667_v11 }
 0x675   : >> { %v11102_v20 = vpop.f32.mrf.mxu0  ;;  %v11104_v43 = vpop.f32.mrf.mxu3  ;;  %5408 = vmatpush.msrb.mxu2 %v3846_v32  ;;  %5222 = vmatmul.f32.gmra.mxu3 %v10421_v63  ;;  %v11126_v32 = vld [vmem:[%s9882_s1 + $0x180] sm:$0xff] }
 0x676   : >> { %13476 = vst [vmem:[#allocation252_spill] sm:$0xff] %v11102_v20  ;;  %5237 = vmatpush.msra.mxu0 %v4454_v16  ;;  %5323 = vmatpush.msra.mxu3 %v4145_v46  ;;  %v4424_v16 = vunpack.c.l.bf16 %v3667_v11  ;;  %v4115_v46 = vunpack.c.h.bf16 %v10823_v53  ;;  %v4105_v53 = vunpack.c.h.bf16 %v10834_v41  ;;  %v11146_v11 = vld [vmem:[%s9882_s1 + $0x130] sm:$0xff]  ;;  %v13483_v41 = vld [vmem:[#allocation228_spill] sm:$0xff] }
 0x677   : >> { %13477 = vst [vmem:[#allocation253_spill] sm:$0xff] %v11104_v43  ;;  %v4135_v43 = vunpack.c.h.bf16 %v10799_v42  ;;  %5382 = vmatpush.msrb.mxu1 %v4455_v12  ;;  %5409 = vmatpush.msrb.mxu2 %v3836_v27  ;;  %v3816_v42 = vunpack.c.l.bf16 %v11118_v59  ;;  %v11133_v12 = vpop.f32.mrf.mxu2  ;;  %v3806_v27 = vunpack.c.l.bf16 %v11126_v32 }
 0x678   : >> { %5238 = vmatpush.msra.mxu0 %v4444_v31  ;;  %5309 = vmatmul.f32.gmra.mxu2 %v10191_v10  ;;  %13480 = vst [vmem:[#allocation256_spill] sm:$0xff] %v11133_v12  ;;  %v11137_v31 = vld [vmem:[%s9882_s1 + $0x158] sm:$0xff]  ;;  %v3652_v12 = vld [vmem:[%s9882_s1 + $0xab0] sm:$0xff] }
 0x679   : >> { %5324 = vmatpush.msra.mxu3 %v4135_v43  ;;  %5383 = vmatpush.msrb.mxu1 %v4445_v30  ;;  %v3657_v43 = vld [vmem:[%s9882_s1 + $0xad8] sm:$0xff]  ;;  %v4414_v30 = vunpack.c.l.bf16 %v3662_v0 }
 0x67a   : >> { %5410 = vmatpush.msrb.mxu2 %v3826_v22  ;;  %5239 = vmatpush.msra.mxu0 %v4434_v45  ;;  %v4415_v45 = vunpack.c.h.bf16 %v3662_v0  ;;  %v4405_v0 = vunpack.c.h.bf16 %v3657_v43 }
 0x67b   : >> { %5325 = vmatpush.msra.mxu3 %v4125_v61  ;;  %5384 = vmatpush.msrb.mxu1 %v4435_v18  ;;  %v11148_v61 = vpop.f32.mrf.mxu1  ;;  %v3796_v18 = vunpack.c.l.bf16 %v11137_v31 }
 0x67c   : >> { %5411 = vmatpush.msrb.mxu2 %v3816_v42  ;;  %5138 = vmatmul.f32.gmra.mxu0 %v10194_v13  ;;  %13482 = vst [vmem:[#allocation258_spill] sm:$0xff] %v11148_v61  ;;  %v4404_v42 = vunpack.c.l.bf16 %v3657_v43  ;;  %v13484_v61 = vld [vmem:[#allocation218_spill] sm:$0xff]  ;;  %v3642_v43 = vld [vmem:[%s9882_s1 + $0xa60] sm:$0xff] }
 0x67d   : >> { %v11131_v44 = vpop.f32.mrf.mxu0  ;;  %v11140_v22 = vpop.f32.mrf.mxu3  ;;  %5283 = vmatmul.f32.gmra.mxu1 %v10194_v13  ;;  %5240 = vmatpush.msra.mxu0 %v4424_v16  ;;  %v3786_v16 = vunpack.c.l.bf16 %v11146_v11  ;;  %v4085_v20 = vunpack.c.h.bf16 %v13484_v61 }
 0x67e   : >> { %13479 = vst [vmem:[#allocation255_spill] sm:$0xff] %v11131_v44  ;;  %5326 = vmatpush.msra.mxu3 %v4115_v46  ;;  %5385 = vmatpush.msrb.mxu1 %v4425_v33  ;;  %v11154_v44 = vld [vmem:[%s9882_s1 + $0x108] sm:$0xff]  ;;  %v4394_v46 = vunpack.c.l.bf16 %v3652_v12  ;;  %v4395_v33 = vunpack.c.h.bf16 %v3652_v12  ;;  %v4385_v12 = vunpack.c.h.bf16 %v3647_v54 }
 0x67f   : >> { %13481 = vst [vmem:[#allocation257_spill] sm:$0xff] %v11140_v22  ;;  %5412 = vmatpush.msrb.mxu2 %v3806_v27  ;;  %v4095_v22 = vunpack.c.h.bf16 %v10845_v49  ;;  %5225 = vmatmul.f32.gmra.mxu3 %v13483_v41  ;;  %v3776_v49 = vunpack.c.l.bf16 %v11154_v44  ;;  %v11162_v27 = vld [vmem:[%s9882_s1 + $0xe0] sm:$0xff]  ;;  %v11169_v61 = vpop.f32.mrf.mxu2 }
 0x680   : >> { %5241 = vmatpush.msra.mxu0 %v4414_v30  ;;  %5327 = vmatpush.msra.mxu3 %v4105_v53  ;;  %v4384_v53 = vunpack.c.l.bf16 %v3647_v54  ;;  %13486 = vst [vmem:[#allocation259_spill] sm:$0xff] %v11169_v61  ;;  %v11182_v54 = vld [vmem:[%s9882_s1 + $0x90] sm:$0xff] }
 0x681   : >> { %5386 = vmatpush.msrb.mxu1 %v4415_v45  ;;  %5413 = vmatpush.msrb.mxu2 %v3796_v18  ;;  %v4075_v45 = vunpack.c.h.bf16 %v10873_v34  ;;  %v3766_v18 = vunpack.c.l.bf16 %v11162_v27  ;;  %v13489_v34 = vld [vmem:[#allocation221_spill] sm:$0xff] }
 0x682   : >> { %5242 = vmatpush.msra.mxu0 %v4404_v42  ;;  %5312 = vmatmul.f32.gmra.mxu2 %v10222_v25  ;;  %v11173_v42 = vld [vmem:[%s9882_s1 + $0xb8] sm:$0xff]  ;;  %v3632_v61 = vld [vmem:[%s9882_s1 + $0xa10] sm:$0xff] }
 0x683   : >> { %5328 = vmatpush.msra.mxu3 %v4095_v22  ;;  %5387 = vmatpush.msrb.mxu1 %v4405_v0  ;;  %13487 = vst [vmem:[#allocation260_spill] sm:$0xff] %v11173_v42  ;;  %v4374_v22 = vunpack.c.l.bf16 %v3642_v43 }
 0x684   : >> { %5414 = vmatpush.msrb.mxu2 %v3786_v16  ;;  %5243 = vmatpush.msra.mxu0 %v4394_v46  ;;  %v4065_v16 = vunpack.c.h.bf16 %v13489_v34  ;;  %v11184_v46 = vpop.f32.mrf.mxu1  ;;  %v13492_v34 = vld [vmem:[#allocation237_spill] sm:$0xff] }
 0x685   : >> { %v11164_v30 = vpop.f32.mrf.mxu0  ;;  %5329 = vmatpush.msra.mxu3 %v4085_v20  ;;  %5388 = vmatpush.msrb.mxu1 %v4395_v33  ;;  %v11176_v0 = vpop.f32.mrf.mxu3  ;;  %v4375_v20 = vunpack.c.h.bf16 %v3642_v43  ;;  %13490 = vst [vmem:[#allocation221_spill] sm:$0xff] %v11184_v46  ;;  %v3756_v33 = vunpack.c.l.bf16 %v11173_v42  ;;  %v3746_v46 = vunpack.c.l.bf16 %v11182_v54  ;;  %v3736_v42 = vunpack.c.l.bf16 %v11190_v62 }
 0x686   : >> { %13485 = vst [vmem:[#allocation218_spill] sm:$0xff] %v11164_v30  ;;  %v3637_v30 = vld [vmem:[%s9882_s1 + $0xa38] sm:$0xff]  ;;  %5415 = vmatpush.msrb.mxu2 %v3776_v49  ;;  %5141 = vmatmul.f32.gmra.mxu0 %v10225_v51 }
 0x687   : >> { %13488 = vst [vmem:[#allocation261_spill] sm:$0xff] %v11176_v0  ;;  %5286 = vmatmul.f32.gmra.mxu1 %v10225_v51  ;;  %5244 = vmatpush.msra.mxu0 %v4384_v53  ;;  %v4364_v49 = vunpack.c.l.bf16 %v3637_v30  ;;  %v13491_v0 = vld [vmem:[#allocation223_spill] sm:$0xff]  ;;  %v4365_v43 = vunpack.c.h.bf16 %v3637_v30  ;;  %v11202_v30 = vld [vmem:[%s9882_s1 + $0x9f0] sm:$0xff] }
 0x688   : >> { %5330 = vmatpush.msra.mxu3 %v4075_v45  ;;  %5389 = vmatpush.msrb.mxu1 %v4385_v12  ;;  %v4055_v39 = vunpack.c.h.bf16 %v13491_v0  ;;  %v4354_v45 = vunpack.c.l.bf16 %v3632_v61  ;;  %v13494_v12 = vld [vmem:[#allocation224_spill] sm:$0xff]  ;;  %v4355_v0 = vunpack.c.h.bf16 %v3632_v61  ;;  %v11211_v61 = vld [vmem:[%s9882_s1 + $0x4f0] sm:$0xff] }
 0x689   : >> { %5416 = vmatpush.msrb.mxu2 %v3766_v18  ;;  %5228 = vmatmul.f32.gmra.mxu3 %v13492_v34  ;;  %v4045_v18 = vunpack.c.h.bf16 %v13494_v12  ;;  %v11199_v34 = vld [vmem:[%s9882_s1 + $0x40] sm:$0xff] }
 0x68a   : >> { %5245 = vmatpush.msra.mxu0 %v4374_v22  ;;  %5331 = vmatpush.msra.mxu3 %v4065_v16  ;;  %13495 = vst [vmem:[#allocation224_spill] sm:$0xff] %v11199_v34  ;;  %v13496_v22 = vld [vmem:[#allocation227_spill] sm:$0xff] }
 0x68b   : >> { %5390 = vmatpush.msrb.mxu1 %v4375_v20  ;;  %5417 = vmatpush.msrb.mxu2 %v3756_v33  ;;  %v4345_v16 = vunpack.c.h.bf16 %v13496_v22  ;;  %v13497_v20 = vld [vmem:[#allocation226_spill] sm:$0xff]  ;;  %v11222_v22 = vld [vmem:[%s9882_s1 + $0x4c8] sm:$0xff] }
 0x68c   : >> { %5246 = vmatpush.msra.mxu0 %v4364_v49  ;;  %5315 = vmatmul.f32.gmra.mxu2 %v10254_v55  ;;  %v4035_v12 = vunpack.c.h.bf16 %v13497_v20  ;;  %v11208_v33 = vld [vmem:[%s9882_s1 + $0x18] sm:$0xff]  ;;  %13499 = vst [vmem:[#allocation226_spill] sm:$0xff] %v11211_v61  ;;  %v11213_v49 = vpop.f32.mrf.mxu2 }
 0x68d   : >> { %v11194_v53 = vpop.f32.mrf.mxu0  ;;  %5332 = vmatpush.msra.mxu3 %v4055_v39  ;;  %5391 = vmatpush.msrb.mxu1 %v4365_v43  ;;  %13498 = vst [vmem:[#allocation227_spill] sm:$0xff] %v11208_v33  ;;  %v4346_v39 = vunpack.c.l.bf16 %v11202_v30  ;;  %v11218_v43 = vld [vmem:[%s9882_s1 + $0x9c8] sm:$0xff]  ;;  %v11224_v20 = vpop.f32.mrf.mxu3 }
 0x68e   : >> { %13493 = vst [vmem:[#allocation223_spill] sm:$0xff] %v11194_v53  ;;  %5418 = vmatpush.msrb.mxu2 %v3746_v46  ;;  %5247 = vmatpush.msra.mxu0 %v4354_v45  ;;  %v3726_v53 = vunpack.c.l.bf16 %v11199_v34  ;;  %v4335_v46 = vunpack.c.h.bf16 %v10924_v5  ;;  %v3716_v45 = vunpack.c.l.bf16 %v11208_v33  ;;  %v4336_v5 = vunpack.c.l.bf16 %v11218_v43  ;;  %v11241_v34 = vld [vmem:[%s9882_s1 + $0x4a0] sm:$0xff] }
 0x68f   : >> { %13500 = vst [vmem:[#allocation262_spill] sm:$0xff] %v11213_v49  ;;  %5333 = vmatpush.msra.mxu3 %v4045_v18  ;;  %5392 = vmatpush.msrb.mxu1 %v4355_v0  ;;  %v4026_v18 = vunpack.c.l.bf16 %v11211_v61  ;;  %v11231_v49 = vld [vmem:[%s9882_s1 + $0x9a0] sm:$0xff]  ;;  %v11234_v0 = vld [vmem:[%s9882_s1 + $0xc70] sm:$0xff]  ;;  %v4016_v33 = vunpack.c.l.bf16 %v11222_v22  ;;  %v11247_v61 = vld [vmem:[%s9882_s1 + $0x978] sm:$0xff] }
 0x690   : >> { %5419 = vmatpush.msrb.mxu2 %v3736_v42  ;;  %13501 = vst [vmem:[#allocation263_spill] sm:$0xff] %v11224_v20  ;;  %5248 = vmatmul.f32.vlgmr.msra.gmra.mxu0 %v10559_v24  ;;  %v11236_v42 = vpop.f32.mrf.mxu1  ;;  %v4325_v20 = vunpack.c.h.bf16 %v10934_v1  ;;  %v4326_v1 = vunpack.c.l.bf16 %v11231_v49 }
 0x691   : >> { %5393 = vmatmul.f32.vlgmr.msrb.gmra.mxu1 %v10559_v24  ;;  %13502 = vst [vmem:[#allocation264_spill] sm:$0xff] %v11234_v0  ;;  %5348 = vmatpush.msrb.mxu0 %v4345_v16  ;;  %v4506_v16 = vunpack.c.l.bf16 %v11234_v0  ;;  %v11266_v0 = vld [vmem:[%s9882_s1 + $0xc20] sm:$0xff] }
 0x692   : >> { %13503 = vst [vmem:[#allocation265_spill] sm:$0xff] %v11236_v42  ;;  %5334 = vmatpush.msra.mxu3 %v4035_v12  ;;  %5420 = vmatpush.msrb.mxu2 %v3726_v53  ;;  %v11250_v42 = vld [vmem:[%s9882_s1 + $0xc48] sm:$0xff]  ;;  %v4315_v53 = vunpack.c.h.bf16 %v10944_v21  ;;  %v4006_v12 = vunpack.c.l.bf16 %v11241_v34  ;;  %v4305_v21 = vunpack.c.h.bf16 %v10953_v19  ;;  %v4295_v19 = vunpack.c.h.bf16 %v10962_v15 }
 0x693   : >> { %13504 = vst [vmem:[#allocation266_spill] sm:$0xff] %v11241_v34  ;;  %5493 = vmatpush.msra.mxu1 %v4346_v39  ;;  %5335 = vmatmul.f32.vlgmr.msra.gmra.mxu3 %v10269_v40  ;;  %v11258_v39 = vld [vmem:[%s9882_s1 + $0x478] sm:$0xff]  ;;  %v11263_v40 = vld [vmem:[%s9882_s1 + $0x950] sm:$0xff]  ;;  %v11314_v34 = vld [vmem:[%s9882_s1 + $0xba8] sm:$0xff] }
 0x694   : >> { %13506 = vst [vmem:[#allocation268_spill] sm:$0xff] %v11250_v42  ;;  %5349 = vmatpush.msrb.mxu0 %v4335_v46  ;;  %5421 = vmatpush.msrb.mxu2 %v3716_v45  ;;  %v4496_v46 = vunpack.c.l.bf16 %v11250_v42  ;;  %v3996_v45 = vunpack.c.l.bf16 %v11258_v39  ;;  %v11311_v42 = vld [vmem:[%s9882_s1 + $0x8d8] sm:$0xff] }
 0x695   : >> { %v11243_v55 = vpop.f32.mrf.mxu0  ;;  %5435 = vmatpush.msrb.mxu3 %v4026_v18  ;;  %13507 = vst [vmem:[#allocation269_spill] sm:$0xff] %v11258_v39  ;;  %5494 = vmatpush.msra.mxu1 %v4336_v5  ;;  %v11275_v18 = vld [vmem:[%s9882_s1 + $0x928] sm:$0xff]  ;;  %v11277_v5 = vpop.f32.mrf.mxu2 }
 0x696   : >> { %13505 = vst [vmem:[#allocation267_spill] sm:$0xff] %v11243_v55  ;;  %5350 = vmatpush.msrb.mxu0 %v4325_v20  ;;  %v4316_v55 = vunpack.c.l.bf16 %v11247_v61  ;;  %5422 = vmatmul.f32.vlgmr.msrb.gmra.mxu2 %v13418_v17  ;;  %v11272_v20 = vld [vmem:[%s9882_s1 + $0x450] sm:$0xff]  ;;  %v4306_v17 = vunpack.c.l.bf16 %v11263_v40  ;;  %v11288_v39 = vpop.f32.mrf.mxu3 }
 0x697   : >> { %13508 = vst [vmem:[#allocation270_spill] sm:$0xff] %v11266_v0  ;;  %5436 = vmatpush.msrb.mxu3 %v4016_v33  ;;  %5495 = vmatpush.msra.mxu1 %v4326_v1  ;;  %v4486_v33 = vunpack.c.l.bf16 %v11266_v0  ;;  %v11282_v1 = vld [vmem:[%s9882_s1 + $0xbf8] sm:$0xff]  ;;  %v11307_v0 = vld [vmem:[%s9882_s1 + $0x400] sm:$0xff] }
 0x698   : >> { %5522 = vmatpush.msra.mxu2 %v4506_v16  ;;  %13509 = vst [vmem:[#allocation271_spill] sm:$0xff] %v11272_v20  ;;  %5351 = vmatpush.msrb.mxu0 %v4315_v53  ;;  %v11286_v16 = vld [vmem:[%s9882_s1 + $0x428] sm:$0xff]  ;;  %v3986_v53 = vunpack.c.l.bf16 %v11272_v20  ;;  %v11302_v15 = vpop.f32.mrf.mxu1 }
 0x699   : >> { %13510 = vst [vmem:[#allocation272_spill] sm:$0xff] %v11277_v5  ;;  %5437 = vmatpush.msrb.mxu3 %v4006_v12  ;;  %5496 = vmatpush.msra.mxu1 %v4316_v55  ;;  %v4296_v55 = vunpack.c.l.bf16 %v11275_v18  ;;  %v11297_v12 = vld [vmem:[%s9882_s1 + $0x900] sm:$0xff]  ;;  %v3976_v20 = vunpack.c.l.bf16 %v11286_v16 }
 0x69a   : >> { %5523 = vmatpush.msra.mxu2 %v4496_v46  ;;  %13511 = vst [vmem:[#allocation273_spill] sm:$0xff] %v11288_v39  ;;  %5251 = vmatmul.f32.gmra.mxu0 %v10605_v37  ;;  %v11300_v46 = vld [vmem:[%s9882_s1 + $0xbd0] sm:$0xff]  ;;  %v4476_v39 = vunpack.c.l.bf16 %v11282_v1 }
 0x69b   : >> { %5396 = vmatmul.f32.gmra.mxu1 %v10605_v37  ;;  %13513 = vst [vmem:[#allocation275_spill] sm:$0xff] %v11300_v46  ;;  %5352 = vmatpush.msrb.mxu0 %v4305_v21  ;;  %v4286_v21 = vunpack.c.l.bf16 %v11297_v12 }
 0x69c   : >> { %13514 = vst [vmem:[#allocation276_spill] sm:$0xff] %v11302_v15  ;;  %5438 = vmatpush.msrb.mxu3 %v3996_v45  ;;  %5497 = vmatpush.msra.mxu1 %v4306_v17  ;;  %v4466_v45 = vunpack.c.l.bf16 %v11300_v46  ;;  %v4275_v17 = vunpack.c.h.bf16 %v10980_v60  ;;  %v4276_v15 = vunpack.c.l.bf16 %v11311_v42  ;;  %v11330_v46 = vld [vmem:[%s9882_s1 + $0xb80] sm:$0xff]  ;;  %v4265_v60 = vunpack.c.h.bf16 %v10989_v48 }
 0x69d   : >> { %v11290_v5 = vpop.f32.mrf.mxu0  ;;  %13515 = vst [vmem:[#allocation277_spill] sm:$0xff] %v11307_v0  ;;  %5524 = vmatpush.msra.mxu2 %v4486_v33  ;;  %5338 = vmatmul.f32.gmra.mxu3 %v10298_v35  ;;  %v11322_v33 = vld [vmem:[%s9882_s1 + $0x3d8] sm:$0xff]  ;;  %v11327_v35 = vld [vmem:[%s9882_s1 + $0x8b0] sm:$0xff]  ;;  %v4255_v48 = vunpack.c.h.bf16 %v10998_v52 }
 0x69e   : >> { %13512 = vst [vmem:[#allocation274_spill] sm:$0xff] %v11290_v5  ;;  %v4285_v5 = vunpack.c.h.bf16 %v10970_v38  ;;  %5353 = vmatpush.msrb.mxu0 %v4295_v19  ;;  %5439 = vmatpush.msrb.mxu3 %v3986_v53  ;;  %v3966_v38 = vunpack.c.l.bf16 %v11307_v0  ;;  %v4456_v19 = vunpack.c.l.bf16 %v11314_v34  ;;  %v11339_v53 = vld [vmem:[%s9882_s1 + $0x888] sm:$0xff] }
 0x69f   : >> { %13516 = vst [vmem:[#allocation278_spill] sm:$0xff] %v11314_v34  ;;  %5498 = vmatpush.msra.mxu1 %v4296_v55  ;;  %5525 = vmatpush.msra.mxu2 %v4476_v39  ;;  %v3956_v39 = vunpack.c.l.bf16 %v11322_v33  ;;  %v11375_v34 = vld [vmem:[%s9882_s1 + $0x838] sm:$0xff]  ;;  %v11378_v0 = vld [vmem:[%s9882_s1 + $0xb08] sm:$0xff] }
 0x6a0   : >> { %13517 = vst [vmem:[#allocation279_spill] sm:$0xff] %v11322_v33  ;;  %5354 = vmatpush.msrb.mxu0 %v4285_v5  ;;  %5425 = vmatmul.f32.gmra.mxu2 %v13426_v36  ;;  %v11336_v5 = vld [vmem:[%s9882_s1 + $0x3b0] sm:$0xff]  ;;  %v4266_v36 = vunpack.c.l.bf16 %v11327_v35  ;;  %v11352_v33 = vld [vmem:[%s9882_s1 + $0x388] sm:$0xff] }
 0x6a1   : >> { %13518 = vst [vmem:[#allocation280_spill] sm:$0xff] %v11330_v46  ;;  %5440 = vmatpush.msrb.mxu3 %v3976_v20  ;;  %5499 = vmatpush.msra.mxu1 %v4286_v21  ;;  %v4446_v20 = vunpack.c.l.bf16 %v11330_v46  ;;  %v11346_v21 = vld [vmem:[%s9882_s1 + $0xb58] sm:$0xff]  ;;  %v11371_v46 = vld [vmem:[%s9882_s1 + $0x360] sm:$0xff] }
 0x6a2   : >> { %5526 = vmatpush.msra.mxu2 %v4466_v45  ;;  %13519 = vst [vmem:[#allocation281_spill] sm:$0xff] %v11336_v5  ;;  %5355 = vmatpush.msrb.mxu0 %v4275_v17  ;;  %v11348_v45 = vpop.f32.mrf.mxu2  ;;  %v3946_v17 = vunpack.c.l.bf16 %v11336_v5  ;;  %v4436_v52 = vunpack.c.l.bf16 %v11346_v21  ;;  %v3936_v5 = vunpack.c.l.bf16 %v11352_v33 }
 0x6a3   : >> { %5441 = vmatpush.msrb.mxu3 %v3966_v38  ;;  %13521 = vst [vmem:[#allocation283_spill] sm:$0xff] %v11348_v45  ;;  %5500 = vmatpush.msra.mxu1 %v4276_v15  ;;  %v4256_v38 = vunpack.c.l.bf16 %v11339_v53  ;;  %v11361_v45 = vld [vmem:[%s9882_s1 + $0x860] sm:$0xff]  ;;  %v11364_v15 = vld [vmem:[%s9882_s1 + $0xb30] sm:$0xff] }
 0x6a4   : >> { %5527 = vmatpush.msra.mxu2 %v4456_v19  ;;  %5254 = vmatmul.f32.gmra.mxu0 %v10646_v8  ;;  %13523 = vst [vmem:[#allocation285_spill] sm:$0xff] %v11364_v15  ;;  %v11366_v19 = vpop.f32.mrf.mxu1 }
 0x6a5   : >> { %v11341_v55 = vpop.f32.mrf.mxu0  ;;  %5399 = vmatmul.f32.gmra.mxu1 %v10646_v8  ;;  %13524 = vst [vmem:[#allocation286_spill] sm:$0xff] %v11366_v19  ;;  %5356 = vmatpush.msrb.mxu0 %v4265_v60  ;;  %v4246_v60 = vunpack.c.l.bf16 %v11361_v45  ;;  %v4236_v19 = vunpack.c.l.bf16 %v11375_v34 }
 0x6a6   : >> { %13520 = vst [vmem:[#allocation282_spill] sm:$0xff] %v11341_v55  ;;  %v11354_v55 = vpop.f32.mrf.mxu3  ;;  %5442 = vmatpush.msrb.mxu3 %v3956_v39  ;;  %5501 = vmatpush.msra.mxu1 %v4266_v36  ;;  %v4426_v39 = vunpack.c.l.bf16 %v11364_v15  ;;  %v4235_v36 = vunpack.c.h.bf16 %v11016_v14  ;;  %v11394_v15 = vld [vmem:[%s9882_s1 + $0xae0] sm:$0xff]  ;;  %v4225_v14 = vunpack.c.h.bf16 %v11027_v47  ;;  %v4215_v47 = vunpack.c.h.bf16 %v11034_v50 }
 0x6a7   : >> { %13522 = vst [vmem:[#allocation284_spill] sm:$0xff] %v11354_v55  ;;  %v4245_v55 = vunpack.c.h.bf16 %v11006_v4  ;;  %5528 = vmatpush.msra.mxu2 %v4446_v20  ;;  %5341 = vmatmul.f32.gmra.mxu3 %v10327_v57  ;;  %v3926_v4 = vunpack.c.l.bf16 %v11371_v46  ;;  %v11386_v20 = vld [vmem:[%s9882_s1 + $0x338] sm:$0xff]  ;;  %v11391_v57 = vld [vmem:[%s9882_s1 + $0x810] sm:$0xff] }
 0x6a8   : >> { %13525 = vst [vmem:[#allocation287_spill] sm:$0xff] %v11371_v46  ;;  %5357 = vmatpush.msrb.mxu0 %v4255_v48  ;;  %5443 = vmatpush.msrb.mxu3 %v3946_v17  ;;  %v4416_v48 = vunpack.c.l.bf16 %v11378_v0  ;;  %v11442_v46 = vld [vmem:[%s9882_s1 + $0xa68] sm:$0xff] }
 0x6a9   : >> { %13526 = vst [vmem:[#allocation288_spill] sm:$0xff] %v11378_v0  ;;  %5502 = vmatpush.msra.mxu1 %v4256_v38  ;;  %5529 = vmatpush.msra.mxu2 %v4436_v52  ;;  %v11402_v38 = vld [vmem:[%s9882_s1 + $0x310] sm:$0xff]  ;;  %v11405_v52 = vld [vmem:[%s9882_s1 + $0x7e8] sm:$0xff]  ;;  %v11439_v0 = vld [vmem:[%s9882_s1 + $0x798] sm:$0xff] }
 0x6aa   : >> { %13527 = vst [vmem:[#allocation289_spill] sm:$0xff] %v11386_v20  ;;  %5358 = vmatpush.msrb.mxu0 %v4245_v55  ;;  %5428 = vmatmul.f32.gmra.mxu2 %v10194_v13  ;;  %v3916_v55 = vunpack.c.l.bf16 %v11386_v20  ;;  %v4406_v13 = vunpack.c.l.bf16 %v11394_v15 }
 0x6ab   : >> { %13528 = vst [vmem:[#allocation290_spill] sm:$0xff] %v11394_v15  ;;  %5444 = vmatpush.msrb.mxu3 %v3936_v5  ;;  %5503 = vmatpush.msra.mxu1 %v4246_v60  ;;  %v11410_v5 = vld [vmem:[%s9882_s1 + $0xab8] sm:$0xff]  ;;  %v11412_v60 = vpop.f32.mrf.mxu2  ;;  %v11435_v15 = vld [vmem:[%s9882_s1 + $0x2c0] sm:$0xff] }
 0x6ac   : >> { %5530 = vmatpush.msra.mxu2 %v4426_v39  ;;  %13530 = vst [vmem:[#allocation292_spill] sm:$0xff] %v11402_v38  ;;  %5359 = vmatpush.msrb.mxu0 %v4235_v36  ;;  %v11416_v39 = vld [vmem:[%s9882_s1 + $0x2e8] sm:$0xff]  ;;  %v3906_v36 = vunpack.c.l.bf16 %v11402_v38  ;;  %v4396_v50 = vunpack.c.l.bf16 %v11410_v5 }
 0x6ad   : >> { %v11396_v17 = vpop.f32.mrf.mxu0  ;;  %5445 = vmatpush.msrb.mxu3 %v3926_v4  ;;  %13531 = vst [vmem:[#allocation293_spill] sm:$0xff] %v11410_v5  ;;  %5504 = vmatpush.msra.mxu1 %v4236_v19  ;;  %v4216_v4 = vunpack.c.l.bf16 %v11405_v52  ;;  %v11428_v19 = vld [vmem:[%s9882_s1 + $0xa90] sm:$0xff]  ;;  %v3896_v38 = vunpack.c.l.bf16 %v11416_v39 }
 0x6ae   : >> { %13529 = vst [vmem:[#allocation291_spill] sm:$0xff] %v11396_v17  ;;  %v4226_v17 = vunpack.c.l.bf16 %v11391_v57  ;;  %5531 = vmatpush.msra.mxu2 %v4416_v48  ;;  %v11418_v20 = vpop.f32.mrf.mxu3  ;;  %5257 = vmatmul.f32.gmra.mxu0 %v10665_v56  ;;  %v11430_v48 = vpop.f32.mrf.mxu1 }
 0x6af   : >> { %13532 = vst [vmem:[#allocation294_spill] sm:$0xff] %v11412_v60  ;;  %5402 = vmatmul.f32.gmra.mxu1 %v10665_v56  ;;  %v11425_v60 = vld [vmem:[%s9882_s1 + $0x7c0] sm:$0xff]  ;;  %5360 = vmatpush.msrb.mxu0 %v4225_v14 }
 0x6b0   : >> { %13533 = vst [vmem:[#allocation295_spill] sm:$0xff] %v11416_v39  ;;  %5446 = vmatpush.msrb.mxu3 %v3916_v55  ;;  %5505 = vmatpush.msra.mxu1 %v4226_v17  ;;  %v4206_v14 = vunpack.c.l.bf16 %v11425_v60  ;;  %v4195_v17 = vunpack.c.h.bf16 %v11056_v6  ;;  %v3548_v55 = vld [vmem:[%s9882_s1 + $0x770] sm:$0xff]  ;;  %v11456_v39 = vld [vmem:[%s9882_s1 + $0xa40] sm:$0xff]  ;;  %v3543_v6 = vld [vmem:[%s9882_s1 + $0x748] sm:$0xff] }
 0x6b1   : >> { %13534 = vst [vmem:[#allocation296_spill] sm:$0xff] %v11418_v20  ;;  %v4205_v20 = vunpack.c.h.bf16 %v11042_v29  ;;  %5532 = vmatpush.msra.mxu2 %v4406_v13  ;;  %5344 = vmatmul.f32.gmra.mxu3 %v10359_v7  ;;  %v4386_v29 = vunpack.c.l.bf16 %v11428_v19  ;;  %v3886_v13 = vunpack.c.l.bf16 %v11435_v15  ;;  %v4196_v7 = vunpack.c.l.bf16 %v11439_v0 }
 0x6b2   : >> { %13535 = vst [vmem:[#allocation297_spill] sm:$0xff] %v11428_v19  ;;  %5361 = vmatpush.msrb.mxu0 %v4215_v47  ;;  %5447 = vmatpush.msrb.mxu3 %v3906_v36  ;;  %v4376_v47 = vunpack.c.l.bf16 %v11442_v46  ;;  %v4186_v36 = vunpack.c.l.bf16 %v3548_v55 }
 0x6b3   : >> { %13536 = vst [vmem:[#allocation298_spill] sm:$0xff] %v11430_v48  ;;  %5506 = vmatpush.msra.mxu1 %v4216_v4  ;;  %v11451_v48 = vld [vmem:[%s9882_s1 + $0x298] sm:$0xff]  ;;  %5533 = vmatpush.msra.mxu2 %v4396_v50  ;;  %v11468_v5 = vpop.f32.mrf.mxu2 }
 0x6b4   : >> { %13537 = vst [vmem:[#allocation299_spill] sm:$0xff] %v11435_v15  ;;  %5362 = vmatpush.msrb.mxu0 %v4205_v20  ;;  %5431 = vmatmul.f32.gmra.mxu2 %v10225_v51  ;;  %v3876_v4 = vunpack.c.l.bf16 %v11451_v48  ;;  %v11464_v50 = vld [vmem:[%s9882_s1 + $0xa18] sm:$0xff]  ;;  %v4366_v20 = vunpack.c.l.bf16 %v11456_v39  ;;  %v3538_v15 = vld [vmem:[%s9882_s1 + $0x720] sm:$0xff] }
 0x6b5   : >> { %13538 = vst [vmem:[#allocation300_spill] sm:$0xff] %v11442_v46  ;;  %v11458_v19 = vpop.f32.mrf.mxu0  ;;  %5448 = vmatpush.msrb.mxu3 %v3896_v38  ;;  %5507 = vmatpush.msra.mxu1 %v4206_v14  ;;  %v4187_v46 = vunpack.c.h.bf16 %v3548_v55  ;;  %v4176_v38 = vunpack.c.l.bf16 %v3543_v6  ;;  %v4356_v14 = vunpack.c.l.bf16 %v11464_v50  ;;  %v4166_v55 = vunpack.c.l.bf16 %v3538_v15 }
 0x6b6   : >> { %13539 = vst [vmem:[#allocation301_spill] sm:$0xff] %v11458_v19  ;;  %5534 = vmatpush.msra.mxu2 %v4386_v29  ;;  %5363 = vmatpush.msrb.mxu0 %v4195_v17  ;;  %v11470_v19 = vpop.f32.mrf.mxu3  ;;  %v3867_v29 = vunpack.c.h.bf16 %v11073_v58  ;;  %v11476_v17 = vpop.f32.mrf.mxu1 }
 0x6b7   : >> { %5449 = vmatpush.msrb.mxu3 %v3886_v13  ;;  %13540 = vst [vmem:[#allocation302_spill] sm:$0xff] %v11468_v5  ;;  %5508 = vmatpush.msra.mxu1 %v4196_v7  ;;  %v4177_v13 = vunpack.c.h.bf16 %v3543_v6  ;;  %v3533_v7 = vld [vmem:[%s9882_s1 + $0x6f8] sm:$0xff]  ;;  %v4167_v5 = vunpack.c.h.bf16 %v3538_v15  ;;  %v3523_v15 = vld [vmem:[%s9882_s1 + $0x6a8] sm:$0xff] }
 0x6b8   : >> { %5535 = vmatpush.msra.mxu2 %v4376_v47  ;;  %13541 = vst [vmem:[#allocation303_spill] sm:$0xff] %v11470_v19  ;;  %5364 = vmatmul.f32.vlgmr.msrb.gmra.mxu0 %v10379_v26  ;;  %v3857_v47 = vunpack.c.h.bf16 %v11082_v28  ;;  %v4347_v19 = vunpack.c.h.bf16 %v11202_v30  ;;  %v4156_v58 = vunpack.c.l.bf16 %v3533_v7  ;;  %v4157_v6 = vunpack.c.h.bf16 %v3533_v7  ;;  %v3513_v7 = vld [vmem:[%s9882_s1 + $0x658] sm:$0xff] }
 0x6b9   : >> { %5509 = vmatmul.f32.vlgmr.msra.gmra.mxu1 %v10379_v26  ;;  %13542 = vst [vmem:[#allocation304_spill] sm:$0xff] %v11476_v17  ;;  %5464 = vmatpush.msra.mxu0 %v4186_v36  ;;  %v3847_v36 = vunpack.c.h.bf16 %v11090_v3 }
 0x6ba   : >> { %5450 = vmatpush.msrb.mxu3 %v3876_v4  ;;  %5536 = vmatpush.msra.mxu2 %v4366_v20  ;;  %v3528_v4 = vld [vmem:[%s9882_s1 + $0x6d0] sm:$0xff]  ;;  %v3837_v20 = vunpack.c.h.bf16 %v11099_v9  ;;  %v3827_v9 = vunpack.c.h.bf16 %v11110_v23  ;;  %v4307_v23 = vunpack.c.h.bf16 %v11263_v40 }
 0x6bb   : >> { %5609 = vmatpush.msrb.mxu1 %v4187_v46  ;;  %5451 = vmatmul.f32.vlgmr.msrb.gmra.mxu3 %v10159_v2  ;;  %v4337_v46 = vunpack.c.h.bf16 %v11218_v43  ;;  %v4146_v30 = vunpack.c.l.bf16 %v3528_v4  ;;  %v4147_v3 = vunpack.c.h.bf16 %v3528_v4  ;;  %v4136_v43 = vunpack.c.l.bf16 %v3523_v15 }
 0x6bc   : >> { %5465 = vmatpush.msra.mxu0 %v4176_v38  ;;  %5537 = vmatpush.msra.mxu2 %v4356_v14  ;;  %v4327_v38 = vunpack.c.h.bf16 %v11231_v49  ;;  %v3518_v14 = vld [vmem:[%s9882_s1 + $0x680] sm:$0xff]  ;;  %v4317_v49 = vunpack.c.h.bf16 %v11247_v61  ;;  %v3807_v4 = vunpack.c.h.bf16 %v11126_v32  ;;  %v4117_v61 = vunpack.c.h.bf16 %v3513_v7 }
 0x6bd   : >> { %5551 = vmatpush.msra.mxu3 %v3867_v29  ;;  %5610 = vmatpush.msrb.mxu1 %v4177_v13  ;;  %v11485_v28 = vpop.f32.mrf.mxu0  ;;  %v11492_v29 = vpop.f32.mrf.mxu2 }
 0x6be   : >> { %5466 = vmatpush.msra.mxu0 %v4166_v55  ;;  %13543 = vst [vmem:[#allocation305_spill] sm:$0xff] %v11485_v28  ;;  %5538 = vmatmul.f32.vlgmr.msra.gmra.mxu2 %v10559_v24  ;;  %v11494_v13 = vpop.f32.mrf.mxu3  ;;  %v4126_v55 = vunpack.c.l.bf16 %v3518_v14  ;;  %v11738_v28 = vld [vmem:[%s9882_s1 + $0x598] sm:$0xff] }
 0x6bf   : >> { %5552 = vmatpush.msra.mxu3 %v3857_v47  ;;  %5611 = vmatpush.msrb.mxu1 %v4167_v5  ;;  %13544 = vst [vmem:[#allocation306_spill] sm:$0xff] %v11492_v29  ;;  %v4137_v5 = vunpack.c.h.bf16 %v3523_v15  ;;  %v3817_v47 = vunpack.c.h.bf16 %v11118_v59  ;;  %v3503_v15 = vld [vmem:[%s9882_s1 + $0x608] sm:$0xff]  ;;  %v13580_v29 = vld [vmem:[#allocation278_spill] sm:$0xff] }
 0x6c0   : >> { %5638 = vmatpush.msrb.mxu2 %v4347_v19  ;;  %5467 = vmatpush.msra.mxu0 %v4156_v58  ;;  %13545 = vst [vmem:[#allocation307_spill] sm:$0xff] %v11494_v13  ;;  %v11499_v19 = vpop.f32.mrf.mxu1  ;;  %v4127_v58 = vunpack.c.h.bf16 %v3518_v14 }
 0x6c1   : >> { %5553 = vmatpush.msra.mxu3 %v3847_v36  ;;  %5612 = vmatpush.msrb.mxu1 %v4157_v6  ;;  %13546 = vst [vmem:[#allocation308_spill] sm:$0xff] %v11499_v19  ;;  %v4116_v36 = vunpack.c.l.bf16 %v3513_v7  ;;  %v3508_v6 = vld [vmem:[%s9882_s1 + $0x630] sm:$0xff] }
 0x6c2   : >> { %5639 = vmatpush.msrb.mxu2 %v4337_v46  ;;  %5367 = vmatmul.f32.gmra.mxu0 %v10421_v63  ;;  %v4297_v46 = vunpack.c.h.bf16 %v11275_v18  ;;  %v4106_v40 = vunpack.c.l.bf16 %v3508_v6  ;;  %v4107_v32 = vunpack.c.h.bf16 %v3508_v6  ;;  %v4096_v18 = vunpack.c.l.bf16 %v3503_v15  ;;  %v13552_v6 = vld [vmem:[#allocation260_spill] sm:$0xff]  ;;  %v11697_v19 = vld [vmem:[%s9882_s1 + $0x610] sm:$0xff] }
 0x6c3   : >> { %5512 = vmatmul.f32.gmra.mxu1 %v10421_v63  ;;  %5468 = vmatpush.msra.mxu0 %v4146_v30  ;;  %v3797_v30 = vunpack.c.h.bf16 %v11137_v31  ;;  %v3787_v31 = vunpack.c.h.bf16 %v11146_v11  ;;  %v4267_v11 = vunpack.c.h.bf16 %v11327_v35 }
 0x6c4   : >> { %5554 = vmatpush.msra.mxu3 %v3837_v20  ;;  %5613 = vmatpush.msrb.mxu1 %v4147_v3  ;;  %v4287_v20 = vunpack.c.h.bf16 %v11297_v12  ;;  %v3498_v3 = vld [vmem:[%s9882_s1 + $0x5e0] sm:$0xff]  ;;  %v4277_v12 = vunpack.c.h.bf16 %v11311_v42 }
 0x6c5   : >> { %5640 = vmatpush.msrb.mxu2 %v4327_v38  ;;  %5454 = vmatmul.f32.gmra.mxu3 %v10191_v10  ;;  %v11516_v38 = vpop.f32.mrf.mxu2  ;;  %v4087_v7 = vunpack.c.h.bf16 %v3498_v3 }
 0x6c6   : >> { %5469 = vmatpush.msra.mxu0 %v4136_v43  ;;  %5555 = vmatpush.msra.mxu3 %v3827_v9  ;;  %13548 = vst [vmem:[#allocation310_spill] sm:$0xff] %v11516_v38  ;;  %v11518_v14 = vpop.f32.mrf.mxu3  ;;  %v4097_v43 = vunpack.c.h.bf16 %v3503_v15  ;;  %v3478_v15 = vld [vmem:[%s9882_s1 + $0x540] sm:$0xff] }
 0x6c7   : >> { %5614 = vmatpush.msrb.mxu1 %v4137_v5  ;;  %5641 = vmatpush.msrb.mxu2 %v4317_v49  ;;  %v11509_v59 = vpop.f32.mrf.mxu0  ;;  %13549 = vst [vmem:[#allocation311_spill] sm:$0xff] %v11518_v14  ;;  %v4086_v5 = vunpack.c.l.bf16 %v3498_v3  ;;  %v3493_v49 = vld [vmem:[%s9882_s1 + $0x5b8] sm:$0xff] }
 0x6c8   : >> { %5470 = vmatpush.msra.mxu0 %v4126_v55  ;;  %13547 = vst [vmem:[#allocation309_spill] sm:$0xff] %v11509_v59  ;;  %5541 = vmatmul.f32.gmra.mxu2 %v10605_v37  ;;  %v11523_v9 = vpop.f32.mrf.mxu1  ;;  %v3777_v55 = vunpack.c.h.bf16 %v11154_v44  ;;  %v4077_v42 = vunpack.c.h.bf16 %v3493_v49  ;;  %v11707_v59 = vld [vmem:[%s9882_s1 + $0x318] sm:$0xff] }
 0x6c9   : >> { %5556 = vmatpush.msra.mxu3 %v3817_v47  ;;  %5615 = vmatpush.msrb.mxu1 %v4127_v58  ;;  %13550 = vst [vmem:[#allocation312_spill] sm:$0xff] %v11523_v9  ;;  %v4076_v47 = vunpack.c.l.bf16 %v3493_v49  ;;  %v3767_v58 = vunpack.c.h.bf16 %v11162_v27  ;;  %v4047_v49 = vunpack.c.h.bf16 %v3478_v15  ;;  %v11655_v9 = vld [vmem:[%s9882_s1 + $0x3b8] sm:$0xff] }
 0x6ca   : >> { %5642 = vmatpush.msrb.mxu2 %v4307_v23  ;;  %5471 = vmatpush.msra.mxu0 %v4116_v36  ;;  %v3488_v23 = vld [vmem:[%s9882_s1 + $0x590] sm:$0xff]  ;;  %v4257_v36 = vunpack.c.h.bf16 %v11339_v53 }
 0x6cb   : >> { %5557 = vmatpush.msra.mxu3 %v3807_v4  ;;  %5616 = vmatpush.msrb.mxu1 %v4117_v61  ;;  %v3483_v4 = vld [vmem:[%s9882_s1 + $0x568] sm:$0xff]  ;;  %v4066_v35 = vunpack.c.l.bf16 %v3488_v23  ;;  %v3757_v61 = vunpack.c.h.bf16 %v13552_v6  ;;  %v4067_v27 = vunpack.c.h.bf16 %v3488_v23 }
 0x6cc   : >> { %5643 = vmatpush.msrb.mxu2 %v4297_v46  ;;  %5370 = vmatmul.f32.gmra.mxu0 %v13483_v41  ;;  %v4247_v46 = vunpack.c.h.bf16 %v11361_v45  ;;  %v4056_v53 = vunpack.c.l.bf16 %v3483_v4  ;;  %v4057_v3 = vunpack.c.h.bf16 %v3483_v4  ;;  %v4237_v45 = vunpack.c.h.bf16 %v11375_v34 }
 0x6cd   : >> { %5515 = vmatmul.f32.gmra.mxu1 %v13483_v41  ;;  %5472 = vmatpush.msra.mxu0 %v4106_v40  ;;  %v11540_v40 = vpop.f32.mrf.mxu2  ;;  %v4207_v4 = vunpack.c.h.bf16 %v11425_v60  ;;  %v4197_v60 = vunpack.c.h.bf16 %v11439_v0  ;;  %v11590_v0 = vld [vmem:[%s9882_s1 + $0x480] sm:$0xff] }
 0x6ce   : >> { %5558 = vmatpush.msra.mxu3 %v3797_v30  ;;  %5617 = vmatpush.msrb.mxu1 %v4107_v32  ;;  %13553 = vst [vmem:[#allocation260_spill] sm:$0xff] %v11540_v40  ;;  %v11542_v30 = vpop.f32.mrf.mxu3  ;;  %v13555_v32 = vld [vmem:[#allocation237_spill] sm:$0xff] }
 0x6cf   : >> { %5644 = vmatpush.msrb.mxu2 %v4287_v20  ;;  %5457 = vmatmul.f32.gmra.mxu3 %v10222_v25  ;;  %13554 = vst [vmem:[#allocation314_spill] sm:$0xff] %v11542_v30  ;;  %v3747_v20 = vunpack.c.h.bf16 %v11182_v54  ;;  %v4227_v54 = vunpack.c.h.bf16 %v11391_v57  ;;  %v13560_v57 = vld [vmem:[#allocation226_spill] sm:$0xff]  ;;  %v4098_v30 = vunpack.c.l.bf16 %v11697_v19 }
 0x6d0   : >> { %5473 = vmatpush.msra.mxu0 %v4096_v18  ;;  %5559 = vmatpush.msra.mxu3 %v3787_v31  ;;  %v11547_v18 = vpop.f32.mrf.mxu1  ;;  %v4046_v31 = vunpack.c.l.bf16 %v3478_v15  ;;  %v4027_v23 = vunpack.c.h.bf16 %v13560_v57  ;;  %v13565_v15 = vld [vmem:[#allocation264_spill] sm:$0xff]  ;;  %v13571_v57 = vld [vmem:[#allocation270_spill] sm:$0xff] }
 0x6d1   : >> { %5618 = vmatpush.msrb.mxu1 %v4097_v43  ;;  %5645 = vmatpush.msrb.mxu2 %v4277_v12  ;;  %v11533_v44 = vpop.f32.mrf.mxu0  ;;  %13556 = vst [vmem:[#allocation315_spill] sm:$0xff] %v11547_v18  ;;  %v3473_v43 = vld [vmem:[%s9882_s1 + $0x518] sm:$0xff]  ;;  %v3737_v12 = vunpack.c.h.bf16 %v11190_v62  ;;  %v4457_v18 = vunpack.c.h.bf16 %v13580_v29 }
 0x6d2   : >> { %5474 = vmatpush.msra.mxu0 %v4086_v5  ;;  %13551 = vst [vmem:[#allocation313_spill] sm:$0xff] %v11533_v44  ;;  %5544 = vmatmul.f32.gmra.mxu2 %v10646_v8  ;;  %v13557_v5 = vld [vmem:[#allocation209_spill] sm:$0xff]  ;;  %v4037_v34 = vunpack.c.h.bf16 %v3473_v43 }
 0x6d3   : >> { %5560 = vmatpush.msra.mxu3 %v3777_v55  ;;  %5619 = vmatpush.msrb.mxu1 %v4087_v7  ;;  %v4036_v55 = vunpack.c.l.bf16 %v3473_v43  ;;  %v13558_v7 = vld [vmem:[#allocation224_spill] sm:$0xff] }
 0x6d4   : >> { %5646 = vmatpush.msrb.mxu2 %v4267_v11  ;;  %5475 = vmatpush.msra.mxu0 %v4076_v47  ;;  %v3727_v11 = vunpack.c.h.bf16 %v13558_v7  ;;  %v4217_v47 = vunpack.c.h.bf16 %v11405_v52 }
 0x6d5   : >> { %5561 = vmatpush.msra.mxu3 %v3767_v58  ;;  %5620 = vmatpush.msrb.mxu1 %v4077_v42  ;;  %v11557_v58 = vld [vmem:[%s9882_s1 + $0x4f8] sm:$0xff]  ;;  %v11569_v6 = vpop.f32.mrf.mxu2 }
 0x6d6   : >> { %5647 = vmatpush.msrb.mxu2 %v4257_v36  ;;  %5373 = vmatmul.f32.gmra.mxu0 %v13555_v32  ;;  %v13561_v42 = vld [vmem:[#allocation227_spill] sm:$0xff]  ;;  %v4028_v52 = vunpack.c.l.bf16 %v11557_v58  ;;  %13562 = vst [vmem:[#allocation224_spill] sm:$0xff] %v11569_v6 }
 0x6d7   : >> { %5518 = vmatmul.f32.gmra.mxu1 %v13555_v32  ;;  %5476 = vmatpush.msra.mxu0 %v4066_v35  ;;  %v3717_v36 = vunpack.c.h.bf16 %v13561_v42  ;;  %v11567_v35 = vld [vmem:[%s9882_s1 + $0x4d0] sm:$0xff]  ;;  %v3998_v42 = vunpack.c.l.bf16 %v11590_v0  ;;  %v11671_v6 = vld [vmem:[%s9882_s1 + $0x660] sm:$0xff] }
 0x6d8   : >> { %5562 = vmatpush.msra.mxu3 %v3757_v61  ;;  %5621 = vmatpush.msrb.mxu1 %v4067_v27  ;;  %v4017_v61 = vunpack.c.h.bf16 %v11222_v22  ;;  %v11572_v27 = vpop.f32.mrf.mxu3  ;;  %v4018_v22 = vunpack.c.l.bf16 %v11567_v35 }
 0x6d9   : >> { %5648 = vmatpush.msrb.mxu2 %v4247_v46  ;;  %5460 = vmatmul.f32.gmra.mxu3 %v13557_v5  ;;  %13563 = vst [vmem:[#allocation226_spill] sm:$0xff] %v11572_v27  ;;  %v13564_v46 = vld [vmem:[#allocation210_spill] sm:$0xff] }
 0x6da   : >> { %5477 = vmatpush.msra.mxu0 %v4056_v53  ;;  %5563 = vmatpush.msra.mxu3 %v3747_v20  ;;  %v4507_v53 = vunpack.c.h.bf16 %v13565_v15  ;;  %v11579_v20 = vld [vmem:[%s9882_s1 + $0x4a8] sm:$0xff] }
 0x6db   : >> { %5622 = vmatpush.msrb.mxu1 %v4057_v3  ;;  %5649 = vmatpush.msrb.mxu2 %v4237_v45  ;;  %v11559_v62 = vpop.f32.mrf.mxu0  ;;  %v11582_v3 = vld [vmem:[%s9882_s1 + $0x778] sm:$0xff]  ;;  %v11584_v45 = vpop.f32.mrf.mxu1  ;;  %v4008_v7 = vunpack.c.l.bf16 %v11579_v20 }
 0x6dc   : >> { %5478 = vmatpush.msra.mxu0 %v4046_v31  ;;  %13559 = vst [vmem:[#allocation209_spill] sm:$0xff] %v11559_v62  ;;  %5547 = vmatmul.f32.gmra.mxu2 %v10665_v56  ;;  %v13567_v31 = vld [vmem:[#allocation266_spill] sm:$0xff] }
 0x6dd   : >> { %5564 = vmatpush.msra.mxu3 %v3737_v12  ;;  %5623 = vmatpush.msrb.mxu1 %v4047_v49  ;;  %13566 = vst [vmem:[#allocation227_spill] sm:$0xff] %v11584_v45  ;;  %v4007_v43 = vunpack.c.h.bf16 %v13567_v31  ;;  %v13568_v12 = vld [vmem:[#allocation268_spill] sm:$0xff] }
 0x6de   : >> { %5650 = vmatpush.msrb.mxu2 %v4227_v54  ;;  %5479 = vmatpush.msra.mxu0 %v4036_v55  ;;  %v4497_v49 = vunpack.c.h.bf16 %v13568_v12  ;;  %v11593_v54 = vld [vmem:[%s9882_s1 + $0x750] sm:$0xff]  ;;  %v11619_v12 = vld [vmem:[%s9882_s1 + $0x700] sm:$0xff] }
 0x6df   : >> { %5565 = vmatpush.msra.mxu3 %v3727_v11  ;;  %5624 = vmatpush.msrb.mxu1 %v4037_v34  ;;  %v13569_v55 = vld [vmem:[#allocation205_spill] sm:$0xff]  ;;  %v4188_v11 = vunpack.c.l.bf16 %v11582_v3 }
 0x6e0   : >> { %5651 = vmatpush.msrb.mxu2 %v4217_v47  ;;  %5480 = vmatmul.f32.vlgmr.msra.gmra.mxu0 %v13564_v46  ;;  %v13570_v34 = vld [vmem:[#allocation269_spill] sm:$0xff] }
 0x6e1   : >> { %5625 = vmatmul.f32.vlgmr.msrb.gmra.mxu1 %v13564_v46  ;;  %5580 = vmatpush.msrb.mxu0 %v4027_v23  ;;  %v3997_v47 = vunpack.c.h.bf16 %v13570_v34  ;;  %v4487_v23 = vunpack.c.h.bf16 %v13571_v57  ;;  %v11621_v34 = vpop.f32.mrf.mxu2 }
 0x6e2   : >> { %5566 = vmatpush.msra.mxu3 %v3717_v36  ;;  %5652 = vmatpush.msrb.mxu2 %v4207_v4  ;;  %v4178_v36 = vunpack.c.l.bf16 %v11593_v54  ;;  %v11603_v4 = vld [vmem:[%s9882_s1 + $0x458] sm:$0xff]  ;;  %13574 = vst [vmem:[#allocation264_spill] sm:$0xff] %v11621_v34 }
 0x6e3   : >> { %5725 = vmatpush.msra.mxu1 %v4028_v52  ;;  %5567 = vmatmul.f32.vlgmr.msra.gmra.mxu3 %v13569_v55  ;;  %v11606_v52 = vld [vmem:[%s9882_s1 + $0x728] sm:$0xff]  ;;  %v3988_v31 = vunpack.c.l.bf16 %v11603_v4  ;;  %v13581_v34 = vld [vmem:[#allocation206_spill] sm:$0xff] }
 0x6e4   : >> { %5581 = vmatpush.msrb.mxu0 %v4017_v61  ;;  %5653 = vmatpush.msrb.mxu2 %v4197_v60  ;;  %v13573_v60 = vld [vmem:[#allocation271_spill] sm:$0xff] }
 0x6e5   : >> { %5667 = vmatpush.msrb.mxu3 %v4507_v53  ;;  %5726 = vmatpush.msra.mxu1 %v4018_v22  ;;  %v11608_v61 = vpop.f32.mrf.mxu0  ;;  %v3987_v15 = vunpack.c.h.bf16 %v13573_v60  ;;  %v4477_v53 = vunpack.c.h.bf16 %v11282_v1  ;;  %v11614_v22 = vld [vmem:[%s9882_s1 + $0x430] sm:$0xff]  ;;  %v11624_v1 = vpop.f32.mrf.mxu3  ;;  %v11634_v60 = vld [vmem:[%s9882_s1 + $0x6d8] sm:$0xff] }
 0x6e6   : >> { %5582 = vmatpush.msrb.mxu0 %v4007_v43  ;;  %13572 = vst [vmem:[#allocation210_spill] sm:$0xff] %v11608_v61  ;;  %5654 = vmatmul.f32.vlgmr.msrb.gmra.mxu2 %v10379_v26  ;;  %v4168_v43 = vunpack.c.l.bf16 %v11606_v52  ;;  %v3978_v57 = vunpack.c.l.bf16 %v11614_v22  ;;  %v11735_v61 = vld [vmem:[%s9882_s1 + $0x2c8] sm:$0xff] }
 0x6e7   : >> { %5668 = vmatpush.msrb.mxu3 %v4497_v49  ;;  %5727 = vmatpush.msra.mxu1 %v4008_v7  ;;  %v3977_v49 = vunpack.c.h.bf16 %v11286_v16  ;;  %13575 = vst [vmem:[#allocation266_spill] sm:$0xff] %v11624_v1  ;;  %v13576_v7 = vld [vmem:[#allocation212_spill] sm:$0xff]  ;;  %v4158_v16 = vunpack.c.l.bf16 %v11619_v12  ;;  %v11645_v1 = vld [vmem:[%s9882_s1 + $0x6b0] sm:$0xff] }
 0x6e8   : >> { %5754 = vmatpush.msra.mxu2 %v4188_v11  ;;  %5583 = vmatpush.msrb.mxu0 %v3997_v47  ;;  %v13577_v11 = vld [vmem:[#allocation275_spill] sm:$0xff]  ;;  %v4138_v14 = vunpack.c.l.bf16 %v11645_v1 }
 0x6e9   : >> { %5669 = vmatpush.msrb.mxu3 %v4487_v23  ;;  %5728 = vmatpush.msra.mxu1 %v3998_v42  ;;  %v4467_v47 = vunpack.c.h.bf16 %v13577_v11  ;;  %v11631_v23 = vld [vmem:[%s9882_s1 + $0x408] sm:$0xff]  ;;  %v11636_v42 = vpop.f32.mrf.mxu1  ;;  %v11642_v11 = vld [vmem:[%s9882_s1 + $0x3e0] sm:$0xff]  ;;  %v11673_v44 = vpop.f32.mrf.mxu2 }
 0x6ea   : >> { %5755 = vmatpush.msra.mxu2 %v4178_v36  ;;  %5483 = vmatmul.f32.gmra.mxu0 %v13576_v7  ;;  %13578 = vst [vmem:[#allocation268_spill] sm:$0xff] %v11636_v42  ;;  %v13579_v36 = vld [vmem:[#allocation277_spill] sm:$0xff]  ;;  %v3958_v29 = vunpack.c.l.bf16 %v11642_v11  ;;  %v11686_v42 = vld [vmem:[%s9882_s1 + $0x638] sm:$0xff] }
 0x6eb   : >> { %5628 = vmatmul.f32.gmra.mxu1 %v13576_v7  ;;  %5584 = vmatpush.msrb.mxu0 %v3987_v15  ;;  %v3967_v38 = vunpack.c.h.bf16 %v13579_v36  ;;  %v3968_v15 = vunpack.c.l.bf16 %v11631_v23  ;;  %v13582_v36 = vld [vmem:[#allocation279_spill] sm:$0xff]  ;;  %13586 = vst [vmem:[#allocation269_spill] sm:$0xff] %v11673_v44  ;;  %v13592_v44 = vld [vmem:[#allocation288_spill] sm:$0xff] }
 0x6ec   : >> { %5670 = vmatpush.msrb.mxu3 %v4477_v53  ;;  %5729 = vmatpush.msra.mxu1 %v3988_v31  ;;  %v4148_v53 = vunpack.c.l.bf16 %v11634_v60  ;;  %v3957_v31 = vunpack.c.h.bf16 %v13582_v36  ;;  %v3948_v36 = vunpack.c.l.bf16 %v11655_v9  ;;  %v4417_v13 = vunpack.c.h.bf16 %v13592_v44 }
 0x6ed   : >> { %5756 = vmatpush.msra.mxu2 %v4168_v43  ;;  %5570 = vmatmul.f32.gmra.mxu3 %v13581_v34  ;;  %v13583_v43 = vld [vmem:[#allocation280_spill] sm:$0xff] }
 0x6ee   : >> { %5585 = vmatpush.msrb.mxu0 %v3977_v49  ;;  %5671 = vmatpush.msrb.mxu3 %v4467_v47  ;;  %v4447_v62 = vunpack.c.h.bf16 %v13583_v43  ;;  %v11658_v49 = vld [vmem:[%s9882_s1 + $0x688] sm:$0xff] }
 0x6ef   : >> { %5730 = vmatpush.msra.mxu1 %v3978_v57  ;;  %5757 = vmatpush.msra.mxu2 %v4158_v16  ;;  %v11660_v27 = vpop.f32.mrf.mxu0  ;;  %v13585_v47 = vld [vmem:[#allocation281_spill] sm:$0xff]  ;;  %v4128_v43 = vunpack.c.l.bf16 %v11658_v49 }
 0x6f0   : >> { %5586 = vmatpush.msrb.mxu0 %v3967_v38  ;;  %13584 = vst [vmem:[#allocation205_spill] sm:$0xff] %v11660_v27  ;;  %5657 = vmatmul.f32.gmra.mxu2 %v10421_v63  ;;  %v3947_v57 = vunpack.c.h.bf16 %v13585_v47  ;;  %v4437_v38 = vunpack.c.h.bf16 %v11346_v21  ;;  %v11666_v16 = vld [vmem:[%s9882_s1 + $0x390] sm:$0xff]  ;;  %v11676_v21 = vpop.f32.mrf.mxu3  ;;  %v11683_v47 = vld [vmem:[%s9882_s1 + $0x368] sm:$0xff]  ;;  %v13593_v27 = vld [vmem:[#allocation207_spill] sm:$0xff] }
 0x6f1   : >> { %5672 = vmatpush.msrb.mxu3 %v4457_v18  ;;  %5731 = vmatpush.msra.mxu1 %v3968_v15  ;;  %v3937_v18 = vunpack.c.h.bf16 %v11352_v33  ;;  %13587 = vst [vmem:[#allocation270_spill] sm:$0xff] %v11676_v21  ;;  %v13588_v15 = vld [vmem:[#allocation215_spill] sm:$0xff]  ;;  %v4118_v33 = vunpack.c.l.bf16 %v11671_v6  ;;  %v11725_v17 = vpop.f32.mrf.mxu2 }
 0x6f2   : >> { %5758 = vmatpush.msra.mxu2 %v4148_v53  ;;  %5587 = vmatpush.msrb.mxu0 %v3957_v31  ;;  %v3938_v31 = vunpack.c.l.bf16 %v11666_v16  ;;  %13600 = vst [vmem:[#allocation277_spill] sm:$0xff] %v11725_v17  ;;  %v13607_v17 = vld [vmem:[#allocation300_spill] sm:$0xff] }
 0x6f3   : >> { %5673 = vmatpush.msrb.mxu3 %v4447_v62  ;;  %5732 = vmatpush.msra.mxu1 %v3958_v29  ;;  %v13589_v62 = vld [vmem:[#allocation285_spill] sm:$0xff]  ;;  %v11688_v29 = vpop.f32.mrf.mxu1 }
 0x6f4   : >> { %5759 = vmatpush.msra.mxu2 %v4138_v14  ;;  %5486 = vmatmul.f32.gmra.mxu0 %v13588_v15  ;;  %v4427_v53 = vunpack.c.h.bf16 %v13589_v62  ;;  %13590 = vst [vmem:[#allocation271_spill] sm:$0xff] %v11688_v29  ;;  %v13591_v14 = vld [vmem:[#allocation287_spill] sm:$0xff] }
 0x6f5   : >> { %5631 = vmatmul.f32.gmra.mxu1 %v13588_v15  ;;  %5588 = vmatpush.msrb.mxu0 %v3947_v57  ;;  %v3927_v21 = vunpack.c.h.bf16 %v13591_v14  ;;  %v11694_v62 = vld [vmem:[%s9882_s1 + $0x340] sm:$0xff]  ;;  %v3928_v57 = vunpack.c.l.bf16 %v11683_v47  ;;  %v13594_v14 = vld [vmem:[#allocation289_spill] sm:$0xff] }
 0x6f6   : >> { %5674 = vmatpush.msrb.mxu3 %v4437_v38  ;;  %5733 = vmatpush.msra.mxu1 %v3948_v36  ;;  %v4108_v38 = vunpack.c.l.bf16 %v11686_v42  ;;  %v3917_v36 = vunpack.c.h.bf16 %v13594_v14  ;;  %v3918_v44 = vunpack.c.l.bf16 %v11694_v62  ;;  %v11718_v14 = vld [vmem:[%s9882_s1 + $0x2f0] sm:$0xff] }
 0x6f7   : >> { %5760 = vmatpush.msra.mxu2 %v4128_v43  ;;  %5573 = vmatmul.f32.gmra.mxu3 %v13593_v27  ;;  %v13595_v43 = vld [vmem:[#allocation290_spill] sm:$0xff] }
 0x6f8   : >> { %5589 = vmatpush.msrb.mxu0 %v3937_v18  ;;  %5675 = vmatpush.msrb.mxu3 %v4427_v53  ;;  %v4407_v29 = vunpack.c.h.bf16 %v13595_v43  ;;  %v11710_v18 = vld [vmem:[%s9882_s1 + $0x5e8] sm:$0xff]  ;;  %v3908_v43 = vunpack.c.l.bf16 %v11707_v59 }
 0x6f9   : >> { %5734 = vmatpush.msra.mxu1 %v3938_v31  ;;  %5761 = vmatpush.msra.mxu2 %v4118_v33  ;;  %13596 = vst [vmem:[#allocation212_spill] sm:$0xff] %v11710_v18  ;;  %v11712_v40 = vpop.f32.mrf.mxu0  ;;  %v13598_v53 = vld [vmem:[#allocation292_spill] sm:$0xff]  ;;  %v13599_v33 = vld [vmem:[#allocation293_spill] sm:$0xff]  ;;  %v4088_v45 = vunpack.c.l.bf16 %v11710_v18  ;;  %v4377_v18 = vunpack.c.h.bf16 %v13607_v17  ;;  %v4367_v17 = vunpack.c.h.bf16 %v11456_v39 }
 0x6fa   : >> { %5590 = vmatpush.msrb.mxu0 %v3927_v21  ;;  %13597 = vst [vmem:[#allocation275_spill] sm:$0xff] %v11712_v40  ;;  %5660 = vmatmul.f32.gmra.mxu2 %v13483_v41  ;;  %v3907_v31 = vunpack.c.h.bf16 %v13598_v53  ;;  %v4397_v21 = vunpack.c.h.bf16 %v13599_v33  ;;  %v11723_v40 = vld [vmem:[%s9882_s1 + $0x5c0] sm:$0xff]  ;;  %v13603_v53 = vld [vmem:[#allocation217_spill] sm:$0xff]  ;;  %v3898_v33 = vunpack.c.l.bf16 %v11718_v14 }
 0x6fb   : >> { %5676 = vmatpush.msrb.mxu3 %v4417_v13  ;;  %5735 = vmatpush.msra.mxu1 %v3928_v57  ;;  %v13601_v13 = vld [vmem:[#allocation295_spill] sm:$0xff]  ;;  %v11749_v41 = vld [vmem:[%s9882_s1 + $0x570] sm:$0xff] }
 0x6fc   : >> { %5762 = vmatpush.msra.mxu2 %v4108_v38  ;;  %5591 = vmatpush.msrb.mxu0 %v3917_v36  ;;  %v3897_v57 = vunpack.c.h.bf16 %v13601_v13  ;;  %v11728_v38 = vpop.f32.mrf.mxu3  ;;  %v13606_v13 = vld [vmem:[#allocation299_spill] sm:$0xff]  ;;  %13608 = vst [vmem:[#allocation279_spill] sm:$0xff] %v11749_v41 }
 0x6fd   : >> { %5677 = vmatpush.msrb.mxu3 %v4407_v29  ;;  %5736 = vmatpush.msra.mxu1 %v3918_v44  ;;  %13602 = vst [vmem:[#allocation278_spill] sm:$0xff] %v11728_v38  ;;  %v13604_v29 = vld [vmem:[#allocation297_spill] sm:$0xff]  ;;  %v11740_v44 = vpop.f32.mrf.mxu1  ;;  %v3887_v38 = vunpack.c.h.bf16 %v13606_v13 }
 0x6fe   : >> { %5763 = vmatpush.msra.mxu2 %v4098_v30  ;;  %5489 = vmatmul.f32.gmra.mxu0 %v13603_v53  ;;  %v4387_v36 = vunpack.c.h.bf16 %v13604_v29  ;;  %13605 = vst [vmem:[#allocation206_spill] sm:$0xff] %v11740_v44  ;;  %v4078_v30 = vunpack.c.l.bf16 %v11723_v40  ;;  %v11746_v29 = vld [vmem:[%s9882_s1 + $0x2a0] sm:$0xff]  ;;  %v11760_v44 = vld [vmem:[%s9882_s1 + $0x548] sm:$0xff] }
 0x6ff   : >> { %5634 = vmatmul.f32.gmra.mxu1 %v13603_v53  ;;  %5592 = vmatpush.msrb.mxu0 %v3907_v31  ;;  %v3888_v31 = vunpack.c.l.bf16 %v11735_v61  ;;  %v3878_v13 = vunpack.c.l.bf16 %v11746_v29 }
 0x700   : >> { %5678 = vmatpush.msrb.mxu3 %v4397_v21  ;;  %5737 = vmatpush.msra.mxu1 %v3908_v43  ;;  %v4068_v21 = vunpack.c.l.bf16 %v11738_v28  ;;  %v3877_v43 = vunpack.c.h.bf16 %v11451_v48  ;;  %v3384_v48 = vld [vmem:[%s9882_s1 + $0x250] sm:$0xff] }
 0x701   : >> { %5764 = vmatpush.msra.mxu2 %v4088_v45  ;;  %5576 = vmatmul.f32.gmra.mxu3 %v10225_v51  ;;  %v3389_v45 = vld [vmem:[%s9882_s1 + $0x278] sm:$0xff] }
 0x702   : >> { %5593 = vmatpush.msrb.mxu0 %v3897_v57  ;;  %5679 = vmatpush.msrb.mxu3 %v4387_v36  ;;  %v4058_v57 = vunpack.c.l.bf16 %v11749_v41  ;;  %v3868_v39 = vunpack.c.l.bf16 %v3389_v45  ;;  %v4357_v36 = vunpack.c.h.bf16 %v11464_v50  ;;  %v3869_v41 = vunpack.c.h.bf16 %v3389_v45 }
 0x703   : >> { %5738 = vmatpush.msra.mxu1 %v3898_v33  ;;  %5765 = vmatpush.msra.mxu2 %v4078_v30  ;;  %v11762_v51 = vpop.f32.mrf.mxu0  ;;  %v11771_v33 = vld [vmem:[%s9882_s1 + $0x9f8] sm:$0xff]  ;;  %v4048_v30 = vunpack.c.l.bf16 %v11760_v44  ;;  %v3859_v45 = vunpack.c.h.bf16 %v3384_v48 }
 0x704   : >> { %5594 = vmatpush.msrb.mxu0 %v3887_v38  ;;  %13609 = vst [vmem:[#allocation280_spill] sm:$0xff] %v11762_v51  ;;  %5663 = vmatmul.f32.gmra.mxu2 %v13555_v32  ;;  %v11768_v38 = vld [vmem:[%s9882_s1 + $0x520] sm:$0xff]  ;;  %v3379_v51 = vld [vmem:[%s9882_s1 + $0x228] sm:$0xff]  ;;  %v11775_v32 = vpop.f32.mrf.mxu2  ;;  %v11780_v50 = vpop.f32.mrf.mxu3 }
 0x705   : >> { %5680 = vmatpush.msrb.mxu3 %v4377_v18  ;;  %5739 = vmatpush.msra.mxu1 %v3888_v31  ;;  %13610 = vst [vmem:[#allocation281_spill] sm:$0xff] %v11768_v38  ;;  %v3858_v18 = vunpack.c.l.bf16 %v3384_v48  ;;  %v11778_v31 = vld [vmem:[%s9882_s1 + $0x9d0] sm:$0xff] }
 0x706   : >> { %5766 = vmatpush.msra.mxu2 %v4068_v21  ;;  %13611 = vst [vmem:[#allocation215_spill] sm:$0xff] %v11771_v33  ;;  %5595 = vmatpush.msrb.mxu0 %v3877_v43  ;;  %v4038_v21 = vunpack.c.l.bf16 %v11768_v38  ;;  %v4348_v43 = vunpack.c.l.bf16 %v11771_v33  ;;  %v3849_v38 = vunpack.c.h.bf16 %v3379_v51  ;;  %v11798_v33 = vld [vmem:[%s9882_s1 + $0x980] sm:$0xff] }
 0x707   : >> { %5681 = vmatpush.msrb.mxu3 %v4367_v17  ;;  %13612 = vst [vmem:[#allocation285_spill] sm:$0xff] %v11775_v32  ;;  %5740 = vmatpush.msra.mxu1 %v3878_v13  ;;  %v11786_v17 = vpop.f32.mrf.mxu1  ;;  %v3848_v13 = vunpack.c.l.bf16 %v3379_v51  ;;  %v11790_v32 = vld [vmem:[%s9882_s1 + $0x9a8] sm:$0xff]  ;;  %v3364_v51 = vld [vmem:[%s9882_s1 + $0x1b0] sm:$0xff] }
 0x708   : >> { %5767 = vmatpush.msra.mxu2 %v4058_v57  ;;  %13613 = vst [vmem:[#allocation287_spill] sm:$0xff] %v11780_v50  ;;  %5596 = vmatmul.f32.vlgmr.msrb.gmra.mxu0 %v10159_v2  ;;  %v3374_v57 = vld [vmem:[%s9882_s1 + $0x200] sm:$0xff]  ;;  %v4338_v50 = vunpack.c.l.bf16 %v11778_v31  ;;  %v4328_v48 = vunpack.c.l.bf16 %v11790_v32 }
 0x709   : >> { %5741 = vmatmul.f32.vlgmr.msra.gmra.mxu1 %v10159_v2  ;;  %13614 = vst [vmem:[#allocation288_spill] sm:$0xff] %v11786_v17  ;;  %5696 = vmatpush.msra.mxu0 %v3868_v39  ;;  %v4029_v17 = vunpack.c.h.bf16 %v11557_v58  ;;  %v3838_v39 = vunpack.c.l.bf16 %v3374_v57 }
 0x70a   : >> { %5682 = vmatpush.msrb.mxu3 %v4357_v36  ;;  %5768 = vmatpush.msra.mxu2 %v4048_v30  ;;  %v3369_v36 = vld [vmem:[%s9882_s1 + $0x1d8] sm:$0xff]  ;;  %v4019_v30 = vunpack.c.h.bf16 %v11567_v35  ;;  %v3359_v35 = vld [vmem:[%s9882_s1 + $0x188] sm:$0xff] }
 0x70b   : >> { %5841 = vmatpush.msrb.mxu1 %v3869_v41  ;;  %5683 = vmatmul.f32.vlgmr.msrb.gmra.mxu3 %v10559_v24  ;;  %v3839_v41 = vunpack.c.h.bf16 %v3374_v57  ;;  %v3828_v58 = vunpack.c.l.bf16 %v3369_v36 }
 0x70c   : >> { %5697 = vmatpush.msra.mxu0 %v3858_v18  ;;  %5769 = vmatpush.msra.mxu2 %v4038_v21  ;;  %v4318_v21 = vunpack.c.l.bf16 %v11798_v33  ;;  %v11811_v57 = vpop.f32.mrf.mxu2 }
 0x70d   : >> { %5783 = vmatpush.msra.mxu3 %v4348_v43  ;;  %5842 = vmatpush.msrb.mxu1 %v3859_v45  ;;  %v11801_v18 = vpop.f32.mrf.mxu0  ;;  %v11807_v43 = vld [vmem:[%s9882_s1 + $0x958] sm:$0xff]  ;;  %v3829_v45 = vunpack.c.h.bf16 %v3369_v36  ;;  %13616 = vst [vmem:[#allocation289_spill] sm:$0xff] %v11811_v57  ;;  %v3999_v36 = vunpack.c.h.bf16 %v11590_v0  ;;  %v11826_v57 = vld [vmem:[%s9882_s1 + $0x908] sm:$0xff] }
 0x70e   : >> { %5698 = vmatpush.msra.mxu0 %v3848_v13  ;;  %13615 = vst [vmem:[#allocation207_spill] sm:$0xff] %v11801_v18  ;;  %5770 = vmatmul.f32.vlgmr.msra.gmra.mxu2 %v13564_v46  ;;  %v4009_v13 = vunpack.c.h.bf16 %v11579_v20  ;;  %v4288_v0 = vunpack.c.l.bf16 %v11826_v57  ;;  %v11834_v18 = vld [vmem:[%s9882_s1 + $0x8e0] sm:$0xff] }
 0x70f   : >> { %5784 = vmatpush.msra.mxu3 %v4338_v50  ;;  %5843 = vmatpush.msrb.mxu1 %v3849_v38  ;;  %v3818_v50 = vunpack.c.l.bf16 %v3364_v51  ;;  %v11814_v38 = vld [vmem:[%s9882_s1 + $0x930] sm:$0xff]  ;;  %v11821_v20 = vpop.f32.mrf.mxu1 }
 0x710   : >> { %5870 = vmatpush.msrb.mxu2 %v4029_v17  ;;  %5699 = vmatpush.msra.mxu0 %v3838_v39  ;;  %v11816_v17 = vpop.f32.mrf.mxu3  ;;  %v4308_v39 = vunpack.c.l.bf16 %v11807_v43  ;;  %13618 = vst [vmem:[#allocation292_spill] sm:$0xff] %v11821_v20  ;;  %v3349_v20 = vld [vmem:[%s9882_s1 + $0x138] sm:$0xff] }
 0x711   : >> { %5785 = vmatpush.msra.mxu3 %v4328_v48  ;;  %5844 = vmatpush.msrb.mxu1 %v3839_v41  ;;  %13617 = vst [vmem:[#allocation290_spill] sm:$0xff] %v11816_v17  ;;  %v3819_v48 = vunpack.c.h.bf16 %v3364_v51  ;;  %v3808_v41 = vunpack.c.l.bf16 %v3359_v35  ;;  %v4298_v17 = vunpack.c.l.bf16 %v11814_v38  ;;  %v3809_v51 = vunpack.c.h.bf16 %v3359_v35 }
 0x712   : >> { %5871 = vmatpush.msrb.mxu2 %v4019_v30  ;;  %5599 = vmatmul.f32.gmra.mxu0 %v10191_v10  ;;  %v3354_v30 = vld [vmem:[%s9882_s1 + $0x160] sm:$0xff]  ;;  %v3788_v35 = vunpack.c.l.bf16 %v3349_v20 }
 0x713   : >> { %5744 = vmatmul.f32.gmra.mxu1 %v10191_v10  ;;  %5700 = vmatpush.msra.mxu0 %v3828_v58  ;;  %v3989_v58 = vunpack.c.h.bf16 %v11603_v4  ;;  %v3344_v4 = vld [vmem:[%s9882_s1 + $0x110] sm:$0xff] }
 0x714   : >> { %5786 = vmatpush.msra.mxu3 %v4318_v21  ;;  %5845 = vmatpush.msrb.mxu1 %v3829_v45  ;;  %v3798_v21 = vunpack.c.l.bf16 %v3354_v30  ;;  %v3799_v45 = vunpack.c.h.bf16 %v3354_v30  ;;  %v11847_v30 = vpop.f32.mrf.mxu2 }
 0x715   : >> { %5872 = vmatpush.msrb.mxu2 %v4009_v13  ;;  %5686 = vmatmul.f32.gmra.mxu3 %v10605_v37  ;;  %v3979_v13 = vunpack.c.h.bf16 %v11614_v22  ;;  %v3339_v22 = vld [vmem:[%s9882_s1 + $0xe8] sm:$0xff]  ;;  %13620 = vst [vmem:[#allocation295_spill] sm:$0xff] %v11847_v30 }
 0x716   : >> { %5701 = vmatpush.msra.mxu0 %v3818_v50  ;;  %5787 = vmatpush.msra.mxu3 %v4308_v39  ;;  %v4278_v39 = vunpack.c.l.bf16 %v11834_v18  ;;  %v11862_v30 = vld [vmem:[%s9882_s1 + $0x868] sm:$0xff] }
 0x717   : >> { %5846 = vmatpush.msrb.mxu1 %v3819_v48  ;;  %5873 = vmatpush.msrb.mxu2 %v3999_v36  ;;  %v11837_v50 = vpop.f32.mrf.mxu0  ;;  %v11843_v48 = vld [vmem:[%s9882_s1 + $0x8b8] sm:$0xff]  ;;  %v3789_v36 = vunpack.c.h.bf16 %v3349_v20 }
 0x718   : >> { %5702 = vmatpush.msra.mxu0 %v3808_v41  ;;  %13619 = vst [vmem:[#allocation293_spill] sm:$0xff] %v11837_v50  ;;  %5773 = vmatmul.f32.gmra.mxu2 %v13576_v7  ;;  %v3969_v41 = vunpack.c.h.bf16 %v11631_v23  ;;  %v4268_v20 = vunpack.c.l.bf16 %v11843_v48  ;;  %v11857_v23 = vpop.f32.mrf.mxu1  ;;  %v11870_v50 = vld [vmem:[%s9882_s1 + $0x840] sm:$0xff] }
 0x719   : >> { %5788 = vmatpush.msra.mxu3 %v4298_v17  ;;  %5847 = vmatpush.msrb.mxu1 %v3809_v51  ;;  %v3778_v17 = vunpack.c.l.bf16 %v3344_v4  ;;  %v11850_v51 = vld [vmem:[%s9882_s1 + $0x890] sm:$0xff]  ;;  %13622 = vst [vmem:[#allocation297_spill] sm:$0xff] %v11857_v23  ;;  %v3329_v23 = vld [vmem:[%s9882_s1 + $0x98] sm:$0xff] }
 0x71a   : >> { %5874 = vmatpush.msrb.mxu2 %v3989_v58  ;;  %5703 = vmatpush.msra.mxu0 %v3798_v21  ;;  %v11852_v58 = vpop.f32.mrf.mxu3  ;;  %v3779_v21 = vunpack.c.h.bf16 %v3344_v4  ;;  %v3769_v4 = vunpack.c.h.bf16 %v3339_v22 }
 0x71b   : >> { %5789 = vmatpush.msra.mxu3 %v4288_v0  ;;  %5848 = vmatpush.msrb.mxu1 %v3799_v45  ;;  %13621 = vst [vmem:[#allocation217_spill] sm:$0xff] %v11852_v58  ;;  %v3959_v0 = vunpack.c.h.bf16 %v11642_v11  ;;  %v3768_v45 = vunpack.c.l.bf16 %v3339_v22  ;;  %v4258_v58 = vunpack.c.l.bf16 %v11850_v51  ;;  %v4248_v11 = vunpack.c.l.bf16 %v11862_v30 }
 0x71c   : >> { %5875 = vmatpush.msrb.mxu2 %v3979_v13  ;;  %5602 = vmatmul.f32.gmra.mxu0 %v10222_v25  ;;  %v3334_v13 = vld [vmem:[%s9882_s1 + $0xc0] sm:$0xff]  ;;  %v3748_v22 = vunpack.c.l.bf16 %v3329_v23 }
 0x71d   : >> { %5747 = vmatmul.f32.gmra.mxu1 %v10222_v25  ;;  %5704 = vmatpush.msra.mxu0 %v3788_v35  ;;  %v3949_v35 = vunpack.c.h.bf16 %v11655_v9  ;;  %v3324_v9 = vld [vmem:[%s9882_s1 + $0x70] sm:$0xff] }
 0x71e   : >> { %5790 = vmatpush.msra.mxu3 %v4278_v39  ;;  %5849 = vmatpush.msrb.mxu1 %v3789_v36  ;;  %v3758_v39 = vunpack.c.l.bf16 %v3334_v13  ;;  %v3759_v36 = vunpack.c.h.bf16 %v3334_v13  ;;  %v11883_v13 = vpop.f32.mrf.mxu2 }
 0x71f   : >> { %5876 = vmatpush.msrb.mxu2 %v3969_v41  ;;  %5689 = vmatmul.f32.gmra.mxu3 %v10646_v8  ;;  %v3939_v41 = vunpack.c.h.bf16 %v11666_v16  ;;  %v3319_v16 = vld [vmem:[%s9882_s1 + $0x48] sm:$0xff]  ;;  %13624 = vst [vmem:[#allocation300_spill] sm:$0xff] %v11883_v13 }
 0x720   : >> { %5705 = vmatpush.msra.mxu0 %v3778_v17  ;;  %5791 = vmatpush.msra.mxu3 %v4268_v20  ;;  %v4238_v20 = vunpack.c.l.bf16 %v11870_v50  ;;  %v11898_v13 = vld [vmem:[%s9882_s1 + $0x7c8] sm:$0xff] }
 0x721   : >> { %5850 = vmatpush.msrb.mxu1 %v3779_v21  ;;  %5877 = vmatpush.msrb.mxu2 %v3959_v0  ;;  %v11873_v17 = vpop.f32.mrf.mxu0  ;;  %v11879_v21 = vld [vmem:[%s9882_s1 + $0x818] sm:$0xff]  ;;  %v3749_v0 = vunpack.c.h.bf16 %v3329_v23 }
 0x722   : >> { %5706 = vmatpush.msra.mxu0 %v3768_v45  ;;  %13623 = vst [vmem:[#allocation299_spill] sm:$0xff] %v11873_v17  ;;  %5776 = vmatmul.f32.gmra.mxu2 %v13588_v15  ;;  %v3929_v45 = vunpack.c.h.bf16 %v11683_v47  ;;  %v4228_v23 = vunpack.c.l.bf16 %v11879_v21  ;;  %v11893_v47 = vpop.f32.mrf.mxu1  ;;  %v11906_v17 = vld [vmem:[%s9882_s1 + $0x7a0] sm:$0xff] }
 0x723   : >> { %5792 = vmatpush.msra.mxu3 %v4258_v58  ;;  %5851 = vmatpush.msrb.mxu1 %v3769_v4  ;;  %v3738_v58 = vunpack.c.l.bf16 %v3324_v9  ;;  %v11886_v4 = vld [vmem:[%s9882_s1 + $0x7f0] sm:$0xff]  ;;  %13626 = vst [vmem:[#allocation317_spill] sm:$0xff] %v11893_v47  ;;  %v3709_v47 = vld [vmem:[%s9882_s1 + $0xc78] sm:$0xff] }
 0x724   : >> { %5878 = vmatpush.msrb.mxu2 %v3949_v35  ;;  %5707 = vmatpush.msra.mxu0 %v3758_v39  ;;  %v11888_v35 = vpop.f32.mrf.mxu3  ;;  %v3739_v39 = vunpack.c.h.bf16 %v3324_v9  ;;  %v3729_v9 = vunpack.c.h.bf16 %v3319_v16 }
 0x725   : >> { %5793 = vmatpush.msra.mxu3 %v4248_v11  ;;  %5852 = vmatpush.msrb.mxu1 %v3759_v36  ;;  %13625 = vst [vmem:[#allocation316_spill] sm:$0xff] %v11888_v35  ;;  %v3919_v11 = vunpack.c.h.bf16 %v11694_v62  ;;  %v3728_v36 = vunpack.c.l.bf16 %v3319_v16  ;;  %v4218_v35 = vunpack.c.l.bf16 %v11886_v4  ;;  %v4208_v62 = vunpack.c.l.bf16 %v11898_v13 }
 0x726   : >> { %5879 = vmatpush.msrb.mxu2 %v3939_v41  ;;  %5605 = vmatmul.f32.gmra.mxu0 %v13557_v5  ;;  %v3314_v41 = vld [vmem:[%s9882_s1 + $0x20] sm:$0xff]  ;;  %v4508_v16 = vunpack.c.l.bf16 %v3709_v47 }
 0x727   : >> { %5750 = vmatmul.f32.gmra.mxu1 %v13557_v5  ;;  %5708 = vmatpush.msra.mxu0 %v3748_v22  ;;  %v3909_v22 = vunpack.c.h.bf16 %v11707_v59  ;;  %v3704_v59 = vld [vmem:[%s9882_s1 + $0xc50] sm:$0xff] }
 0x728   : >> { %5794 = vmatpush.msra.mxu3 %v4238_v20  ;;  %5853 = vmatpush.msrb.mxu1 %v3749_v0  ;;  %v3718_v20 = vunpack.c.l.bf16 %v3314_v41  ;;  %v3719_v0 = vunpack.c.h.bf16 %v3314_v41 }
 0x729   : >> { %5880 = vmatpush.msrb.mxu2 %v3929_v45  ;;  %5692 = vmatmul.f32.gmra.mxu3 %v10665_v56  ;;  %v3899_v45 = vunpack.c.h.bf16 %v11718_v14  ;;  %v4498_v14 = vunpack.c.l.bf16 %v3704_v59 }
 0x72a   : >> { %5709 = vmatpush.msra.mxu0 %v3738_v58  ;;  %5795 = vmatpush.msra.mxu3 %v4228_v23  ;;  %v4198_v58 = vunpack.c.l.bf16 %v11906_v17  ;;  %v3889_v23 = vunpack.c.h.bf16 %v11735_v61  ;;  %v4499_v61 = vunpack.c.h.bf16 %v3704_v59 }
 0x72b   : >> { %5854 = vmatpush.msrb.mxu1 %v3739_v39  ;;  %5881 = vmatpush.msrb.mxu2 %v3919_v11  ;;  %v11909_v56 = vpop.f32.mrf.mxu0  ;;  %v4509_v39 = vunpack.c.h.bf16 %v3709_v47  ;;  %v3699_v11 = vld [vmem:[%s9882_s1 + $0xc28] sm:$0xff] }
 0x72c   : >> { %5710 = vmatpush.msra.mxu0 %v3728_v36  ;;  %5779 = vmatmul.f32.gmra.mxu2 %v13603_v53  ;;  %v11916_v36 = vpop.f32.mrf.mxu2  ;;  %v11918_v41 = vpop.f32.mrf.mxu3  ;;  %v4488_v47 = vunpack.c.l.bf16 %v3699_v11 }
 0x72d   : >> { %5796 = vmatpush.msra.mxu3 %v4218_v35  ;;  %5855 = vmatpush.msrb.mxu1 %v3729_v9  ;;  %v3879_v35 = vunpack.c.h.bf16 %v11746_v29  ;;  %v4189_v9 = vunpack.c.h.bf16 %v11582_v3  ;;  %v4169_v29 = vunpack.c.h.bf16 %v11606_v52 }
 0x72e   : >> { %5882 = vmatpush.msrb.mxu2 %v3909_v22  ;;  %5711 = vmatpush.msra.mxu0 %v3718_v20  ;;  %v11924_v22 = vpop.f32.mrf.mxu1  ;;  %v3694_v20 = vld [vmem:[%s9882_s1 + $0xc00] sm:$0xff] }
 0x72f   : >> { %5797 = vmatpush.msra.mxu3 %v4208_v62  ;;  %5856 = vmatpush.msrb.mxu1 %v3719_v0  ;;  %v4179_v62 = vunpack.c.h.bf16 %v11593_v54  ;;  %v4478_v3 = vunpack.c.l.bf16 %v3694_v20  ;;  %v3689_v0 = vld [vmem:[%s9882_s1 + $0xbd8] sm:$0xff]  ;;  %v3684_v54 = vld [vmem:[%s9882_s1 + $0xbb0] sm:$0xff] }
 0x730   : >> { %5883 = vmatpush.msrb.mxu2 %v3899_v45  ;;  %5712 = vmatmul.f32.vlgmr.msra.gmra.mxu0 %v13569_v55  ;;  %v4479_v45 = vunpack.c.h.bf16 %v3694_v20  ;;  %v4469_v52 = vunpack.c.h.bf16 %v3689_v0  ;;  %v3674_v20 = vld [vmem:[%s9882_s1 + $0xb60] sm:$0xff] }
 0x731   : >> { %5857 = vmatmul.f32.vlgmr.msrb.gmra.mxu1 %v13569_v55  ;;  %5812 = vmatpush.msrb.mxu0 %v4508_v16  ;;  %v4489_v55 = vunpack.c.h.bf16 %v3699_v11  ;;  %v13627_v16 = vld [vmem:[#allocation52_spill] sm:$0xff] }
 0x732   : >> { %5798 = vmatpush.msra.mxu3 %v4198_v58  ;;  %5884 = vmatpush.msrb.mxu2 %v3889_v23  ;;  %v4468_v58 = vunpack.c.l.bf16 %v3689_v0  ;;  %v4159_v23 = vunpack.c.h.bf16 %v11619_v12  ;;  %v4459_v12 = vunpack.c.h.bf16 %v3684_v54  ;;  %v13630_v0 = vld [vmem:[#allocation49_spill] sm:$0xff] }
 0x733   : >> { %5957 = vmatpush.msra.mxu1 %v4509_v39  ;;  %5799 = vmatmul.f32.vlgmr.msra.gmra.mxu3 %v10379_v26  ;;  %v3679_v39 = vld [vmem:[%s9882_s1 + $0xb88] sm:$0xff] }
 0x734   : >> { %5813 = vmatpush.msrb.mxu0 %v4498_v14  ;;  %5885 = vmatpush.msrb.mxu2 %v3879_v35  ;;  %v11938_v11 = vpop.f32.mrf.mxu2  ;;  %v13628_v14 = vld [vmem:[#allocation51_spill] sm:$0xff]  ;;  %v4458_v35 = vunpack.c.l.bf16 %v3684_v54 }
 0x735   : >> { %5899 = vmatpush.msrb.mxu3 %v4189_v9  ;;  %5958 = vmatpush.msra.mxu1 %v4499_v61  ;;  %v11931_v59 = vpop.f32.mrf.mxu0  ;;  %v4149_v9 = vunpack.c.h.bf16 %v11634_v60  ;;  %v4438_v60 = vunpack.c.l.bf16 %v3674_v20 }
 0x736   : >> { %5814 = vmatpush.msrb.mxu0 %v4488_v47  ;;  %5886 = vmatmul.f32.vlgmr.msrb.gmra.mxu2 %v10159_v2  ;;  %v11941_v2 = vpop.f32.mrf.mxu3  ;;  %v11946_v61 = vpop.f32.mrf.mxu1  ;;  %v4448_v47 = vunpack.c.l.bf16 %v3679_v39 }
 0x737   : >> { %5900 = vmatpush.msrb.mxu3 %v4179_v62  ;;  %5959 = vmatpush.msra.mxu1 %v4489_v55  ;;  %v13629_v62 = vld [vmem:[#allocation50_spill] sm:$0xff]  ;;  %v4139_v55 = vunpack.c.h.bf16 %v11645_v1 }
 0x738   : >> { %5986 = vmatpush.msra.mxu2 %v13627_v16  ;;  %5815 = vmatpush.msrb.mxu0 %v4478_v3  ;;  %v4129_v3 = vunpack.c.h.bf16 %v11658_v49  ;;  %v3664_v1 = vld [vmem:[%s9882_s1 + $0xb10] sm:$0xff]  ;;  %v13631_v16 = vld [vmem:[#allocation48_spill] sm:$0xff] }
 0x739   : >> { %5901 = vmatpush.msrb.mxu3 %v4169_v29  ;;  %5960 = vmatpush.msra.mxu1 %v4479_v45  ;;  %v3669_v29 = vld [vmem:[%s9882_s1 + $0xb38] sm:$0xff]  ;;  %v4439_v45 = vunpack.c.h.bf16 %v3674_v20  ;;  %v3654_v20 = vld [vmem:[%s9882_s1 + $0xac0] sm:$0xff] }
 0x73a   : >> { %5987 = vmatpush.msra.mxu2 %v13628_v14  ;;  %5715 = vmatmul.f32.gmra.mxu0 %v13581_v34  ;;  %v4429_v49 = vunpack.c.h.bf16 %v3669_v29  ;;  %v13632_v14 = vld [vmem:[#allocation47_spill] sm:$0xff] }
 0x73b   : >> { %5860 = vmatmul.f32.gmra.mxu1 %v13581_v34  ;;  %5816 = vmatpush.msrb.mxu0 %v4468_v58  ;;  %v4449_v34 = vunpack.c.h.bf16 %v3679_v39  ;;  %v4428_v58 = vunpack.c.l.bf16 %v3669_v29  ;;  %v3649_v29 = vld [vmem:[%s9882_s1 + $0xa98] sm:$0xff] }
 0x73c   : >> { %5902 = vmatpush.msrb.mxu3 %v4159_v23  ;;  %5961 = vmatpush.msra.mxu1 %v4469_v52  ;;  %v4119_v23 = vunpack.c.h.bf16 %v11671_v6  ;;  %v3659_v52 = vld [vmem:[%s9882_s1 + $0xae8] sm:$0xff]  ;;  %v11962_v39 = vpop.f32.mrf.mxu2  ;;  %v4109_v6 = vunpack.c.h.bf16 %v11686_v42  ;;  %v4398_v42 = vunpack.c.l.bf16 %v3654_v20 }
 0x73d   : >> { %5988 = vmatpush.msra.mxu2 %v13629_v62  ;;  %5802 = vmatmul.f32.gmra.mxu3 %v10421_v63  ;;  %v13634_v62 = vld [vmem:[#allocation46_spill] sm:$0xff] }
 0x73e   : >> { %5817 = vmatpush.msrb.mxu0 %v4458_v35  ;;  %5903 = vmatpush.msrb.mxu3 %v4149_v9  ;;  %v11965_v35 = vpop.f32.mrf.mxu3  ;;  %v4419_v9 = vunpack.c.h.bf16 %v3664_v1 }
 0x73f   : >> { %5962 = vmatpush.msra.mxu1 %v4459_v12  ;;  %5989 = vmatpush.msra.mxu2 %v13630_v0  ;;  %v11955_v54 = vpop.f32.mrf.mxu0  ;;  %v11970_v12 = vpop.f32.mrf.mxu1  ;;  %v13637_v0 = vld [vmem:[#allocation45_spill] sm:$0xff] }
 0x740   : >> { %5818 = vmatpush.msrb.mxu0 %v4448_v47  ;;  %5889 = vmatmul.f32.gmra.mxu2 %v10191_v10  ;;  %v4418_v10 = vunpack.c.l.bf16 %v3664_v1  ;;  %v4408_v47 = vunpack.c.l.bf16 %v3659_v52 }
 0x741   : >> { %5904 = vmatpush.msrb.mxu3 %v4139_v55  ;;  %5963 = vmatpush.msra.mxu1 %v4449_v34  ;;  %v4099_v55 = vunpack.c.h.bf16 %v11697_v19  ;;  %v13635_v34 = vld [vmem:[#allocation228_spill] sm:$0xff]  ;;  %v3644_v19 = vld [vmem:[%s9882_s1 + $0xa70] sm:$0xff] }
 0x742   : >> { %5990 = vmatpush.msra.mxu2 %v13631_v16  ;;  %5819 = vmatpush.msrb.mxu0 %v4438_v60  ;;  %v13636_v60 = vld [vmem:[#allocation212_spill] sm:$0xff] }
 0x743   : >> { %5905 = vmatpush.msrb.mxu3 %v4129_v3  ;;  %5964 = vmatpush.msra.mxu1 %v4439_v45  ;;  %v4089_v3 = vunpack.c.h.bf16 %v13636_v60  ;;  %v4399_v45 = vunpack.c.h.bf16 %v3654_v20  ;;  %v13638_v16 = vld [vmem:[#allocation44_spill] sm:$0xff]  ;;  %v4379_v20 = vunpack.c.h.bf16 %v3644_v19  ;;  %v13641_v60 = vld [vmem:[#allocation42_spill] sm:$0xff] }
 0x744   : >> { %5991 = vmatpush.msra.mxu2 %v13632_v14  ;;  %5718 = vmatmul.f32.gmra.mxu0 %v13593_v27  ;;  %v11991_v14 = vld [vmem:[%s11983_s26] sm:$0xff] }
 0x745   : >> { %5863 = vmatmul.f32.gmra.mxu1 %v13593_v27  ;;  %5820 = vmatpush.msrb.mxu0 %v4428_v58  ;;  %v4409_v27 = vunpack.c.h.bf16 %v3659_v52  ;;  %v4388_v58 = vunpack.c.l.bf16 %v3649_v29  ;;  %v3639_v52 = vld [vmem:[%s9882_s1 + $0xa48] sm:$0xff] }
 0x746   : >> { %5906 = vmatpush.msrb.mxu3 %v4119_v23  ;;  %5965 = vmatpush.msra.mxu1 %v4429_v49  ;;  %v4079_v23 = vunpack.c.h.bf16 %v11723_v40  ;;  %v4389_v49 = vunpack.c.h.bf16 %v3649_v29  ;;  %v4069_v40 = vunpack.c.h.bf16 %v11738_v28 }
 0x747   : >> { %5992 = vmatpush.msra.mxu2 %v13634_v62  ;;  %5805 = vmatmul.f32.gmra.mxu3 %v13635_v34  ;;  %v12001_v62 = vpop.f32.mrf.mxu1 }
 0x748   : >> { %5821 = vmatpush.msrb.mxu0 %v4418_v10  ;;  %5907 = vmatpush.msrb.mxu3 %v4109_v6  ;;  %v11993_v10 = vpop.f32.mrf.mxu2  ;;  %v13639_v6 = vld [vmem:[#allocation43_spill] sm:$0xff] }
 0x749   : >> { %5966 = vmatpush.msra.mxu1 %v4419_v9  ;;  %5993 = vmatpush.msra.mxu2 %v13637_v0  ;;  %v11980_v1 = vpop.f32.mrf.mxu0  ;;  %v11996_v9 = vpop.f32.mrf.mxu3  ;;  %v13643_v0 = vld [vmem:[#allocation237_spill] sm:$0xff] }
 0x74a   : >> { %5822 = vmatpush.msrb.mxu0 %v4408_v47  ;;  %5892 = vmatmul.f32.gmra.mxu2 %v10222_v25  ;;  %v4378_v25 = vunpack.c.l.bf16 %v3644_v19  ;;  %v13640_v47 = vld [vmem:[#allocation208_spill] sm:$0xff]  ;;  %v4049_v19 = vunpack.c.h.bf16 %v11760_v44  ;;  %v13649_v44 = vld [vmem:[#allocation213_spill] sm:$0xff] }
 0x74b   : >> { %5908 = vmatpush.msrb.mxu3 %v4099_v55  ;;  %5967 = vmatpush.msra.mxu1 %v4409_v27  ;;  %v4368_v55 = vunpack.c.l.bf16 %v3639_v52  ;;  %v3634_v27 = vld [vmem:[%s9882_s1 + $0xa20] sm:$0xff]  ;;  %s6277_s1 = scalar_lea.vmem [#allocation4], %s7573_s28  ;;  %s13922_s28 = sld [smem:[#allocation28_spill]] (%p2088_p2) }
 0x74c   : >> { %5994 = vmatpush.msra.mxu2 %v13638_v16  ;;  %5823 = vmatpush.msrb.mxu0 %v4398_v42  ;;  %v12005_v42 = vperm.slane %v11991_v14, 0  ;;  %v4358_v28 = vunpack.c.l.bf16 %v3634_v27  ;;  %v13644_v16 = vld [vmem:[#allocation41_spill] sm:$0xff] }
 0x74d   : >> { %5909 = vmatpush.msrb.mxu3 %v4089_v3  ;;  %5968 = vmatpush.msra.mxu1 %v4399_v45  ;;  %v13642_v3 = vld [vmem:[#allocation279_spill] sm:$0xff]  ;;  %v4369_v45 = vunpack.c.h.bf16 %v3639_v52 }
 0x74e   : >> { %5995 = vmatpush.msra.mxu2 %v13639_v6  ;;  %5721 = vmatmul.f32.gmra.mxu0 %v13640_v47  ;;  %v4059_v29 = vunpack.c.h.bf16 %v13642_v3  ;;  %v13647_v52 = vld [vmem:[#allocation215_spill] sm:$0xff]  ;;  %v4339_v3 = vunpack.c.h.bf16 %v11778_v31  ;;  %v13655_v31 = vld [vmem:[#allocation242_spill] sm:$0xff] }
 0x74f   : >> { %5866 = vmatmul.f32.gmra.mxu1 %v13640_v47  ;;  %5824 = vmatpush.msrb.mxu0 %v4388_v58  ;;  %v4359_v58 = vunpack.c.h.bf16 %v3634_v27  ;;  %v4349_v47 = vunpack.c.h.bf16 %v13647_v52  ;;  %v13650_v27 = vld [vmem:[#allocation39_spill] sm:$0xff]  ;;  %v13656_v52 = vld [vmem:[#allocation37_spill] sm:$0xff] }
 0x750   : >> { %5910 = vmatpush.msrb.mxu3 %v4079_v23  ;;  %5969 = vmatpush.msra.mxu1 %v4389_v49  ;;  %v13645_v49 = vld [vmem:[#allocation219_spill] sm:$0xff] }
 0x751   : >> { %5996 = vmatpush.msra.mxu2 %v13641_v60  ;;  %5808 = vmatmul.f32.gmra.mxu3 %v13643_v0  ;;  %v4554_v6 = vadd.f32 %v13645_v49, %v12005_v42  ;;  %v13653_v49 = vld [vmem:[#allocation38_spill] sm:$0xff] }
 0x752   : >> { %5825 = vmatpush.msrb.mxu0 %v4378_v25  ;;  %5911 = vmatpush.msrb.mxu3 %v4069_v40  ;;  %v13646_v25 = vld [vmem:[#allocation40_spill] sm:$0xff]  ;;  %v13648_v40 = vld [vmem:[#allocation281_spill] sm:$0xff] }
 0x753   : >> { %5970 = vmatpush.msra.mxu1 %v4379_v20  ;;  %5997 = vmatpush.msra.mxu2 %v13644_v16  ;;  %v12012_v23 = vpop.f32.mrf.mxu0  ;;  %v4039_v20 = vunpack.c.h.bf16 %v13648_v40  ;;  %v4583_v60 = vadd.f32 %v13649_v44, %v4554_v6  ;;  %v12030_v16 = vpop.f32.mrf.mxu1  ;;  %v13654_v6 = vld [vmem:[#allocation102_spill] sm:$0xff]  ;;  %v13658_v40 = vld [vmem:[#allocation101_spill] sm:$0xff] }
 0x754   : >> { %5826 = vmatpush.msrb.mxu0 %v4368_v55  ;;  %5895 = vmatmul.f32.gmra.mxu2 %v13557_v5  ;;  %v12021_v55 = vpop.f32.mrf.mxu2  ;;  %v12025_v5 = vpop.f32.mrf.mxu3 }
 0x755   : >> { %5912 = vmatpush.msrb.mxu3 %v4059_v29  ;;  %5971 = vmatpush.msra.mxu1 %v4369_v45  ;;  %v13651_v29 = vld [vmem:[#allocation220_spill] sm:$0xff] }
 0x756   : >> { %5998 = vmatpush.msra.mxu2 %v13646_v25  ;;  %5827 = vmatpush.msrb.mxu0 %v4358_v28  ;;  %v4612_v45 = vadd.f32 %v13651_v29, %v4583_v60  ;;  %v4329_v28 = vunpack.c.h.bf16 %v11790_v32  ;;  %v13660_v60 = vld [vmem:[#allocation67_spill] sm:$0xff]  ;;  %v13663_v29 = vld [vmem:[#allocation214_spill] sm:$0xff] }
 0x757   : >> { %5913 = vmatpush.msrb.mxu3 %v4049_v19  ;;  %5972 = vmatpush.msra.mxu1 %v4359_v58  ;;  %v13652_v19 = vld [vmem:[#allocation230_spill] sm:$0xff] }
 0x758   : >> { %5999 = vmatpush.msra.mxu2 %v13650_v27  ;;  %5828 = vmatmul.f32.vlgmr.msrb.gmra.mxu0 %v10559_v24  ;;  %v4641_v58 = vadd.f32 %v13652_v19, %v4612_v45  ;;  %v13662_v27 = vld [vmem:[#allocation120_spill] sm:$0xff]  ;;  %v13665_v19 = vld [vmem:[#allocation99_spill] sm:$0xff] }
 0x759   : >> { %5973 = vmatmul.f32.vlgmr.msra.gmra.mxu1 %v10559_v24  ;;  %5928 = vmatpush.msra.mxu0 %v4349_v47  ;;  %v13657_v24 = vld [vmem:[#allocation68_spill] sm:$0xff]  ;;  %v4319_v47 = vunpack.c.h.bf16 %v11798_v33  ;;  %v13664_v33 = vld [vmem:[#allocation66_spill] sm:$0xff] }
 0x75a   : >> { %5914 = vmatpush.msrb.mxu3 %v4039_v20  ;;  %6000 = vmatpush.msra.mxu2 %v13653_v49  ;;  %v4670_v25 = vadd.f32 %v13655_v31, %v4641_v58  ;;  %v13659_v20 = vld [vmem:[#allocation225_spill] sm:$0xff]  ;;  %v13666_v58 = vld [vmem:[#allocation119_spill] sm:$0xff]  ;;  %v4299_v49 = vunpack.c.h.bf16 %v11814_v38  ;;  %v13671_v38 = vld [vmem:[#allocation118_spill] sm:$0xff] }
 0x75b   : >> { %6073 = vmatpush.msrb.mxu1 %v13654_v6  ;;  %5915 = vmatmul.f32.vlgmr.msrb.gmra.mxu3 %v13564_v46  ;;  %v4557_v44 = vadd.f32 %v13659_v20, %v12005_v42  ;;  %v13661_v46 = vld [vmem:[#allocation100_spill] sm:$0xff]  ;;  %v13667_v31 = vld [vmem:[#allocation229_spill] sm:$0xff]  ;;  %v13670_v20 = vld [vmem:[#allocation98_spill] sm:$0xff] }
 0x75c   : >> { %5929 = vmatpush.msra.mxu0 %v4339_v3  ;;  %6001 = vmatpush.msra.mxu2 %v13656_v52  ;;  %v4309_v3 = vunpack.c.h.bf16 %v11807_v43  ;;  %v12057_v6 = vpop.f32.mrf.mxu3  ;;  %v12062_v43 = vpop.f32.mrf.mxu1  ;;  %v13668_v52 = vld [vmem:[#allocation65_spill] sm:$0xff] }
 0x75d   : >> { %6015 = vmatpush.msra.mxu3 %v13657_v24  ;;  %6074 = vmatpush.msrb.mxu1 %v13658_v40  ;;  %v12042_v32 = vpop.f32.mrf.mxu0  ;;  %v4586_v45 = vadd.f32 %v13663_v29, %v4557_v44  ;;  %v4289_v24 = vunpack.c.h.bf16 %v11826_v57  ;;  %v13672_v44 = vld [vmem:[#allocation245_spill] sm:$0xff]  ;;  %v13676_v29 = vld [vmem:[#allocation232_spill] sm:$0xff] }
 0x75e   : >> { %5930 = vmatpush.msra.mxu0 %v4329_v28  ;;  %6002 = vmatmul.f32.vlgmr.msra.gmra.mxu2 %v4670_v25  ;;  %v12052_v28 = vpop.f32.mrf.mxu2 }
 0x75f   : >> { %6016 = vmatpush.msra.mxu3 %v13660_v60  ;;  %6075 = vmatpush.msrb.mxu1 %v13661_v46  ;;  %v4615_v25 = vadd.f32 %v13667_v31, %v4586_v45  ;;  %v13673_v46 = vld [vmem:[#allocation64_spill] sm:$0xff]  ;;  %v4560_v45 = vadd.f32 %v13676_v29, %v12005_v42 }
 0x760   : >> { %6102 = vmatpush.msrb.mxu2 %v13662_v27  ;;  %5931 = vmatpush.msra.mxu0 %v4319_v47  ;;  %v13669_v47 = vld [vmem:[#allocation234_spill] sm:$0xff]  ;;  %v4279_v27 = vunpack.c.h.bf16 %v11834_v18 }
 0x761   : >> { %6017 = vmatpush.msra.mxu3 %v13664_v33  ;;  %6076 = vmatpush.msrb.mxu1 %v13665_v19  ;;  %v4644_v40 = vadd.f32 %v13669_v47, %v4615_v25  ;;  %v13677_v33 = vld [vmem:[#allocation63_spill] sm:$0xff]  ;;  %v13679_v19 = vld [vmem:[#allocation116_spill] sm:$0xff]  ;;  %v13681_v18 = vld [vmem:[#allocation62_spill] sm:$0xff]  ;;  %v4259_v47 = vunpack.c.h.bf16 %v11850_v51 }
 0x762   : >> { %6103 = vmatpush.msrb.mxu2 %v13666_v58  ;;  %5831 = vmatmul.f32.gmra.mxu0 %v10605_v37  ;;  %v4269_v58 = vunpack.c.h.bf16 %v11843_v48  ;;  %v13687_v51 = vld [vmem:[#allocation92_spill] sm:$0xff] }
 0x763   : >> { %5976 = vmatmul.f32.gmra.mxu1 %v10605_v37  ;;  %5932 = vmatpush.msra.mxu0 %v4309_v3  ;;  %v4673_v60 = vadd.f32 %v13672_v44, %v4644_v40  ;;  %v13674_v37 = vld [vmem:[#allocation97_spill] sm:$0xff] }
 0x764   : >> { %6018 = vmatpush.msra.mxu3 %v13668_v52  ;;  %6077 = vmatpush.msrb.mxu1 %v13670_v20  ;;  %v13675_v3 = vld [vmem:[#allocation117_spill] sm:$0xff]  ;;  %v13682_v52 = vld [vmem:[#allocation95_spill] sm:$0xff]  ;;  %v12090_v40 = vpop.f32.mrf.mxu3  ;;  %v12095_v48 = vpop.f32.mrf.mxu1 }
 0x765   : >> { %6104 = vmatpush.msrb.mxu2 %v13671_v38  ;;  %5918 = vmatmul.f32.gmra.mxu3 %v13576_v7  ;;  %v13678_v7 = vld [vmem:[#allocation96_spill] sm:$0xff]  ;;  %v13684_v20 = vld [vmem:[#allocation233_spill] sm:$0xff] }
 0x766   : >> { %5933 = vmatpush.msra.mxu0 %v4299_v49  ;;  %6019 = vmatpush.msra.mxu3 %v13673_v46  ;;  %v13680_v49 = vld [vmem:[#allocation216_spill] sm:$0xff]  ;;  %v12085_v25 = vpop.f32.mrf.mxu2  ;;  %v13685_v44 = vld [vmem:[#allocation61_spill] sm:$0xff]  ;;  %v13686_v46 = vld [vmem:[#allocation238_spill] sm:$0xff] }
 0x767   : >> { %6078 = vmatpush.msrb.mxu1 %v13674_v37  ;;  %6105 = vmatpush.msrb.mxu2 %v13675_v3  ;;  %v12075_v57 = vpop.f32.mrf.mxu0  ;;  %v4589_v31 = vadd.f32 %v13680_v49, %v4560_v45  ;;  %v13688_v3 = vld [vmem:[#allocation114_spill] sm:$0xff]  ;;  %v13690_v45 = vld [vmem:[#allocation60_spill] sm:$0xff] }
 0x768   : >> { %5934 = vmatpush.msra.mxu0 %v4289_v24  ;;  %6005 = vmatmul.f32.gmra.mxu2 %v4673_v60  ;;  %v13683_v24 = vld [vmem:[#allocation115_spill] sm:$0xff]  ;;  %v4249_v60 = vunpack.c.h.bf16 %v11862_v30  ;;  %v4239_v30 = vunpack.c.h.bf16 %v11870_v50  ;;  %v13696_v50 = vld [vmem:[#allocation90_spill] sm:$0xff] }
 0x769   : >> { %6020 = vmatpush.msra.mxu3 %v13677_v33  ;;  %6079 = vmatpush.msrb.mxu1 %v13678_v7  ;;  %v4618_v38 = vadd.f32 %v13684_v20, %v4589_v31  ;;  %v13691_v33 = vld [vmem:[#allocation91_spill] sm:$0xff]  ;;  %v13692_v7 = vld [vmem:[#allocation113_spill] sm:$0xff]  ;;  %v12116_v31 = vperm.slane %v11991_v14, 1  ;;  %v4229_v20 = vunpack.c.h.bf16 %v11879_v21 }
 0x76a   : >> { %6106 = vmatpush.msrb.mxu2 %v13679_v19  ;;  %5935 = vmatpush.msra.mxu0 %v4279_v27  ;;  %v12101_v27 = vperm.slane %v11991_v14, 3 }
 0x76b   : >> { %6021 = vmatpush.msra.mxu3 %v13681_v18  ;;  %6080 = vmatpush.msrb.mxu1 %v13682_v52  ;;  %v4647_v37 = vadd.f32 %v13686_v46, %v4618_v38  ;;  %v13695_v52 = vld [vmem:[#allocation59_spill] sm:$0xff]  ;;  %v13698_v38 = vld [vmem:[#allocation222_spill] sm:$0xff] }
 0x76c   : >> { %6107 = vmatpush.msrb.mxu2 %v13683_v24  ;;  %5834 = vmatmul.f32.gmra.mxu0 %v10646_v8  ;;  %v12122_v24 = vperm.slane %v11991_v14, 4  ;;  %v13700_v46 = vld [vmem:[#allocation58_spill] sm:$0xff] }
 0x76d   : >> { %5979 = vmatmul.f32.gmra.mxu1 %v10646_v8  ;;  %5936 = vmatpush.msra.mxu0 %v4269_v58  ;;  %v13689_v8 = vld [vmem:[#allocation249_spill] sm:$0xff]  ;;  %v13693_v58 = vld [vmem:[#allocation236_spill] sm:$0xff] }
 0x76e   : >> { %6022 = vmatpush.msra.mxu3 %v13685_v44  ;;  %6081 = vmatpush.msrb.mxu1 %v13687_v51  ;;  %v4676_v29 = vadd.f32 %v13689_v8, %v4647_v37  ;;  %v4563_v49 = vadd.f32 %v13693_v58, %v12005_v42  ;;  %v13699_v44 = vld [vmem:[#allocation305_spill] sm:$0xff]  ;;  %v12130_v37 = vpop.f32.mrf.mxu2  ;;  %v4219_v8 = vunpack.c.h.bf16 %v11886_v4  ;;  %v13705_v58 = vld [vmem:[#allocation211_spill] sm:$0xff]  ;;  %v4209_v4 = vunpack.c.h.bf16 %v11898_v13 }
 0x76f   : >> { %6108 = vmatpush.msrb.mxu2 %v13688_v3  ;;  %5921 = vmatmul.f32.gmra.mxu3 %v13588_v15  ;;  %v13694_v15 = vld [vmem:[#allocation296_spill] sm:$0xff]  ;;  %v13701_v51 = vld [vmem:[#allocation89_spill] sm:$0xff]  ;;  %v13702_v3 = vld [vmem:[#allocation111_spill] sm:$0xff] }
 0x770   : >> { %5937 = vmatpush.msra.mxu0 %v4259_v47  ;;  %6023 = vmatpush.msra.mxu3 %v13690_v45  ;;  %v4989_v18 = vadd.f32 %v13694_v15, %v12101_v27  ;;  %v13697_v47 = vld [vmem:[#allocation112_spill] sm:$0xff]  ;;  %v4592_v42 = vadd.f32 %v13698_v38, %v4563_v49  ;;  %v13703_v45 = vld [vmem:[#allocation231_spill] sm:$0xff]  ;;  %v12144_v15 = vpop.f32.mrf.mxu1 }
 0x771   : >> { %6082 = vmatpush.msrb.mxu1 %v13691_v33  ;;  %6109 = vmatpush.msrb.mxu2 %v13692_v7  ;;  %v12111_v19 = vpop.f32.mrf.mxu0  ;;  %v4699_v21 = vadd.f32 %v13703_v45, %v12116_v31  ;;  %v13704_v33 = vld [vmem:[#allocation239_spill] sm:$0xff]  ;;  %13707 = vst [vmem:[#allocation228_spill] sm:$0xff] %v12144_v15 }
 0x772   : >> { %5938 = vmatpush.msra.mxu0 %v4249_v60  ;;  %6008 = vmatmul.f32.gmra.mxu2 %v4676_v29  ;;  %v5018_v60 = vadd.f32 %v13699_v44, %v4989_v18  ;;  %v12135_v29 = vpop.f32.mrf.mxu3  ;;  %v4621_v7 = vadd.f32 %v13704_v33, %v4592_v42  ;;  %v13708_v18 = vld [vmem:[#allocation57_spill] sm:$0xff]  ;;  %v13711_v44 = vld [vmem:[#allocation304_spill] sm:$0xff]  ;;  %v13717_v13 = vld [vmem:[#allocation87_spill] sm:$0xff] }
 0x773   : >> { %6024 = vmatpush.msra.mxu3 %v13695_v52  ;;  %6083 = vmatpush.msrb.mxu1 %v13696_v50  ;;  %v13709_v52 = vld [vmem:[#allocation243_spill] sm:$0xff] }
 0x774   : >> { %6110 = vmatpush.msrb.mxu2 %v13697_v47  ;;  %5939 = vmatpush.msra.mxu0 %v4239_v30  ;;  %v13706_v30 = vld [vmem:[#allocation210_spill] sm:$0xff]  ;;  %v4728_v50 = vadd.f32 %v13709_v52, %v4699_v21  ;;  %v13710_v47 = vld [vmem:[#allocation241_spill] sm:$0xff]  ;;  %v5047_v42 = vadd.f32 %v13711_v44, %v5018_v60  ;;  %v4199_v21 = vunpack.c.h.bf16 %v11906_v17  ;;  %v13724_v44 = vld [vmem:[#allocation55_spill] sm:$0xff] }
 0x775   : >> { %6025 = vmatpush.msra.mxu3 %v13700_v46  ;;  %6084 = vmatpush.msrb.mxu1 %v13701_v51  ;;  %v5134_v49 = vadd.f32 %v13706_v30, %v12122_v24  ;;  %v4650_v38 = vadd.f32 %v13710_v47, %v4621_v7  ;;  %v13712_v46 = vld [vmem:[#allocation88_spill] sm:$0xff]  ;;  %v13713_v51 = vld [vmem:[#allocation110_spill] sm:$0xff]  ;;  %v13718_v7 = vld [vmem:[#allocation303_spill] sm:$0xff] }
 0x776   : >> { %6111 = vmatpush.msrb.mxu2 %v13702_v3  ;;  %5837 = vmatmul.f32.gmra.mxu0 %v13705_v58  ;;  %v13714_v3 = vld [vmem:[#allocation246_spill] sm:$0xff]  ;;  %v4992_v60 = vadd.f32 %v13718_v7, %v12101_v27  ;;  %v13719_v30 = vld [vmem:[#allocation227_spill] sm:$0xff]  ;;  %v13720_v52 = vld [vmem:[#allocation109_spill] sm:$0xff] }
 0x777   : >> { %5982 = vmatmul.f32.gmra.mxu1 %v13705_v58  ;;  %5940 = vmatpush.msra.mxu0 %v4229_v20  ;;  %v4757_v45 = vadd.f32 %v13714_v3, %v4728_v50  ;;  %v13715_v20 = vld [vmem:[#allocation252_spill] sm:$0xff]  ;;  %v13726_v17 = vld [vmem:[#allocation86_spill] sm:$0xff] }
 0x778   : >> { %6026 = vmatpush.msra.mxu3 %v13708_v18  ;;  %6085 = vmatpush.msrb.mxu1 %v13712_v46  ;;  %v4679_v33 = vadd.f32 %v13715_v20, %v4650_v38  ;;  %v13716_v58 = vld [vmem:[#allocation56_spill] sm:$0xff]  ;;  %v5163_v18 = vadd.f32 %v13719_v30, %v5134_v49  ;;  %v13725_v46 = vld [vmem:[#allocation309_spill] sm:$0xff]  ;;  %v13727_v3 = vld [vmem:[#allocation106_spill] sm:$0xff]  ;;  %v12178_v30 = vpop.f32.mrf.mxu2 }
 0x779   : >> { %6112 = vmatpush.msrb.mxu2 %v13713_v51  ;;  %5924 = vmatmul.f32.gmra.mxu3 %v13603_v53  ;;  %v13723_v47 = vld [vmem:[#allocation260_spill] sm:$0xff]  ;;  %v5021_v51 = vadd.f32 %v13725_v46, %v4992_v60  ;;  %v13728_v49 = vld [vmem:[#allocation235_spill] sm:$0xff]  ;;  %v13733_v60 = vld [vmem:[#allocation85_spill] sm:$0xff] }
 0x77a   : >> { %5941 = vmatpush.msra.mxu0 %v4219_v8  ;;  %6027 = vmatpush.msra.mxu3 %v13716_v58  ;;  %v13722_v8 = vld [vmem:[#allocation255_spill] sm:$0xff]  ;;  %v5076_v38 = vadd.f32 %v13723_v47, %v5047_v42  ;;  %v4702_v20 = vadd.f32 %v13728_v49, %v12116_v31  ;;  %v13729_v58 = vld [vmem:[#allocation314_spill] sm:$0xff]  ;;  %v13736_v46 = vld [vmem:[#allocation248_spill] sm:$0xff] }
 0x77b   : >> { %6086 = vmatpush.msrb.mxu1 %v13717_v13  ;;  %6113 = vmatpush.msrb.mxu2 %v13720_v52  ;;  %v12163_v53 = vpop.f32.mrf.mxu0  ;;  %v4786_v50 = vadd.f32 %v13722_v8, %v4757_v45  ;;  %v13730_v13 = vld [vmem:[#allocation54_spill] sm:$0xff]  ;;  %v13731_v45 = vld [vmem:[#allocation205_spill] sm:$0xff]  ;;  %v12182_v8 = vpop.f32.mrf.mxu3  ;;  %v13735_v47 = vld [vmem:[#allocation247_spill] sm:$0xff] }
 0x77c   : >> { %5942 = vmatpush.msra.mxu0 %v4209_v4  ;;  %13721 = vst [vmem:[#allocation212_spill] sm:$0xff] %v12163_v53  ;;  %6011 = vmatmul.f32.gmra.mxu2 %v4679_v33  ;;  %v5105_v4 = vadd.f32 %v13729_v58, %v5076_v38  ;;  %v5137_v42 = vadd.f32 %v13731_v45, %v12122_v24  ;;  %v13732_v33 = vld [vmem:[#allocation277_spill] sm:$0xff]  ;;  %v13741_v45 = vld [vmem:[#allocation250_spill] sm:$0xff] }
 0x77d   : >> { %6028 = vmatpush.msra.mxu3 %v13724_v44  ;;  %6087 = vmatpush.msrb.mxu1 %v13726_v17  ;;  %v5192_v7 = vadd.f32 %v13732_v33, %v5163_v18  ;;  %v13734_v52 = vld [vmem:[#allocation105_spill] sm:$0xff]  ;;  %v4731_v44 = vadd.f32 %v13735_v47, %v4702_v20  ;;  %v4815_v38 = vadd.f32 %v13736_v46, %v4786_v50  ;;  %v12189_v18 = vpop.f32.mrf.mxu1  ;;  %v13743_v50 = vld [vmem:[#allocation307_spill] sm:$0xff] }
 0x77e   : >> { %6114 = vmatpush.msrb.mxu2 %v13727_v3  ;;  %5943 = vmatpush.msra.mxu0 %v4199_v21  ;;  %v13737_v21 = vld [vmem:[#allocation308_spill] sm:$0xff]  ;;  %v13738_v3 = vld [vmem:[#allocation278_spill] sm:$0xff]  ;;  %v13739_v58 = vld [vmem:[#allocation53_spill] sm:$0xff]  ;;  %v4995_v20 = vadd.f32 %v13743_v50, %v12101_v27 }
 0x77f   : >> { %6029 = vmatpush.msra.mxu3 %v13730_v13  ;;  %6088 = vmatpush.msrb.mxu1 %v13733_v60  ;;  %v5050_v17 = vadd.f32 %v13737_v21, %v5021_v51  ;;  %v5221_v49 = vadd.f32 %v13738_v3, %v5192_v7  ;;  %v13740_v13 = vld [vmem:[#allocation84_spill] sm:$0xff]  ;;  %v4760_v33 = vadd.f32 %v13741_v45, %v4731_v44  ;;  %v13746_v47 = vld [vmem:[#allocation83_spill] sm:$0xff]  ;;  %v13750_v3 = vld [vmem:[#allocation218_spill] sm:$0xff] }
 0x780   : >> { %6115 = vmatpush.msrb.mxu2 %v13734_v52  ;;  %5944 = vmatmul.f32.vlgmr.msra.gmra.mxu0 %v10379_v26  ;;  %v13742_v60 = vld [vmem:[#allocation104_spill] sm:$0xff]  ;;  %v13745_v52 = vld [vmem:[#allocation207_spill] sm:$0xff]  ;;  %v12225_v15 = vpop.f32.mrf.mxu2 }
 0x781   : >> { %6089 = vmatmul.f32.vlgmr.msrb.gmra.mxu1 %v5105_v4  ;;  %6030 = vmatpush.msra.mxu3 %v13739_v58  ;;  %v13744_v26 = vld [vmem:[#allocation268_spill] sm:$0xff]  ;;  %v5250_v51 = vadd.f32 %v13745_v52, %v5221_v49  ;;  %v13748_v46 = vld [vmem:[#allocation103_spill] sm:$0xff]  ;;  %v4789_v44 = vadd.f32 %v13750_v3, %v4760_v33  ;;  %v13751_v58 = vld [vmem:[#allocation313_spill] sm:$0xff]  ;;  %13767 = vst [vmem:[#allocation208_spill] sm:$0xff] %v12225_v15 }
 0x782   : >> { %6044 = vmatpush.msrb.mxu0 %v13740_v13  ;;  %6116 = vmatpush.msrb.mxu2 %v13742_v60  ;;  %v5166_v4 = vadd.f32 %v13744_v26, %v5137_v42  ;;  %v13747_v7 = vld [vmem:[#allocation140_spill] sm:$0xff]  ;;  %v5024_v13 = vadd.f32 %v13751_v58, %v4995_v20  ;;  %v13753_v60 = vld [vmem:[#allocation82_spill] sm:$0xff]  ;;  %v13755_v26 = vld [vmem:[#allocation139_spill] sm:$0xff] }
 0x783   : >> { %6031 = vmatmul.f32.vlgmr.msra.gmra.mxu3 %v4815_v38  ;;  %v13749_v21 = vld [vmem:[#allocation172_spill] sm:$0xff]  ;;  %v13756_v52 = vld [vmem:[#allocation171_spill] sm:$0xff]  ;;  %v13759_v20 = vld [vmem:[#allocation285_spill] sm:$0xff] }
 0x784   : >> { %6045 = vmatpush.msrb.mxu0 %v13746_v47  ;;  %6131 = vmatpush.msrb.mxu3 %v13747_v7  ;;  %v13752_v38 = vld [vmem:[#allocation224_spill] sm:$0xff]  ;;  %v13757_v47 = vld [vmem:[#allocation226_spill] sm:$0xff]  ;;  %v13758_v33 = vld [vmem:[#allocation275_spill] sm:$0xff] }
 0x785   : >> { %6117 = vmatpush.msrb.mxu2 %v13748_v46  ;;  %6189 = vmatpush.msra.mxu1 %v13749_v21  ;;  %v5079_v45 = vadd.f32 %v13752_v38, %v5050_v17  ;;  %v12207_v42 = vpop.f32.mrf.mxu0  ;;  %v13754_v49 = vld [vmem:[#allocation240_spill] sm:$0xff]  ;;  %v5140_v46 = vadd.f32 %v13758_v33, %v12122_v24  ;;  %v5195_v21 = vadd.f32 %v13759_v20, %v5166_v4  ;;  %v13760_v17 = vld [vmem:[#allocation81_spill] sm:$0xff]  ;;  %v13762_v3 = vld [vmem:[#allocation251_spill] sm:$0xff]  ;;  %v12228_v33 = vpop.f32.mrf.mxu3 }
 0x786   : >> { %6118 = vmatmul.f32.vlgmr.msrb.gmra.mxu2 %v5250_v51  ;;  %6046 = vmatpush.msrb.mxu0 %v13753_v60  ;;  %v4705_v50 = vadd.f32 %v13754_v49, %v12116_v31  ;;  %v13761_v51 = vld [vmem:[#allocation188_spill] sm:$0xff]  ;;  %v13763_v38 = vld [vmem:[#allocation138_spill] sm:$0xff]  ;;  %v13769_v20 = vld [vmem:[#allocation253_spill] sm:$0xff] }
 0x787   : >> { %6132 = vmatpush.msrb.mxu3 %v13755_v26  ;;  %6190 = vmatpush.msra.mxu1 %v13756_v52  ;;  %v5108_v7 = vadd.f32 %v13757_v47, %v5079_v45  ;;  %v13764_v60 = vld [vmem:[#allocation254_spill] sm:$0xff]  ;;  %v13765_v26 = vld [vmem:[#allocation312_spill] sm:$0xff]  ;;  %v13766_v45 = vld [vmem:[#allocation287_spill] sm:$0xff] }
 0x788   : >> { %6047 = vmatpush.msrb.mxu0 %v13760_v17  ;;  %6218 = vmatpush.msra.mxu2 %v13761_v51  ;;  %v4734_v58 = vadd.f32 %v13762_v3, %v4705_v50  ;;  %v4818_v49 = vadd.f32 %v13764_v60, %v4789_v44  ;;  %v5053_v52 = vadd.f32 %v13765_v26, %v5024_v13  ;;  %v13768_v4 = vld [vmem:[#allocation80_spill] sm:$0xff]  ;;  %v13770_v50 = vld [vmem:[#allocation137_spill] sm:$0xff]  ;;  %v13771_v51 = vld [vmem:[#allocation170_spill] sm:$0xff]  ;;  %v12237_v60 = vpop.f32.mrf.mxu1 }
 0x789   : >> { %6133 = vmatpush.msrb.mxu3 %v13763_v38  ;;  %5947 = vmatmul.f32.gmra.mxu0 %v10421_v63  ;;  %v5224_v47 = vadd.f32 %v13766_v45, %v5195_v21  ;;  %v13772_v63 = vld [vmem:[#allocation311_spill] sm:$0xff]  ;;  %v13774_v38 = vld [vmem:[#allocation293_spill] sm:$0xff]  ;;  %v13776_v26 = vld [vmem:[#allocation134_spill] sm:$0xff] }
 0x78a   : >> { %6092 = vmatmul.f32.gmra.mxu1 %v5108_v7  ;;  %6048 = vmatpush.msrb.mxu0 %v13768_v4  ;;  %v4763_v17 = vadd.f32 %v13769_v20, %v4734_v58  ;;  %v4998_v44 = vadd.f32 %v13772_v63, %v12101_v27  ;;  %v13773_v3 = vld [vmem:[#allocation271_spill] sm:$0xff]  ;;  %v13777_v45 = vld [vmem:[#allocation169_spill] sm:$0xff]  ;;  %v13781_v27 = vld [vmem:[#allocation78_spill] sm:$0xff] }
 0x78b   : >> { %6134 = vmatpush.msrb.mxu3 %v13770_v50  ;;  %6191 = vmatpush.msra.mxu1 %v13771_v51  ;;  %v5169_v13 = vadd.f32 %v13773_v3, %v5140_v46  ;;  %v5253_v21 = vadd.f32 %v13774_v38, %v5224_v47  ;;  %v13775_v7 = vld [vmem:[#allocation79_spill] sm:$0xff]  ;;  %v13779_v20 = vld [vmem:[#allocation209_spill] sm:$0xff]  ;;  %v13780_v51 = vld [vmem:[#allocation264_spill] sm:$0xff] }
 0x78c   : >> { %6034 = vmatmul.f32.gmra.mxu3 %v4818_v49  ;;  %6049 = vmatpush.msrb.mxu0 %v13775_v7  ;;  %v13778_v58 = vld [vmem:[#allocation223_spill] sm:$0xff]  ;;  %v5027_v50 = vadd.f32 %v13779_v20, %v4998_v44  ;;  %v5082_v15 = vadd.f32 %v13780_v51, %v5053_v52  ;;  %v13782_v46 = vld [vmem:[#allocation244_spill] sm:$0xff]  ;;  %v12249_v49 = vperm.slane %v11991_v14, 2  ;;  %v13783_v63 = vld [vmem:[#allocation133_spill] sm:$0xff] }
 0x78d   : >> { %6135 = vmatpush.msrb.mxu3 %v13776_v26  ;;  %6192 = vmatpush.msra.mxu1 %v13777_v45  ;;  %v4792_v4 = vadd.f32 %v13778_v58, %v4763_v17  ;;  %v4708_v47 = vadd.f32 %v13782_v46, %v12116_v31  ;;  %v13784_v3 = vld [vmem:[#allocation168_spill] sm:$0xff]  ;;  %v13785_v38 = vld [vmem:[#allocation266_spill] sm:$0xff]  ;;  %v13787_v26 = vld [vmem:[#allocation289_spill] sm:$0xff] }
 0x78e   : >> { %6121 = vmatmul.f32.gmra.mxu2 %v5253_v21  ;;  %6050 = vmatpush.msrb.mxu0 %v13781_v27  ;;  %v5111_v7 = vadd.f32 %v13785_v38, %v5082_v15  ;;  %v13786_v17 = vld [vmem:[#allocation280_spill] sm:$0xff]  ;;  %v5198_v52 = vadd.f32 %v13787_v26, %v5169_v13  ;;  %v13788_v21 = vld [vmem:[#allocation77_spill] sm:$0xff]  ;;  %v13789_v58 = vld [vmem:[#allocation187_spill] sm:$0xff] }
 0x78f   : >> { %6136 = vmatpush.msrb.mxu3 %v13783_v63  ;;  %6193 = vmatpush.msra.mxu1 %v13784_v3  ;;  %v5143_v44 = vadd.f32 %v13786_v17, %v12122_v24  ;;  %v12258_v45 = vpop.f32.mrf.mxu0  ;;  %v13790_v31 = vld [vmem:[#allocation256_spill] sm:$0xff]  ;;  %v13792_v27 = vld [vmem:[#allocation258_spill] sm:$0xff]  ;;  %v13793_v15 = vld [vmem:[#allocation315_spill] sm:$0xff] }
 0x790   : >> { %6051 = vmatpush.msrb.mxu0 %v13788_v21  ;;  %6219 = vmatpush.msra.mxu2 %v13789_v58  ;;  %v4737_v20 = vadd.f32 %v13790_v31, %v4708_v47  ;;  %v13791_v51 = vld [vmem:[#allocation132_spill] sm:$0xff]  ;;  %v4821_v46 = vadd.f32 %v13792_v27, %v4792_v4  ;;  %v5056_v63 = vadd.f32 %v13793_v15, %v5027_v50  ;;  %v13794_v3 = vld [vmem:[#allocation290_spill] sm:$0xff]  ;;  %v13796_v38 = vld [vmem:[#allocation259_spill] sm:$0xff]  ;;  %v12281_v27 = vpop.f32.mrf.mxu3 }
 0x791   : >> { %6137 = vmatpush.msrb.mxu3 %v13791_v51  ;;  %5950 = vmatmul.f32.gmra.mxu0 %v13635_v34  ;;  %v5227_v24 = vadd.f32 %v13794_v3, %v5198_v52  ;;  %v13795_v13 = vld [vmem:[#allocation76_spill] sm:$0xff]  ;;  %v4844_v17 = vadd.f32 %v13796_v38, %v12249_v49  ;;  %v13797_v26 = vld [vmem:[#allocation131_spill] sm:$0xff]  ;;  %v13799_v47 = vld [vmem:[#allocation257_spill] sm:$0xff]  ;;  %v12274_v34 = vperm.slane %v11991_v14, 5  ;;  %v12278_v52 = vpop.f32.mrf.mxu2 }
 0x792   : >> { %6095 = vmatmul.f32.gmra.mxu1 %v5111_v7  ;;  %6052 = vmatpush.msrb.mxu0 %v13795_v13  ;;  %v13798_v21 = vld [vmem:[#allocation167_spill] sm:$0xff]  ;;  %v4766_v58 = vadd.f32 %v13799_v47, %v4737_v20  ;;  %v13800_v4 = vld [vmem:[#allocation206_spill] sm:$0xff]  ;;  %13802 = vst [vmem:[#allocation279_spill] sm:$0xff] %v12278_v52  ;;  %v13804_v15 = vld [vmem:[#allocation261_spill] sm:$0xff] }
 0x793   : >> { %6138 = vmatpush.msrb.mxu3 %v13797_v26  ;;  %6194 = vmatpush.msra.mxu1 %v13798_v21  ;;  %v5172_v31 = vadd.f32 %v13800_v4, %v5143_v44  ;;  %v13801_v50 = vld [vmem:[#allocation299_spill] sm:$0xff]  ;;  %v4873_v3 = vadd.f32 %v13804_v15, %v4844_v17  ;;  %v13805_v13 = vld [vmem:[#allocation130_spill] sm:$0xff]  ;;  %v13808_v21 = vld [vmem:[#allocation269_spill] sm:$0xff]  ;;  %v12288_v44 = vpop.f32.mrf.mxu1 }
 0x794   : >> { %v5256_v51 = vadd.f32 %v13801_v50, %v5227_v24  ;;  %6037 = vmatmul.f32.gmra.mxu3 %v4821_v46  ;;  %v13803_v7 = vld [vmem:[#allocation75_spill] sm:$0xff]  ;;  %v13806_v38 = vld [vmem:[#allocation166_spill] sm:$0xff]  ;;  %v5085_v47 = vadd.f32 %v13808_v21, %v5056_v63  ;;  %v12293_v50 = vperm.slane %v11991_v14, 7  ;;  %v13812_v17 = vld [vmem:[#allocation165_spill] sm:$0xff] }
 0x795   : >> { %6053 = vmatpush.msrb.mxu0 %v13803_v7  ;;  %6139 = vmatpush.msrb.mxu3 %v13805_v13  ;;  %v13807_v20 = vld [vmem:[#allocation267_spill] sm:$0xff]  ;;  %v13809_v24 = vld [vmem:[#allocation74_spill] sm:$0xff]  ;;  %v13811_v7 = vld [vmem:[#allocation129_spill] sm:$0xff] }
 0x796   : >> { %6195 = vmatpush.msra.mxu1 %v13806_v38  ;;  %v4795_v26 = vadd.f32 %v13807_v20, %v4766_v58  ;;  %6124 = vmatmul.f32.gmra.mxu2 %v5256_v51  ;;  %v13810_v46 = vld [vmem:[#allocation274_spill] sm:$0xff]  ;;  %v13814_v58 = vld [vmem:[#allocation288_spill] sm:$0xff]  ;;  %v13815_v63 = vld [vmem:[#allocation295_spill] sm:$0xff] }
 0x797   : >> { %6054 = vmatpush.msrb.mxu0 %v13809_v24  ;;  %v4902_v4 = vadd.f32 %v13810_v46, %v4873_v3  ;;  %6140 = vmatpush.msrb.mxu3 %v13811_v7  ;;  %v13813_v15 = vld [vmem:[#allocation270_spill] sm:$0xff]  ;;  %v5279_v38 = vadd.f32 %v13814_v58, %v12274_v34  ;;  %v5201_v20 = vadd.f32 %v13815_v63, %v5172_v31  ;;  %v13816_v21 = vld [vmem:[#allocation73_spill] sm:$0xff]  ;;  %v13818_v24 = vld [vmem:[#allocation128_spill] sm:$0xff] }
 0x798   : >> { %6196 = vmatpush.msra.mxu1 %v13812_v17  ;;  %v5114_v13 = vadd.f32 %v13813_v15, %v5085_v47  ;;  %v13817_v51 = vld [vmem:[#allocation186_spill] sm:$0xff]  ;;  %v13819_v3 = vld [vmem:[#allocation221_spill] sm:$0xff]  ;;  %v13820_v7 = vld [vmem:[#allocation300_spill] sm:$0xff]  ;;  %v5569_v63 = vadd.f32 %v12135_v29, %v12293_v50 }
 0x799   : >> { %6055 = vmatpush.msrb.mxu0 %v13816_v21  ;;  %6220 = vmatpush.msra.mxu2 %v13817_v51  ;;  %v4824_v46 = vadd.f32 %v13819_v3, %v4795_v26  ;;  %v5308_v52 = vadd.f32 %v13820_v7, %v5279_v38  ;;  %v13821_v17 = vld [vmem:[#allocation217_spill] sm:$0xff]  ;;  %v13822_v47 = vld [vmem:[#allocation72_spill] sm:$0xff]  ;;  %v12309_v15 = vpop.f32.mrf.mxu0  ;;  %v13823_v31 = vld [vmem:[#allocation262_spill] sm:$0xff] }
 0x79a   : >> { %6141 = vmatpush.msrb.mxu3 %v13818_v24  ;;  %5953 = vmatmul.f32.gmra.mxu0 %v13643_v0  ;;  %v5230_v53 = vadd.f32 %v13821_v17, %v5201_v20  ;;  %v4847_v58 = vadd.f32 %v13823_v31, %v12249_v49  ;;  %v13824_v21 = vld [vmem:[#allocation127_spill] sm:$0xff]  ;;  %v13825_v0 = vld [vmem:[#allocation164_spill] sm:$0xff]  ;;  %v13826_v26 = vld [vmem:[#allocation265_spill] sm:$0xff]  ;;  %v5598_v17 = vadd.f32 %v12207_v42, %v5569_v63 }
 0x79b   : >> { %6098 = vmatmul.f32.gmra.mxu1 %v5114_v13  ;;  %6056 = vmatpush.msrb.mxu0 %v13822_v47  ;;  %v4931_v51 = vadd.f32 %v13826_v26, %v4902_v4  ;;  %v13827_v38 = vld [vmem:[#allocation316_spill] sm:$0xff]  ;;  %v13828_v20 = vld [vmem:[#allocation71_spill] sm:$0xff]  ;;  %v13829_v3 = vld [vmem:[#allocation126_spill] sm:$0xff]  ;;  %v12333_v63 = vpop.f32.mrf.mxu1 }
 0x79c   : >> { %6142 = vmatpush.msrb.mxu3 %v13824_v21  ;;  %6197 = vmatpush.msra.mxu1 %v13825_v0  ;;  %v5337_v24 = vadd.f32 %v13827_v38, %v5308_v52  ;;  %v5259_v13 = vadd.f32 %v11909_v56, %v5230_v53  ;;  %v13830_v7 = vld [vmem:[#allocation163_spill] sm:$0xff]  ;;  %v5655_v21 = vpop.f32.mrf.mxu2  ;;  %v13832_v4 = vld [vmem:[#allocation70_spill] sm:$0xff]  ;;  %v5684_v52 = vpop.f32.mrf.mxu3  ;;  %v13833_v0 = vld [vmem:[#allocation125_spill] sm:$0xff] }
 0x79d   : >> { %6040 = vmatmul.f32.gmra.mxu3 %v4824_v46  ;;  %6057 = vmatpush.msrb.mxu0 %v13828_v20  ;;  %v13831_v29 = vld [vmem:[#allocation263_spill] sm:$0xff]  ;;  %v13834_v56 = vld [vmem:[#allocation162_spill] sm:$0xff]  ;;  %v13837_v20 = vld [vmem:[#allocation292_spill] sm:$0xff] }
 0x79e   : >> { %6143 = vmatpush.msrb.mxu3 %v13829_v3  ;;  %6198 = vmatpush.msra.mxu1 %v13830_v7  ;;  %v4876_v47 = vadd.f32 %v13831_v29, %v4847_v58  ;;  %v5366_v31 = vadd.f32 %v11931_v59, %v5337_v24  ;;  %v13835_v53 = vld [vmem:[#allocation294_spill] sm:$0xff]  ;;  %v5282_v42 = vadd.f32 %v13837_v20, %v12274_v34  ;;  %v13838_v58 = vld [vmem:[#allocation69_spill] sm:$0xff]  ;;  %v13842_v29 = vld [vmem:[#allocation184_spill] sm:$0xff] }
 0x79f   : >> { %6127 = vmatmul.f32.gmra.mxu2 %v5259_v13  ;;  %6058 = vmatpush.msrb.mxu0 %v13832_v4  ;;  %v4960_v46 = vadd.f32 %v13835_v53, %v4931_v51  ;;  %v13836_v26 = vld [vmem:[#allocation282_spill] sm:$0xff]  ;;  %v13839_v59 = vld [vmem:[#allocation185_spill] sm:$0xff]  ;;  %v5627_v24 = vadd.f32 %v12189_v18, %v5598_v17  ;;  %v13840_v13 = vld [vmem:[#allocation124_spill] sm:$0xff] }
 0x7a0   : >> { %6144 = vmatpush.msrb.mxu3 %v13833_v0  ;;  %6199 = vmatpush.msra.mxu1 %v13834_v56  ;;  %v4905_v38 = vadd.f32 %v13836_v26, %v4876_v47  ;;  %v13841_v3 = vld [vmem:[#allocation161_spill] sm:$0xff]  ;;  %v5311_v7 = vadd.f32 %v11916_v36, %v5282_v42  ;;  %v5395_v51 = vadd.f32 %v11924_v22, %v5366_v31  ;;  %v13843_v4 = vld [vmem:[#allocation123_spill] sm:$0xff]  ;;  %v13844_v0 = vld [vmem:[#allocation156_spill] sm:$0xff] }
 0x7a1   : >> { %6059 = vmatpush.msrb.mxu0 %v13838_v58  ;;  %6221 = vmatpush.msra.mxu2 %v13839_v59  ;;  %v5572_v47 = vadd.f32 %v12182_v8, %v12293_v50  ;;  %v13845_v18 = vld [vmem:[#allocation272_spill] sm:$0xff]  ;;  %v13848_v31 = vld [vmem:[#allocation155_spill] sm:$0xff]  ;;  %v13850_v42 = vld [vmem:[#allocation273_spill] sm:$0xff] }
 0x7a2   : >> { %6145 = vmatpush.msrb.mxu3 %v13840_v13  ;;  %6200 = vmatpush.msra.mxu1 %v13841_v3  ;;  %v4850_v17 = vadd.f32 %v13845_v18, %v12249_v49  ;;  %v13846_v56 = vld [vmem:[#allocation276_spill] sm:$0xff]  ;;  %v5340_v26 = vadd.f32 %v11918_v41, %v5311_v7  ;;  %v13849_v20 = vld [vmem:[#allocation183_spill] sm:$0xff]  ;;  %v13853_v3 = vld [vmem:[#allocation154_spill] sm:$0xff] }
 0x7a3   : >> { %6060 = vmatmul.f32.vlgmr.msrb.gmra.mxu0 %v4960_v46  ;;  %6222 = vmatpush.msra.mxu2 %v13842_v29  ;;  %v4934_v53 = vadd.f32 %v13846_v56, %v4905_v38  ;;  %v13847_v36 = vld [vmem:[#allocation160_spill] sm:$0xff]  ;;  %v12352_v22 = vpop.f32.mrf.mxu0  ;;  %v5601_v8 = vadd.f32 %v12258_v45, %v5572_v47  ;;  %v5656_v46 = vadd.f32 %v5655_v21, %v5627_v24  ;;  %v13851_v13 = vld [vmem:[#allocation159_spill] sm:$0xff]  ;;  %v13854_v7 = vld [vmem:[#allocation182_spill] sm:$0xff] }
 0x7a4   : >> { %6146 = vmatpush.msrb.mxu3 %v13843_v4  ;;  %6160 = vmatpush.msra.mxu0 %v13844_v0  ;;  %v4879_v58 = vadd.f32 %v13850_v42, %v4850_v17  ;;  %v5369_v59 = vadd.f32 %v11955_v54, %v5340_v26  ;;  %v13852_v38 = vld [vmem:[#allocation204_spill] sm:$0xff]  ;;  %v13856_v45 = vld [vmem:[#allocation297_spill] sm:$0xff]  ;;  %v5658_v24 = vpop.f32.mrf.mxu2  ;;  %v13857_v47 = vld [vmem:[#allocation158_spill] sm:$0xff]  ;;  %v5687_v54 = vpop.f32.mrf.mxu3 }
 0x7a5   : >> { %6201 = vmatpush.msra.mxu1 %v13847_v36  ;;  %6147 = vmatmul.f32.vlgmr.msrb.gmra.mxu3 %v5395_v51  ;;  %v5685_v41 = vadd.f32 %v5684_v52, %v5656_v46  ;;  %v13855_v51 = vld [vmem:[#allocation291_spill] sm:$0xff]  ;;  %v5285_v21 = vadd.f32 %v13856_v45, %v12274_v34  ;;  %v13858_v4 = vld [vmem:[#allocation302_spill] sm:$0xff]  ;;  %v5630_v17 = vadd.f32 %v12237_v60, %v5601_v8  ;;  %v13860_v52 = vld [vmem:[#allocation153_spill] sm:$0xff] }
 0x7a6   : >> { %6161 = vmatpush.msra.mxu0 %v13848_v31  ;;  %6223 = vmatpush.msra.mxu2 %v13849_v20  ;;  %v4908_v29 = vadd.f32 %v13855_v51, %v4879_v58  ;;  %v4963_v0 = vadd.f32 %v13858_v4, %v4934_v53  ;;  %v13859_v18 = vld [vmem:[#allocation203_spill] sm:$0xff]  ;;  %v13861_v56 = vld [vmem:[#allocation181_spill] sm:$0xff]  ;;  %v5398_v36 = vadd.f32 %v11946_v61, %v5369_v59  ;;  %v12374_v31 = vpop.f32.mrf.mxu1  ;;  %v13863_v20 = vld [vmem:[#allocation152_spill] sm:$0xff]  ;;  %v12399_v4 = vperm.slane %v11991_v14, 6 }
 0x7a7   : >> { %6202 = vmatpush.msra.mxu1 %v13851_v13  ;;  %6247 = vmatpush.msra.mxu3 %v13852_v38  ;;  %v5314_v26 = vadd.f32 %v11938_v11, %v5285_v21  ;;  %v13862_v46 = vld [vmem:[#allocation157_spill] sm:$0xff]  ;;  %v5575_v53 = vadd.f32 %v12228_v33, %v12293_v50  ;;  %v13864_v60 = vld [vmem:[#allocation283_spill] sm:$0xff]  ;;  %v13865_v42 = vld [vmem:[#allocation286_spill] sm:$0xff]  ;;  %v5659_v38 = vadd.f32 %v5658_v24, %v5630_v17 }
 0x7a8   : >> { %6162 = vmatpush.msra.mxu0 %v13853_v3  ;;  %6224 = vmatpush.msra.mxu2 %v13854_v7  ;;  %v4853_v8 = vadd.f32 %v13864_v60, %v12249_v49  ;;  %v4937_v58 = vadd.f32 %v13865_v42, %v4908_v29  ;;  %v13866_v61 = vld [vmem:[#allocation180_spill] sm:$0xff]  ;;  %v13867_v59 = vld [vmem:[#allocation151_spill] sm:$0xff]  ;;  %v13868_v3 = vld [vmem:[#allocation202_spill] sm:$0xff]  ;;  %v5578_v14 = vadd.f32 %v12281_v27, %v12293_v50 }
 0x7a9   : >> { %6203 = vmatpush.msra.mxu1 %v13857_v47  ;;  %6248 = vmatpush.msra.mxu3 %v13859_v18  ;;  %v5343_v11 = vadd.f32 %v11941_v2, %v5314_v26  ;;  %v5604_v13 = vadd.f32 %v12309_v15, %v5575_v53  ;;  %v13869_v33 = vld [vmem:[#allocation284_spill] sm:$0xff]  ;;  %v13870_v49 = vld [vmem:[#allocation179_spill] sm:$0xff]  ;;  %v5688_v29 = vadd.f32 %v5687_v54, %v5659_v38  ;;  %v13871_v2 = vld [vmem:[#allocation150_spill] sm:$0xff] }
 0x7aa   : >> { %6163 = vmatpush.msra.mxu0 %v13860_v52  ;;  %6225 = vmatpush.msra.mxu2 %v13861_v56  ;;  %v13872_v45 = vld [vmem:[#allocation201_spill] sm:$0xff]  ;;  %v13878_v54 = vld [vmem:[#allocation200_spill] sm:$0xff]  ;;  %v5424_v60 = vadd.f32 %v11993_v10, %v12399_v4  ;;  %v13883_v42 = vld [vmem:[#allocation147_spill] sm:$0xff] }
 0x7ab   : >> { %6204 = vmatpush.msra.mxu1 %v13862_v46  ;;  %6063 = vmatmul.f32.gmra.mxu0 %v4963_v0  ;;  %v5372_v7 = vadd.f32 %v11980_v1, %v5343_v11  ;;  %v13873_v21 = vld [vmem:[#allocation301_spill] sm:$0xff]  ;;  %v13875_v0 = vld [vmem:[#allocation306_spill] sm:$0xff]  ;;  %v5633_v17 = vadd.f32 %v12288_v44, %v5604_v13  ;;  %v13880_v53 = vld [vmem:[#allocation148_spill] sm:$0xff] }
 0x7ac   : >> { %6205 = vmatmul.f32.vlgmr.msra.gmra.mxu1 %v5685_v41  ;;  %6164 = vmatpush.msra.mxu0 %v13863_v20  ;;  %v4882_v41 = vadd.f32 %v13869_v33, %v4853_v8  ;;  %v13874_v15 = vld [vmem:[#allocation317_spill] sm:$0xff]  ;;  %v4966_v18 = vadd.f32 %v13875_v0, %v4937_v58  ;;  %v13876_v1 = vld [vmem:[#allocation178_spill] sm:$0xff]  ;;  %v5607_v58 = vadd.f32 %v12352_v22, %v5578_v14  ;;  %v13884_v50 = vld [vmem:[#allocation199_spill] sm:$0xff] }
 0x7ad   : >> { %6150 = vmatmul.f32.gmra.mxu3 %v5398_v36  ;;  %6226 = vmatpush.msra.mxu2 %v13866_v61  ;;  %v12390_v51 = vpop.f32.mrf.mxu0  ;;  %v5288_v24 = vadd.f32 %v13874_v15, %v12274_v34  ;;  %v13877_v52 = vld [vmem:[#allocation149_spill] sm:$0xff]  ;;  %v5401_v26 = vadd.f32 %v11970_v12, %v5372_v7  ;;  %v5661_v36 = vpop.f32.mrf.mxu2  ;;  %v13881_v44 = vld [vmem:[#allocation298_spill] sm:$0xff]  ;;  %v13882_v12 = vld [vmem:[#allocation176_spill] sm:$0xff]  ;;  %v5453_v11 = vadd.f32 %v11996_v9, %v5424_v60 }
 0x7ae   : >> { %6165 = vmatpush.msra.mxu0 %v13867_v59  ;;  %6249 = vmatpush.msra.mxu3 %v13868_v3  ;;  %v4911_v47 = vadd.f32 %v13873_v21, %v4882_v41  ;;  %v5690_v34 = vpop.f32.mrf.mxu3  ;;  %v13879_v46 = vld [vmem:[#allocation177_spill] sm:$0xff]  ;;  %v12416_v8 = vpop.f32.mrf.mxu1  ;;  %v5662_v27 = vadd.f32 %v5661_v36, %v5633_v17  ;;  %v13885_v59 = vld [vmem:[#allocation175_spill] sm:$0xff]  ;;  %v13887_v13 = vld [vmem:[#allocation198_spill] sm:$0xff]  ;;  %v5636_v7 = vadd.f32 %v12333_v63, %v5607_v58 }
 0x7af   : >> { %6227 = vmatpush.msra.mxu2 %v13870_v49  ;;  %v5317_v56 = vadd.f32 %v11962_v39, %v5288_v24  ;;  %v5482_v38 = vadd.f32 %v12042_v32, %v5453_v11  ;;  %v13888_v3 = vld [vmem:[#allocation310_spill] sm:$0xff]  ;;  %v13890_v49 = vld [vmem:[#allocation145_spill] sm:$0xff]  ;;  %v5427_v32 = vadd.f32 %v12021_v55, %v12399_v4  ;;  %v13895_v24 = vld [vmem:[#allocation196_spill] sm:$0xff] }
 0x7b0   : >> { %6166 = vmatpush.msra.mxu0 %v13871_v2  ;;  %6250 = vmatpush.msra.mxu3 %v13872_v45  ;;  %v4940_v20 = vadd.f32 %v13881_v44, %v4911_v47  ;;  %v5691_v10 = vadd.f32 %v5690_v34, %v5662_v27  ;;  %v13889_v22 = vld [vmem:[#allocation174_spill] sm:$0xff]  ;;  %v13891_v9 = vld [vmem:[#allocation197_spill] sm:$0xff]  ;;  %v13893_v2 = vld [vmem:[#allocation144_spill] sm:$0xff] }
 0x7b1   : >> { %6228 = vmatpush.msra.mxu2 %v13876_v1  ;;  %v5346_v39 = vadd.f32 %v11965_v35, %v5317_v56  ;;  %v13886_v35 = vld [vmem:[#allocation146_spill] sm:$0xff]  ;;  %v5511_v45 = vadd.f32 %v12030_v16, %v5482_v38  ;;  %v13894_v47 = vld [vmem:[#allocation143_spill] sm:$0xff]  ;;  %v4513_v34 = vld [vmem:[%s11983_s26 + $0x8] sm:$0x3]  ;;  %s13921_s26 = sld [smem:[#allocation27_spill]] (%p2088_p2) }
 0x7b2   : >> { %6167 = vmatpush.msra.mxu0 %v13877_v52  ;;  %6251 = vmatpush.msra.mxu3 %v13878_v54  ;;  %v4969_v33 = vadd.f32 %v13888_v3, %v4940_v20  ;;  %v13896_v1 = vld [vmem:[#allocation142_spill] sm:$0xff]  ;;  %v13897_v17 = vld [vmem:[#allocation195_spill] sm:$0xff]  ;;  %v13898_v52 = vld [vmem:[#allocation141_spill] sm:$0xff] }
 0x7b3   : >> { %6066 = vmatmul.f32.gmra.mxu0 %v4966_v18  ;;  %6229 = vmatpush.msra.mxu2 %v13879_v46  ;;  %v5375_v61 = vadd.f32 %v12012_v23, %v5346_v39  ;;  %v5540_v55 = vadd.f32 %v12130_v37, %v5511_v45  ;;  %v13899_v54 = vld [vmem:[#allocation194_spill] sm:$0xff]  ;;  %v13901_v46 = vld [vmem:[#allocation192_spill] sm:$0xff]  ;;  %v13902_v14 = vld [vmem:[#allocation191_spill] sm:$0xff] }
 0x7b4   : >> { %6208 = vmatmul.f32.gmra.mxu1 %v5688_v29  ;;  %6168 = vmatpush.msra.mxu0 %v13880_v53  ;;  %v13892_v29 = vld [vmem:[#allocation173_spill] sm:$0xff]  ;;  %v13903_v60 = vld [vmem:[#allocation190_spill] sm:$0xff]  ;;  %v13906_v11 = vld [vmem:[#allocation208_spill] sm:$0xff] }
 0x7b5   : >> { %6153 = vmatmul.f32.gmra.mxu3 %v5401_v26  ;;  %6230 = vmatpush.msra.mxu2 %v13882_v12  ;;  %v5404_v23 = vadd.f32 %v12001_v62, %v5375_v61  ;;  %v5664_v21 = vpop.f32.mrf.mxu2  ;;  %v5456_v62 = vadd.f32 %v12025_v5, %v5427_v32  ;;  %v13900_v26 = vld [vmem:[#allocation193_spill] sm:$0xff]  ;;  %v5430_v5 = vadd.f32 %v12052_v28, %v12399_v4 }
 0x7b6   : >> { %6169 = vmatpush.msra.mxu0 %v13883_v42  ;;  %6252 = vmatpush.msra.mxu3 %v13884_v50  ;;  %v5693_v63 = vpop.f32.mrf.mxu3  ;;  %v5665_v15 = vadd.f32 %v5664_v21, %v5636_v7  ;;  %v5748_v0 = vpop.f32.mrf.mxu1  ;;  %v5433_v12 = vadd.f32 %v12085_v25, %v12399_v4 }
 0x7b7   : >> { %6231 = vmatpush.msra.mxu2 %v13885_v59  ;;  %v5716_v41 = vpop.f32.mrf.mxu0  ;;  %v5485_v16 = vadd.f32 %v12075_v57, %v5456_v62  ;;  %v5459_v37 = vadd.f32 %v12057_v6, %v5430_v5  ;;  %v4524_v57 = vperm.slane %v4513_v34, 0 }
 0x7b8   : >> { %6170 = vmatpush.msra.mxu0 %v13886_v35  ;;  %6253 = vmatpush.msra.mxu3 %v13887_v13  ;;  %v5694_v18 = vadd.f32 %v5693_v63, %v5665_v15 }
 0x7b9   : >> { %6232 = vmatpush.msra.mxu2 %v13889_v22  ;;  %v5514_v36 = vadd.f32 %v12062_v43, %v5485_v16  ;;  %v5488_v53 = vadd.f32 %v12111_v19, %v5459_v37  ;;  %v5714_v28 = vadd.f32 %v12390_v51, %v4524_v57  ;;  %v13904_v43 = vld [vmem:[#allocation189_spill] sm:$0xff]  ;;  %v5462_v19 = vadd.f32 %v12090_v40, %v5433_v12 }
 0x7ba   : >> { %6171 = vmatpush.msra.mxu0 %v13890_v49  ;;  %6254 = vmatpush.msra.mxu3 %v13891_v9  ;;  %v5717_v38 = vadd.f32 %v5716_v41, %v4524_v57 }
 0x7bb   : >> { %6069 = vmatmul.f32.gmra.mxu0 %v4969_v33  ;;  %6233 = vmatpush.msra.mxu2 %v13892_v29  ;;  %v5543_v20 = vadd.f32 %v12178_v30, %v5514_v36  ;;  %v5517_v6 = vadd.f32 %v12095_v48, %v5488_v53  ;;  %v5743_v27 = vadd.f32 %v12374_v31, %v5714_v28  ;;  %v13905_v30 = vld [vmem:[#allocation212_spill] sm:$0xff]  ;;  %v13908_v33 = vld [vmem:[#allocation279_spill] sm:$0xff] }
 0x7bc   : >> { %6211 = vmatmul.f32.gmra.mxu1 %v5691_v10  ;;  %6172 = vmatpush.msra.mxu0 %v13893_v2  ;;  %v5491_v50 = vadd.f32 %v13905_v30, %v5462_v19  ;;  %v13907_v10 = vld [vmem:[#allocation228_spill] sm:$0xff]  ;;  %v5746_v40 = vadd.f32 %v12416_v8, %v5717_v38 }
 0x7bd   : >> { %6156 = vmatmul.f32.gmra.mxu3 %v5404_v23  ;;  %v5771_v39 = vpop.f32.mrf.mxu2  ;;  %v5546_v61 = vadd.f32 %v13906_v11, %v5517_v6 }
 0x7be   : >> { %6173 = vmatpush.msra.mxu0 %v13894_v47  ;;  %6255 = vmatpush.msra.mxu3 %v13895_v24  ;;  %v5751_v44 = vpop.f32.mrf.mxu1  ;;  %v5800_v42 = vpop.f32.mrf.mxu3  ;;  %v5772_v51 = vadd.f32 %v5771_v39, %v5743_v27  ;;  %v5520_v35 = vadd.f32 %v13907_v10, %v5491_v50 }
 0x7c0   : >> { %6174 = vmatpush.msra.mxu0 %v13896_v1  ;;  %6256 = vmatpush.msra.mxu3 %v13897_v17  ;;  %v5801_v25 = vadd.f32 %v5800_v42, %v5772_v51  ;;  %v5549_v22 = vadd.f32 %v13908_v33, %v5520_v35 }
 0x7c1   : >> { %v5719_v56 = vpop.f32.mrf.mxu0 }
 0x7c2   : >> { %6175 = vmatpush.msra.mxu0 %v13898_v52  ;;  %6257 = vmatpush.msra.mxu3 %v13899_v54  ;;  %v5720_v9 = vadd.f32 %v5719_v56, %v4524_v57  ;;  %v4525_v56 = vperm.slane %v4513_v34, 1 }
 0x7c3   : >> { %6176 = vmatmul.f32.vlgmr.msra.gmra.mxu0 %v5540_v55 }
 0x7c4   : >> { %6214 = vmatmul.f32.gmra.mxu1 %v5694_v18  ;;  %6258 = vmatpush.msra.mxu3 %v13900_v26  ;;  %v5749_v45 = vadd.f32 %v5748_v0, %v5720_v9 }
 0x7c5   : >> { %v5774_v13 = vpop.f32.mrf.mxu2 }
 0x7c6   : >> { %6259 = vmatpush.msra.mxu3 %v13901_v46  ;;  %v5858_v59 = vpop.f32.mrf.mxu1  ;;  %v5803_v4 = vpop.f32.mrf.mxu3  ;;  %v5775_v7 = vadd.f32 %v5774_v13, %v5746_v40 }
 0x7c7   : >> { %v5859_v0 = vadd.f32 %v5858_v59, %v4525_v56 }
 0x7c8   : >> { %6260 = vmatpush.msra.mxu3 %v13902_v14  ;;  %v5804_v23 = vadd.f32 %v5803_v4, %v5775_v7 }
 0x7ca   : >> { %6261 = vmatpush.msra.mxu3 %v13903_v60 }
 0x7cb   : >> { %6179 = vmatmul.f32.gmra.mxu0 %v5543_v20  ;;  %v5722_v58 = vpop.f32.mrf.mxu0 }
 0x7cc   : >> { %6262 = vmatpush.msra.mxu3 %v13904_v43  ;;  %v5723_v47 = vadd.f32 %v5722_v58, %v4524_v57 }
 0x7cd   : >> { %v5777_v49 = vpop.f32.mrf.mxu2 }
 0x7ce   : >> { %v5861_v31 = vpop.f32.mrf.mxu1  ;;  %v5806_v29 = vpop.f32.mrf.mxu3  ;;  %v5778_v21 = vadd.f32 %v5777_v49, %v5749_v45  ;;  %v5752_v18 = vadd.f32 %v5751_v44, %v5723_v47 }
 0x7cf   : >> { %v5862_v20 = vadd.f32 %v5861_v31, %v4525_v56 }
 0x7d0   : >> { %v5807_v15 = vadd.f32 %v5806_v29, %v5778_v21 }
 0x7d3   : >> { %6182 = vmatmul.f32.gmra.mxu0 %v5546_v61 }
 0x7d5   : >> { %v5829_v48 = vpop.f32.mrf.mxu0  ;;  %v5780_v63 = vpop.f32.mrf.mxu2 }
 0x7d6   : >> { %v5830_v3 = vadd.f32 %v5829_v48, %v5801_v25  ;;  %v5864_v41 = vpop.f32.mrf.mxu1  ;;  %v5809_v24 = vpop.f32.mrf.mxu3  ;;  %v5781_v17 = vadd.f32 %v5780_v63, %v5752_v18 }
 0x7d7   : >> { %v5865_v42 = vadd.f32 %v5864_v41, %v4525_v56 }
 0x7d8   : >> { %6234 = vmatmul.f32.vlgmr.msra.gmra.mxu2 %v5830_v3  ;;  %v5810_v16 = vadd.f32 %v5809_v24, %v5781_v17 }
 0x7db   : >> { %6185 = vmatmul.f32.gmra.mxu0 %v5549_v22 }
 0x7dd   : >> { %v5887_v55 = vpop.f32.mrf.mxu2 }
 0x7de   : >> { %v5867_v1 = vpop.f32.mrf.mxu1  ;;  %v5916_v52 = vpop.f32.mrf.mxu3  ;;  %v5888_v36 = vadd.f32 %v5887_v55, %v5859_v0 }
 0x7df   : >> { %v5832_v2 = vpop.f32.mrf.mxu0  ;;  %v5868_v59 = vadd.f32 %v5867_v1, %v4525_v56 }
 0x7e0   : >> { %v5833_v32 = vadd.f32 %v5832_v2, %v5804_v23  ;;  %v5917_v37 = vadd.f32 %v5916_v52, %v5888_v36 }
 0x7e2   : >> { %6237 = vmatmul.f32.gmra.mxu2 %v5833_v32 }
 0x7e5   : >> { %v5890_v46 = vpop.f32.mrf.mxu2 }
 0x7e6   : >> { %v5974_v5 = vpop.f32.mrf.mxu1  ;;  %v5891_v60 = vadd.f32 %v5890_v46, %v5862_v20 }
 0x7e8   : >> { %v5919_v57 = vpop.f32.mrf.mxu3 }
 0x7e9   : >> { %v5835_v62 = vpop.f32.mrf.mxu0  ;;  %v5920_v28 = vadd.f32 %v5919_v57, %v5891_v60 }
 0x7ea   : >> { %v5836_v8 = vadd.f32 %v5835_v62, %v5807_v15 }
 0x7ec   : >> { %6240 = vmatmul.f32.gmra.mxu2 %v5836_v8 }
 0x7ed   : >> { %v5893_v43 = vpop.f32.mrf.mxu2 }
 0x7ee   : >> { %v5977_v39 = vpop.f32.mrf.mxu1  ;;  %v5894_v19 = vadd.f32 %v5893_v43, %v5865_v42 }
 0x7f2   : >> { %v5922_v34 = vpop.f32.mrf.mxu3 }
 0x7f3   : >> { %v5838_v54 = vpop.f32.mrf.mxu0  ;;  %v5923_v27 = vadd.f32 %v5922_v34, %v5894_v19 }
 0x7f4   : >> { %v5839_v26 = vadd.f32 %v5838_v54, %v5810_v16 }
 0x7f5   : >> { %v5896_v61 = vpop.f32.mrf.mxu2 }
 0x7f6   : >> { %6243 = vmatmul.f32.gmra.mxu2 %v5839_v26  ;;  %v5980_v30 = vpop.f32.mrf.mxu1  ;;  %v5897_v35 = vadd.f32 %v5896_v61, %v5868_v59 }
 0x7fc   : >> { %v5925_v10 = vpop.f32.mrf.mxu3 }
 0x7fd   : >> { %v5945_v14 = vpop.f32.mrf.mxu0  ;;  %v5926_v13 = vadd.f32 %v5925_v10, %v5897_v35  ;;  %v6003_v3 = vpop.f32.mrf.mxu2 }
 0x7fe   : >> { %v5946_v53 = vadd.f32 %v5945_v14, %v5917_v37  ;;  %v5983_v4 = vpop.f32.mrf.mxu1 }
 0x800   : >> { %v5975_v44 = vadd.f32 %v5974_v5, %v5946_v53 }
 0x802   : >> { %6263 = vmatmul.f32.vlgmr.msra.gmra.mxu3 %v5975_v44 }
 0x805   : >> { %v6006_v33 = vpop.f32.mrf.mxu2 }
 0x806   : >> { %v5948_v12 = vpop.f32.mrf.mxu0  ;;  %v6032_v22 = vpop.f32.mrf.mxu3 }
 0x807   : >> { %v5949_v6 = vadd.f32 %v5948_v12, %v5920_v28  ;;  %v6090_v23 = vpop.f32.mrf.mxu1  ;;  %v6033_v8 = vadd.f32 %v6032_v22, %v6003_v3 }
 0x809   : >> { %v5978_v58 = vadd.f32 %v5977_v39, %v5949_v6 }
 0x80b   : >> { %6266 = vmatmul.f32.gmra.mxu3 %v5978_v58 }
 0x80d   : >> { %v6009_v40 = vpop.f32.mrf.mxu2 }
 0x80e   : >> { %v5951_v50 = vpop.f32.mrf.mxu0 }
 0x80f   : >> { %v5952_v11 = vadd.f32 %v5951_v50, %v5923_v27  ;;  %v6035_v31 = vpop.f32.mrf.mxu3  ;;  %v6093_v45 = vpop.f32.mrf.mxu1 }
 0x810   : >> { %v6036_v54 = vadd.f32 %v6035_v31, %v6006_v33 }
 0x811   : >> { %v5981_v51 = vadd.f32 %v5980_v30, %v5952_v11 }
 0x813   : >> { %6269 = vmatmul.f32.gmra.mxu3 %v5981_v51 }
 0x815   : >> { %v6012_v7 = vpop.f32.mrf.mxu2 }
 0x817   : >> { %v5954_v38 = vpop.f32.mrf.mxu0  ;;  %v6038_v49 = vpop.f32.mrf.mxu3 }
 0x818   : >> { %v5955_v25 = vadd.f32 %v5954_v38, %v5926_v13  ;;  %v6096_v47 = vpop.f32.mrf.mxu1  ;;  %v6039_v53 = vadd.f32 %v6038_v49, %v6009_v40 }
 0x81a   : >> { %v5984_v48 = vadd.f32 %v5983_v4, %v5955_v25 }
 0x81c   : >> { %6272 = vmatmul.f32.gmra.mxu3 %v5984_v48 }
 0x81d   : >> { %v6119_v29 = vpop.f32.mrf.mxu2 }
 0x820   : >> { %v6061_v9 = vpop.f32.mrf.mxu0  ;;  %v6041_v2 = vpop.f32.mrf.mxu3 }
 0x821   : >> { %v6099_v18 = vpop.f32.mrf.mxu1  ;;  %v6062_v1 = vadd.f32 %v6061_v9, %v6033_v8  ;;  %v6042_v19 = vadd.f32 %v6041_v2, %v6012_v7 }
 0x823   : >> { %v6091_v52 = vadd.f32 %v6090_v23, %v6062_v1 }
 0x825   : >> { %v6122_v41 = vpop.f32.mrf.mxu2  ;;  %v6120_v26 = vadd.f32 %v6119_v29, %v6091_v52 }
 0x828   : >> { %v6064_v32 = vpop.f32.mrf.mxu0  ;;  %v6148_v21 = vpop.f32.mrf.mxu3 }
 0x829   : >> { %v6065_v56 = vadd.f32 %v6064_v32, %v6036_v54  ;;  %v6206_v0 = vpop.f32.mrf.mxu1  ;;  %v6149_v36 = vadd.f32 %v6148_v21, %v6120_v26 }
 0x82b   : >> { %v6094_v37 = vadd.f32 %v6093_v45, %v6065_v56  ;;  %v6620_v45 = vld [vmem:[#allocation3] sm:$0xff] (%p2088_p2) }
 0x82c   : > { %6655 = vmatpush.msra.mxu0 (%p2088_p2), %v6620_v45 }
 0x82d   : >> { %v6125_v15 = vpop.f32.mrf.mxu2  ;;  %v6123_v44 = vadd.f32 %v6122_v41, %v6094_v37  ;;  %v6622_v41 = vld [vmem:[#allocation3 + $0x10] sm:$0xff] (%p2088_p2) }
 0x82e   : > { %6737 = vmatpush.msra.mxu2 (%p2088_p2), %v6622_v41 }
 0x830   : >> { %v6067_v63 = vpop.f32.mrf.mxu0  ;;  %v6151_v24 = vpop.f32.mrf.mxu3 }
 0x831   : >> { %v6068_v20 = vadd.f32 %v6067_v63, %v6039_v53  ;;  %v6152_v39 = vadd.f32 %v6151_v24, %v6123_v44  ;;  %v6209_v28 = vpop.f32.mrf.mxu1 }
 0x833   : >> { %v6097_v34 = vadd.f32 %v6096_v47, %v6068_v20 }
 0x835   : >> { %v6128_v17 = vpop.f32.mrf.mxu2  ;;  %v6126_v50 = vadd.f32 %v6125_v15, %v6097_v34 }
 0x838   : >> { %v6070_v62 = vpop.f32.mrf.mxu0  ;;  %v6154_v55 = vpop.f32.mrf.mxu3 }
 0x839   : >> { %v6071_v30 = vadd.f32 %v6070_v62, %v6042_v19  ;;  %v6155_v61 = vadd.f32 %v6154_v55, %v6126_v50  ;;  %v6212_v38 = vpop.f32.mrf.mxu1 }
 0x83b   : >> { %v6100_v10 = vadd.f32 %v6099_v18, %v6071_v30 }
 0x83d   : >> { %v6129_v4 = vadd.f32 %v6128_v17, %v6100_v10 }
 0x840   : >> { %v6177_v16 = vpop.f32.mrf.mxu0  ;;  %v6157_v46 = vpop.f32.mrf.mxu3 }
 0x841   : >> { %v6178_v57 = vadd.f32 %v6177_v16, %v6149_v36  ;;  %v6158_v33 = vadd.f32 %v6157_v46, %v6129_v4  ;;  %v6215_v49 = vpop.f32.mrf.mxu1 }
 0x843   : >> { %v6207_v60 = vadd.f32 %v6206_v0, %v6178_v57 }
 0x848   : >> { %v6180_v14 = vpop.f32.mrf.mxu0 }
 0x849   : >> { %v6181_v42 = vadd.f32 %v6180_v14, %v6152_v39 }
 0x84b   : >> { %v6210_v11 = vadd.f32 %v6209_v28, %v6181_v42 }
 0x850   : >> { %v6183_v27 = vpop.f32.mrf.mxu0 }
 0x851   : >> { %v6184_v35 = vadd.f32 %v6183_v27, %v6155_v61 }
 0x853   : >> { %v6213_v48 = vadd.f32 %v6212_v38, %v6184_v35 }
 0x858   : >> { %v6186_v3 = vpop.f32.mrf.mxu0 }
 0x859   : >> { %v6187_v31 = vadd.f32 %v6186_v3, %v6158_v33 }
 0x85b   : >> { %v6235_v5 = vpop.f32.mrf.mxu2  ;;  %v6216_v23 = vadd.f32 %v6215_v49, %v6187_v31 }
 0x85c   : >> { %v6236_v43 = vadd.f32 %v6235_v5, %v6207_v60 }
 0x865   : >> { %v6238_v12 = vpop.f32.mrf.mxu2 }
 0x866   : >> { %v6239_v59 = vadd.f32 %v6238_v12, %v6210_v11 }
 0x86f   : >> { %v6241_v25 = vpop.f32.mrf.mxu2 }
 0x870   : >> { %v6242_v22 = vadd.f32 %v6241_v25, %v6213_v48 }
 0x879   : >> { %v6244_v9 = vpop.f32.mrf.mxu2 }
 0x87a   : >> { %v6245_v29 = vadd.f32 %v6244_v9, %v6216_v23 }
 0x885   : >> { %v6264_v6 = vpop.f32.mrf.mxu3 }
 0x886   : >> { %v6265_v58 = vadd.f32 %v6264_v6, %v6236_v43 }
 0x888   : >> { %6279 = vst.msk [vmem:[%s6277_s1] sm:$0xff] %vm6278_vm11, %v6265_v58 }
 0x88e   : >> { %v6267_v51 = vpop.f32.mrf.mxu3 }
 0x88f   : >> { %v6268_v13 = vadd.f32 %v6267_v51, %v6239_v59 }
 0x891   : >> { %6280 = vst.msk [vmem:[%s6277_s1 + $0x8] sm:$0xff] %vm6278_vm11, %v6268_v13 }
 0x896   : >> { %v6270_v40 = vpop.f32.mrf.mxu3 }
 0x897   : >> { %v6271_v7 = vadd.f32 %v6270_v40, %v6242_v22 }
 0x899   : >> { %6281 = vst.msk [vmem:[%s6277_s1 + $0x10] sm:$0xff] %vm6278_vm11, %v6271_v7 }
 0x89e   : > { %2090 = sbr.rel (!%p2088_p2) target bundleno = 1058 (0x422), region = 283 }
 0x89f   : >> { %v6273_v2 = vpop.f32.mrf.mxu3 }
 0x8a0   : >> { %v6274_v32 = vadd.f32 %v6273_v2, %v6245_v29 }
 0x8a2   : >> { %6282 = vst.msk [vmem:[%s6277_s1 + $0x18] sm:$0xff] %vm6278_vm11, %v6274_v32  ;;  %s13923_s1 = sld [smem:[#allocation29_spill]] (%p2088_p2) }
 0x8a9   : > { %v12479_v21 = vld [vmem:[#allocation4] sm:$0xff]  ;;  %v12495_v17 = vld [vmem:[#allocation4 + $0x8] sm:$0xff]  ;;  %v12521_v20 = vld [vmem:[#allocation4 + $0x10] sm:$0xff] }
 0x8aa   : > { %v12481_v63 = vld [vmem:[#allocation4 + $0x20] sm:$0xff]  ;;  %v6316_v24 = vsel %vm6278_vm11, %v12479_v21, -inf  ;;  %v12497_v55 = vld [vmem:[#allocation4 + $0x28] sm:$0xff]  ;;  %v6331_v56 = vsel %vm6278_vm11, %v12495_v17, -inf  ;;  %v12523_v44 = vld [vmem:[#allocation4 + $0x30] sm:$0xff]  ;;  %v6346_v6 = vsel %vm6278_vm11, %v12521_v20, -inf }
 0x8ab   : > { %v12483_v47 = vld [vmem:[#allocation4 + $0x40] sm:$0xff]  ;;  %v6317_v62 = vsel %vm6278_vm11, %v12481_v63, -inf  ;;  %v12501_v52 = vld [vmem:[#allocation4 + $0x48] sm:$0xff]  ;;  %v6332_v26 = vsel %vm6278_vm11, %v12497_v55, -inf  ;;  %v12527_v43 = vld [vmem:[#allocation4 + $0x50] sm:$0xff]  ;;  %v6347_v34 = vsel %vm6278_vm11, %v12523_v44, -inf }
 0x8ac   : > { %v12485_v15 = vld [vmem:[#allocation4 + $0x60] sm:$0xff]  ;;  %v6319_v8 = vsel %vm6278_vm11, %v12483_v47, -inf  ;;  %v6318_v1 = vmax.f32 %v6316_v24, %v6317_v62  ;;  %v12503_v54 = vld [vmem:[#allocation4 + $0x68] sm:$0xff]  ;;  %v6333_v46 = vmax.f32 %v6331_v56, %v6332_v26  ;;  %v6334_v37 = vsel %vm6278_vm11, %v12501_v52, -inf  ;;  %v12529_v12 = vld [vmem:[#allocation4 + $0x70] sm:$0xff] }
 0x8ad   : > { %v12493_v18 = vld [vmem:[#allocation4 + $0x80] sm:$0xff]  ;;  %v6321_v16 = vsel %vm6278_vm11, %v12485_v15, -inf  ;;  %v12511_v36 = vld [vmem:[#allocation4 + $0x88] sm:$0xff]  ;;  %v6336_v53 = vsel %vm6278_vm11, %v12503_v54, -inf  ;;  %v12541_v27 = vld [vmem:[#allocation4 + $0x90] sm:$0xff]  ;;  %v6348_v30 = vmax.f32 %v6346_v6, %v6347_v34  ;;  %v6349_v50 = vsel %vm6278_vm11, %v12527_v43, -inf }
 0x8ae   : > { %v12509_v0 = vld [vmem:[#allocation4 + $0xa0] sm:$0xff]  ;;  %v6320_v5 = vmax.f32 %v6318_v1, %v6319_v8  ;;  %v6323_v14 = vsel %vm6278_vm11, %v12493_v18, -inf  ;;  %v12525_v39 = vld [vmem:[#allocation4 + $0xa8] sm:$0xff]  ;;  %v6335_v28 = vmax.f32 %v6333_v46, %v6334_v37  ;;  %v6338_v19 = vsel %vm6278_vm11, %v12511_v36, -inf  ;;  %v12547_v51 = vld [vmem:[#allocation4 + $0xb0] sm:$0xff] }
 0x8af   : > { %v12515_v57 = vld [vmem:[#allocation4 + $0xc0] sm:$0xff]  ;;  %v6325_v58 = vsel %vm6278_vm11, %v12509_v0, -inf  ;;  %v12545_v61 = vld [vmem:[#allocation4 + $0xc8] sm:$0xff]  ;;  %v6351_v10 = vsel %vm6278_vm11, %v12529_v12, -inf  ;;  %v6340_v38 = vsel %vm6278_vm11, %v12525_v39, -inf  ;;  %v6350_v25 = vmax.f32 %v6348_v30, %v6349_v50  ;;  %v12557_v4 = vld [vmem:[#allocation4 + $0x18] sm:$0xff] }
 0x8b0   : > { %v6322_v60 = vmax.f32 %v6320_v5, %v6321_v16  ;;  %v12535_v42 = vld [vmem:[#allocation4 + $0xe0] sm:$0xff]  ;;  %v6337_v59 = vmax.f32 %v6335_v28, %v6336_v53  ;;  %v6327_v35 = vsel %vm6278_vm11, %v12515_v57, -inf  ;;  %v12553_v13 = vld [vmem:[#allocation4 + $0xe8] sm:$0xff]  ;;  %v12559_v48 = vld [vmem:[#allocation4 + $0x38] sm:$0xff]  ;;  %v6353_v7 = vsel %vm6278_vm11, %v12541_v27, -inf }
 0x8b1   : > { %v6329_v33 = vsel %vm6278_vm11, %v12535_v42, -inf  ;;  %v12563_v40 = vld [vmem:[#allocation4 + $0xd0] sm:$0xff]  ;;  %v6342_v49 = vsel %vm6278_vm11, %v12545_v61, -inf  ;;  %v6352_v9 = vmax.f32 %v6350_v25, %v6351_v10  ;;  %v6355_v23 = vsel %vm6278_vm11, %v12547_v51, -inf  ;;  %v12573_v29 = vld [vmem:[#allocation4 + $0x58] sm:$0xff] }
 0x8b2   : > { %v6324_v11 = vmax.f32 %v6322_v60, %v6323_v14  ;;  %v6339_v22 = vmax.f32 %v6337_v59, %v6338_v19  ;;  %v12565_v31 = vld [vmem:[#allocation4 + $0xf0] sm:$0xff]  ;;  %v12575_v2 = vld [vmem:[#allocation4 + $0x78] sm:$0xff]  ;;  %v6361_v41 = vsel %vm6278_vm11, %v12557_v4, -inf  ;;  %v6362_v24 = vsel %vm6278_vm11, %v12559_v48, -inf }
 0x8b3   : > { %v6344_v62 = vsel %vm6278_vm11, %v12553_v13, -inf  ;;  %v6354_v8 = vmax.f32 %v6352_v9, %v6353_v7  ;;  %v6357_v56 = vsel %vm6278_vm11, %v12563_v40, -inf  ;;  %v6359_v26 = vsel %vm6278_vm11, %v12565_v31, -inf  ;;  %v12587_v5 = vld [vmem:[#allocation4 + $0x98] sm:$0xff] }
 0x8b4   : > { %v6326_v3 = vmax.f32 %v6324_v11, %v6325_v58  ;;  %v6341_v45 = vmax.f32 %v6339_v22, %v6340_v38  ;;  %v6363_v37 = vmax.f32 %v6361_v41, %v6362_v24  ;;  %v6364_v14 = vsel %vm6278_vm11, %v12573_v29, -inf }
 0x8b5   : > { %v6356_v46 = vmax.f32 %v6354_v8, %v6355_v23  ;;  %v6366_v53 = vsel %vm6278_vm11, %v12575_v2, -inf  ;;  %v6368_v50 = vsel %vm6278_vm11, %v12587_v5, -inf }
 0x8b6   : > { %v6328_v32 = vmax.f32 %v6326_v3, %v6327_v35  ;;  %v6343_v16 = vmax.f32 %v6341_v45, %v6342_v49 }
 0x8b7   : > { %v6358_v25 = vmax.f32 %v6356_v46, %v6357_v56 }
 0x8b8   : > { %v6330_v1 = vmax.f32 %v6328_v32, %v6329_v33  ;;  %v6345_v35 = vmax.f32 %v6343_v16, %v6344_v62  ;;  %v12607_v33 = vld [vmem:[#allocation4 + $0xb8] sm:$0xff] }
 0x8b9   : > { %v12619_v24 = vmax.f32 %v6358_v25, %v6359_v26 }
 0x8ba   : > { %v6376_v60 = vsub.f32 %v12479_v21, %v6330_v1  ;;  %v6380_v28 = vsub.f32 %v12481_v63, %v6330_v1  ;;  %v6384_v6 = vsub.f32 %v12483_v47, %v6330_v1  ;;  %v6388_v34 = vsub.f32 %v12485_v15, %v6330_v1 }
 0x8bb   : > { %v6392_v58 = vsub.f32 %v12493_v18, %v6330_v1  ;;  %v6396_v19 = vsub.f32 %v12509_v0, %v6330_v1  ;;  %v6400_v30 = vsub.f32 %v12515_v57, %v6330_v1  ;;  %v6404_v21 = vsub.f32 %v12535_v42, %v6330_v1 }
 0x8bc   : > { %v6408_v11 = vmul.f32 1.442695, %v6376_v60  ;;  %v6416_v59 = vmul.f32 1.442695, %v6380_v28  ;;  %v6424_v10 = vmul.f32 1.442695, %v6384_v6  ;;  %v6365_v47 = vmax.f32 %v6363_v37, %v6364_v14 }
 0x8bd   : > { %v6432_v63 = vmul.f32 1.442695, %v6388_v34  ;;  %v6440_v38 = vmul.f32 1.442695, %v6392_v58  ;;  %v6448_v15 = vmul.f32 1.442695, %v6396_v19  ;;  %v6377_v18 = vsub.f32 %v12495_v17, %v6345_v35 }
 0x8be   : > { %8156 = vpow2.f32 %v6408_v11  ;;  %v6381_v0 = vsub.f32 %v12497_v55, %v6345_v35  ;;  %v6385_v57 = vsub.f32 %v12501_v52, %v6345_v35  ;;  %v6389_v3 = vsub.f32 %v12503_v54, %v6345_v35  ;;  %v6621_v6 = vld [vmem:[#allocation3 + $0x8] sm:$0xff]  ;;  %v6623_v34 = vld [vmem:[#allocation3 + $0x18] sm:$0xff] }
 0x8bf   : > { %8158 = vpow2.f32 %v6416_v59  ;;  %v6456_v22 = vmul.f32 1.442695, %v6400_v30  ;;  %v6393_v42 = vsub.f32 %v12511_v36, %v6345_v35  ;;  %v6397_v7 = vsub.f32 %v12525_v39, %v6345_v35  ;;  %6696 = vmatpush.msra.mxu1 %v6621_v6  ;;  %6778 = vmatpush.msra.mxu3 %v6623_v34 }
 0x8c0   : > { %8160 = vpow2.f32 %v6424_v10  ;;  %v6464_v49 = vmul.f32 1.442695, %v6404_v21  ;;  %v6401_v17 = vsub.f32 %v12545_v61, %v6345_v35  ;;  %v6405_v9 = vsub.f32 %v12553_v13, %v6345_v35 }
 0x8c1   : > { %8162 = vpow2.f32 %v6432_v63  ;;  %v6410_v55 = vmul.f32 1.442695, %v6377_v18  ;;  %v6367_v23 = vmax.f32 %v6365_v47, %v6366_v53  ;;  %v12615_v52 = vsel %vm6278_vm11, %v12607_v33, -inf }
 0x8c2   : > { %8164 = vpow2.f32 %v6440_v38  ;;  %v6418_v54 = vmul.f32 1.442695, %v6381_v0  ;;  %v6426_v32 = vmul.f32 1.442695, %v6385_v57  ;;  %v6434_v45 = vmul.f32 1.442695, %v6389_v3 }
 0x8c3   : > { %8166 = vpow2.f32 %v6448_v15  ;;  %v6442_v39 = vmul.f32 1.442695, %v6393_v42  ;;  %v6450_v41 = vmul.f32 1.442695, %v6397_v7  ;;  %v6458_v62 = vmul.f32 1.442695, %v6401_v17 }
 0x8c4   : > { %v12617_v36 = vpop.eup %8156  ;;  %8168 = vpow2.f32 %v6456_v22  ;;  %v6466_v8 = vmul.f32 1.442695, %v6405_v9  ;;  %v6378_v56 = vsub.f32 %v12521_v20, %v12619_v24  ;;  %v12631_v46 = vmax.f32 %v6367_v23, %v6368_v50  ;;  %v12677_v22 = vld [vmem:[#allocation4 + $0xd8] sm:$0xff] }
 0x8c5   : > { %v12621_v61 = vpop.eup %8158  ;;  %8170 = vpow2.f32 %v6464_v49  ;;  %v6472_v13 = vsel %vm6278_vm11, %v12617_v36, 0.0  ;;  %v6382_v53 = vsub.f32 %v12523_v44, %v12619_v24  ;;  %v6386_v20 = vsub.f32 %v12527_v43, %v12619_v24 }
 0x8c6   : > { %v12625_v1 = vpop.eup %8160  ;;  %v6473_v16 = vsel %vm6278_vm11, %v12621_v61, 0.0  ;;  %8172 = vpow2.f32 %v6410_v55  ;;  %v6390_v58 = vsub.f32 %v12529_v12, %v12619_v24  ;;  %v6394_v50 = vsub.f32 %v12541_v27, %v12619_v24 }
 0x8c7   : > { %v12633_v26 = vpop.eup %8162  ;;  %v6474_v37 = vadd.f32 %v6473_v16, %v6472_v13  ;;  %v6475_v14 = vsel %vm6278_vm11, %v12625_v1, 0.0  ;;  %8174 = vpow2.f32 %v6418_v54  ;;  %v6398_v12 = vsub.f32 %v12547_v51, %v12619_v24 }
 0x8c8   : > { %v12639_v60 = vpop.eup %8164  ;;  %v6477_v28 = vsel %vm6278_vm11, %v12633_v26, 0.0  ;;  %8176 = vpow2.f32 %v6426_v32  ;;  %v6402_v59 = vsub.f32 %v12563_v40, %v12619_v24  ;;  %v6406_v21 = vsub.f32 %v12565_v31, %v12619_v24 }
 0x8c9   : > { %v12647_v19 = vpop.eup %8166  ;;  %v6476_v30 = vadd.f32 %v6475_v14, %v6474_v37  ;;  %v6479_v44 = vsel %vm6278_vm11, %v12639_v60, 0.0  ;;  %8178 = vpow2.f32 %v6434_v45  ;;  %v6412_v27 = vmul.f32 1.442695, %v6378_v56 }
 0x8ca   : > { %v12653_v11 = vpop.eup %8168  ;;  %v6481_v43 = vsel %vm6278_vm11, %v12647_v19, 0.0  ;;  %8180 = vpow2.f32 %v6442_v39  ;;  %v6420_v47 = vmul.f32 1.442695, %v6382_v53  ;;  %v6428_v15 = vmul.f32 1.442695, %v6386_v20 }
 0x8cb   : > { %v12661_v10 = vpop.eup %8170  ;;  %v6478_v35 = vadd.f32 %v6477_v28, %v6476_v30  ;;  %8182 = vpow2.f32 %v6450_v41  ;;  %v6483_v38 = vsel %vm6278_vm11, %v12653_v11, 0.0  ;;  %v6436_v25 = vmul.f32 1.442695, %v6390_v58 }
 0x8cc   : > { %v12665_v63 = vpop.eup %8172  ;;  %8184 = vpow2.f32 %v6458_v62  ;;  %v6444_v57 = vmul.f32 1.442695, %v6394_v50  ;;  %v6452_v3 = vmul.f32 1.442695, %v6398_v12  ;;  %v6485_v55 = vsel %vm6278_vm11, %v12661_v10, 0.0  ;;  %v12695_v62 = vld [vmem:[#allocation4 + $0xf8] sm:$0xff] }
 0x8cd   : > { %v12669_v51 = vpop.eup %8174  ;;  %v6480_v18 = vadd.f32 %v6479_v44, %v6478_v35  ;;  %8186 = vpow2.f32 %v6466_v8  ;;  %v6487_v40 = vsel %vm6278_vm11, %v12665_v63, 0.0  ;;  %v6460_v54 = vmul.f32 1.442695, %v6402_v59 }
 0x8ce   : > { %v12673_v0 = vpop.eup %8176  ;;  %v6488_v31 = vsel %vm6278_vm11, %v12669_v51, 0.0  ;;  %8188 = vpow2.f32 %v6412_v27  ;;  %v6372_v41 = vsel %vm6278_vm11, %v12677_v22, -inf  ;;  %v6468_v13 = vmul.f32 1.442695, %v6406_v21 }
 0x8cf   : > { %v12679_v42 = vpop.eup %8178  ;;  %v6482_v7 = vadd.f32 %v6481_v43, %v6480_v18  ;;  %v6489_v49 = vadd.f32 %v6488_v31, %v6487_v40  ;;  %v6490_v17 = vsel %vm6278_vm11, %v12673_v0, 0.0  ;;  %8190 = vpow2.f32 %v6420_v47 }
 0x8d0   : > { %v12683_v9 = vpop.eup %8180  ;;  %v6492_v23 = vsel %vm6278_vm11, %v12679_v42, 0.0  ;;  %8192 = vpow2.f32 %v6428_v15  ;;  %v6371_v8 = vmax.f32 %v12631_v46, %v12615_v52  ;;  %v6374_v52 = vsel %vm6278_vm11, %v12695_v62, -inf }
 0x8d1   : > { %v12689_v32 = vpop.eup %8182  ;;  %v6484_v45 = vadd.f32 %v6483_v38, %v6482_v7  ;;  %v6491_v39 = vadd.f32 %v6490_v17, %v6489_v49  ;;  %8194 = vpow2.f32 %v6436_v25  ;;  %v6494_v14 = vsel %vm6278_vm11, %v12683_v9, 0.0 }
 0x8d2   : > { %v12693_v24 = vpop.eup %8184  ;;  %8196 = vpow2.f32 %v6444_v57  ;;  %v6373_v28 = vmax.f32 %v6371_v8, %v6372_v41  ;;  %v6496_v34 = vsel %vm6278_vm11, %v12689_v32, 0.0 }
 0x8d3   : > { %v12699_v16 = vpop.eup %8186  ;;  %v6486_v56 = vadd.f32 %v6485_v55, %v6484_v45  ;;  %v6493_v37 = vadd.f32 %v6492_v23, %v6491_v39  ;;  %8198 = vpow2.f32 %v6452_v3  ;;  %v6498_v50 = vsel %vm6278_vm11, %v12693_v24, 0.0 }
 0x8d4   : > { %v12703_v53 = vpop.eup %8188  ;;  %8200 = vpow2.f32 %v6460_v54  ;;  %v12727_v27 = vmax.f32 %v6373_v28, %v6374_v52  ;;  %v6500_v47 = vsel %vm6278_vm11, %v12699_v16, 0.0 }
 0x8d5   : > { %v12705_v6 = vpop.eup %8190  ;;  %8202 = vrcp.f32 %v6486_v56  ;;  %v6495_v20 = vadd.f32 %v6494_v14, %v6493_v37  ;;  %v6502_v58 = vsel %vm6278_vm11, %v12703_v53, 0.0  ;;  %v6543_v57 = vand.u32 2147483648, %v6486_v56 }
 0x8d6   : > { %v12711_v46 = vpop.eup %8192  ;;  %v6503_v30 = vsel %vm6278_vm11, %v12705_v6, 0.0  ;;  %8204 = vpow2.f32 %v6468_v13  ;;  %v6379_v49 = vsub.f32 %v12557_v4, %v12727_v27  ;;  %v6383_v23 = vsub.f32 %v12559_v48, %v12727_v27 }
 0x8d7   : > { %v12717_v44 = vpop.eup %8194  ;;  %v6504_v43 = vadd.f32 %v6503_v30, %v6502_v58  ;;  %v6505_v12 = vsel %vm6278_vm11, %v12711_v46, 0.0  ;;  %v6497_v35 = vadd.f32 %v6496_v34, %v6495_v20  ;;  %v6387_v54 = vsub.f32 %v12573_v29, %v12727_v27 }
 0x8d8   : > { %v12723_v59 = vpop.eup %8196  ;;  %v6507_v21 = vsel %vm6278_vm11, %v12717_v44, 0.0  ;;  %vm6537_vm12 = vweird.f32 %v6486_v56  ;;  %v6541_v39 = vand.u32 2147483647, %v6486_v56  ;;  %v6391_v13 = vsub.f32 %v12575_v2, %v12727_v27 }
 0x8d9   : > { %v12729_v38 = vpop.eup %8198  ;;  %v6506_v15 = vadd.f32 %v6505_v12, %v6504_v43  ;;  %v6499_v40 = vadd.f32 %v6498_v50, %v6497_v35  ;;  %v6509_v25 = vsel %vm6278_vm11, %v12723_v59, 0.0  ;;  %v6544_v37 = vor.u32 1.1754944e-38, %v6543_v57 }
 0x8da   : > { %v12733_v18 = vpop.eup %8200  ;;  %v6511_v7 = vsel %vm6278_vm11, %v12729_v38, 0.0  ;;  %v6395_v29 = vsub.f32 %v12587_v5, %v12727_v27  ;;  %v6414_v14 = vmul.f32 1.442695, %v6379_v49  ;;  %v6422_v52 = vmul.f32 1.442695, %v6383_v23 }
 0x8db   : > { %v8203_v31 = vpop.eup %8202  ;;  %v6508_v3 = vadd.f32 %v6507_v21, %v6506_v15  ;;  %v12741_v55 = vadd.f32 %v6500_v47, %v6499_v40  ;;  %v6513_v4 = vsel %vm6278_vm11, %v12733_v18, 0.0  ;;  %v6430_v20 = vmul.f32 1.442695, %v6387_v54 }
 0x8dc   : > { %v6533_v17 = vmul.f32 %v8203_v31, %v6486_v56  ;;  %v12747_v45 = vpop.eup %8204  ;;  %vm6538_vm13 = vweird.f32 %v8203_v31  ;;  %v6399_v30 = vsub.f32 %v12607_v33, %v12727_v27  ;;  %v6438_v50 = vmul.f32 1.442695, %v6391_v13 }
 0x8dd   : > { %v6510_v41 = vadd.f32 %v6509_v25, %v6508_v3  ;;  %8206 = vrcp.f32 %v12741_v55  ;;  %v6515_v34 = vsel %vm6278_vm11, %v12747_v45, 0.0  ;;  %vm12759_vm14 = vmor %vm6537_vm12, %vm6538_vm13  ;;  %vm6542_vm15 = vcmp.eq.f32.partialorder %v6541_v39, 8.507059e+37 }
 0x8de   : > { %v6534_v8 = vsub.f32 1.0, %v6533_v17  ;;  %8208 = vpow2.f32 %v6414_v14  ;;  %v6403_v5 = vsub.f32 %v12677_v22, %v12727_v27  ;;  %vm6552_vm0 = vweird.f32 %v12741_v55 }
 0x8df   : > { %v6512_v48 = vadd.f32 %v6511_v7, %v6510_v41  ;;  %8210 = vpow2.f32 %v6422_v52  ;;  %v6558_v56 = vand.u32 2147483648, %v12741_v55  ;;  %v6407_v33 = vsub.f32 %v12695_v62, %v12727_v27 }
 0x8e0   : > { %v6535_v28 = vmul.f32 %v8203_v31, %v6534_v8  ;;  %8212 = vpow2.f32 %v6430_v20  ;;  %v6446_v47 = vmul.f32 1.442695, %v6395_v29  ;;  %v6454_v40 = vmul.f32 1.442695, %v6399_v30 }
 0x8e1   : > { %v6514_v58 = vadd.f32 %v6513_v4, %v6512_v48  ;;  %8214 = vpow2.f32 %v6438_v50  ;;  %v6556_v7 = vand.u32 2147483647, %v12741_v55  ;;  %v6462_v49 = vmul.f32 1.442695, %v6403_v5 }
 0x8e2   : > { %v6536_v43 = vadd.f32 %v8203_v31, %v6535_v28  ;;  %v6559_v39 = vor.u32 1.1754944e-38, %v6558_v56 }
 0x8e3   : > { %v12769_v12 = vadd.f32 %v6515_v34, %v6514_v58  ;;  %v8207_v35 = vpop.eup %8206  ;;  %vm6557_vm3 = vcmp.eq.f32.partialorder %v6556_v7, 8.507059e+37  ;;  %v6626_v58 = vld [vmem:[#allocation3 + $0x30] sm:$0xff] }
 0x8e4   : > { %v6540_v21 = vsel %vm12759_vm14, %v8203_v31, %v6536_v43  ;;  %v6548_v22 = vmul.f32 %v8207_v35, %v12741_v55  ;;  %v12787_v27 = vpop.eup %8208  ;;  %vm6553_vm1 = vweird.f32 %v8207_v35  ;;  %6901 = vmatpush.msrb.mxu2 %v6626_v58 }
 0x8e5   : > { %v12775_v15 = vsel %vm6542_vm15, %v6544_v37, %v6540_v21  ;;  %8216 = vrcp.f32 %v12769_v12  ;;  %v12790_v17 = vpop.eup %8210  ;;  %vm12805_vm2 = vmor %vm6552_vm0, %vm6553_vm1  ;;  %vm6567_vm4 = vweird.f32 %v12769_v12  ;;  %v6573_v29 = vand.u32 2147483648, %v12769_v12  ;;  %v6627_v21 = vld [vmem:[#allocation3 + $0x38] sm:$0xff] }
 0x8e6   : > { %v6546_v25 = vmul.f32 %v12617_v36, %v12775_v15  ;;  %v6596_v57 = vmul.f32 %v12625_v1, %v12775_v15  ;;  %v6592_v31 = vmul.f32 %v12621_v61, %v12775_v15  ;;  %v6600_v62 = vmul.f32 %v12633_v26, %v12775_v15  ;;  %v12796_v1 = vpop.eup %8212  ;;  %6942 = vmatpush.msrb.mxu3 %v6627_v21 }
 0x8e7   : > { %v6549_v3 = vsub.f32 1.0, %v6548_v22  ;;  %8218 = vpow2.f32 %v6446_v47  ;;  %v6470_v36 = vmul.f32 1.442695, %v6407_v33  ;;  %v6517_v61 = vsel %vm6278_vm11, %v12787_v27, 0.0  ;;  %v12800_v23 = vpop.eup %8214 }
 0x8e8   : > { %7574 = vmatmul.msk.f32.vlgmr.msra.gmra.mxu0 %vm6278_vm11, %v6546_v25  ;;  %7582 = vmatmul.msk.f32.vlgmr.msra.gmra.mxu2 %vm6278_vm11, %v6596_v57  ;;  %8220 = vpow2.f32 %v6454_v40  ;;  %v6518_v41 = vsel %vm6278_vm11, %v12790_v17, 0.0  ;;  %v6520_v13 = vsel %vm6278_vm11, %v12796_v1, 0.0  ;;  %v6522_v28 = vsel %vm6278_vm11, %v12800_v23, 0.0 }
 0x8e9   : > { %7578 = vmatmul.msk.f32.vlgmr.msra.gmra.mxu1 %vm6278_vm11, %v6592_v31  ;;  %7586 = vmatmul.msk.f32.vlgmr.msra.gmra.mxu3 %vm6278_vm11, %v6600_v62  ;;  %v6550_v26 = vmul.f32 %v8207_v35, %v6549_v3  ;;  %8222 = vpow2.f32 %v6462_v49  ;;  %v6519_v37 = vadd.f32 %v6518_v41, %v6517_v61  ;;  %v6571_v2 = vand.u32 2147483647, %v12769_v12 }
 0x8ea   : > { %8224 = vpow2.f32 %v6470_v36 }
 0x8eb   : > { %v8217_v8 = vpop.eup %8216  ;;  %v6551_v4 = vadd.f32 %v8207_v35, %v6550_v26  ;;  %v6521_v14 = vadd.f32 %v6520_v13, %v6519_v37  ;;  %vm6572_vm9 = vcmp.eq.f32.partialorder %v6571_v2, 8.507059e+37 }
 0x8ec   : > { %v6563_v48 = vmul.f32 %v8217_v8, %v12769_v12  ;;  %vm6568_vm5 = vweird.f32 %v8217_v8 }
 0x8ed   : > { %v6555_v55 = vsel %vm12805_vm2, %v8207_v35, %v6551_v4  ;;  %v12820_v34 = vpop.eup %8218  ;;  %v6624_v35 = vld [vmem:[#allocation3 + $0x20] sm:$0xff]  ;;  %v6523_v47 = vadd.f32 %v6522_v28, %v6521_v14  ;;  %vm6569_vm8 = vmor %vm6567_vm4, %vm6568_vm5 }
 0x8ee   : > { %v12822_v52 = vsel %vm6557_vm3, %v6559_v39, %v6555_v55  ;;  %v6564_v20 = vsub.f32 1.0, %v6563_v48  ;;  %v12825_v30 = vpop.eup %8220  ;;  %v6524_v22 = vsel %vm6278_vm11, %v12820_v34, 0.0  ;;  %6819 = vmatpush.msrb.mxu0 %v6624_v35 }
 0x8ef   : > { %v6561_v50 = vmul.f32 %v12665_v63, %v12822_v52  ;;  %v6597_v43 = vmul.f32 %v12673_v0, %v12822_v52  ;;  %v6593_v5 = vmul.f32 %v12669_v51, %v12822_v52  ;;  %v6601_v56 = vmul.f32 %v12679_v42, %v12822_v52  ;;  %v6625_v63 = vld [vmem:[#allocation3 + $0x28] sm:$0xff]  ;;  %v12837_v40 = vpop.eup %8222 }
 0x8f0   : > { %v6565_v33 = vmul.f32 %v8217_v8, %v6564_v20  ;;  %v6574_v51 = vor.u32 1.1754944e-38, %v6573_v29  ;;  %v6526_v0 = vsel %vm6278_vm11, %v12825_v30, 0.0  ;;  %v12846_v42 = vpop.eup %8224  ;;  %v6525_v57 = vadd.f32 %v6524_v22, %v6523_v47  ;;  %6860 = vmatpush.msrb.mxu1 %v6625_v63 }
 0x8f1   : > { %7575 = vmatmul.msk.f32.gmra.mxu0 %vm6278_vm11, %v6561_v50  ;;  %7583 = vmatmul.msk.f32.gmra.mxu2 %vm6278_vm11, %v6597_v43  ;;  %v6528_v12 = vsel %vm6278_vm11, %v12837_v40, 0.0  ;;  %v6530_v7 = vsel %vm6278_vm11, %v12846_v42, 0.0  ;;  %v6604_v20 = vmul.f32 %v12639_v60, %v12775_v15  ;;  %v6605_v60 = vmul.f32 %v12683_v9, %v12822_v52 }
 0x8f2   : > { %7579 = vmatmul.msk.f32.gmra.mxu1 %vm6278_vm11, %v6593_v5  ;;  %7587 = vmatmul.msk.f32.gmra.mxu3 %vm6278_vm11, %v6601_v56  ;;  %v6566_v25 = vadd.f32 %v8217_v8, %v6565_v33  ;;  %v6527_v62 = vadd.f32 %v6526_v0, %v6525_v57  ;;  %v7050_v0 = vld [vmem:[%s13913_s0 + $0x10] sm:$0xff] }
 0x8f4   : > { %v6570_v31 = vsel %vm6569_vm8, %v8217_v8, %v6566_v25  ;;  %v6529_v54 = vadd.f32 %v6528_v12, %v6527_v62 }
 0x8f5   : > { %v6575_v3 = vsel %vm6572_vm9, %v6574_v51, %v6570_v31  ;;  %v7051_v51 = vld [vmem:[%s13913_s0 + $0x18] sm:$0xff]  ;;  %v7048_v31 = vld [vmem:[%s13913_s0] sm:$0xff] }
 0x8f6   : > { %v6576_v49 = vmul.f32 %v12703_v53, %v6575_v3  ;;  %v6598_v36 = vmul.f32 %v12711_v46, %v6575_v3  ;;  %v6594_v61 = vmul.f32 %v12705_v6, %v6575_v3  ;;  %v6602_v26 = vmul.f32 %v12717_v44, %v6575_v3  ;;  %7070 = vmatpush.msra.mxu1 %v7051_v51 }
 0x8f7   : > { %v6531_v39 = vadd.f32 %v6530_v7, %v6529_v54  ;;  %v6614_v9 = vmul.f32 %v12733_v18, %v6575_v3 }
 0x8f8   : > { %7071 = vmatpush.msra.mxu1 %v7050_v0 }
 0x8f9   : > { %7576 = vmatmul.msk.f32.gmra.mxu0 %vm6278_vm11, %v6576_v49  ;;  %7584 = vmatmul.msk.f32.gmra.mxu2 %vm6278_vm11, %v6598_v36  ;;  %8226 = vrcp.f32 %v6531_v39  ;;  %v6588_v53 = vand.u32 2147483648, %v6531_v39  ;;  %vm6582_vm10 = vweird.f32 %v6531_v39  ;;  %v6586_v6 = vand.u32 2147483647, %v6531_v39 }
 0x8fa   : > { %7580 = vmatmul.msk.f32.gmra.mxu1 %vm6278_vm11, %v6594_v61  ;;  %7588 = vmatmul.msk.f32.gmra.mxu3 %vm6278_vm11, %v6602_v26 }
 0x8fb   : > { %v6589_v44 = vor.u32 1.1754944e-38, %v6588_v53  ;;  %vm6587_vm14 = vcmp.eq.f32.partialorder %v6586_v6, 8.507059e+37 }
 0x8ff   : > { %v8227_v41 = vpop.eup %8226 }
 0x900   : > { %v6578_v13 = vmul.f32 %v8227_v41, %v6531_v39  ;;  %vm6583_vm12 = vweird.f32 %v8227_v41 }
 0x901   : > { %vm6584_vm13 = vmor %vm6582_vm10, %vm6583_vm12 }
 0x902   : > { %v6579_v8 = vsub.f32 1.0, %v6578_v13 }
 0x904   : > { %v6580_v46 = vmul.f32 %v8227_v41, %v6579_v8 }
 0x906   : > { %v6581_v4 = vadd.f32 %v8227_v41, %v6580_v46  ;;  %v13915_v46 = vld [vmem:[#allocation31_spill] sm:$0xff] }
 0x908   : > { %v6585_v37 = vsel %vm6584_vm13, %v8227_v41, %v6581_v4 }
 0x909   : > { %v6590_v48 = vsel %vm6587_vm14, %v6589_v44, %v6585_v37 }
 0x90a   : > { %v6591_v55 = vmul.f32 %v12787_v27, %v6590_v48  ;;  %v6599_v29 = vmul.f32 %v12796_v1, %v6590_v48  ;;  %v6595_v14 = vmul.f32 %v12790_v17, %v6590_v48  ;;  %v6603_v28 = vmul.f32 %v12800_v23, %v6590_v48 }
 0x90b   : > { %v6612_v27 = vmul.f32 %v12653_v11, %v12775_v15  ;;  %v6608_v1 = vmul.f32 %v12647_v19, %v12775_v15  ;;  %v6616_v17 = vmul.f32 %v12661_v10, %v12775_v15  ;;  %v6613_v11 = vmul.f32 %v12693_v24, %v12822_v52 }
 0x90c   : > { %7577 = vmatmul.msk.f32.gmra.mxu0 %vm6278_vm11, %v6591_v55  ;;  %7585 = vmatmul.msk.f32.gmra.mxu2 %vm6278_vm11, %v6599_v29  ;;  %v6609_v19 = vmul.f32 %v12689_v32, %v12822_v52  ;;  %v6617_v10 = vmul.f32 %v12699_v16, %v12822_v52  ;;  %v6606_v15 = vmul.f32 %v12723_v59, %v6575_v3 }
 0x90d   : > { %7581 = vmatmul.msk.f32.gmra.mxu1 %vm6278_vm11, %v6595_v14  ;;  %7589 = vmatmul.msk.f32.gmra.mxu3 %vm6278_vm11, %v6603_v28  ;;  %v6610_v24 = vmul.f32 %v12729_v38, %v6575_v3  ;;  %v6618_v23 = vmul.f32 %v12747_v45, %v6575_v3  ;;  %v6607_v32 = vmul.f32 %v12820_v34, %v6590_v48  ;;  %v13914_v3 = vld [vmem:[#allocation32_spill] sm:$0xff] }
 0x90e   : > { %v6615_v16 = vmul.f32 %v12837_v40, %v6590_v48  ;;  %v6611_v59 = vmul.f32 %v12825_v30, %v6590_v48  ;;  %v6619_v18 = vmul.f32 %v12846_v42, %v6590_v48  ;;  %v7049_v42 = vld [vmem:[%s13913_s0 + $0x8] sm:$0xff] }
 0x90f   : > { %7072 = vmatpush.msra.mxu1 %v7049_v42 }
 0x911   : > { %7073 = vmatpush.msra.mxu1 %v7048_v31 }
 0x914   : > { %7590 = vmatmul.msk.f32.vlgmr.msrb.gmra.mxu0 %vm6278_vm11, %v6604_v20  ;;  %7598 = vmatmul.msk.f32.vlgmr.msrb.gmra.mxu2 %vm6278_vm11, %v6612_v27 }
 0x915   : > { %7594 = vmatmul.msk.f32.vlgmr.msrb.gmra.mxu1 %vm6278_vm11, %v6608_v1  ;;  %7602 = vmatmul.msk.f32.vlgmr.msrb.gmra.mxu3 %vm6278_vm11, %v6616_v17 }
 0x91c   : > { %7591 = vmatmul.msk.f32.gmra.mxu0 %vm6278_vm11, %v6605_v60  ;;  %7599 = vmatmul.msk.f32.gmra.mxu2 %vm6278_vm11, %v6613_v11 }
 0x91d   : > { %7595 = vmatmul.msk.f32.gmra.mxu1 %vm6278_vm11, %v6609_v19  ;;  %7603 = vmatmul.msk.f32.gmra.mxu3 %vm6278_vm11, %v6617_v10 }
 0x924   : > { %7592 = vmatmul.msk.f32.gmra.mxu0 %vm6278_vm11, %v6606_v15  ;;  %7600 = vmatmul.msk.f32.gmra.mxu2 %vm6278_vm11, %v6614_v9 }
 0x925   : > { %7596 = vmatmul.msk.f32.gmra.mxu1 %vm6278_vm11, %v6610_v24  ;;  %7604 = vmatmul.msk.f32.gmra.mxu3 %vm6278_vm11, %v6618_v23 }
 0x92c   : > { %7593 = vmatmul.msk.f32.gmra.mxu0 %vm6278_vm11, %v6607_v32  ;;  %7601 = vmatmul.msk.f32.gmra.mxu2 %vm6278_vm11, %v6615_v16 }
 0x92d   : > { %7597 = vmatmul.msk.f32.gmra.mxu1 %vm6278_vm11, %v6611_v59  ;;  %7605 = vmatmul.msk.f32.gmra.mxu3 %vm6278_vm11, %v6619_v18 }
 0x935   : > { %7608 = vmatmul.msk.f32.vlgmr.msra.gmra.mxu1 %vm2137_vm7, %v13914_v3 }
 0x93d   : > { %7609 = vmatmul.msk.f32.gmra.mxu1 %vm2137_vm7, %v13915_v46 }
 0x965   : > { %v6657_v38 = vpop.f32.mrf.mxu0 }
 0x966   : > { %v6698_v45 = vpop.f32.mrf.mxu1  ;;  %v6957_v37 = vsel %vm2137_vm7, %v6657_v38, 0.0 }
 0x967   : > { %v6958_v48 = vsel %vm2137_vm7, %v6698_v45, 0.0 }
 0x968   : > { %v6959_v17 = vadd.f32 %v6958_v48, %v6957_v37 }
 0x96b   : > { %v6739_v52 = vpop.f32.mrf.mxu2 }
 0x96c   : > { %v6780_v2 = vpop.f32.mrf.mxu3  ;;  %v6960_v20 = vsel %vm2137_vm7, %v6739_v52, 0.0 }
 0x96d   : > { %v6961_v9 = vadd.f32 %v6960_v20, %v6959_v17  ;;  %v6962_v16 = vsel %vm2137_vm7, %v6780_v2, 0.0 }
 0x96e   : > { %v6660_v34 = vpop.f32.mrf.mxu0 }
 0x96f   : > { %v6701_v58 = vpop.f32.mrf.mxu1  ;;  %v6972_v41 = vsel %vm2137_vm7, %v6660_v34, 0.0 }
 0x970   : > { %v6973_v13 = vsel %vm2137_vm7, %v6701_v58, 0.0 }
 0x971   : > { %v6974_v29 = vadd.f32 %v6973_v13, %v6972_v41 }
 0x974   : > { %v6742_v50 = vpop.f32.mrf.mxu2 }
 0x975   : > { %v6783_v30 = vpop.f32.mrf.mxu3  ;;  %v6975_v55 = vsel %vm2137_vm7, %v6742_v50, 0.0 }
 0x976   : > { %v6663_v43 = vpop.f32.mrf.mxu0  ;;  %v6976_v60 = vadd.f32 %v6975_v55, %v6974_v29  ;;  %v6977_v19 = vsel %vm2137_vm7, %v6783_v30, 0.0 }
 0x977   : > { %v6704_v5 = vpop.f32.mrf.mxu1  ;;  %v6987_v49 = vsel %vm2137_vm7, %v6663_v43, 0.0  ;;  %v6963_v43 = vadd.f32 %v6962_v16, %v6961_v9 }
 0x978   : > { %v6988_v36 = vsel %vm2137_vm7, %v6704_v5, 0.0  ;;  %v6978_v45 = vadd.f32 %v6977_v19, %v6976_v60 }
 0x979   : > { %v6989_v44 = vadd.f32 %v6988_v36, %v6987_v49 }
 0x97c   : > { %v6745_v56 = vpop.f32.mrf.mxu2 }
 0x97d   : > { %v6786_v35 = vpop.f32.mrf.mxu3  ;;  %v6990_v53 = vsel %vm2137_vm7, %v6745_v56, 0.0 }
 0x97e   : > { %v6991_v14 = vadd.f32 %v6990_v53, %v6989_v44  ;;  %v6992_v27 = vsel %vm2137_vm7, %v6786_v35, 0.0  ;;  %v7018_v53 = vld [vmem:[%s13916_s15 + $0x8] sm:$0xff]  ;;  %v8150_v44 = vld [vmem:[%s13917_s16] ss:$0 sm:$0xff]  ;;  %s13924_s16 = sld [smem:[#allocation13_spill]] (!%p7612_p3) }
 0x980   : > { %v6993_v24 = vadd.f32 %v6992_v27, %v6991_v14 }
 0x989   : > { %v6666_v21 = vpop.f32.mrf.mxu0 }
 0x98a   : > { %v6707_v33 = vpop.f32.mrf.mxu1  ;;  %v7002_v61 = vsel %vm2137_vm7, %v6666_v21, 0.0 }
 0x98b   : > { %v7003_v26 = vsel %vm2137_vm7, %v6707_v33, 0.0 }
 0x98c   : > { %v7004_v4 = vadd.f32 %v7003_v26, %v7002_v61 }
 0x98f   : > { %v6748_v47 = vpop.f32.mrf.mxu2 }
 0x990   : > { %v6789_v22 = vpop.f32.mrf.mxu3  ;;  %v7005_v8 = vsel %vm2137_vm7, %v6748_v47, 0.0 }
 0x991   : > { %v6821_v63 = vpop.f32.mrf.mxu0  ;;  %v7006_v28 = vadd.f32 %v7005_v8, %v7004_v4  ;;  %v7007_v1 = vsel %vm2137_vm7, %v6789_v22, 0.0  ;;  %v7017_v8 = vld [vmem:[%s13916_s15] sm:$0xff] }
 0x992   : > { %v12910_v40 = vpop.f32.mrf.mxu1  ;;  %v6964_v58 = vsel %vm2137_vm7, %v6821_v63, 0.0 }
 0x993   : > { %v7008_v23 = vadd.f32 %v7007_v1, %v7006_v28  ;;  %v6965_v35 = vadd.f32 %v6964_v58, %v6963_v43  ;;  %v6966_v22 = vsel %vm2137_vm7, %v12910_v40, 0.0 }
 0x995   : > { %v6967_v36 = vadd.f32 %v6966_v22, %v6965_v35  ;;  %v7163_v22 = vld [vmem:[%s13918_s18 + $0x10] sm:$0xff] }
 0x997   : > { %v12915_v25 = vpop.f32.mrf.mxu2 }
 0x998   : > { %v12917_v57 = vpop.f32.mrf.mxu3 }
 0x999   : > { %v6824_v62 = vpop.f32.mrf.mxu0  ;;  %v6970_v41 = vsel %vm2137_vm7, %v12917_v57, 0.0 }
 0x99a   : > { %v6865_v12 = vpop.f32.mrf.mxu1  ;;  %v6979_v59 = vsel %vm2137_vm7, %v6824_v62, 0.0 }
 0x99b   : > { %v6980_v5 = vadd.f32 %v6979_v59, %v6978_v45  ;;  %v6981_v56 = vsel %vm2137_vm7, %v6865_v12, 0.0  ;;  %v6968_v12 = vsel %vm2137_vm7, %v12915_v25, 0.0 }
 0x99c   : > { %v6969_v26 = vadd.f32 %v6968_v12, %v6967_v36 }
 0x99d   : > { %v6982_v42 = vadd.f32 %v6981_v56, %v6980_v5 }
 0x99e   : > { %v6971_v25 = vadd.f32 %v6970_v41, %v6969_v26 }
 0x99f   : > { %v6906_v7 = vpop.f32.mrf.mxu2 }
 0x9a0   : > { %v6947_v54 = vpop.f32.mrf.mxu3  ;;  %v6983_v51 = vsel %vm2137_vm7, %v6906_v7, 0.0 }
 0x9a1   : > { %v6827_v39 = vpop.f32.mrf.mxu0  ;;  %v6984_v61 = vadd.f32 %v6983_v51, %v6982_v42  ;;  %v6985_v7 = vsel %vm2137_vm7, %v6947_v54, 0.0  ;;  %v7161_v42 = vld [vmem:[%s13918_s18] sm:$0xff] }
 0x9a2   : > { %v6868_v6 = vpop.f32.mrf.mxu1  ;;  %v6994_v10 = vsel %vm2137_vm7, %v6827_v39, 0.0 }
 0x9a3   : > { %v6995_v52 = vadd.f32 %v6994_v10, %v6993_v24  ;;  %v6996_v50 = vsel %vm2137_vm7, %v6868_v6, 0.0  ;;  %v6986_v13 = vadd.f32 %v6985_v7, %v6984_v61  ;;  %v8370_v6 = vmov 16.0  }
 0x9a4   : > { %8228 = vrcp.f32 %v8370_v6 }
 0x9a5   : > { %v6997_v21 = vadd.f32 %v6996_v50, %v6995_v52 }
 0x9a7   : > { %v6909_v11 = vpop.f32.mrf.mxu2 }
 0x9a8   : > { %v6950_v15 = vpop.f32.mrf.mxu3  ;;  %v6998_v2 = vsel %vm2137_vm7, %v6909_v11, 0.0 }
 0x9a9   : > { %v6830_v32 = vpop.f32.mrf.mxu0  ;;  %v6999_v31 = vadd.f32 %v6998_v2, %v6997_v21  ;;  %v7000_v49 = vsel %vm2137_vm7, %v6950_v15, 0.0 }
 0x9aa   : > { %v7009_v18 = vsel %vm2137_vm7, %v6830_v32, 0.0  ;;  %v6871_v38 = vpop.f32.mrf.mxu1  ;;  %v8229_v4 = vpop.eup %8228 }
 0x9ab   : > { %v7010_v34 = vadd.f32 %v7009_v18, %v7008_v23  ;;  %v7011_v30 = vsel %vm2137_vm7, %v6871_v38, 0.0  ;;  %v7001_v39 = vadd.f32 %v7000_v49, %v6999_v31  ;;  %v7097_v14 = vmul.f32 16.0, %v8229_v4 }
 0x9ac   : > { %vm7101_vm11 = vweird.f32 %v8229_v4 }
 0x9ad   : > { %v7012_v33 = vadd.f32 %v7011_v30, %v7010_v34  ;;  %v7098_v1 = vsub.f32 1.0, %v7097_v14 }
 0x9af   : > { %v6912_v47 = vpop.f32.mrf.mxu2  ;;  %v7099_v11 = vmul.f32 %v8229_v4, %v7098_v1 }
 0x9b0   : > { %v7013_v63 = vsel %vm2137_vm7, %v6912_v47, 0.0  ;;  %v6953_v0 = vpop.f32.mrf.mxu3  ;;  %v7164_v47 = vld [vmem:[%s13918_s18 + $0x18] sm:$0xff] }
 0x9b1   : > { %v7014_v62 = vadd.f32 %v7013_v63, %v7012_v33  ;;  %v7015_v3 = vsel %vm2137_vm7, %v6953_v0, 0.0  ;;  %v7100_v15 = vadd.f32 %v8229_v4, %v7099_v11  ;;  %7187 = vmatpush.msra.mxu2 %v7164_v47  ;;  %v7162_v63 = vld [vmem:[%s13918_s18 + $0x8] sm:$0xff] }
 0x9b2   : > { %v7075_v54 = vpop.f32.mrf.mxu1 }
 0x9b3   : > { %v7016_v40 = vadd.f32 %v7015_v3, %v7014_v62  ;;  %v12966_v23 = vsel %vm7101_vm11, %v8229_v4, %v7100_v15  ;;  %7188 = vmatpush.msra.mxu2 %v7163_v22 }
 0x9b5   : > { %7037 = vmatpush.msra.mxu0 %v7016_v40  ;;  %8060 = vmatpush.msra.mxu3 %v7016_v40 }
 0x9b6   : > { %7189 = vmatpush.msra.mxu2 %v7162_v63 }
 0x9b7   : > { %7038 = vmatpush.msra.mxu0 %v7001_v39  ;;  %8061 = vmatpush.msra.mxu3 %v7001_v39 }
 0x9b8   : > { %7190 = vmatpush.msra.mxu2 %v7161_v42 }
 0x9b9   : > { %7039 = vmatpush.msra.mxu0 %v6986_v13  ;;  %8062 = vmatpush.msra.mxu3 %v6986_v13 }
 0x9ba   : > { %v7078_v37 = vpop.f32.mrf.mxu1 }
 0x9bb   : > { %7040 = vmatpush.msra.mxu0 %v6971_v25  ;;  %8063 = vmatpush.msra.mxu3 %v6971_v25 }
 0x9bc   : > { %7607 = vmatmul.msk.f32.vlgmr.msra.gmra.mxu3 %vm2137_vm7, %v7018_v53  ;;  %7606 = vmatmul.msk.f32.vlgmr.msra.gmra.mxu0 %vm2137_vm7, %v7017_v8 }
 0xa39   : > { %v7042_v46 = vpop.f32.mrf.mxu0 }
 0xa3a   : > { %v7076_v57 = vadd.f32 %v7075_v54, %v7042_v46  ;;  %v8151_v54 = vld [vmem:[%s13919_s22] ss:$0 sm:$0xff]  ;;  %s13925_s22 = sld [smem:[#allocation30_spill]] (!%p7612_p3) }
 0xa3c   : > { %v7085_v55 = vadd.f32 %v8150_v44, %v7076_v57  ;;  %v8152_v57 = vld [vmem:[%s13920_s23] ss:$0 sm:$0xff] }
 0xa3e   : > { %v7087_v20 = vsel %vm2137_vm7, %v7085_v55, 0.0 }
 0xa3f   : > { %v7045_v48 = vpop.f32.mrf.mxu3 }
 0xa40   : > { %v7079_v29 = vadd.f32 %v7078_v37, %v7045_v48 }
 0xa42   : > { %v7086_v28 = vadd.f32 %v8150_v44, %v7079_v29 }
 0xa44   : > { %v7088_v27 = vsel %vm2137_vm7, %v7086_v28, 0.0 }
 0xa45   : > { %v7089_v17 = vadd.f32 %v7088_v27, %v7087_v20  ;;  %v8153_v20 = vld [vmem:[%s13921_s26] ss:$0 sm:$0xff] }
 0xa47   : > { %v7090_v60 = vrot.slane %v7089_v17, 4 }
 0xa49   : > { %v7091_v19 = vadd.f32 %v7090_v60, %v7089_v17 }
 0xa4b   : > { %v7092_v10 = vrot.slane %v7091_v19, 2 }
 0xa4d   : > { %v7093_v9 = vadd.f32 %v7092_v10, %v7091_v19 }
 0xa4f   : > { %v7094_v24 = vrot.slane %v7093_v9, 1 }
 0xa51   : > { %v7095_v32 = vadd.f32 %v7094_v24, %v7093_v9 }
 0xa53   : > { %v7103_v16 = vmul.f32 %v12966_v23, %v7095_v32 }
 0xa55   : > { %v7104_v59 = vsub.f32 %v7085_v55, %v7103_v16  ;;  %v7105_v18 = vsub.f32 %v7086_v28, %v7103_v16 }
 0xa57   : > { %v7106_v38 = vmul.f32 %v7104_v59, %v7104_v59  ;;  %v7107_v45 = vmul.f32 %v7105_v18, %v7105_v18 }
 0xa59   : > { %v7108_v52 = vsel %vm2137_vm7, %v7106_v38, 0.0  ;;  %v7109_v34 = vsel %vm2137_vm7, %v7107_v45, 0.0 }
 0xa5a   : > { %v7110_v58 = vadd.f32 %v7109_v34, %v7108_v52 }
 0xa5c   : > { %v7111_v50 = vrot.slane %v7110_v58, 4 }
 0xa5e   : > { %v7112_v30 = vadd.f32 %v7111_v50, %v7110_v58 }
 0xa60   : > { %v7113_v43 = vrot.slane %v7112_v30, 2 }
 0xa62   : > { %v7114_v5 = vadd.f32 %v7113_v43, %v7112_v30 }
 0xa64   : > { %v7115_v56 = vrot.slane %v7114_v5, 1 }
 0xa66   : > { %v7116_v2 = vadd.f32 %v7115_v56, %v7114_v5 }
 0xa68   : > { %v7117_v35 = vmul.f32 %v7116_v2, %v12966_v23 }
 0xa6a   : > { %v7118_v21 = vadd.f32 1e-05, %v7117_v35 }
 0xa6c   : > { %8230 = vrsqrt.f32 %v7118_v21  ;;  %vm7126_vm15 = vcmp.eq.f32.partialorder %v7118_v21, inf  ;;  %v7129_v49 = vand.u32 2147483648, %v7118_v21  ;;  %vm7128_vm0 = vcmp.eq.f32.partialorder %v7118_v21, 0.0 }
 0xa72   : > { %v8231_v33 = vpop.eup %8230 }
 0xa73   : > { %v7120_v51 = vmul.f32 %v8231_v33, %v7118_v21 }
 0xa75   : > { %v7121_v0 = vmul.f32 %v8231_v33, %v7120_v51 }
 0xa77   : > { %v7122_v31 = vmul.f32 0.5, %v7121_v0 }
 0xa79   : > { %v7123_v62 = vsub.f32 1.5, %v7122_v31 }
 0xa7b   : > { %v7124_v3 = vmul.f32 %v8231_v33, %v7123_v62 }
 0xa7d   : > { %v7125_v12 = vmul.f32 %v7124_v3, %v7118_v21 }
 0xa7f   : > { %v7127_v36 = vsel %vm7126_vm15, %v7118_v21, %v7125_v12 }
 0xa80   : > { %v7130_v61 = vsel %vm7128_vm0, %v7129_v49, %v7127_v36 }
 0xa81   : > { %8232 = vrcp.f32 %v7130_v61  ;;  %v7142_v39 = vand.u32 2147483648, %v7130_v61  ;;  %v7140_v13 = vand.u32 2147483647, %v7130_v61  ;;  %vm7136_vm2 = vweird.f32 %v7130_v61 }
 0xa83   : > { %v7143_v53 = vor.u32 1.1754944e-38, %v7142_v39  ;;  %vm7141_vm4 = vcmp.eq.f32.partialorder %v7140_v13, 8.507059e+37  ;;  %v8154_v13 = vld [vmem:[%s13922_s28] ss:$0 sm:$0xff] }
 0xa87   : > { %v8233_v40 = vpop.eup %8232 }
 0xa88   : > { %v7132_v7 = vmul.f32 %v8233_v40, %v7130_v61  ;;  %vm7137_vm1 = vweird.f32 %v8233_v40 }
 0xa89   : > { %vm7138_vm3 = vmor %vm7136_vm2, %vm7137_vm1 }
 0xa8a   : > { %v7133_v26 = vsub.f32 1.0, %v7132_v7 }
 0xa8c   : > { %v7134_v41 = vmul.f32 %v8233_v40, %v7133_v26 }
 0xa8e   : > { %v7135_v25 = vadd.f32 %v8233_v40, %v7134_v41 }
 0xa90   : > { %v7139_v8 = vsel %vm7138_vm3, %v8233_v40, %v7135_v25 }
 0xa91   : > { %v7144_v6 = vsel %vm7141_vm4, %v7143_v53, %v7139_v8 }
 0xa92   : > { %v7145_v46 = vmul.f32 %v7144_v6, %v7104_v59  ;;  %v7146_v4 = vmul.f32 %v7144_v6, %v7105_v18 }
 0xa94   : > { %v7151_v44 = vmul.f32 %v8151_v54, %v7145_v46  ;;  %v7152_v55 = vmul.f32 %v8151_v54, %v7146_v4  ;;  %v8155_v54 = vld [vmem:[%s13923_s1] ss:$0 sm:$0xff] }
 0xa96   : > { %v7157_v37 = vadd.f32 %v8152_v57, %v7151_v44  ;;  %v7158_v29 = vadd.f32 %v8152_v57, %v7152_v55 }
 0xa98   : > { %v7159_v48 = vmax.f32 %v7157_v37, 0.0  ;;  %v7160_v14 = vmax.f32 %v7158_v29, 0.0 }
 0xa9a   : > { %7610 = vmatmul.msk.f32.vlgmr.msra.gmra.mxu2 %vm2137_vm7, %v7159_v48 }
 0xaa2   : > { %7611 = vmatmul.msk.f32.gmra.mxu2 %vm2137_vm7, %v7160_v14 }
 0xb1d   : > { %v7192_v28 = vpop.f32.mrf.mxu2 }
 0xb1e   : > { %v7193_v27 = vadd.f32 %v8153_v20, %v7192_v28 }
 0xb20   : > { %v7198_v60 = vsel %vm2137_vm7, %v7193_v27, 0.0 }
 0xb25   : > { %v7195_v1 = vpop.f32.mrf.mxu2 }
 0xb26   : > { %v7196_v17 = vadd.f32 %v8153_v20, %v7195_v1 }
 0xb28   : > { %v7199_v11 = vsel %vm2137_vm7, %v7196_v17, 0.0 }
 0xb29   : > { %v7200_v19 = vadd.f32 %v7199_v11, %v7198_v60 }
 0xb2b   : > { %v7201_v10 = vrot.slane %v7200_v19, 4 }
 0xb2d   : > { %v7202_v15 = vadd.f32 %v7201_v10, %v7200_v19 }
 0xb2f   : > { %v7203_v9 = vrot.slane %v7202_v15, 2 }
 0xb31   : > { %v7204_v24 = vadd.f32 %v7203_v9, %v7202_v15 }
 0xb33   : > { %v7205_v32 = vrot.slane %v7204_v24, 1 }
 0xb35   : > { %v7206_v16 = vadd.f32 %v7205_v32, %v7204_v24 }
 0xb37   : > { %v7207_v59 = vmul.f32 %v7206_v16, %v12966_v23 }
 0xb39   : > { %v7208_v18 = vsub.f32 %v7193_v27, %v7207_v59  ;;  %v7209_v38 = vsub.f32 %v7196_v17, %v7207_v59 }
 0xb3b   : > { %v7210_v45 = vmul.f32 %v7208_v18, %v7208_v18  ;;  %v7211_v52 = vmul.f32 %v7209_v38, %v7209_v38 }
 0xb3d   : > { %v7212_v34 = vsel %vm2137_vm7, %v7210_v45, 0.0  ;;  %v7213_v58 = vsel %vm2137_vm7, %v7211_v52, 0.0 }
 0xb3e   : > { %v7214_v50 = vadd.f32 %v7213_v58, %v7212_v34 }
 0xb40   : > { %v7215_v30 = vrot.slane %v7214_v50, 4 }
 0xb42   : > { %v7216_v43 = vadd.f32 %v7215_v30, %v7214_v50 }
 0xb44   : > { %v7217_v5 = vrot.slane %v7216_v43, 2 }
 0xb46   : > { %v7218_v56 = vadd.f32 %v7217_v5, %v7216_v43 }
 0xb48   : > { %v7219_v2 = vrot.slane %v7218_v56, 1 }
 0xb4a   : > { %v7220_v35 = vadd.f32 %v7219_v2, %v7218_v56 }
 0xb4c   : > { %v7221_v21 = vmul.f32 %v7220_v35, %v12966_v23 }
 0xb4e   : > { %v7222_v33 = vadd.f32 1e-05, %v7221_v21 }
 0xb50   : > { %8234 = vrsqrt.f32 %v7222_v33  ;;  %vm7230_vm5 = vcmp.eq.f32.partialorder %v7222_v33, inf  ;;  %v7233_v62 = vand.u32 2147483648, %v7222_v33  ;;  %vm7232_vm8 = vcmp.eq.f32.partialorder %v7222_v33, 0.0 }
 0xb56   : > { %v8235_v47 = vpop.eup %8234 }
 0xb57   : > { %v7224_v22 = vmul.f32 %v8235_v47, %v7222_v33 }
 0xb59   : > { %v7225_v51 = vmul.f32 %v8235_v47, %v7224_v22 }
 0xb5b   : > { %v7226_v63 = vmul.f32 0.5, %v7225_v51 }
 0xb5d   : > { %v7227_v0 = vsub.f32 1.5, %v7226_v63 }
 0xb5f   : > { %v7228_v42 = vmul.f32 %v8235_v47, %v7227_v0 }
 0xb61   : > { %v7229_v31 = vmul.f32 %v7228_v42, %v7222_v33 }
 0xb63   : > { %v7231_v3 = vsel %vm7230_vm5, %v7222_v33, %v7229_v31 }
 0xb64   : > { %v7234_v12 = vsel %vm7232_vm8, %v7233_v62, %v7231_v3 }
 0xb65   : > { %8236 = vrcp.f32 %v7234_v12  ;;  %v7246_v61 = vand.u32 2147483648, %v7234_v12  ;;  %v7244_v7 = vand.u32 2147483647, %v7234_v12  ;;  %vm7240_vm10 = vweird.f32 %v7234_v12 }
 0xb67   : > { %v7247_v39 = vor.u32 1.1754944e-38, %v7246_v61  ;;  %vm7245_vm13 = vcmp.eq.f32.partialorder %v7244_v7, 8.507059e+37 }
 0xb6b   : > { %v8237_v49 = vpop.eup %8236 }
 0xb6c   : > { %v7236_v36 = vmul.f32 %v8237_v49, %v7234_v12  ;;  %vm7241_vm9 = vweird.f32 %v8237_v49 }
 0xb6d   : > { %vm7242_vm12 = vmor %vm7240_vm10, %vm7241_vm9 }
 0xb6e   : > { %v7237_v23 = vsub.f32 1.0, %v7236_v36 }
 0xb70   : > { %v7238_v40 = vmul.f32 %v8237_v49, %v7237_v23 }
 0xb72   : > { %v7239_v26 = vadd.f32 %v8237_v49, %v7238_v40 }
 0xb74   : > { %v7243_v41 = vsel %vm7242_vm12, %v8237_v49, %v7239_v26 }
 0xb75   : > { %v7248_v25 = vsel %vm7245_vm13, %v7247_v39, %v7243_v41 }
 0xb76   : > { %v7249_v53 = vmul.f32 %v7248_v25, %v7208_v18  ;;  %v7250_v8 = vmul.f32 %v7248_v25, %v7209_v38 }
 0xb78   : > { %v7255_v6 = vmul.f32 %v8154_v13, %v7249_v53  ;;  %v7256_v46 = vmul.f32 %v8154_v13, %v7250_v8 }
 0xb7a   : > { %v7261_v57 = vadd.f32 %v8155_v54, %v7255_v6  ;;  %v7262_v44 = vadd.f32 %v8155_v54, %v7256_v46 }
 0xb7b   : > { %7270 = sbr.rel (%p7612_p3) target bundleno = 3345 (0xd11), region = 194 }
 0xb7c   : > { %v7263_v4 = vmax.f32 %v7261_v57, 0.0  ;;  %v7264_v37 = vmax.f32 %v7262_v44, 0.0 }
 0xb7e   : > { %7265 = vst.msk [vmem:[#allocation2] sm:$0xff] %vm2137_vm7, %v7263_v4 }
 0xb7f   : > { %7266 = vst.msk [vmem:[#allocation2 + $0x8] sm:$0xff] %vm2137_vm7, %v7264_v37 }
 0xb80   : > { %v7271_v29 = vld [vmem:[%s13924_s16] sm:$0x3]  ;;  %v7300_v14 = vld [vmem:[%s13925_s22 + $0x18] sm:$0xff]  ;;  %v7299_v28 = vld [vmem:[%s13925_s22 + $0x10] sm:$0xff]  ;;  %vm7358_vm14 = vcmask 17408  }
 0xb81   : > { %7320 = vmatpush.msra.mxu1 %v7300_v14  ;;  %v7298_v20 = vld [vmem:[%s13925_s22 + $0x8] sm:$0xff]  ;;  %v7297_v27 = vld [vmem:[%s13925_s22] sm:$0xff] }
 0xb82   : > { %v7330_v17 = vld [vmem:[%s8555_s3 + $0x8] sm:$0xff]  ;;  %v7329_v60 = vld [vmem:[%s8555_s3] sm:$0xff] }
 0xb83   : > { %7321 = vmatpush.msra.mxu1 %v7299_v28  ;;  %7352 = vmatpush.msra.mxu2 %v7330_v17  ;;  %v8238_v11 = vld [vmem:[%s8550_s6] ss:$0 sm:$0xff] }
 0xb84   : > { %v8239_v9 = vld [vmem:[%s8560_s12] ss:$0 sm:$0xff] }
 0xb85   : > { %v7272_v55 = vld [vmem:[#allocation2] sm:$0xff]  ;;  %7322 = vmatpush.msra.mxu1 %v7298_v20  ;;  %7353 = vmatpush.msra.mxu2 %v7329_v60 }
 0xb86   : > { %v7273_v48 = vld [vmem:[#allocation2 + $0x8] sm:$0xff] }
 0xb87   : > { %7291 = vmatpush.msra.mxu0 %v7273_v48  ;;  %7323 = vmatpush.msra.mxu1 %v7297_v27 }
 0xb89   : > { %7292 = vmatpush.msra.mxu0 %v7272_v55 }
 0xb8a   : > { %7613 = vmatmul.msk.f32.vlgmr.msra.gmra.mxu0 %vm1835_vm6, %v7271_v29 }
 0xc07   : > { %v7294_v1 = vpop.f32.mrf.mxu0 }
 0xc08   : > { %7614 = vmatmul.msk.f32.vlgmr.msra.gmra.mxu1 %vm2137_vm7, %v7294_v1 }
 0xc85   : > { %v7325_v19 = vpop.f32.mrf.mxu1 }
 0xc86   : > { %v7326_v10 = vadd.f32 %v8238_v11, %v7325_v19 }
 0xc88   : > { %v7328_v15 = vmax.f32 %v7326_v10, 0.0 }
 0xc8a   : > { %7615 = vmatmul.msk.f32.vlgmr.msra.gmra.mxu2 %vm1835_vm6, %v7328_v15 }
 0xd0d   : > { %v7355_v24 = vpop.f32.mrf.mxu2 }
 0xd0e   : > { %v7356_v32 = vadd.f32 %v8239_v9, %v7355_v24 }
 0xd10   : > { %7359 = vst.msk [vmem:[#allocation8] sm:$0x3] %vm7358_vm14, %v7356_v32 }
 0xd11 PF: > { %p8078_p4 = scmp.eq.s32.totalorder %s8574_s11, 2  ;;  %s8371_s23 = smov [#allocation8]  }
 0xd12   : > { %s7366_s26 = sshll.u32 %s8371_s23, 4  ;;  %s7368_s28 = sshll.u32 %s8565_s9, 4  ;;  %s7367_s26 = int_to_ptr.vmem [resolvable:$true] %s7366_s26  ;;  %s7369_s28 = int_to_ptr.hbm [resolvable:$true] %s7368_s28 }
 0xd13   : > { %s8284_s1 = sshra.s32 %s7369_s28, 4  ;;  %s8290_s0 = scalar_lea.hbm %s8565_s9, 2  ;;  %s8285_s1 = int_to_ptr.hbm [resolvable:$true] %s8284_s1 }
 0xd14   : > { %s8286_s16 = scalar_lea.hbm %s8285_s1, 2  ;;  %p8291_p8 = scmp.lt.s32.totalorder %s8285_s1, %s8565_s9 }
 0xd15   : > { %p8287_p5 = scmp.ne.s32.totalorder %s8285_s1, %s8286_s16  ;;  %p8292_p9 = scmp.lt.s32.totalorder %s8290_s0, %s8286_s16 }
 0xd17   : > { %p8288_p6 = pnand %p8287_p5, %p8078_p4  ;;  %p8293_p10 = por %p8292_p9, %p8291_p8 }
 0xd19   : > { %p8289_p7 = pneg %p8288_p6 }
 0xd1b   : > { %p8294_p11 = pnand %p8293_p10, %p8289_p7 }
 0xd1d   : > { %8297 = shalt.err (!%p8294_p11)
}
 0xd1e   : > { %8069 = dma.vmem_to_hbm [thread:$0]  (%p8078_p4), %s7367_s26, 32, %s7369_s28, [#allocation7]  }
 0xd1f   : > { %8315 = dma.done.wait (%p8078_p4), [#allocation7], 32  }
 0xd20   : > { %8317 = vsyncadd (%p8078_p4), [#allocation7], 4294967264 }
 0xd21 PF: > { %s87_s7 = sadd.s32 1, %s8320_s7  }
 0xd22   : > { %p84_p12 = scmp.ge.s32.totalorder %s87_s7, 5  }
 0xd24   :  { %86 = sbr.rel (!%p84_p12) target bundleno = 63 (0x3f), region = 294 }
 0xd29   :  { %7382 = vsyncpa [#allocation6], 1 }
 0xd2a   :  { %7384 = vsyncpa [#allocation6 + $0x1], 1 }
 0xd2b   :  { %7385 = vsyncpa [#allocation7], 1 }
 0xd2c   :  { %7387 = vsyncpa [#allocation7 + $0x1], 1 }

</bundles_post_ra>
